<compile_context>
chip_gen: v7x
topology: tpu7x:2x2x1
jax: 0.10.0
libtpu: 0.0.40
codegen_flags: <defaults>
</compile_context>

<pallas_src>
import functools

import jax
import jax.numpy as jnp
from jax import lax
from jax.experimental import pallas as pl
from jax.experimental.pallas import tpu as pltpu


def _round_up(x, m):
    return (x + m - 1) // m * m


def _pick_tile(d, cands):
    """Pick a tile size for dimension d.

    Returns (tile, padded_dim).  Prefers the largest candidate that divides d;
    for small/ragged dims uses a full-extent block (legal per the (8,128)
    rule when the block equals the full array dim), avoiding pad copies.
    """
    for c in cands:
        if d % c == 0:
            return c, d
    if d <= cands[-1]:
        dp = _round_up(d, 16)
        return dp, dp
    dp = _round_up(d, cands[-1])
    return cands[-1], dp


# --------------------------- Pallas matmul (conv hot path) ---------------------------

def _matmul_kernel(a_ref, b_ref, o_ref, acc_ref):
    @pl.when(pl.program_id(2) == 0)
    def _():
        acc_ref[...] = jnp.zeros_like(acc_ref)

    acc_ref[...] += jnp.dot(a_ref[...], b_ref[...],
                            preferred_element_type=jnp.float32)

    @pl.when(pl.program_id(2) == pl.num_programs(2) - 1)
    def _():
        o_ref[...] = acc_ref[...].astype(o_ref.dtype)


def pallas_matmul(a, b):
    """a: (M, K), b: (K, N) -> (M, N) f32.  bf16 MXU operands, f32 accumulation."""
    M, K = a.shape
    K2, N = b.shape
    assert K == K2
    tm, Mp = _pick_tile(M, (512, 256, 128))
    tk, Kp = _pick_tile(K, (512, 256, 128))
    tn, Np = _pick_tile(N, (256, 128))

    a = a.astype(jnp.bfloat16)
    b = b.astype(jnp.bfloat16)
    if (Mp, Kp) != (M, K):
        a = jnp.pad(a, ((0, Mp - M), (0, Kp - K)))
    if (Kp, Np) != (K, N):
        b = jnp.pad(b, ((0, Kp - K), (0, Np - N)))

    out = pl.pallas_call(
        _matmul_kernel,
        out_shape=jax.ShapeDtypeStruct((Mp, Np), jnp.float32),
        grid_spec=pltpu.PrefetchScalarGridSpec(
            num_scalar_prefetch=0,
            grid=(Mp // tm, Np // tn, Kp // tk),
            in_specs=[
                pl.BlockSpec((tm, tk), lambda i, j, k: (i, k)),
                pl.BlockSpec((tk, tn), lambda i, j, k: (k, j)),
            ],
            out_specs=pl.BlockSpec((tm, tn), lambda i, j, k: (i, j)),
            scratch_shapes=[pltpu.VMEM((tm, tn), jnp.float32)],
        ),
        compiler_params=pltpu.CompilerParams(
            dimension_semantics=("parallel", "parallel", "arbitrary")),
    )(a, b)
    if (Mp, Np) != (M, N):
        out = out[:M, :N]
    return out


# ------------------- Pallas fused BatchNorm (batch stats) + ReLU ---------------------

def _bn_stats_kernel(x_ref, g_ref, b_ref, scale_ref, shift_ref,
                     s_acc, s2_acc, *, m_valid, eps):
    @pl.when(pl.program_id(0) == 0)
    def _():
        s_acc[...] = jnp.zeros_like(s_acc)
        s2_acc[...] = jnp.zeros_like(s2_acc)

    x = x_ref[...]                                      # (tm, C) row tile
    s_acc[...] += jnp.sum(x, axis=0, keepdims=True)     # padded rows are zeros
    s2_acc[...] += jnp.sum(x * x, axis=0, keepdims=True)

    @pl.when(pl.program_id(0) == pl.num_programs(0) - 1)
    def _():
        mean = s_acc[...] * (1.0 / m_valid)
        # biased variance in f32; clamp guards E[x^2]-mean^2 cancellation
        var = jnp.maximum(s2_acc[...] * (1.0 / m_valid) - mean * mean, 0.0)
        inv = lax.rsqrt(var + eps)
        scale = g_ref[...] * inv
        scale_ref[...] = scale
        shift_ref[...] = b_ref[...] - mean * scale


def _bn_apply_kernel(x_ref, scale_ref, shift_ref, o_ref):
    o_ref[...] = jnp.maximum(x_ref[...] * scale_ref[...] + shift_ref[...], 0.0)


def batchnorm_relu(x_nhwc, gamma, beta, eps=1e-5):
    """Training-mode BatchNorm2d (batch statistics) + ReLU, row-tiled."""
    N, H, W, C = x_nhwc.shape
    M = N * H * W
    x2 = x_nhwc.reshape(M, C)
    tm, Mp = _pick_tile(M, (512, 256, 128))
    if Mp != M:
        x2 = jnp.pad(x2, ((0, Mp - M), (0, 0)))
    g = gamma.reshape(1, C)
    b = beta.reshape(1, C)

    scale, shift = pl.pallas_call(
        functools.partial(_bn_stats_kernel, m_valid=float(M), eps=eps),
        out_shape=(jax.ShapeDtypeStruct((1, C), jnp.float32),
                   jax.ShapeDtypeStruct((1, C), jnp.float32)),
        grid=(Mp // tm,),
        in_specs=[pl.BlockSpec((tm, C), lambda i: (i, 0)),
                  pl.BlockSpec((1, C), lambda i: (0, 0)),
                  pl.BlockSpec((1, C), lambda i: (0, 0))],
        out_specs=(pl.BlockSpec((1, C), lambda i: (0, 0)),
                   pl.BlockSpec((1, C), lambda i: (0, 0))),
        scratch_shapes=[pltpu.VMEM((1, C), jnp.float32),
                        pltpu.VMEM((1, C), jnp.float32)],
        compiler_params=pltpu.CompilerParams(
            dimension_semantics=("arbitrary",)),
    )(x2, g, b)

    y = pl.pallas_call(
        _bn_apply_kernel,
        out_shape=jax.ShapeDtypeStruct((Mp, C), jnp.float32),
        grid=(Mp // tm,),
        in_specs=[pl.BlockSpec((tm, C), lambda i: (i, 0)),
                  pl.BlockSpec((1, C), lambda i: (0, 0)),
                  pl.BlockSpec((1, C), lambda i: (0, 0))],
        out_specs=pl.BlockSpec((tm, C), lambda i: (i, 0)),
        compiler_params=pltpu.CompilerParams(
            dimension_semantics=("parallel",)),
    )(x2, scale, shift)
    if Mp != M:
        y = y[:M]
    return y.reshape(N, H, W, C)


# ----------------------------- Pallas bias + tanh kernel -----------------------------

def _bias_tanh_kernel(x_ref, b_ref, o_ref):
    o_ref[...] = jnp.tanh(x_ref[...] + b_ref[...])


def pallas_bias_tanh(x2, bias, batch):
    """x2: (N*C, H*W) f32 (rows ordered (n, c)); bias: (C,)."""
    R, L = x2.shape
    bias_col = jnp.tile(bias, batch).reshape(R, 1)
    tl, Lp = _pick_tile(L, (2048, 1024, 512, 256, 128))
    if Lp != L:
        x2 = jnp.pad(x2, ((0, 0), (0, Lp - L)))
    out = pl.pallas_call(
        _bias_tanh_kernel,
        out_shape=jax.ShapeDtypeStruct((R, Lp), jnp.float32),
        grid=(Lp // tl,),
        in_specs=[pl.BlockSpec((R, tl), lambda j: (0, j)),
                  pl.BlockSpec((R, 1), lambda j: (0, 0))],
        out_specs=pl.BlockSpec((R, tl), lambda j: (0, j)),
        compiler_params=pltpu.CompilerParams(
            dimension_semantics=("parallel",)),
    )(x2, bias_col)
    if Lp != L:
        out = out[:, :L]
    return out


# ------------------ ConvTranspose2d = matmul + overlap-add (col2im) ------------------

def _overlap_add_s2p1(y):
    """Overlap-add for stride=2, kernel=4, padding=1.

    y: (N, H, W, 4, 4, C) per-input-pixel kernel-tap contributions.
    Returns (N, 2H, 2W, C).  Implemented with shifted pads + interleave
    (no scatter): buffer row 2h+kh only receives taps kh of matching parity.
    """
    N, H, W, k, _, C = y.shape
    # Interleave along H (tap axis 3).
    rows = []
    for q in (0, 1):
        a = y[:, :, :, q, :, :]                          # (N, H, W, 4, C)
        b = y[:, :, :, q + 2, :, :]
        rows.append(jnp.pad(a, ((0, 0), (0, 1), (0, 0), (0, 0), (0, 0)))
                    + jnp.pad(b, ((0, 0), (1, 0), (0, 0), (0, 0), (0, 0))))
    z = jnp.stack(rows, axis=2).reshape(N, 2 * (H + 1), W, k, C)
    # Interleave along W (tap axis 3).
    cols = []
    for q in (0, 1):
        a = z[:, :, :, q, :]                             # (N, 2H+2, W, C)
        b = z[:, :, :, q + 2, :]
        cols.append(jnp.pad(a, ((0, 0), (0, 0), (0, 1), (0, 0)))
                    + jnp.pad(b, ((0, 0), (0, 0), (1, 0), (0, 0))))
    buf = jnp.stack(cols, axis=3).reshape(N, 2 * (H + 1), 2 * (W + 1), C)
    # Crop the ConvTranspose padding=1 border.
    return buf[:, 1:2 * H + 1, 1:2 * W + 1, :]


def deconv_s2p1(x_nhwc, w):
    """ConvTranspose2d(kernel=4, stride=2, padding=1, bias=False), NHWC activations.

    x_nhwc: (N, H, W, Cin); w: (Cin, Cout, 4, 4) (PyTorch layout).
    """
    N, H, W, Cin = x_nhwc.shape
    _, Cout, k, _ = w.shape
    a = x_nhwc.reshape(N * H * W, Cin)                       # no im2col, no transpose
    bmat = jnp.transpose(w, (0, 2, 3, 1)).reshape(Cin, k * k * Cout)
    y = pallas_matmul(a, bmat)                               # (N*H*W, k*k*Cout) f32
    y = y.reshape(N, H, W, k, k, Cout)
    return _overlap_add_s2p1(y)                              # (N, 2H, 2W, Cout)


def deconv_1x1_s1p0(x_flat, w):
    """Layer 1: ConvTranspose2d(kernel=4, stride=1, padding=0) on 1x1 input.

    Tiny GEMM -> plain jnp.dot (Pallas launch overhead would dominate).
    """
    Cin, Cout, k, _ = w.shape
    bmat = jnp.transpose(w, (0, 2, 3, 1)).reshape(Cin, k * k * Cout)
    y = jnp.dot(x_flat, bmat, preferred_element_type=jnp.float32)
    return y.reshape(x_flat.shape[0], k, k, Cout)            # (N, 4, 4, Cout) NHWC


# ----------------------------------- Generator ---------------------------------------

def generator_forward(x, params):
    """x: (N, noise_channels, 1, 1) NCHW (PyTorch layout). Returns (N, C, 64, 64)."""
    N = x.shape[0]
    x_flat = x.reshape(N, x.shape[1])                        # H=W=1: flatten, no transpose

    w0, g0, b0 = params["blocks"][0]
    h = deconv_1x1_s1p0(x_flat, w0)                          # (N, 4, 4, C1)
    h = batchnorm_relu(h, g0, b0)

    for (w, gamma, beta) in params["blocks"][1:]:
        h = deconv_s2p1(h, w)
        h = batchnorm_relu(h, gamma, beta)

    w_f, bias_f = params["final"]
    h = deconv_s2p1(h, w_f)                                  # (N, 64, 64, img_ch)

    # Final bias + tanh on the NCHW-flattened slab (lane dim = H*W, lane-dense);
    # the NHWC->NCHW transpose is required for the return layout anyway.
    N2, Ho, Wo, C = h.shape
    h_nchw = jnp.transpose(h, (0, 3, 1, 2))
    out = pallas_bias_tanh(h_nchw.reshape(N2 * C, Ho * Wo), bias_f, N2)
    return out.reshape(N2, C, Ho, Wo)


def init_generator_params(key, noise_channels, out_features, img_channels):
    chans = [noise_channels, out_features * 16, out_features * 8,
             out_features * 4, out_features * 2]
    blocks = []
    for cin, cout in zip(chans[:-1], chans[1:]):
        key, kw = jax.random.split(key)
        w = 0.02 * jax.random.normal(kw, (cin, cout, 4, 4), jnp.float32)
        gamma = jnp.ones((cout,), jnp.float32)
        beta = jnp.zeros((cout,), jnp.float32)
        blocks.append((w, gamma, beta))
    key, kw, kb = jax.random.split(key, 3)
    w_final = 0.02 * jax.random.normal(kw, (chans[-1], img_channels, 4, 4), jnp.float32)
    b_final = 0.02 * jax.random.normal(kb, (img_channels,), jnp.float32)
    return {"blocks": blocks, "final": (w_final, b_final)}


if __name__ == "__main__":
    noise_channels, out_features, img_channels = 4, 8, 3
    batch = 2

    key = jax.random.PRNGKey(0)
    key, kx = jax.random.split(key)
    params = init_generator_params(key, noise_channels, out_features, img_channels)
    x = jax.random.normal(kx, (batch, noise_channels, 1, 1), jnp.float32)

    fwd = jax.jit(generator_forward)
    out = fwd(x, params)
    out = jax.block_until_ready(out)

    assert out.shape == (batch, img_channels, 64, 64), out.shape
    assert bool(jnp.all(jnp.isfinite(out)))
    assert bool(jnp.all(jnp.abs(out) <= 1.0 + 1e-6))  # tanh range
    print("KERNEL_OK")
</pallas_src>

<mosaic_0001>
module attributes {stable_mosaic.version = 11 : i64} {
  func.func @_bn_stats_kernel(%arg0: i32, %arg1: memref<32x128xf32, #tpu.memory_space<vmem>>, %arg2: memref<1x128xf32, #tpu.memory_space<vmem>>, %arg3: memref<1x128xf32, #tpu.memory_space<vmem>>, %arg4: memref<1x128xf32, #tpu.memory_space<vmem>>, %arg5: memref<1x128xf32, #tpu.memory_space<vmem>>, %arg6: memref<1x128xf32, #tpu.memory_space<vmem>>, %arg7: memref<1x128xf32, #tpu.memory_space<vmem>>) attributes {dimension_semantics = [#tpu.dimension_semantics<arbitrary>], iteration_bounds = array<i64: 1>, scalar_prefetch = 0 : i64, scratch_operands = 2 : i64, tpu.core_type = #tpu.core_type<tc>, window_params = [{transform_indices = @transform_0, window_bounds = array<i64: 32, 128>}, {pipeline_mode = #tpu.pipeline_mode<synchronous>, transform_indices = @transform_1, window_bounds = array<i64: 1, 128>}, {pipeline_mode = #tpu.pipeline_mode<synchronous>, transform_indices = @transform_2, window_bounds = array<i64: 1, 128>}, {pipeline_mode = #tpu.pipeline_mode<synchronous>, transform_indices = @transform_3, window_bounds = array<i64: 1, 128>}, {pipeline_mode = #tpu.pipeline_mode<synchronous>, transform_indices = @transform_4, window_bounds = array<i64: 1, 128>}]} {
    %c0_i32 = arith.constant 0 : i32
    %0 = arith.cmpi eq, %arg0, %c0_i32 : i32
    %1 = arith.extui %0 : i1 to i32
    %c0_i32_0 = arith.constant 0 : i32
    %2 = arith.cmpi ne, %1, %c0_i32_0 : i32
    scf.if %2 {
      %cst_13 = arith.constant 0.000000e+00 : f32
      %18 = vector.broadcast %cst_13 : f32 to vector<1x128xf32>
      %c0_14 = arith.constant 0 : index
      %c0_15 = arith.constant 0 : index
      %19 = vector.load %arg6[%c0_14, %c0_15] : memref<1x128xf32, #tpu.memory_space<vmem>>, vector<1x128xf32>
      tpu.vector_store %arg6[%c0_14, %c0_15], %18 {strides = array<i32>} : memref<1x128xf32, #tpu.memory_space<vmem>>, vector<1x128xf32>,
      %cst_16 = arith.constant 0.000000e+00 : f32
      %20 = vector.broadcast %cst_16 : f32 to vector<1x128xf32>
      %c0_17 = arith.constant 0 : index
      %c0_18 = arith.constant 0 : index
      %21 = vector.load %arg7[%c0_17, %c0_18] : memref<1x128xf32, #tpu.memory_space<vmem>>, vector<1x128xf32>
      tpu.vector_store %arg7[%c0_17, %c0_18], %20 {strides = array<i32>} : memref<1x128xf32, #tpu.memory_space<vmem>>, vector<1x128xf32>,
    } else {
    }
    %c0 = arith.constant 0 : index
    %c0_1 = arith.constant 0 : index
    %3 = vector.load %arg1[%c0, %c0_1] : memref<32x128xf32, #tpu.memory_space<vmem>>, vector<32x128xf32>
    %c0_2 = arith.constant 0 : index
    %c0_3 = arith.constant 0 : index
    %4 = vector.load %arg6[%c0_2, %c0_3] : memref<1x128xf32, #tpu.memory_space<vmem>>, vector<1x128xf32>
    %cst = arith.constant dense<0.000000e+00> : vector<128xf32>
    %5 = vector.multi_reduction <add>, %3, %cst [0] : vector<32x128xf32> to vector<128xf32>
    %6 = vector.shape_cast %5 : vector<128xf32> to vector<1x128xf32>
    %7 = arith.addf %4, %6 : vector<1x128xf32>
    %c0_4 = arith.constant 0 : index
    %c0_5 = arith.constant 0 : index
    %8 = vector.load %arg6[%c0_4, %c0_5] : memref<1x128xf32, #tpu.memory_space<vmem>>, vector<1x128xf32>
    tpu.vector_store %arg6[%c0_4, %c0_5], %7 {strides = array<i32>} : memref<1x128xf32, #tpu.memory_space<vmem>>, vector<1x128xf32>,
    %c0_6 = arith.constant 0 : index
    %c0_7 = arith.constant 0 : index
    %9 = vector.load %arg7[%c0_6, %c0_7] : memref<1x128xf32, #tpu.memory_space<vmem>>, vector<1x128xf32>
    %10 = arith.mulf %3, %3 : vector<32x128xf32>
    %cst_8 = arith.constant dense<0.000000e+00> : vector<128xf32>
    %11 = vector.multi_reduction <add>, %10, %cst_8 [0] : vector<32x128xf32> to vector<128xf32>
    %12 = vector.shape_cast %11 : vector<128xf32> to vector<1x128xf32>
    %13 = arith.addf %9, %12 : vector<1x128xf32>
    %c0_9 = arith.constant 0 : index
    %c0_10 = arith.constant 0 : index
    %14 = vector.load %arg7[%c0_9, %c0_10] : memref<1x128xf32, #tpu.memory_space<vmem>>, vector<1x128xf32>
    tpu.vector_store %arg7[%c0_9, %c0_10], %13 {strides = array<i32>} : memref<1x128xf32, #tpu.memory_space<vmem>>, vector<1x128xf32>,
    %c0_i32_11 = arith.constant 0 : i32
    %15 = arith.cmpi eq, %arg0, %c0_i32_11 : i32
    %16 = arith.extui %15 : i1 to i32
    %c0_i32_12 = arith.constant 0 : i32
    %17 = arith.cmpi ne, %16, %c0_i32_12 : i32
    scf.if %17 {
      %c0_13 = arith.constant 0 : index
      %c0_14 = arith.constant 0 : index
      %18 = vector.load %arg6[%c0_13, %c0_14] : memref<1x128xf32, #tpu.memory_space<vmem>>, vector<1x128xf32>
      %cst_15 = arith.constant 3.125000e-02 : f32
      %19 = vector.broadcast %cst_15 : f32 to vector<1x128xf32>
      %20 = arith.mulf %18, %19 : vector<1x128xf32>
      %c0_16 = arith.constant 0 : index
      %c0_17 = arith.constant 0 : index
      %21 = vector.load %arg7[%c0_16, %c0_17] : memref<1x128xf32, #tpu.memory_space<vmem>>, vector<1x128xf32>
      %cst_18 = arith.constant 3.125000e-02 : f32
      %22 = vector.broadcast %cst_18 : f32 to vector<1x128xf32>
      %23 = arith.mulf %21, %22 : vector<1x128xf32>
      %24 = arith.mulf %20, %20 : vector<1x128xf32>
      %25 = arith.subf %23, %24 : vector<1x128xf32>
      %cst_19 = arith.constant 0.000000e+00 : f32
      %26 = vector.broadcast %cst_19 : f32 to vector<1x128xf32>
      %27 = arith.maximumf %25, %26 : vector<1x128xf32>
      %cst_20 = arith.constant 9.99999974E-6 : f32
      %28 = vector.broadcast %cst_20 : f32 to vector<1x128xf32>
      %29 = arith.addf %27, %28 : vector<1x128xf32>
      %30 = math.rsqrt %29 : vector<1x128xf32>
      %c0_21 = arith.constant 0 : index
      %c0_22 = arith.constant 0 : index
      %31 = vector.load %arg2[%c0_21, %c0_22] : memref<1x128xf32, #tpu.memory_space<vmem>>, vector<1x128xf32>
      %32 = arith.mulf %31, %30 : vector<1x128xf32>
      %c0_23 = arith.constant 0 : index
      %c0_24 = arith.constant 0 : index
      %33 = vector.load %arg4[%c0_23, %c0_24] : memref<1x128xf32, #tpu.memory_space<vmem>>, vector<1x128xf32>
      tpu.vector_store %arg4[%c0_23, %c0_24], %32 {strides = array<i32>} : memref<1x128xf32, #tpu.memory_space<vmem>>, vector<1x128xf32>,
      %c0_25 = arith.constant 0 : index
      %c0_26 = arith.constant 0 : index
      %34 = vector.load %arg3[%c0_25, %c0_26] : memref<1x128xf32, #tpu.memory_space<vmem>>, vector<1x128xf32>
      %35 = arith.mulf %20, %32 : vector<1x128xf32>
      %36 = arith.subf %34, %35 : vector<1x128xf32>
      %c0_27 = arith.constant 0 : index
      %c0_28 = arith.constant 0 : index
      %37 = vector.load %arg5[%c0_27, %c0_28] : memref<1x128xf32, #tpu.memory_space<vmem>>, vector<1x128xf32>
      tpu.vector_store %arg5[%c0_27, %c0_28], %36 {strides = array<i32>} : memref<1x128xf32, #tpu.memory_space<vmem>>, vector<1x128xf32>,
    } else {
    }
    return
  }
  func.func @transform_0(%arg0: i32) -> (i32, i32) {
    %c0_i32 = arith.constant 0 : i32
    %c0_i32_0 = arith.constant 0 : i32
    return %arg0, %c0_i32 : i32, i32
  }
  func.func @transform_1(%arg0: i32) -> (i32, i32) {
    %c0_i32 = arith.constant 0 : i32
    %c0_i32_0 = arith.constant 0 : i32
    %c0_i32_1 = arith.constant 0 : i32
    return %c0_i32, %c0_i32_0 : i32, i32
  }
  func.func @transform_2(%arg0: i32) -> (i32, i32) {
    %c0_i32 = arith.constant 0 : i32
    %c0_i32_0 = arith.constant 0 : i32
    %c0_i32_1 = arith.constant 0 : i32
    return %c0_i32, %c0_i32_0 : i32, i32
  }
  func.func @transform_3(%arg0: i32) -> (i32, i32) {
    %c0_i32 = arith.constant 0 : i32
    %c0_i32_0 = arith.constant 0 : i32
    %c0_i32_1 = arith.constant 0 : i32
    return %c0_i32, %c0_i32_0 : i32, i32
  }
  func.func @transform_4(%arg0: i32) -> (i32, i32) {
    %c0_i32 = arith.constant 0 : i32
    %c0_i32_0 = arith.constant 0 : i32
    %c0_i32_1 = arith.constant 0 : i32
    return %c0_i32, %c0_i32_0 : i32, i32
  }
}

module attributes {stable_mosaic.version = 11 : i64} {
  func.func @_bn_apply_kernel(%arg0: i32, %arg1: memref<32x128xf32, #tpu.memory_space<vmem>>, %arg2: memref<1x128xf32, #tpu.memory_space<vmem>>, %arg3: memref<1x128xf32, #tpu.memory_space<vmem>>, %arg4: memref<32x128xf32, #tpu.memory_space<vmem>>) attributes {dimension_semantics = [#tpu.dimension_semantics<parallel>], iteration_bounds = array<i64: 1>, scalar_prefetch = 0 : i64, scratch_operands = 0 : i64, tpu.core_type = #tpu.core_type<tc>, window_params = [{transform_indices = @transform_0, window_bounds = array<i64: 32, 128>}, {pipeline_mode = #tpu.pipeline_mode<synchronous>, transform_indices = @transform_1, window_bounds = array<i64: 1, 128>}, {pipeline_mode = #tpu.pipeline_mode<synchronous>, transform_indices = @transform_2, window_bounds = array<i64: 1, 128>}, {transform_indices = @transform_3, window_bounds = array<i64: 32, 128>}]} {
    %c0 = arith.constant 0 : index
    %c0_0 = arith.constant 0 : index
    %0 = vector.load %arg1[%c0, %c0_0] : memref<32x128xf32, #tpu.memory_space<vmem>>, vector<32x128xf32>
    %c0_1 = arith.constant 0 : index
    %c0_2 = arith.constant 0 : index
    %1 = vector.load %arg2[%c0_1, %c0_2] : memref<1x128xf32, #tpu.memory_space<vmem>>, vector<1x128xf32>
    %2 = vector.broadcast %1 : vector<1x128xf32> to vector<32x128xf32>
    %3 = arith.mulf %0, %2 : vector<32x128xf32>
    %c0_3 = arith.constant 0 : index
    %c0_4 = arith.constant 0 : index
    %4 = vector.load %arg3[%c0_3, %c0_4] : memref<1x128xf32, #tpu.memory_space<vmem>>, vector<1x128xf32>
    %5 = vector.broadcast %4 : vector<1x128xf32> to vector<32x128xf32>
    %6 = arith.addf %3, %5 : vector<32x128xf32>
    %cst = arith.constant 0.000000e+00 : f32
    %7 = vector.broadcast %cst : f32 to vector<32x128xf32>
    %8 = arith.maximumf %6, %7 : vector<32x128xf32>
    %c0_5 = arith.constant 0 : index
    %c0_6 = arith.constant 0 : index
    %9 = vector.load %arg4[%c0_5, %c0_6] : memref<32x128xf32, #tpu.memory_space<vmem>>, vector<32x128xf32>
    tpu.vector_store %arg4[%c0_5, %c0_6], %8 {strides = array<i32>} : memref<32x128xf32, #tpu.memory_space<vmem>>, vector<32x128xf32>,
    return
  }
  func.func @transform_0(%arg0: i32) -> (i32, i32) {
    %c0_i32 = arith.constant 0 : i32
    %c0_i32_0 = arith.constant 0 : i32
    return %arg0, %c0_i32 : i32, i32
  }
  func.func @transform_1(%arg0: i32) -> (i32, i32) {
    %c0_i32 = arith.constant 0 : i32
    %c0_i32_0 = arith.constant 0 : i32
    %c0_i32_1 = arith.constant 0 : i32
    return %c0_i32, %c0_i32_0 : i32, i32
  }
  func.func @transform_2(%arg0: i32) -> (i32, i32) {
    %c0_i32 = arith.constant 0 : i32
    %c0_i32_0 = arith.constant 0 : i32
    %c0_i32_1 = arith.constant 0 : i32
    return %c0_i32, %c0_i32_0 : i32, i32
  }
  func.func @transform_3(%arg0: i32) -> (i32, i32) {
    %c0_i32 = arith.constant 0 : i32
    %c0_i32_0 = arith.constant 0 : i32
    return %arg0, %c0_i32 : i32, i32
  }
}

module attributes {stable_mosaic.version = 11 : i64} {
  func.func @_matmul_kernel(%arg0: i32, %arg1: i32, %arg2: i32, %arg3: memref<32x128xbf16, #tpu.memory_space<vmem>>, %arg4: memref<128x256xbf16, #tpu.memory_space<vmem>>, %arg5: memref<32x256xf32, #tpu.memory_space<vmem>>, %arg6: memref<32x256xf32, #tpu.memory_space<vmem>>) attributes {dimension_semantics = [#tpu.dimension_semantics<parallel>, #tpu.dimension_semantics<parallel>, #tpu.dimension_semantics<arbitrary>], iteration_bounds = array<i64: 1, 4, 1>, scalar_prefetch = 0 : i64, scratch_operands = 1 : i64, tpu.core_type = #tpu.core_type<tc>, window_params = [{transform_indices = @transform_0, window_bounds = array<i64: 32, 128>}, {transform_indices = @transform_1, window_bounds = array<i64: 128, 256>}, {transform_indices = @transform_2, window_bounds = array<i64: 32, 256>}]} {
    %c0_i32 = arith.constant 0 : i32
    %0 = arith.cmpi eq, %arg2, %c0_i32 : i32
    %1 = arith.extui %0 : i1 to i32
    %c0_i32_0 = arith.constant 0 : i32
    %2 = arith.cmpi ne, %1, %c0_i32_0 : i32
    scf.if %2 {
      %cst_10 = arith.constant 0.000000e+00 : f32
      %12 = vector.broadcast %cst_10 : f32 to vector<32x256xf32>
      %c0_11 = arith.constant 0 : index
      %c0_12 = arith.constant 0 : index
      %13 = vector.load %arg6[%c0_11, %c0_12] : memref<32x256xf32, #tpu.memory_space<vmem>>, vector<32x256xf32>
      tpu.vector_store %arg6[%c0_11, %c0_12], %12 {strides = array<i32>} : memref<32x256xf32, #tpu.memory_space<vmem>>, vector<32x256xf32>,
    } else {
    }
    %c0 = arith.constant 0 : index
    %c0_1 = arith.constant 0 : index
    %3 = vector.load %arg6[%c0, %c0_1] : memref<32x256xf32, #tpu.memory_space<vmem>>, vector<32x256xf32>
    %c0_2 = arith.constant 0 : index
    %c0_3 = arith.constant 0 : index
    %4 = vector.load %arg3[%c0_2, %c0_3] : memref<32x128xbf16, #tpu.memory_space<vmem>>, vector<32x128xbf16>
    %c0_4 = arith.constant 0 : index
    %c0_5 = arith.constant 0 : index
    %5 = vector.load %arg4[%c0_4, %c0_5] : memref<128x256xbf16, #tpu.memory_space<vmem>>, vector<128x256xbf16>
    %cst = arith.constant dense<0.000000e+00> : vector<32x256xf32>
    %6 = tpu.matmul %4, %5, %cst {dimension_numbers = #tpu.dot_dimension_numbers<[1], [0], [0], [1], [0, 0, 1, 1], [], []>} : vector<32x128xbf16>, vector<128x256xbf16>, vector<32x256xf32> -> vector<32x256xf32>
    %7 = arith.addf %3, %6 : vector<32x256xf32>
    %c0_6 = arith.constant 0 : index
    %c0_7 = arith.constant 0 : index
    %8 = vector.load %arg6[%c0_6, %c0_7] : memref<32x256xf32, #tpu.memory_space<vmem>>, vector<32x256xf32>
    tpu.vector_store %arg6[%c0_6, %c0_7], %7 {strides = array<i32>} : memref<32x256xf32, #tpu.memory_space<vmem>>, vector<32x256xf32>,
    %c0_i32_8 = arith.constant 0 : i32
    %9 = arith.cmpi eq, %arg2, %c0_i32_8 : i32
    %10 = arith.extui %9 : i1 to i32
    %c0_i32_9 = arith.constant 0 : i32
    %11 = arith.cmpi ne, %10, %c0_i32_9 : i32
    scf.if %11 {
      %c0_10 = arith.constant 0 : index
      %c0_11 = arith.constant 0 : index
      %12 = vector.load %arg6[%c0_10, %c0_11] : memref<32x256xf32, #tpu.memory_space<vmem>>, vector<32x256xf32>
      %c0_12 = arith.constant 0 : index
      %c0_13 = arith.constant 0 : index
      %13 = vector.load %arg5[%c0_12, %c0_13] : memref<32x256xf32, #tpu.memory_space<vmem>>, vector<32x256xf32>
      tpu.vector_store %arg5[%c0_12, %c0_13], %12 {strides = array<i32>} : memref<32x256xf32, #tpu.memory_space<vmem>>, vector<32x256xf32>,
    } else {
    }
    return
  }
  func.func @transform_0(%arg0: i32, %arg1: i32, %arg2: i32) -> (i32, i32) {
    %c0_i32 = arith.constant 0 : i32
    return %arg0, %arg2 : i32, i32
  }
  func.func @transform_1(%arg0: i32, %arg1: i32, %arg2: i32) -> (i32, i32) {
    %c0_i32 = arith.constant 0 : i32
    return %arg2, %arg1 : i32, i32
  }
  func.func @transform_2(%arg0: i32, %arg1: i32, %arg2: i32) -> (i32, i32) {
    %c0_i32 = arith.constant 0 : i32
    return %arg0, %arg1 : i32, i32
  }
}

module attributes {stable_mosaic.version = 11 : i64} {
  func.func @_bn_apply_kernel(%arg0: i32, %arg1: memref<128x64xf32, #tpu.memory_space<vmem>>, %arg2: memref<1x64xf32, #tpu.memory_space<vmem>>, %arg3: memref<1x64xf32, #tpu.memory_space<vmem>>, %arg4: memref<128x64xf32, #tpu.memory_space<vmem>>) attributes {dimension_semantics = [#tpu.dimension_semantics<parallel>], iteration_bounds = array<i64: 1>, scalar_prefetch = 0 : i64, scratch_operands = 0 : i64, tpu.core_type = #tpu.core_type<tc>, window_params = [{transform_indices = @transform_0, window_bounds = array<i64: 128, 64>}, {pipeline_mode = #tpu.pipeline_mode<synchronous>, transform_indices = @transform_1, window_bounds = array<i64: 1, 64>}, {pipeline_mode = #tpu.pipeline_mode<synchronous>, transform_indices = @transform_2, window_bounds = array<i64: 1, 64>}, {transform_indices = @transform_3, window_bounds = array<i64: 128, 64>}]} {
    %c0 = arith.constant 0 : index
    %c0_0 = arith.constant 0 : index
    %0 = vector.load %arg1[%c0, %c0_0] : memref<128x64xf32, #tpu.memory_space<vmem>>, vector<128x64xf32>
    %c0_1 = arith.constant 0 : index
    %c0_2 = arith.constant 0 : index
    %1 = vector.load %arg2[%c0_1, %c0_2] : memref<1x64xf32, #tpu.memory_space<vmem>>, vector<1x64xf32>
    %2 = vector.broadcast %1 : vector<1x64xf32> to vector<128x64xf32>
    %3 = arith.mulf %0, %2 : vector<128x64xf32>
    %c0_3 = arith.constant 0 : index
    %c0_4 = arith.constant 0 : index
    %4 = vector.load %arg3[%c0_3, %c0_4] : memref<1x64xf32, #tpu.memory_space<vmem>>, vector<1x64xf32>
    %5 = vector.broadcast %4 : vector<1x64xf32> to vector<128x64xf32>
    %6 = arith.addf %3, %5 : vector<128x64xf32>
    %cst = arith.constant 0.000000e+00 : f32
    %7 = vector.broadcast %cst : f32 to vector<128x64xf32>
    %8 = arith.maximumf %6, %7 : vector<128x64xf32>
    %c0_5 = arith.constant 0 : index
    %c0_6 = arith.constant 0 : index
    %9 = vector.load %arg4[%c0_5, %c0_6] : memref<128x64xf32, #tpu.memory_space<vmem>>, vector<128x64xf32>
    tpu.vector_store %arg4[%c0_5, %c0_6], %8 {strides = array<i32>} : memref<128x64xf32, #tpu.memory_space<vmem>>, vector<128x64xf32>,
    return
  }
  func.func @transform_0(%arg0: i32) -> (i32, i32) {
    %c0_i32 = arith.constant 0 : i32
    %c0_i32_0 = arith.constant 0 : i32
    return %arg0, %c0_i32 : i32, i32
  }
  func.func @transform_1(%arg0: i32) -> (i32, i32) {
    %c0_i32 = arith.constant 0 : i32
    %c0_i32_0 = arith.constant 0 : i32
    %c0_i32_1 = arith.constant 0 : i32
    return %c0_i32, %c0_i32_0 : i32, i32
  }
  func.func @transform_2(%arg0: i32) -> (i32, i32) {
    %c0_i32 = arith.constant 0 : i32
    %c0_i32_0 = arith.constant 0 : i32
    %c0_i32_1 = arith.constant 0 : i32
    return %c0_i32, %c0_i32_0 : i32, i32
  }
  func.func @transform_3(%arg0: i32) -> (i32, i32) {
    %c0_i32 = arith.constant 0 : i32
    %c0_i32_0 = arith.constant 0 : i32
    return %arg0, %c0_i32 : i32, i32
  }
}

module attributes {stable_mosaic.version = 11 : i64} {
  func.func @_bn_stats_kernel(%arg0: i32, %arg1: memref<128x64xf32, #tpu.memory_space<vmem>>, %arg2: memref<1x64xf32, #tpu.memory_space<vmem>>, %arg3: memref<1x64xf32, #tpu.memory_space<vmem>>, %arg4: memref<1x64xf32, #tpu.memory_space<vmem>>, %arg5: memref<1x64xf32, #tpu.memory_space<vmem>>, %arg6: memref<1x64xf32, #tpu.memory_space<vmem>>, %arg7: memref<1x64xf32, #tpu.memory_space<vmem>>) attributes {dimension_semantics = [#tpu.dimension_semantics<arbitrary>], iteration_bounds = array<i64: 1>, scalar_prefetch = 0 : i64, scratch_operands = 2 : i64, tpu.core_type = #tpu.core_type<tc>, window_params = [{transform_indices = @transform_0, window_bounds = array<i64: 128, 64>}, {pipeline_mode = #tpu.pipeline_mode<synchronous>, transform_indices = @transform_1, window_bounds = array<i64: 1, 64>}, {pipeline_mode = #tpu.pipeline_mode<synchronous>, transform_indices = @transform_2, window_bounds = array<i64: 1, 64>}, {pipeline_mode = #tpu.pipeline_mode<synchronous>, transform_indices = @transform_3, window_bounds = array<i64: 1, 64>}, {pipeline_mode = #tpu.pipeline_mode<synchronous>, transform_indices = @transform_4, window_bounds = array<i64: 1, 64>}]} {
    %c0_i32 = arith.constant 0 : i32
    %0 = arith.cmpi eq, %arg0, %c0_i32 : i32
    %1 = arith.extui %0 : i1 to i32
    %c0_i32_0 = arith.constant 0 : i32
    %2 = arith.cmpi ne, %1, %c0_i32_0 : i32
    scf.if %2 {
      %cst_13 = arith.constant 0.000000e+00 : f32
      %18 = vector.broadcast %cst_13 : f32 to vector<1x64xf32>
      %c0_14 = arith.constant 0 : index
      %c0_15 = arith.constant 0 : index
      %19 = vector.load %arg6[%c0_14, %c0_15] : memref<1x64xf32, #tpu.memory_space<vmem>>, vector<1x64xf32>
      tpu.vector_store %arg6[%c0_14, %c0_15], %18 {strides = array<i32>} : memref<1x64xf32, #tpu.memory_space<vmem>>, vector<1x64xf32>,
      %cst_16 = arith.constant 0.000000e+00 : f32
      %20 = vector.broadcast %cst_16 : f32 to vector<1x64xf32>
      %c0_17 = arith.constant 0 : index
      %c0_18 = arith.constant 0 : index
      %21 = vector.load %arg7[%c0_17, %c0_18] : memref<1x64xf32, #tpu.memory_space<vmem>>, vector<1x64xf32>
      tpu.vector_store %arg7[%c0_17, %c0_18], %20 {strides = array<i32>} : memref<1x64xf32, #tpu.memory_space<vmem>>, vector<1x64xf32>,
    } else {
    }
    %c0 = arith.constant 0 : index
    %c0_1 = arith.constant 0 : index
    %3 = vector.load %arg1[%c0, %c0_1] : memref<128x64xf32, #tpu.memory_space<vmem>>, vector<128x64xf32>
    %c0_2 = arith.constant 0 : index
    %c0_3 = arith.constant 0 : index
    %4 = vector.load %arg6[%c0_2, %c0_3] : memref<1x64xf32, #tpu.memory_space<vmem>>, vector<1x64xf32>
    %cst = arith.constant dense<0.000000e+00> : vector<64xf32>
    %5 = vector.multi_reduction <add>, %3, %cst [0] : vector<128x64xf32> to vector<64xf32>
    %6 = vector.shape_cast %5 : vector<64xf32> to vector<1x64xf32>
    %7 = arith.addf %4, %6 : vector<1x64xf32>
    %c0_4 = arith.constant 0 : index
    %c0_5 = arith.constant 0 : index
    %8 = vector.load %arg6[%c0_4, %c0_5] : memref<1x64xf32, #tpu.memory_space<vmem>>, vector<1x64xf32>
    tpu.vector_store %arg6[%c0_4, %c0_5], %7 {strides = array<i32>} : memref<1x64xf32, #tpu.memory_space<vmem>>, vector<1x64xf32>,
    %c0_6 = arith.constant 0 : index
    %c0_7 = arith.constant 0 : index
    %9 = vector.load %arg7[%c0_6, %c0_7] : memref<1x64xf32, #tpu.memory_space<vmem>>, vector<1x64xf32>
    %10 = arith.mulf %3, %3 : vector<128x64xf32>
    %cst_8 = arith.constant dense<0.000000e+00> : vector<64xf32>
    %11 = vector.multi_reduction <add>, %10, %cst_8 [0] : vector<128x64xf32> to vector<64xf32>
    %12 = vector.shape_cast %11 : vector<64xf32> to vector<1x64xf32>
    %13 = arith.addf %9, %12 : vector<1x64xf32>
    %c0_9 = arith.constant 0 : index
    %c0_10 = arith.constant 0 : index
    %14 = vector.load %arg7[%c0_9, %c0_10] : memref<1x64xf32, #tpu.memory_space<vmem>>, vector<1x64xf32>
    tpu.vector_store %arg7[%c0_9, %c0_10], %13 {strides = array<i32>} : memref<1x64xf32, #tpu.memory_space<vmem>>, vector<1x64xf32>,
    %c0_i32_11 = arith.constant 0 : i32
    %15 = arith.cmpi eq, %arg0, %c0_i32_11 : i32
    %16 = arith.extui %15 : i1 to i32
    %c0_i32_12 = arith.constant 0 : i32
    %17 = arith.cmpi ne, %16, %c0_i32_12 : i32
    scf.if %17 {
      %c0_13 = arith.constant 0 : index
      %c0_14 = arith.constant 0 : index
      %18 = vector.load %arg6[%c0_13, %c0_14] : memref<1x64xf32, #tpu.memory_space<vmem>>, vector<1x64xf32>
      %cst_15 = arith.constant 7.812500e-03 : f32
      %19 = vector.broadcast %cst_15 : f32 to vector<1x64xf32>
      %20 = arith.mulf %18, %19 : vector<1x64xf32>
      %c0_16 = arith.constant 0 : index
      %c0_17 = arith.constant 0 : index
      %21 = vector.load %arg7[%c0_16, %c0_17] : memref<1x64xf32, #tpu.memory_space<vmem>>, vector<1x64xf32>
      %cst_18 = arith.constant 7.812500e-03 : f32
      %22 = vector.broadcast %cst_18 : f32 to vector<1x64xf32>
      %23 = arith.mulf %21, %22 : vector<1x64xf32>
      %24 = arith.mulf %20, %20 : vector<1x64xf32>
      %25 = arith.subf %23, %24 : vector<1x64xf32>
      %cst_19 = arith.constant 0.000000e+00 : f32
      %26 = vector.broadcast %cst_19 : f32 to vector<1x64xf32>
      %27 = arith.maximumf %25, %26 : vector<1x64xf32>
      %cst_20 = arith.constant 9.99999974E-6 : f32
      %28 = vector.broadcast %cst_20 : f32 to vector<1x64xf32>
      %29 = arith.addf %27, %28 : vector<1x64xf32>
      %30 = math.rsqrt %29 : vector<1x64xf32>
      %c0_21 = arith.constant 0 : index
      %c0_22 = arith.constant 0 : index
      %31 = vector.load %arg2[%c0_21, %c0_22] : memref<1x64xf32, #tpu.memory_space<vmem>>, vector<1x64xf32>
      %32 = arith.mulf %31, %30 : vector<1x64xf32>
      %c0_23 = arith.constant 0 : index
      %c0_24 = arith.constant 0 : index
      %33 = vector.load %arg4[%c0_23, %c0_24] : memref<1x64xf32, #tpu.memory_space<vmem>>, vector<1x64xf32>
      tpu.vector_store %arg4[%c0_23, %c0_24], %32 {strides = array<i32>} : memref<1x64xf32, #tpu.memory_space<vmem>>, vector<1x64xf32>,
      %c0_25 = arith.constant 0 : index
      %c0_26 = arith.constant 0 : index
      %34 = vector.load %arg3[%c0_25, %c0_26] : memref<1x64xf32, #tpu.memory_space<vmem>>, vector<1x64xf32>
      %35 = arith.mulf %20, %32 : vector<1x64xf32>
      %36 = arith.subf %34, %35 : vector<1x64xf32>
      %c0_27 = arith.constant 0 : index
      %c0_28 = arith.constant 0 : index
      %37 = vector.load %arg5[%c0_27, %c0_28] : memref<1x64xf32, #tpu.memory_space<vmem>>, vector<1x64xf32>
      tpu.vector_store %arg5[%c0_27, %c0_28], %36 {strides = array<i32>} : memref<1x64xf32, #tpu.memory_space<vmem>>, vector<1x64xf32>,
    } else {
    }
    return
  }
  func.func @transform_0(%arg0: i32) -> (i32, i32) {
    %c0_i32 = arith.constant 0 : i32
    %c0_i32_0 = arith.constant 0 : i32
    return %arg0, %c0_i32 : i32, i32
  }
  func.func @transform_1(%arg0: i32) -> (i32, i32) {
    %c0_i32 = arith.constant 0 : i32
    %c0_i32_0 = arith.constant 0 : i32
    %c0_i32_1 = arith.constant 0 : i32
    return %c0_i32, %c0_i32_0 : i32, i32
  }
  func.func @transform_2(%arg0: i32) -> (i32, i32) {
    %c0_i32 = arith.constant 0 : i32
    %c0_i32_0 = arith.constant 0 : i32
    %c0_i32_1 = arith.constant 0 : i32
    return %c0_i32, %c0_i32_0 : i32, i32
  }
  func.func @transform_3(%arg0: i32) -> (i32, i32) {
    %c0_i32 = arith.constant 0 : i32
    %c0_i32_0 = arith.constant 0 : i32
    %c0_i32_1 = arith.constant 0 : i32
    return %c0_i32, %c0_i32_0 : i32, i32
  }
  func.func @transform_4(%arg0: i32) -> (i32, i32) {
    %c0_i32 = arith.constant 0 : i32
    %c0_i32_0 = arith.constant 0 : i32
    %c0_i32_1 = arith.constant 0 : i32
    return %c0_i32, %c0_i32_0 : i32, i32
  }
}

module attributes {stable_mosaic.version = 11 : i64} {
  func.func @_matmul_kernel(%arg0: i32, %arg1: i32, %arg2: i32, %arg3: memref<128x64xbf16, #tpu.memory_space<vmem>>, %arg4: memref<64x256xbf16, #tpu.memory_space<vmem>>, %arg5: memref<128x256xf32, #tpu.memory_space<vmem>>, %arg6: memref<128x256xf32, #tpu.memory_space<vmem>>) attributes {dimension_semantics = [#tpu.dimension_semantics<parallel>, #tpu.dimension_semantics<parallel>, #tpu.dimension_semantics<arbitrary>], iteration_bounds = array<i64: 1, 2, 1>, scalar_prefetch = 0 : i64, scratch_operands = 1 : i64, tpu.core_type = #tpu.core_type<tc>, window_params = [{transform_indices = @transform_0, window_bounds = array<i64: 128, 64>}, {transform_indices = @transform_1, window_bounds = array<i64: 64, 256>}, {transform_indices = @transform_2, window_bounds = array<i64: 128, 256>}]} {
    %c0_i32 = arith.constant 0 : i32
    %0 = arith.cmpi eq, %arg2, %c0_i32 : i32
    %1 = arith.extui %0 : i1 to i32
    %c0_i32_0 = arith.constant 0 : i32
    %2 = arith.cmpi ne, %1, %c0_i32_0 : i32
    scf.if %2 {
      %cst_10 = arith.constant 0.000000e+00 : f32
      %12 = vector.broadcast %cst_10 : f32 to vector<128x256xf32>
      %c0_11 = arith.constant 0 : index
      %c0_12 = arith.constant 0 : index
      %13 = vector.load %arg6[%c0_11, %c0_12] : memref<128x256xf32, #tpu.memory_space<vmem>>, vector<128x256xf32>
      tpu.vector_store %arg6[%c0_11, %c0_12], %12 {strides = array<i32>} : memref<128x256xf32, #tpu.memory_space<vmem>>, vector<128x256xf32>,
    } else {
    }
    %c0 = arith.constant 0 : index
    %c0_1 = arith.constant 0 : index
    %3 = vector.load %arg6[%c0, %c0_1] : memref<128x256xf32, #tpu.memory_space<vmem>>, vector<128x256xf32>
    %c0_2 = arith.constant 0 : index
    %c0_3 = arith.constant 0 : index
    %4 = vector.load %arg3[%c0_2, %c0_3] : memref<128x64xbf16, #tpu.memory_space<vmem>>, vector<128x64xbf16>
    %c0_4 = arith.constant 0 : index
    %c0_5 = arith.constant 0 : index
    %5 = vector.load %arg4[%c0_4, %c0_5] : memref<64x256xbf16, #tpu.memory_space<vmem>>, vector<64x256xbf16>
    %cst = arith.constant dense<0.000000e+00> : vector<128x256xf32>
    %6 = tpu.matmul %4, %5, %cst {dimension_numbers = #tpu.dot_dimension_numbers<[1], [0], [0], [1], [0, 0, 1, 1], [], []>} : vector<128x64xbf16>, vector<64x256xbf16>, vector<128x256xf32> -> vector<128x256xf32>
    %7 = arith.addf %3, %6 : vector<128x256xf32>
    %c0_6 = arith.constant 0 : index
    %c0_7 = arith.constant 0 : index
    %8 = vector.load %arg6[%c0_6, %c0_7] : memref<128x256xf32, #tpu.memory_space<vmem>>, vector<128x256xf32>
    tpu.vector_store %arg6[%c0_6, %c0_7], %7 {strides = array<i32>} : memref<128x256xf32, #tpu.memory_space<vmem>>, vector<128x256xf32>,
    %c0_i32_8 = arith.constant 0 : i32
    %9 = arith.cmpi eq, %arg2, %c0_i32_8 : i32
    %10 = arith.extui %9 : i1 to i32
    %c0_i32_9 = arith.constant 0 : i32
    %11 = arith.cmpi ne, %10, %c0_i32_9 : i32
    scf.if %11 {
      %c0_10 = arith.constant 0 : index
      %c0_11 = arith.constant 0 : index
      %12 = vector.load %arg6[%c0_10, %c0_11] : memref<128x256xf32, #tpu.memory_space<vmem>>, vector<128x256xf32>
      %c0_12 = arith.constant 0 : index
      %c0_13 = arith.constant 0 : index
      %13 = vector.load %arg5[%c0_12, %c0_13] : memref<128x256xf32, #tpu.memory_space<vmem>>, vector<128x256xf32>
      tpu.vector_store %arg5[%c0_12, %c0_13], %12 {strides = array<i32>} : memref<128x256xf32, #tpu.memory_space<vmem>>, vector<128x256xf32>,
    } else {
    }
    return
  }
  func.func @transform_0(%arg0: i32, %arg1: i32, %arg2: i32) -> (i32, i32) {
    %c0_i32 = arith.constant 0 : i32
    return %arg0, %arg2 : i32, i32
  }
  func.func @transform_1(%arg0: i32, %arg1: i32, %arg2: i32) -> (i32, i32) {
    %c0_i32 = arith.constant 0 : i32
    return %arg2, %arg1 : i32, i32
  }
  func.func @transform_2(%arg0: i32, %arg1: i32, %arg2: i32) -> (i32, i32) {
    %c0_i32 = arith.constant 0 : i32
    return %arg0, %arg1 : i32, i32
  }
}

module attributes {stable_mosaic.version = 11 : i64} {
  func.func @_bn_stats_kernel(%arg0: i32, %arg1: memref<512x32xf32, #tpu.memory_space<vmem>>, %arg2: memref<1x32xf32, #tpu.memory_space<vmem>>, %arg3: memref<1x32xf32, #tpu.memory_space<vmem>>, %arg4: memref<1x32xf32, #tpu.memory_space<vmem>>, %arg5: memref<1x32xf32, #tpu.memory_space<vmem>>, %arg6: memref<1x32xf32, #tpu.memory_space<vmem>>, %arg7: memref<1x32xf32, #tpu.memory_space<vmem>>) attributes {dimension_semantics = [#tpu.dimension_semantics<arbitrary>], iteration_bounds = array<i64: 1>, scalar_prefetch = 0 : i64, scratch_operands = 2 : i64, tpu.core_type = #tpu.core_type<tc>, window_params = [{transform_indices = @transform_0, window_bounds = array<i64: 512, 32>}, {pipeline_mode = #tpu.pipeline_mode<synchronous>, transform_indices = @transform_1, window_bounds = array<i64: 1, 32>}, {pipeline_mode = #tpu.pipeline_mode<synchronous>, transform_indices = @transform_2, window_bounds = array<i64: 1, 32>}, {pipeline_mode = #tpu.pipeline_mode<synchronous>, transform_indices = @transform_3, window_bounds = array<i64: 1, 32>}, {pipeline_mode = #tpu.pipeline_mode<synchronous>, transform_indices = @transform_4, window_bounds = array<i64: 1, 32>}]} {
    %c0_i32 = arith.constant 0 : i32
    %0 = arith.cmpi eq, %arg0, %c0_i32 : i32
    %1 = arith.extui %0 : i1 to i32
    %c0_i32_0 = arith.constant 0 : i32
    %2 = arith.cmpi ne, %1, %c0_i32_0 : i32
    scf.if %2 {
      %cst_13 = arith.constant 0.000000e+00 : f32
      %18 = vector.broadcast %cst_13 : f32 to vector<1x32xf32>
      %c0_14 = arith.constant 0 : index
      %c0_15 = arith.constant 0 : index
      %19 = vector.load %arg6[%c0_14, %c0_15] : memref<1x32xf32, #tpu.memory_space<vmem>>, vector<1x32xf32>
      tpu.vector_store %arg6[%c0_14, %c0_15], %18 {strides = array<i32>} : memref<1x32xf32, #tpu.memory_space<vmem>>, vector<1x32xf32>,
      %cst_16 = arith.constant 0.000000e+00 : f32
      %20 = vector.broadcast %cst_16 : f32 to vector<1x32xf32>
      %c0_17 = arith.constant 0 : index
      %c0_18 = arith.constant 0 : index
      %21 = vector.load %arg7[%c0_17, %c0_18] : memref<1x32xf32, #tpu.memory_space<vmem>>, vector<1x32xf32>
      tpu.vector_store %arg7[%c0_17, %c0_18], %20 {strides = array<i32>} : memref<1x32xf32, #tpu.memory_space<vmem>>, vector<1x32xf32>,
    } else {
    }
    %c0 = arith.constant 0 : index
    %c0_1 = arith.constant 0 : index
    %3 = vector.load %arg1[%c0, %c0_1] : memref<512x32xf32, #tpu.memory_space<vmem>>, vector<512x32xf32>
    %c0_2 = arith.constant 0 : index
    %c0_3 = arith.constant 0 : index
    %4 = vector.load %arg6[%c0_2, %c0_3] : memref<1x32xf32, #tpu.memory_space<vmem>>, vector<1x32xf32>
    %cst = arith.constant dense<0.000000e+00> : vector<32xf32>
    %5 = vector.multi_reduction <add>, %3, %cst [0] : vector<512x32xf32> to vector<32xf32>
    %6 = vector.shape_cast %5 : vector<32xf32> to vector<1x32xf32>
    %7 = arith.addf %4, %6 : vector<1x32xf32>
    %c0_4 = arith.constant 0 : index
    %c0_5 = arith.constant 0 : index
    %8 = vector.load %arg6[%c0_4, %c0_5] : memref<1x32xf32, #tpu.memory_space<vmem>>, vector<1x32xf32>
    tpu.vector_store %arg6[%c0_4, %c0_5], %7 {strides = array<i32>} : memref<1x32xf32, #tpu.memory_space<vmem>>, vector<1x32xf32>,
    %c0_6 = arith.constant 0 : index
    %c0_7 = arith.constant 0 : index
    %9 = vector.load %arg7[%c0_6, %c0_7] : memref<1x32xf32, #tpu.memory_space<vmem>>, vector<1x32xf32>
    %10 = arith.mulf %3, %3 : vector<512x32xf32>
    %cst_8 = arith.constant dense<0.000000e+00> : vector<32xf32>
    %11 = vector.multi_reduction <add>, %10, %cst_8 [0] : vector<512x32xf32> to vector<32xf32>
    %12 = vector.shape_cast %11 : vector<32xf32> to vector<1x32xf32>
    %13 = arith.addf %9, %12 : vector<1x32xf32>
    %c0_9 = arith.constant 0 : index
    %c0_10 = arith.constant 0 : index
    %14 = vector.load %arg7[%c0_9, %c0_10] : memref<1x32xf32, #tpu.memory_space<vmem>>, vector<1x32xf32>
    tpu.vector_store %arg7[%c0_9, %c0_10], %13 {strides = array<i32>} : memref<1x32xf32, #tpu.memory_space<vmem>>, vector<1x32xf32>,
    %c0_i32_11 = arith.constant 0 : i32
    %15 = arith.cmpi eq, %arg0, %c0_i32_11 : i32
    %16 = arith.extui %15 : i1 to i32
    %c0_i32_12 = arith.constant 0 : i32
    %17 = arith.cmpi ne, %16, %c0_i32_12 : i32
    scf.if %17 {
      %c0_13 = arith.constant 0 : index
      %c0_14 = arith.constant 0 : index
      %18 = vector.load %arg6[%c0_13, %c0_14] : memref<1x32xf32, #tpu.memory_space<vmem>>, vector<1x32xf32>
      %cst_15 = arith.constant 0.001953125 : f32
      %19 = vector.broadcast %cst_15 : f32 to vector<1x32xf32>
      %20 = arith.mulf %18, %19 : vector<1x32xf32>
      %c0_16 = arith.constant 0 : index
      %c0_17 = arith.constant 0 : index
      %21 = vector.load %arg7[%c0_16, %c0_17] : memref<1x32xf32, #tpu.memory_space<vmem>>, vector<1x32xf32>
      %cst_18 = arith.constant 0.001953125 : f32
      %22 = vector.broadcast %cst_18 : f32 to vector<1x32xf32>
      %23 = arith.mulf %21, %22 : vector<1x32xf32>
      %24 = arith.mulf %20, %20 : vector<1x32xf32>
      %25 = arith.subf %23, %24 : vector<1x32xf32>
      %cst_19 = arith.constant 0.000000e+00 : f32
      %26 = vector.broadcast %cst_19 : f32 to vector<1x32xf32>
      %27 = arith.maximumf %25, %26 : vector<1x32xf32>
      %cst_20 = arith.constant 9.99999974E-6 : f32
      %28 = vector.broadcast %cst_20 : f32 to vector<1x32xf32>
      %29 = arith.addf %27, %28 : vector<1x32xf32>
      %30 = math.rsqrt %29 : vector<1x32xf32>
      %c0_21 = arith.constant 0 : index
      %c0_22 = arith.constant 0 : index
      %31 = vector.load %arg2[%c0_21, %c0_22] : memref<1x32xf32, #tpu.memory_space<vmem>>, vector<1x32xf32>
      %32 = arith.mulf %31, %30 : vector<1x32xf32>
      %c0_23 = arith.constant 0 : index
      %c0_24 = arith.constant 0 : index
      %33 = vector.load %arg4[%c0_23, %c0_24] : memref<1x32xf32, #tpu.memory_space<vmem>>, vector<1x32xf32>
      tpu.vector_store %arg4[%c0_23, %c0_24], %32 {strides = array<i32>} : memref<1x32xf32, #tpu.memory_space<vmem>>, vector<1x32xf32>,
      %c0_25 = arith.constant 0 : index
      %c0_26 = arith.constant 0 : index
      %34 = vector.load %arg3[%c0_25, %c0_26] : memref<1x32xf32, #tpu.memory_space<vmem>>, vector<1x32xf32>
      %35 = arith.mulf %20, %32 : vector<1x32xf32>
      %36 = arith.subf %34, %35 : vector<1x32xf32>
      %c0_27 = arith.constant 0 : index
      %c0_28 = arith.constant 0 : index
      %37 = vector.load %arg5[%c0_27, %c0_28] : memref<1x32xf32, #tpu.memory_space<vmem>>, vector<1x32xf32>
      tpu.vector_store %arg5[%c0_27, %c0_28], %36 {strides = array<i32>} : memref<1x32xf32, #tpu.memory_space<vmem>>, vector<1x32xf32>,
    } else {
    }
    return
  }
  func.func @transform_0(%arg0: i32) -> (i32, i32) {
    %c0_i32 = arith.constant 0 : i32
    %c0_i32_0 = arith.constant 0 : i32
    return %arg0, %c0_i32 : i32, i32
  }
  func.func @transform_1(%arg0: i32) -> (i32, i32) {
    %c0_i32 = arith.constant 0 : i32
    %c0_i32_0 = arith.constant 0 : i32
    %c0_i32_1 = arith.constant 0 : i32
    return %c0_i32, %c0_i32_0 : i32, i32
  }
  func.func @transform_2(%arg0: i32) -> (i32, i32) {
    %c0_i32 = arith.constant 0 : i32
    %c0_i32_0 = arith.constant 0 : i32
    %c0_i32_1 = arith.constant 0 : i32
    return %c0_i32, %c0_i32_0 : i32, i32
  }
  func.func @transform_3(%arg0: i32) -> (i32, i32) {
    %c0_i32 = arith.constant 0 : i32
    %c0_i32_0 = arith.constant 0 : i32
    %c0_i32_1 = arith.constant 0 : i32
    return %c0_i32, %c0_i32_0 : i32, i32
  }
  func.func @transform_4(%arg0: i32) -> (i32, i32) {
    %c0_i32 = arith.constant 0 : i32
    %c0_i32_0 = arith.constant 0 : i32
    %c0_i32_1 = arith.constant 0 : i32
    return %c0_i32, %c0_i32_0 : i32, i32
  }
}

module attributes {stable_mosaic.version = 11 : i64} {
  func.func @_bn_apply_kernel(%arg0: i32, %arg1: memref<512x32xf32, #tpu.memory_space<vmem>>, %arg2: memref<1x32xf32, #tpu.memory_space<vmem>>, %arg3: memref<1x32xf32, #tpu.memory_space<vmem>>, %arg4: memref<512x32xf32, #tpu.memory_space<vmem>>) attributes {dimension_semantics = [#tpu.dimension_semantics<parallel>], iteration_bounds = array<i64: 1>, scalar_prefetch = 0 : i64, scratch_operands = 0 : i64, tpu.core_type = #tpu.core_type<tc>, window_params = [{transform_indices = @transform_0, window_bounds = array<i64: 512, 32>}, {pipeline_mode = #tpu.pipeline_mode<synchronous>, transform_indices = @transform_1, window_bounds = array<i64: 1, 32>}, {pipeline_mode = #tpu.pipeline_mode<synchronous>, transform_indices = @transform_2, window_bounds = array<i64: 1, 32>}, {transform_indices = @transform_3, window_bounds = array<i64: 512, 32>}]} {
    %c0 = arith.constant 0 : index
    %c0_0 = arith.constant 0 : index
    %0 = vector.load %arg1[%c0, %c0_0] : memref<512x32xf32, #tpu.memory_space<vmem>>, vector<512x32xf32>
    %c0_1 = arith.constant 0 : index
    %c0_2 = arith.constant 0 : index
    %1 = vector.load %arg2[%c0_1, %c0_2] : memref<1x32xf32, #tpu.memory_space<vmem>>, vector<1x32xf32>
    %2 = vector.broadcast %1 : vector<1x32xf32> to vector<512x32xf32>
    %3 = arith.mulf %0, %2 : vector<512x32xf32>
    %c0_3 = arith.constant 0 : index
    %c0_4 = arith.constant 0 : index
    %4 = vector.load %arg3[%c0_3, %c0_4] : memref<1x32xf32, #tpu.memory_space<vmem>>, vector<1x32xf32>
    %5 = vector.broadcast %4 : vector<1x32xf32> to vector<512x32xf32>
    %6 = arith.addf %3, %5 : vector<512x32xf32>
    %cst = arith.constant 0.000000e+00 : f32
    %7 = vector.broadcast %cst : f32 to vector<512x32xf32>
    %8 = arith.maximumf %6, %7 : vector<512x32xf32>
    %c0_5 = arith.constant 0 : index
    %c0_6 = arith.constant 0 : index
    %9 = vector.load %arg4[%c0_5, %c0_6] : memref<512x32xf32, #tpu.memory_space<vmem>>, vector<512x32xf32>
    tpu.vector_store %arg4[%c0_5, %c0_6], %8 {strides = array<i32>} : memref<512x32xf32, #tpu.memory_space<vmem>>, vector<512x32xf32>,
    return
  }
  func.func @transform_0(%arg0: i32) -> (i32, i32) {
    %c0_i32 = arith.constant 0 : i32
    %c0_i32_0 = arith.constant 0 : i32
    return %arg0, %c0_i32 : i32, i32
  }
  func.func @transform_1(%arg0: i32) -> (i32, i32) {
    %c0_i32 = arith.constant 0 : i32
    %c0_i32_0 = arith.constant 0 : i32
    %c0_i32_1 = arith.constant 0 : i32
    return %c0_i32, %c0_i32_0 : i32, i32
  }
  func.func @transform_2(%arg0: i32) -> (i32, i32) {
    %c0_i32 = arith.constant 0 : i32
    %c0_i32_0 = arith.constant 0 : i32
    %c0_i32_1 = arith.constant 0 : i32
    return %c0_i32, %c0_i32_0 : i32, i32
  }
  func.func @transform_3(%arg0: i32) -> (i32, i32) {
    %c0_i32 = arith.constant 0 : i32
    %c0_i32_0 = arith.constant 0 : i32
    return %arg0, %c0_i32 : i32, i32
  }
}

module attributes {stable_mosaic.version = 11 : i64} {
  func.func @_matmul_kernel(%arg0: i32, %arg1: i32, %arg2: i32, %arg3: memref<512x32xbf16, #tpu.memory_space<vmem>>, %arg4: memref<32x256xbf16, #tpu.memory_space<vmem>>, %arg5: memref<512x256xf32, #tpu.memory_space<vmem>>, %arg6: memref<512x256xf32, #tpu.memory_space<vmem>>) attributes {dimension_semantics = [#tpu.dimension_semantics<parallel>, #tpu.dimension_semantics<parallel>, #tpu.dimension_semantics<arbitrary>], iteration_bounds = array<i64: 1, 1, 1>, scalar_prefetch = 0 : i64, scratch_operands = 1 : i64, tpu.core_type = #tpu.core_type<tc>, window_params = [{transform_indices = @transform_0, window_bounds = array<i64: 512, 32>}, {transform_indices = @transform_1, window_bounds = array<i64: 32, 256>}, {transform_indices = @transform_2, window_bounds = array<i64: 512, 256>}]} {
    %c0_i32 = arith.constant 0 : i32
    %0 = arith.cmpi eq, %arg2, %c0_i32 : i32
    %1 = arith.extui %0 : i1 to i32
    %c0_i32_0 = arith.constant 0 : i32
    %2 = arith.cmpi ne, %1, %c0_i32_0 : i32
    scf.if %2 {
      %cst_10 = arith.constant 0.000000e+00 : f32
      %12 = vector.broadcast %cst_10 : f32 to vector<512x256xf32>
      %c0_11 = arith.constant 0 : index
      %c0_12 = arith.constant 0 : index
      %13 = vector.load %arg6[%c0_11, %c0_12] : memref<512x256xf32, #tpu.memory_space<vmem>>, vector<512x256xf32>
      tpu.vector_store %arg6[%c0_11, %c0_12], %12 {strides = array<i32>} : memref<512x256xf32, #tpu.memory_space<vmem>>, vector<512x256xf32>,
    } else {
    }
    %c0 = arith.constant 0 : index
    %c0_1 = arith.constant 0 : index
    %3 = vector.load %arg6[%c0, %c0_1] : memref<512x256xf32, #tpu.memory_space<vmem>>, vector<512x256xf32>
    %c0_2 = arith.constant 0 : index
    %c0_3 = arith.constant 0 : index
    %4 = vector.load %arg3[%c0_2, %c0_3] : memref<512x32xbf16, #tpu.memory_space<vmem>>, vector<512x32xbf16>
    %c0_4 = arith.constant 0 : index
    %c0_5 = arith.constant 0 : index
    %5 = vector.load %arg4[%c0_4, %c0_5] : memref<32x256xbf16, #tpu.memory_space<vmem>>, vector<32x256xbf16>
    %cst = arith.constant dense<0.000000e+00> : vector<512x256xf32>
    %6 = tpu.matmul %4, %5, %cst {dimension_numbers = #tpu.dot_dimension_numbers<[1], [0], [0], [1], [0, 0, 1, 1], [], []>} : vector<512x32xbf16>, vector<32x256xbf16>, vector<512x256xf32> -> vector<512x256xf32>
    %7 = arith.addf %3, %6 : vector<512x256xf32>
    %c0_6 = arith.constant 0 : index
    %c0_7 = arith.constant 0 : index
    %8 = vector.load %arg6[%c0_6, %c0_7] : memref<512x256xf32, #tpu.memory_space<vmem>>, vector<512x256xf32>
    tpu.vector_store %arg6[%c0_6, %c0_7], %7 {strides = array<i32>} : memref<512x256xf32, #tpu.memory_space<vmem>>, vector<512x256xf32>,
    %c0_i32_8 = arith.constant 0 : i32
    %9 = arith.cmpi eq, %arg2, %c0_i32_8 : i32
    %10 = arith.extui %9 : i1 to i32
    %c0_i32_9 = arith.constant 0 : i32
    %11 = arith.cmpi ne, %10, %c0_i32_9 : i32
    scf.if %11 {
      %c0_10 = arith.constant 0 : index
      %c0_11 = arith.constant 0 : index
      %12 = vector.load %arg6[%c0_10, %c0_11] : memref<512x256xf32, #tpu.memory_space<vmem>>, vector<512x256xf32>
      %c0_12 = arith.constant 0 : index
      %c0_13 = arith.constant 0 : index
      %13 = vector.load %arg5[%c0_12, %c0_13] : memref<512x256xf32, #tpu.memory_space<vmem>>, vector<512x256xf32>
      tpu.vector_store %arg5[%c0_12, %c0_13], %12 {strides = array<i32>} : memref<512x256xf32, #tpu.memory_space<vmem>>, vector<512x256xf32>,
    } else {
    }
    return
  }
  func.func @transform_0(%arg0: i32, %arg1: i32, %arg2: i32) -> (i32, i32) {
    %c0_i32 = arith.constant 0 : i32
    return %arg0, %arg2 : i32, i32
  }
  func.func @transform_1(%arg0: i32, %arg1: i32, %arg2: i32) -> (i32, i32) {
    %c0_i32 = arith.constant 0 : i32
    return %arg2, %arg1 : i32, i32
  }
  func.func @transform_2(%arg0: i32, %arg1: i32, %arg2: i32) -> (i32, i32) {
    %c0_i32 = arith.constant 0 : i32
    return %arg0, %arg1 : i32, i32
  }
}

module attributes {stable_mosaic.version = 11 : i64} {
  func.func @_bn_stats_kernel(%arg0: i32, %arg1: memref<512x16xf32, #tpu.memory_space<vmem>>, %arg2: memref<1x16xf32, #tpu.memory_space<vmem>>, %arg3: memref<1x16xf32, #tpu.memory_space<vmem>>, %arg4: memref<1x16xf32, #tpu.memory_space<vmem>>, %arg5: memref<1x16xf32, #tpu.memory_space<vmem>>, %arg6: memref<1x16xf32, #tpu.memory_space<vmem>>, %arg7: memref<1x16xf32, #tpu.memory_space<vmem>>) attributes {dimension_semantics = [#tpu.dimension_semantics<arbitrary>], iteration_bounds = array<i64: 4>, scalar_prefetch = 0 : i64, scratch_operands = 2 : i64, tpu.core_type = #tpu.core_type<tc>, window_params = [{transform_indices = @transform_0, window_bounds = array<i64: 512, 16>}, {pipeline_mode = #tpu.pipeline_mode<synchronous>, transform_indices = @transform_1, window_bounds = array<i64: 1, 16>}, {pipeline_mode = #tpu.pipeline_mode<synchronous>, transform_indices = @transform_2, window_bounds = array<i64: 1, 16>}, {pipeline_mode = #tpu.pipeline_mode<synchronous>, transform_indices = @transform_3, window_bounds = array<i64: 1, 16>}, {pipeline_mode = #tpu.pipeline_mode<synchronous>, transform_indices = @transform_4, window_bounds = array<i64: 1, 16>}]} {
    %c0_i32 = arith.constant 0 : i32
    %0 = arith.cmpi eq, %arg0, %c0_i32 : i32
    %1 = arith.extui %0 : i1 to i32
    %c0_i32_0 = arith.constant 0 : i32
    %2 = arith.cmpi ne, %1, %c0_i32_0 : i32
    scf.if %2 {
      %cst_12 = arith.constant 0.000000e+00 : f32
      %18 = vector.broadcast %cst_12 : f32 to vector<1x16xf32>
      %c0_13 = arith.constant 0 : index
      %c0_14 = arith.constant 0 : index
      %19 = vector.load %arg6[%c0_13, %c0_14] : memref<1x16xf32, #tpu.memory_space<vmem>>, vector<1x16xf32>
      tpu.vector_store %arg6[%c0_13, %c0_14], %18 {strides = array<i32>} : memref<1x16xf32, #tpu.memory_space<vmem>>, vector<1x16xf32>,
      %cst_15 = arith.constant 0.000000e+00 : f32
      %20 = vector.broadcast %cst_15 : f32 to vector<1x16xf32>
      %c0_16 = arith.constant 0 : index
      %c0_17 = arith.constant 0 : index
      %21 = vector.load %arg7[%c0_16, %c0_17] : memref<1x16xf32, #tpu.memory_space<vmem>>, vector<1x16xf32>
      tpu.vector_store %arg7[%c0_16, %c0_17], %20 {strides = array<i32>} : memref<1x16xf32, #tpu.memory_space<vmem>>, vector<1x16xf32>,
    } else {
    }
    %c0 = arith.constant 0 : index
    %c0_1 = arith.constant 0 : index
    %3 = vector.load %arg1[%c0, %c0_1] : memref<512x16xf32, #tpu.memory_space<vmem>>, vector<512x16xf32>
    %c0_2 = arith.constant 0 : index
    %c0_3 = arith.constant 0 : index
    %4 = vector.load %arg6[%c0_2, %c0_3] : memref<1x16xf32, #tpu.memory_space<vmem>>, vector<1x16xf32>
    %cst = arith.constant dense<0.000000e+00> : vector<16xf32>
    %5 = vector.multi_reduction <add>, %3, %cst [0] : vector<512x16xf32> to vector<16xf32>
    %6 = vector.shape_cast %5 : vector<16xf32> to vector<1x16xf32>
    %7 = arith.addf %4, %6 : vector<1x16xf32>
    %c0_4 = arith.constant 0 : index
    %c0_5 = arith.constant 0 : index
    %8 = vector.load %arg6[%c0_4, %c0_5] : memref<1x16xf32, #tpu.memory_space<vmem>>, vector<1x16xf32>
    tpu.vector_store %arg6[%c0_4, %c0_5], %7 {strides = array<i32>} : memref<1x16xf32, #tpu.memory_space<vmem>>, vector<1x16xf32>,
    %c0_6 = arith.constant 0 : index
    %c0_7 = arith.constant 0 : index
    %9 = vector.load %arg7[%c0_6, %c0_7] : memref<1x16xf32, #tpu.memory_space<vmem>>, vector<1x16xf32>
    %10 = arith.mulf %3, %3 : vector<512x16xf32>
    %cst_8 = arith.constant dense<0.000000e+00> : vector<16xf32>
    %11 = vector.multi_reduction <add>, %10, %cst_8 [0] : vector<512x16xf32> to vector<16xf32>
    %12 = vector.shape_cast %11 : vector<16xf32> to vector<1x16xf32>
    %13 = arith.addf %9, %12 : vector<1x16xf32>
    %c0_9 = arith.constant 0 : index
    %c0_10 = arith.constant 0 : index
    %14 = vector.load %arg7[%c0_9, %c0_10] : memref<1x16xf32, #tpu.memory_space<vmem>>, vector<1x16xf32>
    tpu.vector_store %arg7[%c0_9, %c0_10], %13 {strides = array<i32>} : memref<1x16xf32, #tpu.memory_space<vmem>>, vector<1x16xf32>,
    %c3_i32 = arith.constant 3 : i32
    %15 = arith.cmpi eq, %arg0, %c3_i32 : i32
    %16 = arith.extui %15 : i1 to i32
    %c0_i32_11 = arith.constant 0 : i32
    %17 = arith.cmpi ne, %16, %c0_i32_11 : i32
    scf.if %17 {
      %c0_12 = arith.constant 0 : index
      %c0_13 = arith.constant 0 : index
      %18 = vector.load %arg6[%c0_12, %c0_13] : memref<1x16xf32, #tpu.memory_space<vmem>>, vector<1x16xf32>
      %cst_14 = arith.constant 4.8828125E-4 : f32
      %19 = vector.broadcast %cst_14 : f32 to vector<1x16xf32>
      %20 = arith.mulf %18, %19 : vector<1x16xf32>
      %c0_15 = arith.constant 0 : index
      %c0_16 = arith.constant 0 : index
      %21 = vector.load %arg7[%c0_15, %c0_16] : memref<1x16xf32, #tpu.memory_space<vmem>>, vector<1x16xf32>
      %cst_17 = arith.constant 4.8828125E-4 : f32
      %22 = vector.broadcast %cst_17 : f32 to vector<1x16xf32>
      %23 = arith.mulf %21, %22 : vector<1x16xf32>
      %24 = arith.mulf %20, %20 : vector<1x16xf32>
      %25 = arith.subf %23, %24 : vector<1x16xf32>
      %cst_18 = arith.constant 0.000000e+00 : f32
      %26 = vector.broadcast %cst_18 : f32 to vector<1x16xf32>
      %27 = arith.maximumf %25, %26 : vector<1x16xf32>
      %cst_19 = arith.constant 9.99999974E-6 : f32
      %28 = vector.broadcast %cst_19 : f32 to vector<1x16xf32>
      %29 = arith.addf %27, %28 : vector<1x16xf32>
      %30 = math.rsqrt %29 : vector<1x16xf32>
      %c0_20 = arith.constant 0 : index
      %c0_21 = arith.constant 0 : index
      %31 = vector.load %arg2[%c0_20, %c0_21] : memref<1x16xf32, #tpu.memory_space<vmem>>, vector<1x16xf32>
      %32 = arith.mulf %31, %30 : vector<1x16xf32>
      %c0_22 = arith.constant 0 : index
      %c0_23 = arith.constant 0 : index
      %33 = vector.load %arg4[%c0_22, %c0_23] : memref<1x16xf32, #tpu.memory_space<vmem>>, vector<1x16xf32>
      tpu.vector_store %arg4[%c0_22, %c0_23], %32 {strides = array<i32>} : memref<1x16xf32, #tpu.memory_space<vmem>>, vector<1x16xf32>,
      %c0_24 = arith.constant 0 : index
      %c0_25 = arith.constant 0 : index
      %34 = vector.load %arg3[%c0_24, %c0_25] : memref<1x16xf32, #tpu.memory_space<vmem>>, vector<1x16xf32>
      %35 = arith.mulf %20, %32 : vector<1x16xf32>
      %36 = arith.subf %34, %35 : vector<1x16xf32>
      %c0_26 = arith.constant 0 : index
      %c0_27 = arith.constant 0 : index
      %37 = vector.load %arg5[%c0_26, %c0_27] : memref<1x16xf32, #tpu.memory_space<vmem>>, vector<1x16xf32>
      tpu.vector_store %arg5[%c0_26, %c0_27], %36 {strides = array<i32>} : memref<1x16xf32, #tpu.memory_space<vmem>>, vector<1x16xf32>,
    } else {
    }
    return
  }
  func.func @transform_0(%arg0: i32) -> (i32, i32) {
    %c0_i32 = arith.constant 0 : i32
    %c0_i32_0 = arith.constant 0 : i32
    return %arg0, %c0_i32 : i32, i32
  }
  func.func @transform_1(%arg0: i32) -> (i32, i32) {
    %c0_i32 = arith.constant 0 : i32
    %c0_i32_0 = arith.constant 0 : i32
    %c0_i32_1 = arith.constant 0 : i32
    return %c0_i32, %c0_i32_0 : i32, i32
  }
  func.func @transform_2(%arg0: i32) -> (i32, i32) {
    %c0_i32 = arith.constant 0 : i32
    %c0_i32_0 = arith.constant 0 : i32
    %c0_i32_1 = arith.constant 0 : i32
    return %c0_i32, %c0_i32_0 : i32, i32
  }
  func.func @transform_3(%arg0: i32) -> (i32, i32) {
    %c0_i32 = arith.constant 0 : i32
    %c0_i32_0 = arith.constant 0 : i32
    %c0_i32_1 = arith.constant 0 : i32
    return %c0_i32, %c0_i32_0 : i32, i32
  }
  func.func @transform_4(%arg0: i32) -> (i32, i32) {
    %c0_i32 = arith.constant 0 : i32
    %c0_i32_0 = arith.constant 0 : i32
    %c0_i32_1 = arith.constant 0 : i32
    return %c0_i32, %c0_i32_0 : i32, i32
  }
}

module attributes {stable_mosaic.version = 11 : i64} {
  func.func @_bn_apply_kernel(%arg0: i32, %arg1: memref<512x16xf32, #tpu.memory_space<vmem>>, %arg2: memref<1x16xf32, #tpu.memory_space<vmem>>, %arg3: memref<1x16xf32, #tpu.memory_space<vmem>>, %arg4: memref<512x16xf32, #tpu.memory_space<vmem>>) attributes {dimension_semantics = [#tpu.dimension_semantics<parallel>], iteration_bounds = array<i64: 4>, scalar_prefetch = 0 : i64, scratch_operands = 0 : i64, tpu.core_type = #tpu.core_type<tc>, window_params = [{transform_indices = @transform_0, window_bounds = array<i64: 512, 16>}, {pipeline_mode = #tpu.pipeline_mode<synchronous>, transform_indices = @transform_1, window_bounds = array<i64: 1, 16>}, {pipeline_mode = #tpu.pipeline_mode<synchronous>, transform_indices = @transform_2, window_bounds = array<i64: 1, 16>}, {transform_indices = @transform_3, window_bounds = array<i64: 512, 16>}]} {
    %c0 = arith.constant 0 : index
    %c0_0 = arith.constant 0 : index
    %0 = vector.load %arg1[%c0, %c0_0] : memref<512x16xf32, #tpu.memory_space<vmem>>, vector<512x16xf32>
    %c0_1 = arith.constant 0 : index
    %c0_2 = arith.constant 0 : index
    %1 = vector.load %arg2[%c0_1, %c0_2] : memref<1x16xf32, #tpu.memory_space<vmem>>, vector<1x16xf32>
    %2 = vector.broadcast %1 : vector<1x16xf32> to vector<512x16xf32>
    %3 = arith.mulf %0, %2 : vector<512x16xf32>
    %c0_3 = arith.constant 0 : index
    %c0_4 = arith.constant 0 : index
    %4 = vector.load %arg3[%c0_3, %c0_4] : memref<1x16xf32, #tpu.memory_space<vmem>>, vector<1x16xf32>
    %5 = vector.broadcast %4 : vector<1x16xf32> to vector<512x16xf32>
    %6 = arith.addf %3, %5 : vector<512x16xf32>
    %cst = arith.constant 0.000000e+00 : f32
    %7 = vector.broadcast %cst : f32 to vector<512x16xf32>
    %8 = arith.maximumf %6, %7 : vector<512x16xf32>
    %c0_5 = arith.constant 0 : index
    %c0_6 = arith.constant 0 : index
    %9 = vector.load %arg4[%c0_5, %c0_6] : memref<512x16xf32, #tpu.memory_space<vmem>>, vector<512x16xf32>
    tpu.vector_store %arg4[%c0_5, %c0_6], %8 {strides = array<i32>} : memref<512x16xf32, #tpu.memory_space<vmem>>, vector<512x16xf32>,
    return
  }
  func.func @transform_0(%arg0: i32) -> (i32, i32) {
    %c0_i32 = arith.constant 0 : i32
    %c0_i32_0 = arith.constant 0 : i32
    return %arg0, %c0_i32 : i32, i32
  }
  func.func @transform_1(%arg0: i32) -> (i32, i32) {
    %c0_i32 = arith.constant 0 : i32
    %c0_i32_0 = arith.constant 0 : i32
    %c0_i32_1 = arith.constant 0 : i32
    return %c0_i32, %c0_i32_0 : i32, i32
  }
  func.func @transform_2(%arg0: i32) -> (i32, i32) {
    %c0_i32 = arith.constant 0 : i32
    %c0_i32_0 = arith.constant 0 : i32
    %c0_i32_1 = arith.constant 0 : i32
    return %c0_i32, %c0_i32_0 : i32, i32
  }
  func.func @transform_3(%arg0: i32) -> (i32, i32) {
    %c0_i32 = arith.constant 0 : i32
    %c0_i32_0 = arith.constant 0 : i32
    return %arg0, %c0_i32 : i32, i32
  }
}

module attributes {stable_mosaic.version = 11 : i64} {
  func.func @_matmul_kernel(%arg0: i32, %arg1: i32, %arg2: i32, %arg3: memref<512x16xbf16, #tpu.memory_space<vmem>>, %arg4: memref<16x48xbf16, #tpu.memory_space<vmem>>, %arg5: memref<512x48xf32, #tpu.memory_space<vmem>>, %arg6: memref<512x48xf32, #tpu.memory_space<vmem>>) attributes {dimension_semantics = [#tpu.dimension_semantics<parallel>, #tpu.dimension_semantics<parallel>, #tpu.dimension_semantics<arbitrary>], iteration_bounds = array<i64: 4, 1, 1>, scalar_prefetch = 0 : i64, scratch_operands = 1 : i64, tpu.core_type = #tpu.core_type<tc>, window_params = [{transform_indices = @transform_0, window_bounds = array<i64: 512, 16>}, {transform_indices = @transform_1, window_bounds = array<i64: 16, 48>}, {transform_indices = @transform_2, window_bounds = array<i64: 512, 48>}]} {
    %c0_i32 = arith.constant 0 : i32
    %0 = arith.cmpi eq, %arg2, %c0_i32 : i32
    %1 = arith.extui %0 : i1 to i32
    %c0_i32_0 = arith.constant 0 : i32
    %2 = arith.cmpi ne, %1, %c0_i32_0 : i32
    scf.if %2 {
      %cst_10 = arith.constant 0.000000e+00 : f32
      %12 = vector.broadcast %cst_10 : f32 to vector<512x48xf32>
      %c0_11 = arith.constant 0 : index
      %c0_12 = arith.constant 0 : index
      %13 = vector.load %arg6[%c0_11, %c0_12] : memref<512x48xf32, #tpu.memory_space<vmem>>, vector<512x48xf32>
      tpu.vector_store %arg6[%c0_11, %c0_12], %12 {strides = array<i32>} : memref<512x48xf32, #tpu.memory_space<vmem>>, vector<512x48xf32>,
    } else {
    }
    %c0 = arith.constant 0 : index
    %c0_1 = arith.constant 0 : index
    %3 = vector.load %arg6[%c0, %c0_1] : memref<512x48xf32, #tpu.memory_space<vmem>>, vector<512x48xf32>
    %c0_2 = arith.constant 0 : index
    %c0_3 = arith.constant 0 : index
    %4 = vector.load %arg3[%c0_2, %c0_3] : memref<512x16xbf16, #tpu.memory_space<vmem>>, vector<512x16xbf16>
    %c0_4 = arith.constant 0 : index
    %c0_5 = arith.constant 0 : index
    %5 = vector.load %arg4[%c0_4, %c0_5] : memref<16x48xbf16, #tpu.memory_space<vmem>>, vector<16x48xbf16>
    %cst = arith.constant dense<0.000000e+00> : vector<512x48xf32>
    %6 = tpu.matmul %4, %5, %cst {dimension_numbers = #tpu.dot_dimension_numbers<[1], [0], [0], [1], [0, 0, 1, 1], [], []>} : vector<512x16xbf16>, vector<16x48xbf16>, vector<512x48xf32> -> vector<512x48xf32>
    %7 = arith.addf %3, %6 : vector<512x48xf32>
    %c0_6 = arith.constant 0 : index
    %c0_7 = arith.constant 0 : index
    %8 = vector.load %arg6[%c0_6, %c0_7] : memref<512x48xf32, #tpu.memory_space<vmem>>, vector<512x48xf32>
    tpu.vector_store %arg6[%c0_6, %c0_7], %7 {strides = array<i32>} : memref<512x48xf32, #tpu.memory_space<vmem>>, vector<512x48xf32>,
    %c0_i32_8 = arith.constant 0 : i32
    %9 = arith.cmpi eq, %arg2, %c0_i32_8 : i32
    %10 = arith.extui %9 : i1 to i32
    %c0_i32_9 = arith.constant 0 : i32
    %11 = arith.cmpi ne, %10, %c0_i32_9 : i32
    scf.if %11 {
      %c0_10 = arith.constant 0 : index
      %c0_11 = arith.constant 0 : index
      %12 = vector.load %arg6[%c0_10, %c0_11] : memref<512x48xf32, #tpu.memory_space<vmem>>, vector<512x48xf32>
      %c0_12 = arith.constant 0 : index
      %c0_13 = arith.constant 0 : index
      %13 = vector.load %arg5[%c0_12, %c0_13] : memref<512x48xf32, #tpu.memory_space<vmem>>, vector<512x48xf32>
      tpu.vector_store %arg5[%c0_12, %c0_13], %12 {strides = array<i32>} : memref<512x48xf32, #tpu.memory_space<vmem>>, vector<512x48xf32>,
    } else {
    }
    return
  }
  func.func @transform_0(%arg0: i32, %arg1: i32, %arg2: i32) -> (i32, i32) {
    %c0_i32 = arith.constant 0 : i32
    return %arg0, %arg2 : i32, i32
  }
  func.func @transform_1(%arg0: i32, %arg1: i32, %arg2: i32) -> (i32, i32) {
    %c0_i32 = arith.constant 0 : i32
    return %arg2, %arg1 : i32, i32
  }
  func.func @transform_2(%arg0: i32, %arg1: i32, %arg2: i32) -> (i32, i32) {
    %c0_i32 = arith.constant 0 : i32
    return %arg0, %arg1 : i32, i32
  }
}

module attributes {stable_mosaic.version = 11 : i64} {
  func.func @_bias_tanh_kernel(%arg0: i32, %arg1: memref<6x2048xf32, #tpu.memory_space<vmem>>, %arg2: memref<6x1xf32, #tpu.memory_space<vmem>>, %arg3: memref<6x2048xf32, #tpu.memory_space<vmem>>) attributes {dimension_semantics = [#tpu.dimension_semantics<parallel>], iteration_bounds = array<i64: 2>, scalar_prefetch = 0 : i64, scratch_operands = 0 : i64, tpu.core_type = #tpu.core_type<tc>, window_params = [{transform_indices = @transform_0, window_bounds = array<i64: 6, 2048>}, {pipeline_mode = #tpu.pipeline_mode<synchronous>, transform_indices = @transform_1, window_bounds = array<i64: 6, 1>}, {transform_indices = @transform_2, window_bounds = array<i64: 6, 2048>}]} {
    %c0 = arith.constant 0 : index
    %c0_0 = arith.constant 0 : index
    %0 = vector.load %arg1[%c0, %c0_0] : memref<6x2048xf32, #tpu.memory_space<vmem>>, vector<6x2048xf32>
    %c0_1 = arith.constant 0 : index
    %c0_2 = arith.constant 0 : index
    %1 = vector.load %arg2[%c0_1, %c0_2] : memref<6x1xf32, #tpu.memory_space<vmem>>, vector<6x1xf32>
    %2 = vector.broadcast %1 : vector<6x1xf32> to vector<6x2048xf32>
    %3 = arith.addf %0, %2 : vector<6x2048xf32>
    %4 = math.tanh %3 : vector<6x2048xf32>
    %c0_3 = arith.constant 0 : index
    %c0_4 = arith.constant 0 : index
    %5 = vector.load %arg3[%c0_3, %c0_4] : memref<6x2048xf32, #tpu.memory_space<vmem>>, vector<6x2048xf32>
    tpu.vector_store %arg3[%c0_3, %c0_4], %4 {strides = array<i32>} : memref<6x2048xf32, #tpu.memory_space<vmem>>, vector<6x2048xf32>,
    return
  }
  func.func @transform_0(%arg0: i32) -> (i32, i32) {
    %c0_i32 = arith.constant 0 : i32
    %c0_i32_0 = arith.constant 0 : i32
    return %c0_i32, %arg0 : i32, i32
  }
  func.func @transform_1(%arg0: i32) -> (i32, i32) {
    %c0_i32 = arith.constant 0 : i32
    %c0_i32_0 = arith.constant 0 : i32
    %c0_i32_1 = arith.constant 0 : i32
    return %c0_i32, %c0_i32_0 : i32, i32
  }
  func.func @transform_2(%arg0: i32) -> (i32, i32) {
    %c0_i32 = arith.constant 0 : i32
    %c0_i32_0 = arith.constant 0 : i32
    return %c0_i32, %arg0 : i32, i32
  }
}

</mosaic_0001>

<bundles_post_ra>
// kernel: generator_forward.14
= control target key start
LH: loop header
LB: loop body
LE: loop exit
PB: predicated region body
PF: predicated region fallthrough
CT: control target
= control target key end

     0   :  { %s104_s0 = inlined_call_operand.vmem [shape: f32[32,128], index: 0, kind: input, shape index: {}]   ;;  %s105_s1 = inlined_call_operand.vmem [shape: f32[1,128], index: 1, kind: input, shape index: {}]   ;;  %s106_s2 = inlined_call_operand.vmem [shape: f32[1,128], index: 2, kind: input, shape index: {}]   ;;  %s107_s3 = inlined_call_operand.vmem [shape: f32[32,128], index: 3, kind: output, shape index: {}]  }
   0x1   :  { %v14_v0 = vld [vmem:[%s104_s0] sm:$0xff]  ;;  %v15_v4 = vld [vmem:[%s104_s0 + $0x8] sm:$0xff]  ;;  %v16_v5 = vld [vmem:[%s104_s0 + $0x10] sm:$0xff] }
   0x2   :  { %v52_v1 = vld [vmem:[%s105_s1] ss:$0 sm:$0xff]  ;;  %v17_v6 = vld [vmem:[%s104_s0 + $0x18] sm:$0xff] }
   0x3   :  { %v53_v2 = vld [vmem:[%s106_s2] ss:$0 sm:$0xff]  ;;  %v25_v3 = vmul.f32 %v52_v1, %v14_v0  ;;  %v26_v7 = vmul.f32 %v52_v1, %v15_v4  ;;  %v27_v8 = vmul.f32 %v52_v1, %v16_v5  ;;  %v28_v9 = vmul.f32 %v52_v1, %v17_v6 }
   0x5   :  { %v36_v10 = vadd.f32 %v53_v2, %v25_v3  ;;  %v37_v11 = vadd.f32 %v53_v2, %v26_v7  ;;  %v38_v12 = vadd.f32 %v53_v2, %v27_v8  ;;  %v39_v13 = vadd.f32 %v53_v2, %v28_v9 }
   0x7   :  { %v40_v14 = vmax.f32 %v36_v10, 0.0  ;;  %v41_v15 = vmax.f32 %v37_v11, 0.0  ;;  %v42_v16 = vmax.f32 %v38_v12, 0.0  ;;  %v43_v17 = vmax.f32 %v39_v13, 0.0 }
   0x9   :  { %44 = vst [vmem:[%s107_s3] sm:$0xff] %v40_v14  ;;  %45 = vst [vmem:[%s107_s3 + $0x8] sm:$0xff] %v41_v15 }
   0xa   :  { %46 = vst [vmem:[%s107_s3 + $0x10] sm:$0xff] %v42_v16  ;;  %47 = vst [vmem:[%s107_s3 + $0x18] sm:$0xff] %v43_v17 }

// kernel: generator_forward.13
= control target key start
LH: loop header
LB: loop body
LE: loop exit
PB: predicated region body
PF: predicated region fallthrough
CT: control target
= control target key end

     0   :  { %10 = vsyncpa [#allocation5], 0  ;;  %s230_s0 = inlined_call_operand.vmem [shape: f32[32,128], index: 0, kind: input, shape index: {}]   ;;  %s231_s1 = inlined_call_operand.hbm [shape: f32[1,128], index: 1, kind: input, shape index: {}]   ;;  %s232_s2 = inlined_call_operand.hbm [shape: f32[1,128], index: 2, kind: input, shape index: {}]   ;;  %s233_s3 = inlined_call_operand.vmem [shape: f32[1,128], index: 3, kind: output, shape index: {0}]   ;;  %s234_s4 = inlined_call_operand.vmem [shape: f32[1,128], index: 4, kind: output, shape index: {1}]  }
   0x1   :  { %11 = vsyncpa [#allocation7], 0  ;;  %s160_s15 = smov [#allocation4]   ;;  %s161_s17 = smov [#allocation6]  }
   0x2   :  { %s20_s16 = sshll.u32 %s160_s15, 4  ;;  %s30_s18 = sshll.u32 %s161_s17, 4  ;;  %s21_s16 = int_to_ptr.vmem [resolvable:$true] %s20_s16  ;;  %s31_s18 = int_to_ptr.vmem [resolvable:$true] %s30_s18 }
   0x3   :  { %s112_s21 = scalar_lea.hbm %s231_s1, 16 }
   0x4   :  { %p113_p0 = scmp.ne.s32.totalorder %s231_s1, %s112_s21  ;;  %p116_p1 = scmp.lt.u32.totalorder %s112_s21, %s231_s1 }
   0x6   :  { %p118_p2 = pnand %p116_p1, %p113_p0 }
   0x8   :  { %121 = shalt.err (!%p118_p2)
}
   0x9   :  { %s122_s26 = scalar_lea.vmem %s21_s16, 16  ;;  %s126_s27 = scalar_lea.vmem %s21_s16, 32 }
   0xa   :  { %p123_p3 = scmp.ne.s32.totalorder %s21_s16, %s122_s26  ;;  %p127_p4 = scmp.lt.s32.totalorder %s21_s16, %s21_s16 }
   0xb   :  { %p128_p5 = scmp.lt.s32.totalorder %s126_s27, %s122_s26 }
   0xd   :  { %p129_p6 = por %p128_p5, %p127_p4 }
   0xf   :  { %p130_p7 = pnand %p129_p6, %p123_p3 }
  0x11   :  { %133 = shalt.err (!%p130_p7)
}
  0x12   :  { %23 = dma.hbm_to_vmem [thread:$0]  %s231_s1, 16, %s21_s16, [#allocation5]  }
  0x13   :  { %s134_s6 = scalar_lea.hbm %s232_s2, 16 }
  0x14   :  { %p135_p8 = scmp.ne.s32.totalorder %s232_s2, %s134_s6  ;;  %p138_p9 = scmp.lt.u32.totalorder %s134_s6, %s232_s2 }
  0x16   :  { %p140_p10 = pnand %p138_p9, %p135_p8 }
  0x18   :  { %143 = shalt.err (!%p140_p10)
}
  0x19   :  { %s144_s11 = scalar_lea.vmem %s31_s18, 16  ;;  %s148_s12 = scalar_lea.vmem %s31_s18, 32 }
  0x1a   :  { %p145_p11 = scmp.ne.s32.totalorder %s31_s18, %s144_s11  ;;  %p149_p12 = scmp.lt.s32.totalorder %s31_s18, %s31_s18 }
  0x1b   :  { %p150_p13 = scmp.lt.s32.totalorder %s148_s12, %s144_s11 }
  0x1d   :  { %p151_p0 = por %p150_p13, %p149_p12 }
  0x1f   :  { %p152_p1 = pnand %p151_p0, %p145_p11 }
  0x21   :  { %155 = shalt.err (!%p152_p1)
}
  0x22   :  { %33 = dma.hbm_to_vmem [thread:$0]  %s232_s2, 16, %s31_s18, [#allocation7]  }
  0x23   :  { %156 = dma.done.wait [#allocation5], 16  }
  0x24   :  { %157 = vsyncadd [#allocation5], 4294967280 }
  0x25   :  { %158 = dma.done.wait [#allocation7], 16  }
  0x26   :  { %159 = vsyncadd [#allocation7], 4294967280  ;;  %v162_v0 = vmov 0.0   ;;  %v46_v1 = vld [vmem:[%s230_s0] sm:$0xff]  ;;  %v47_v2 = vld [vmem:[%s230_s0 + $0x8] sm:$0xff] }
  0x27   :  { %44 = vst [vmem:[#allocation2] sm:$0x1] %v162_v0  ;;  %45 = vst [vmem:[#allocation3] sm:$0x1] %v162_v0  ;;  %v48_v3 = vld [vmem:[%s230_s0 + $0x10] sm:$0xff]  ;;  %v49_v4 = vld [vmem:[%s230_s0 + $0x18] sm:$0xff]  ;;  %v51_v5 = vadd.f32 %v47_v2, %v46_v1  ;;  %v63_v6 = vmul.f32 %v46_v1, %v46_v1  ;;  %v64_v7 = vmul.f32 %v47_v2, %v47_v2 }
  0x28   :  { %v65_v8 = vmul.f32 %v48_v3, %v48_v3  ;;  %v66_v10 = vmul.f32 %v49_v4, %v49_v4  ;;  %v90_v39 = vld [vmem:[#allocation4] sm:$0x1]  ;;  %v93_v42 = vld [vmem:[#allocation6] sm:$0x1] }
  0x29   :  { %v52_v9 = vadd.f32 %v51_v5, %v48_v3  ;;  %v67_v11 = vadd.f32 %v64_v7, %v63_v6 }
  0x2b   :  { %v53_v12 = vadd.f32 %v52_v9, %v49_v4  ;;  %v68_v13 = vadd.f32 %v67_v11, %v65_v8 }
  0x2d   :  { %v54_v14 = vrot.slane %v53_v12, 4  ;;  %v69_v15 = vadd.f32 %v68_v13, %v66_v10 }
  0x2e   :  { %v50_v24 = vld [vmem:[#allocation2] sm:$0x1]  ;;  %v62_v27 = vld [vmem:[#allocation3] sm:$0x1] }
  0x2f   :  { %v55_v16 = vadd.f32 %v54_v14, %v53_v12  ;;  %v70_v17 = vrot.slane %v69_v15, 4 }
  0x31   :  { %v56_v18 = vrot.slane %v55_v16, 2  ;;  %v71_v19 = vadd.f32 %v70_v17, %v69_v15 }
  0x33   :  { %v57_v20 = vadd.f32 %v56_v18, %v55_v16  ;;  %v72_v21 = vrot.slane %v71_v19, 2 }
  0x35   :  { %v58_v22 = vrot.slane %v57_v20, 1  ;;  %v73_v23 = vadd.f32 %v72_v21, %v71_v19 }
  0x37   :  { %v59_v25 = vadd.f32 %v58_v22, %v57_v20  ;;  %v74_v26 = vrot.slane %v73_v23, 1 }
  0x39   :  { %v60_v28 = vadd.f32 %v59_v25, %v50_v24  ;;  %v75_v29 = vadd.f32 %v74_v26, %v73_v23 }
  0x3b   :  { %61 = vst [vmem:[#allocation2] sm:$0x1] %v60_v28  ;;  %v76_v30 = vadd.f32 %v75_v29, %v62_v27 }
  0x3d   :  { %77 = vst [vmem:[#allocation3] sm:$0x1] %v76_v30 }
  0x42   :  { %v81_v31 = vld [vmem:[#allocation2] sm:$0x1] }
  0x43   :  { %v82_v32 = vmul.f32 0.03125, %v81_v31 }
  0x44   :  { %v83_v33 = vld [vmem:[#allocation3] sm:$0x1] }
  0x45   :  { %v84_v34 = vmul.f32 0.03125, %v83_v33  ;;  %v85_v35 = vmul.f32 %v82_v32, %v82_v32 }
  0x47   :  { %v86_v36 = vsub.f32 %v84_v34, %v85_v35 }
  0x49   :  { %v87_v37 = vmax.f32 %v86_v36, 0.0 }
  0x4b   :  { %v88_v38 = vadd.f32 1e-05, %v87_v37 }
  0x4d   :  { %110 = vrsqrt.f32 %v88_v38 }
  0x57   :  { %v111_v40 = vpop.eup %110 }
  0x58   :  { %v91_v41 = vmul.f32 %v111_v40, %v90_v39 }
  0x5a   :  { %92 = vst [vmem:[%s233_s3] sm:$0x1] %v91_v41  ;;  %v94_v43 = vmul.f32 %v91_v41, %v82_v32 }
  0x5c   :  { %v95_v44 = vsub.f32 %v93_v42, %v94_v43 }
  0x5e   :  { %96 = vst [vmem:[%s234_s4] sm:$0x1] %v95_v44 }
  0x5f   :  { %105 = vsyncpa [#allocation5], 1 }
  0x60   :  { %106 = vsyncpa [#allocation7], 1 }

// kernel: generator_forward.15
= control target key start
LH: loop header
LB: loop body
LE: loop exit
PB: predicated region body
PF: predicated region fallthrough
CT: control target
= control target key end

     0   :  { %s828_s9 = smov 0   ;;  %s830_s10 = smov 0   ;;  %s964_s0 = inlined_call_operand.vmem [shape: bf16[32,128], index: 0, kind: input, shape index: {}]   ;;  %s965_s1 = inlined_call_operand.vmem [shape: bf16[128,1024], index: 1, kind: input, shape index: {}]   ;;  %s966_s2 = inlined_call_operand.vmem [shape: f32[32,1024], index: 2, kind: output, shape index: {}]  }
   0x1   :  { %s832_s11 = smov 0   ;;  %s834_s12 = smov 0  }
   0x2   :  { %s836_s13 = smov 0  }
   0x3 LB: > { %s27_s14 = sadd.s32 1, %s806_s12  ;;  %s653_s15 = sadd.s32 4294967295, %s810_s13   ;;  %s810_s13 = sphi %s836_s13, %s12_s13   ;;  %s806_s12 = sphi %s834_s12, %s971_s12   ;;  %s802_s11 = sphi %s832_s11, %s970_s11   ;;  %s798_s10 = sphi %s830_s10, %s969_s10   ;;  %s794_s9 = sphi %s828_s9, %s968_s9  }
   0x4   : > { %p29_p0 = scmp.ge.s32.totalorder %s27_s14, 4  ;;  %p75_p1 = scmp.ne.s32.totalorder %s798_s10, %s794_s9 }
   0x5   : > { %p76_p2 = scmp.eq.s32.totalorder %s810_s13, 0  ;;  %p107_p4 = scmp.eq.s32.totalorder %s653_s15, 3 }
   0x6   : > { %s973_s14 = smov (%p29_p0, %s27_s14), 0  ;;  %s68_s17 = sadd.s32 1, %s798_s10 }
   0x7   : > { %p77_p3 = por %p76_p2, %p75_p1  ;;  %s64_s16 = ssub.s32 %s806_s12, %s973_s14 }
   0x8   : > { %p66_p5 = scmp.eq.s32.totalorder %s64_s16, 0  ;;  %p863_p6 = por %p107_p4, %p75_p1 }
   0x9   : > { %p657_p7 = scmp.ge.s32.totalorder %s810_s13, 4 }
   0xa   : > { %s868_s19 = scalar_select %p66_p5, %s798_s10, %s68_s17  }
   0xb   : > { %141 = sbr.rel (%p657_p7) target bundleno = 38 (0x26), region = 20 }
  0x12   : > { %144 = sbr.rel (!%p77_p3) target bundleno = 38 (0x26), region = 24  ;;  %s146_s20 = sand.u32 (%p77_p3), 1, %s798_s10  }
  0x13   : > { %s687_s21 = sshll.u32 (%p77_p3), %s806_s12, 3  ;;  %s658_s22 = sshll.u32 (%p77_p3), %s146_s20, 7 }
  0x14   : > { %s876_s25 = scalar_lea.vmem (%p77_p3), %s965_s1, %s687_s21  ;;  %s148_s26 = scalar_lea.vmem (%p77_p3), [#allocation3], %s658_s22 }
  0x15   : > { %v212_v0 = vld [vmem:[%s876_s25] sm:$0xff] (%p77_p3) }
  0x16   : > { %v214_v1 = vld [vmem:[%s876_s25 + $0x20] sm:$0xff] (%p77_p3)  ;;  %213 = vst [vmem:[%s148_s26] sm:$0xff] (%p77_p3), %v212_v0 }
  0x17   : > { %v216_v2 = vld [vmem:[%s876_s25 + $0x40] sm:$0xff] (%p77_p3)  ;;  %215 = vst [vmem:[%s148_s26 + $0x8] sm:$0xff] (%p77_p3), %v214_v1 }
  0x18   : > { %217 = vst [vmem:[%s148_s26 + $0x10] sm:$0xff] (%p77_p3), %v216_v2  ;;  %v218_v3 = vld [vmem:[%s876_s25 + $0x60] sm:$0xff] (%p77_p3) }
  0x19   : > { %v220_v4 = vld [vmem:[%s876_s25 + $0x80] sm:$0xff]  ;;  %219 = vst [vmem:[%s148_s26 + $0x18] sm:$0xff] %v218_v3 }
  0x1a   : > { %v222_v5 = vld [vmem:[%s876_s25 + $0xa0] sm:$0xff]  ;;  %221 = vst [vmem:[%s148_s26 + $0x20] sm:$0xff] %v220_v4 }
  0x1b   : > { %223 = vst [vmem:[%s148_s26 + $0x28] sm:$0xff] %v222_v5  ;;  %v224_v6 = vld [vmem:[%s876_s25 + $0xc0] sm:$0xff] }
  0x1c   : > { %v226_v7 = vld [vmem:[%s876_s25 + $0xe0] sm:$0xff]  ;;  %225 = vst [vmem:[%s148_s26 + $0x30] sm:$0xff] %v224_v6 }
  0x1d   : > { %v228_v8 = vld [vmem:[%s876_s25 + $0x100] sm:$0xff]  ;;  %227 = vst [vmem:[%s148_s26 + $0x38] sm:$0xff] %v226_v7 }
  0x1e   : > { %229 = vst [vmem:[%s148_s26 + $0x40] sm:$0xff] %v228_v8  ;;  %v230_v9 = vld [vmem:[%s876_s25 + $0x120] sm:$0xff] }
  0x1f   : > { %v232_v10 = vld [vmem:[%s876_s25 + $0x140] sm:$0xff]  ;;  %231 = vst [vmem:[%s148_s26 + $0x48] sm:$0xff] %v230_v9 }
  0x20   : > { %v234_v11 = vld [vmem:[%s876_s25 + $0x160] sm:$0xff]  ;;  %233 = vst [vmem:[%s148_s26 + $0x50] sm:$0xff] %v232_v10 }
  0x21   : > { %235 = vst [vmem:[%s148_s26 + $0x58] sm:$0xff] %v234_v11  ;;  %v236_v12 = vld [vmem:[%s876_s25 + $0x180] sm:$0xff] }
  0x22   : > { %v238_v13 = vld [vmem:[%s876_s25 + $0x1a0] sm:$0xff]  ;;  %237 = vst [vmem:[%s148_s26 + $0x60] sm:$0xff] %v236_v12 }
  0x23   : > { %v240_v14 = vld [vmem:[%s876_s25 + $0x1c0] sm:$0xff]  ;;  %239 = vst [vmem:[%s148_s26 + $0x68] sm:$0xff] %v238_v13 }
  0x24   : > { %241 = vst [vmem:[%s148_s26 + $0x70] sm:$0xff] %v240_v14  ;;  %v242_v15 = vld [vmem:[%s876_s25 + $0x1e0] sm:$0xff] }
  0x25   : > { %243 = vst [vmem:[%s148_s26 + $0x78] sm:$0xff] %v242_v15 }
  0x26 PF: > { %p661_p8 = scmp.ge.s32.totalorder %s810_s13, 1  ;;  %p248_p9 = scmp.lt.s32.totalorder %s810_s13, 5 }
  0x28   : > { %p249_p10 = pnand %p661_p8, %p248_p9 }
  0x29   : > { %s255_s27 = sand.u32 (!%p249_p10), 1, %s794_s9   ;;  %v812_v16 = vmov (!%p249_p10), 0   ;;  %v770_v33 = vld [vmem:[%s964_s0] sm:$0xff] (!%p249_p10)   ;;  %v771_v34 = vld [vmem:[%s964_s0 + $0x8] sm:$0xff] (!%p249_p10)  }
  0x2a   : > { %252 = sbr.rel (%p249_p10) target bundleno = 302 (0x12e), region = 62  ;;  %s662_s28 = sshll.u32 (!%p249_p10), %s255_s27, 7  ;;  %461 = vmatprep.mubr.bf16.mxu0 (!%p249_p10), %v812_v16  ;;  %471 = vmatprep.mubr.bf16.mxu1 (!%p249_p10), %v812_v16 }
  0x2b   : > { %s899_s29 = scalar_lea.vmem (!%p249_p10), [#allocation3], %s662_s28  ;;  %s663_s6 = sshll.u32 (!%p249_p10), %s255_s27, 6 }
  0x2c   : > { %v746_v17 = vld [vmem:[%s899_s29 + $0x4] ss:$8 sps:$4 sm:$0xff] (!%p249_p10)   ;;  %v748_v18 = vld [vmem:[%s899_s29] ss:$8 sps:$4 sm:$0xff] (!%p249_p10)   ;;  %v749_v19 = vld [vmem:[%s899_s29 + $0x14] ss:$8 sps:$4 sm:$0xff] (!%p249_p10)  }
  0x2d   : > { %429 = vmatprep.subr.bf16.mxu0 (!%p249_p10), %v746_v17  ;;  %689 = vmatprep.subr.bf16.mxu1 (!%p249_p10), %v746_v17  ;;  %v751_v20 = vld [vmem:[%s899_s29 + $0x10] ss:$8 sps:$4 sm:$0xff] (!%p249_p10)   ;;  %v752_v21 = vld [vmem:[%s899_s29 + $0x24] ss:$8 sps:$4 sm:$0xff] (!%p249_p10)   ;;  %v754_v22 = vld [vmem:[%s899_s29 + $0x20] ss:$8 sps:$4 sm:$0xff] (!%p249_p10)  }
  0x2e   : > { %430 = vmatpush1.bf16.msra.mxu0 (!%p249_p10), %v748_v18  ;;  %697 = vmatpush1.bf16.msra.mxu1 (!%p249_p10), %v748_v18  ;;  %v755_v23 = vld [vmem:[%s899_s29 + $0x34] ss:$8 sps:$4 sm:$0xff] (!%p249_p10)   ;;  %v757_v24 = vld [vmem:[%s899_s29 + $0x30] ss:$8 sps:$4 sm:$0xff] (!%p249_p10)   ;;  %v758_v25 = vld [vmem:[%s899_s29 + $0x44] ss:$8 sps:$4 sm:$0xff] (!%p249_p10)  }
  0x2f   : > { %431 = vmatprep.subr.bf16.mxu0 (!%p249_p10), %v749_v19  ;;  %690 = vmatprep.subr.bf16.mxu1 (!%p249_p10), %v749_v19  ;;  %v760_v26 = vld [vmem:[%s899_s29 + $0x40] ss:$8 sps:$4 sm:$0xff] (!%p249_p10)   ;;  %v761_v27 = vld [vmem:[%s899_s29 + $0x54] ss:$8 sps:$4 sm:$0xff] (!%p249_p10)   ;;  %v763_v28 = vld [vmem:[%s899_s29 + $0x50] ss:$8 sps:$4 sm:$0xff] (!%p249_p10)  }
  0x30   : > { %v764_v29 = vld [vmem:[%s899_s29 + $0x64] ss:$8 sps:$4 sm:$0xff] (!%p249_p10)   ;;  %v766_v30 = vld [vmem:[%s899_s29 + $0x60] ss:$8 sps:$4 sm:$0xff] (!%p249_p10)   ;;  %v767_v31 = vld [vmem:[%s899_s29 + $0x74] ss:$8 sps:$4 sm:$0xff] (!%p249_p10)  }
  0x31   : > { %v769_v32 = vld [vmem:[%s899_s29 + $0x70] ss:$8 sps:$4 sm:$0xff]   ;;  %s925_s7 = scalar_lea.vmem [#allocation4], %s663_s6  ;;  %s688_s8 = sshll.u32 (%p863_p6), %s802_s11, 4 }
  0x32   : > { %432 = vmatpush1.bf16.msra.mxu0 %v751_v20  ;;  %698 = vmatpush1.bf16.msra.mxu1 %v751_v20  ;;  %s529_s16 = scalar_lea.vmem (%p863_p6), %s966_s2, %s688_s8 }
  0x33   : > { %433 = vmatprep.subr.bf16.mxu0 %v752_v21  ;;  %691 = vmatprep.subr.bf16.mxu1 %v752_v21 }
  0x36   : > { %434 = vmatpush1.bf16.msra.mxu0 %v754_v22  ;;  %699 = vmatpush1.bf16.msra.mxu1 %v754_v22 }
  0x37   : > { %435 = vmatprep.subr.bf16.mxu0 %v755_v23  ;;  %692 = vmatprep.subr.bf16.mxu1 %v755_v23 }
  0x3a   : > { %436 = vmatpush1.bf16.msra.mxu0 %v757_v24  ;;  %700 = vmatpush1.bf16.msra.mxu1 %v757_v24 }
  0x3b   : > { %437 = vmatprep.subr.bf16.mxu0 %v758_v25  ;;  %693 = vmatprep.subr.bf16.mxu1 %v758_v25 }
  0x3e   : > { %438 = vmatpush1.bf16.msra.mxu0 %v760_v26  ;;  %701 = vmatpush1.bf16.msra.mxu1 %v760_v26 }
  0x3f   : > { %439 = vmatprep.subr.bf16.mxu0 %v761_v27  ;;  %694 = vmatprep.subr.bf16.mxu1 %v761_v27 }
  0x42   : > { %440 = vmatpush1.bf16.msra.mxu0 %v763_v28  ;;  %702 = vmatpush1.bf16.msra.mxu1 %v763_v28 }
  0x43   : > { %441 = vmatprep.subr.bf16.mxu0 %v764_v29  ;;  %695 = vmatprep.subr.bf16.mxu1 %v764_v29 }
  0x46   : > { %442 = vmatpush1.bf16.msra.mxu0 %v766_v30  ;;  %703 = vmatpush1.bf16.msra.mxu1 %v766_v30 }
  0x47   : > { %443 = vmatprep.subr.bf16.mxu0 %v767_v31  ;;  %696 = vmatprep.subr.bf16.mxu1 %v767_v31 }
  0x4a   : > { %444 = vmatpush1.bf16.msra.mxu0 %v769_v32  ;;  %704 = vmatpush1.bf16.msra.mxu1 %v769_v32 }
  0x4d   : > { %462 = vmatmul.mubr.bf16.vlgmr.msra.gmra.mrb[0].mxu0 %v770_v33  ;;  %472 = vmatmul.mubr.bf16.vlgmr.msra.gmra.mrb[0].mxu1 %v771_v34 }
 0x11e   : > { %523 = sbr.rel (!%p863_p6) target bundleno = 302 (0x12e), region = 78 }
 0x120   : > { %v463_v35 = vpop.f32.mrb[0].mxu0  ;;  %v473_v36 = vpop.f32.mrb[0].mxu1 }
 0x121   : > { %509 = vst [vmem:[%s925_s7] sm:$0xff] %v463_v35  ;;  %513 = vst [vmem:[%s925_s7 + $0x20] sm:$0xff] %v473_v36  ;;  %v465_v37 = vpop.f32.mrb[1].mxu0  ;;  %v475_v38 = vpop.f32.mrb[1].mxu1 }
 0x122   : > { %510 = vst [vmem:[%s925_s7 + $0x8] sm:$0xff] %v465_v37  ;;  %514 = vst [vmem:[%s925_s7 + $0x28] sm:$0xff] %v475_v38  ;;  %v467_v39 = vpop.f32.mrb[2].mxu0  ;;  %v477_v40 = vpop.f32.mrb[2].mxu1 }
 0x123   : > { %511 = vst [vmem:[%s925_s7 + $0x10] sm:$0xff] %v467_v39  ;;  %515 = vst [vmem:[%s925_s7 + $0x30] sm:$0xff] %v477_v40  ;;  %v469_v41 = vpop.f32.mrb[3].mxu0  ;;  %v479_v42 = vpop.f32.mrb[3].mxu1 }
 0x124   : > { %512 = vst [vmem:[%s925_s7 + $0x18] sm:$0xff] %v469_v41  ;;  %516 = vst [vmem:[%s925_s7 + $0x38] sm:$0xff] %v479_v42 }
 0x128   : > { %v542_v43 = vld [vmem:[%s925_s7] sm:$0xff] }
 0x129   : > { %v544_v44 = vld [vmem:[%s925_s7 + $0x8] sm:$0xff]  ;;  %v550_v47 = vld [vmem:[%s925_s7 + $0x20] sm:$0xff]  ;;  %543 = vst [vmem:[%s529_s16] sm:$0xff] %v542_v43 }
 0x12a   : > { %v546_v45 = vld [vmem:[%s925_s7 + $0x10] sm:$0xff]  ;;  %v552_v48 = vld [vmem:[%s925_s7 + $0x28] sm:$0xff]  ;;  %545 = vst [vmem:[%s529_s16 + $0x8] sm:$0xff] %v544_v44  ;;  %551 = vst [vmem:[%s529_s16 + $0x80] sm:$0xff] %v550_v47 }
 0x12b   : > { %v548_v46 = vld [vmem:[%s925_s7 + $0x18] sm:$0xff]  ;;  %547 = vst [vmem:[%s529_s16 + $0x40] sm:$0xff] %v546_v45  ;;  %553 = vst [vmem:[%s529_s16 + $0x88] sm:$0xff] %v552_v48  ;;  %v554_v49 = vld [vmem:[%s925_s7 + $0x30] sm:$0xff] }
 0x12c   : > { %549 = vst [vmem:[%s529_s16 + $0x48] sm:$0xff] %v548_v46  ;;  %v556_v50 = vld [vmem:[%s925_s7 + $0x38] sm:$0xff]  ;;  %555 = vst [vmem:[%s529_s16 + $0xc0] sm:$0xff] %v554_v49 }
 0x12d   : > { %557 = vst [vmem:[%s529_s16 + $0xc8] sm:$0xff] %v556_v50 }
 0x12e PF: > { %s12_s13 = sadd.s32 1, %s810_s13   ;;  %s968_s9 = smov %s798_s10 }
 0x12f   : > { %p9_p11 = scmp.ge.s32.totalorder %s12_s13, 6   ;;  %s969_s10 = smov %s868_s19 }
 0x130   : > { %s970_s11 = smov %s806_s12  ;;  %s971_s12 = smov %s973_s14 }
 0x131   :  { %11 = sbr.rel (!%p9_p11) target bundleno = 3 (0x3), region = 135 }

// kernel: generator_forward.17
= control target key start
LH: loop header
LB: loop body
LE: loop exit
PB: predicated region body
PF: predicated region fallthrough
CT: control target
= control target key end

     0   :  { %vm92_vm0 = vcmask 523264   ;;  %s271_s0 = inlined_call_operand.vmem [shape: f32[128,64], index: 0, kind: input, shape index: {}]   ;;  %s272_s1 = inlined_call_operand.vmem [shape: f32[1,64], index: 1, kind: input, shape index: {}]   ;;  %s273_s2 = inlined_call_operand.vmem [shape: f32[1,64], index: 2, kind: input, shape index: {}]   ;;  %s274_s3 = inlined_call_operand.vmem [shape: f32[128,64], index: 3, kind: output, shape index: {}]  }
   0x1   :  { %v14_v0 = vld [vmem:[%s271_s0] sm:$0xff]  ;;  %v15_v4 = vld [vmem:[%s271_s0 + $0x8] sm:$0xff]  ;;  %v16_v5 = vld [vmem:[%s271_s0 + $0x10] sm:$0xff] }
   0x2   :  { %v113_v1 = vld [vmem:[%s272_s1] ss:$0 sm:$0xff]  ;;  %v17_v6 = vld [vmem:[%s271_s0 + $0x18] sm:$0xff]  ;;  %v19_v11 = vld [vmem:[%s271_s0 + $0x28] sm:$0xff] }
   0x3   :  { %v144_v2 = vld [vmem:[%s273_s2] ss:$0 sm:$0xff]  ;;  %v37_v3 = vmul.f32 %v113_v1, %v14_v0  ;;  %v38_v7 = vmul.f32 %v113_v1, %v15_v4  ;;  %v39_v8 = vmul.f32 %v113_v1, %v16_v5  ;;  %v40_v9 = vmul.f32 %v113_v1, %v17_v6  ;;  %v20_v12 = vld [vmem:[%s271_s0 + $0x30] sm:$0xff]  ;;  %v21_v17 = vld [vmem:[%s271_s0 + $0x38] sm:$0xff] }
   0x4   :  { %v18_v10 = vld [vmem:[%s271_s0 + $0x20] sm:$0xff]  ;;  %v42_v15 = vmul.f32 %v113_v1, %v19_v11  ;;  %v43_v16 = vmul.f32 %v113_v1, %v20_v12  ;;  %v44_v21 = vmul.f32 %v113_v1, %v21_v17  ;;  %v23_v27 = vld [vmem:[%s271_s0 + $0x48] sm:$0xff]  ;;  %v24_v28 = vld [vmem:[%s271_s0 + $0x50] sm:$0xff] }
   0x5   :  { %v60_v13 = vadd.f32 %v144_v2, %v37_v3  ;;  %v41_v14 = vmul.f32 %v113_v1, %v18_v10  ;;  %v61_v18 = vadd.f32 %v144_v2, %v38_v7  ;;  %v62_v19 = vadd.f32 %v144_v2, %v39_v8  ;;  %v22_v22 = vld [vmem:[%s271_s0 + $0x40] sm:$0xff]  ;;  %v25_v29 = vld [vmem:[%s271_s0 + $0x58] sm:$0xff]  ;;  %v27_v35 = vld [vmem:[%s271_s0 + $0x68] sm:$0xff] }
   0x6   :  { %v63_v20 = vadd.f32 %v144_v2, %v40_v9  ;;  %v65_v25 = vadd.f32 %v144_v2, %v42_v15  ;;  %v66_v26 = vadd.f32 %v144_v2, %v43_v16  ;;  %v67_v33 = vadd.f32 %v144_v2, %v44_v21  ;;  %v26_v34 = vld [vmem:[%s271_s0 + $0x60] sm:$0xff]  ;;  %v28_v36 = vld [vmem:[%s271_s0 + $0x70] sm:$0xff]  ;;  %v29_v41 = vld [vmem:[%s271_s0 + $0x78] sm:$0xff] }
   0x7   :  { %v76_v23 = vmax.f32 %v60_v13, 0.0  ;;  %v64_v24 = vadd.f32 %v144_v2, %v41_v14  ;;  %v77_v30 = vmax.f32 %v61_v18, 0.0  ;;  %v78_v31 = vmax.f32 %v62_v19, 0.0 }
   0x8   :  { %v79_v32 = vmax.f32 %v63_v20, 0.0  ;;  %v81_v38 = vmax.f32 %v65_v25, 0.0  ;;  %v82_v39 = vmax.f32 %v66_v26, 0.0  ;;  %v45_v40 = vmul.f32 %v113_v1, %v22_v22 }
   0x9   :  { %93 = vst.msk [vmem:[%s274_s3] sm:$0xff] %vm92_vm0, %v76_v23  ;;  %v80_v37 = vmax.f32 %v64_v24, 0.0  ;;  %94 = vst.msk [vmem:[%s274_s3 + $0x8] sm:$0xff] %vm92_vm0, %v77_v30  ;;  %v83_v42 = vmax.f32 %v67_v33, 0.0  ;;  %v46_v43 = vmul.f32 %v113_v1, %v23_v27  ;;  %v47_v44 = vmul.f32 %v113_v1, %v24_v28 }
   0xa   :  { %95 = vst.msk [vmem:[%s274_s3 + $0x10] sm:$0xff] %vm92_vm0, %v78_v31  ;;  %96 = vst.msk [vmem:[%s274_s3 + $0x18] sm:$0xff] %vm92_vm0, %v79_v32  ;;  %v48_v45 = vmul.f32 %v113_v1, %v25_v29  ;;  %v68_v46 = vadd.f32 %v144_v2, %v45_v40  ;;  %v49_v47 = vmul.f32 %v113_v1, %v26_v34 }
   0xb   :  { %97 = vst.msk [vmem:[%s274_s3 + $0x20] sm:$0xff] %vm92_vm0, %v80_v37  ;;  %98 = vst.msk [vmem:[%s274_s3 + $0x28] sm:$0xff] %vm92_vm0, %v81_v38  ;;  %v50_v48 = vmul.f32 %v113_v1, %v27_v35  ;;  %v51_v49 = vmul.f32 %v113_v1, %v28_v36  ;;  %v69_v50 = vadd.f32 %v144_v2, %v46_v43 }
   0xc   :  { %99 = vst.msk [vmem:[%s274_s3 + $0x30] sm:$0xff] %vm92_vm0, %v82_v39  ;;  %100 = vst.msk [vmem:[%s274_s3 + $0x38] sm:$0xff] %vm92_vm0, %v83_v42  ;;  %v70_v51 = vadd.f32 %v144_v2, %v47_v44  ;;  %v71_v52 = vadd.f32 %v144_v2, %v48_v45  ;;  %v52_v53 = vmul.f32 %v113_v1, %v29_v41  ;;  %v84_v54 = vmax.f32 %v68_v46, 0.0 }
   0xd   :  { %v72_v55 = vadd.f32 %v144_v2, %v49_v47  ;;  %v73_v56 = vadd.f32 %v144_v2, %v50_v48  ;;  %v74_v57 = vadd.f32 %v144_v2, %v51_v49  ;;  %v85_v58 = vmax.f32 %v69_v50, 0.0 }
   0xe   :  { %v86_v59 = vmax.f32 %v70_v51, 0.0  ;;  %v87_v60 = vmax.f32 %v71_v52, 0.0  ;;  %v75_v61 = vadd.f32 %v144_v2, %v52_v53  ;;  %101 = vst.msk [vmem:[%s274_s3 + $0x40] sm:$0xff] %vm92_vm0, %v84_v54 }
   0xf   :  { %v88_v62 = vmax.f32 %v72_v55, 0.0  ;;  %v89_v63 = vmax.f32 %v73_v56, 0.0  ;;  %v90_v0 = vmax.f32 %v74_v57, 0.0  ;;  %102 = vst.msk [vmem:[%s274_s3 + $0x48] sm:$0xff] %vm92_vm0, %v85_v58 }
  0x10   :  { %103 = vst.msk [vmem:[%s274_s3 + $0x50] sm:$0xff] %vm92_vm0, %v86_v59  ;;  %104 = vst.msk [vmem:[%s274_s3 + $0x58] sm:$0xff] %vm92_vm0, %v87_v60  ;;  %v91_v1 = vmax.f32 %v75_v61, 0.0 }
  0x11   :  { %105 = vst.msk [vmem:[%s274_s3 + $0x60] sm:$0xff] %vm92_vm0, %v88_v62  ;;  %106 = vst.msk [vmem:[%s274_s3 + $0x68] sm:$0xff] %vm92_vm0, %v89_v63 }
  0x12   :  { %107 = vst.msk [vmem:[%s274_s3 + $0x70] sm:$0xff] %vm92_vm0, %v90_v0  ;;  %108 = vst.msk [vmem:[%s274_s3 + $0x78] sm:$0xff] %vm92_vm0, %v91_v1 }

// kernel: generator_forward.16
= control target key start
LH: loop header
LB: loop body
LE: loop exit
PB: predicated region body
PF: predicated region fallthrough
CT: control target
= control target key end

     0   :  { %vm20_vm0 = vcmask 516096   ;;  %vm40_vm1 = vcmask 523264   ;;  %v167_v0 = vmov 0.0   ;;  %s291_s0 = inlined_call_operand.vmem [shape: f32[128,64], index: 0, kind: input, shape index: {}]   ;;  %s292_s1 = inlined_call_operand.vmem [shape: f32[1,64], index: 1, kind: input, shape index: {}]   ;;  %s293_s2 = inlined_call_operand.vmem [shape: f32[1,64], index: 2, kind: input, shape index: {}]   ;;  %s294_s3 = inlined_call_operand.vmem [shape: f32[1,64], index: 3, kind: output, shape index: {0}]   ;;  %s295_s4 = inlined_call_operand.vmem [shape: f32[1,64], index: 4, kind: output, shape index: {1}]  }
   0x1   :  { %21 = vst.msk [vmem:[#allocation2] sm:$0x1] %vm20_vm0, %v167_v0  ;;  %22 = vst.msk [vmem:[#allocation3] sm:$0x1] %vm20_vm0, %v167_v0  ;;  %v23_v1 = vld [vmem:[%s291_s0] sm:$0xff]  ;;  %v24_v2 = vld [vmem:[%s291_s0 + $0x8] sm:$0xff] }
   0x2   :  { %v25_v3 = vld [vmem:[%s291_s0 + $0x10] sm:$0xff]  ;;  %v26_v4 = vld [vmem:[%s291_s0 + $0x18] sm:$0xff]  ;;  %v41_v5 = vsel %vm40_vm1, %v23_v1, 0.0  ;;  %v42_v6 = vsel %vm40_vm1, %v24_v2, 0.0  ;;  %v27_v8 = vld [vmem:[%s291_s0 + $0x20] sm:$0xff]  ;;  %v82_v16 = vmul.f32 %v23_v1, %v23_v1  ;;  %v83_v17 = vmul.f32 %v24_v2, %v24_v2 }
   0x3   :  { %v44_v7 = vsel %vm40_vm1, %v25_v3, 0.0  ;;  %v43_v9 = vadd.f32 %v42_v6, %v41_v5  ;;  %v46_v10 = vsel %vm40_vm1, %v26_v4, 0.0  ;;  %v28_v11 = vld [vmem:[%s291_s0 + $0x28] sm:$0xff]  ;;  %v48_v13 = vsel %vm40_vm1, %v27_v8, 0.0  ;;  %v29_v14 = vld [vmem:[%s291_s0 + $0x30] sm:$0xff]  ;;  %v30_v20 = vld [vmem:[%s291_s0 + $0x38] sm:$0xff] }
   0x4   :  { %v84_v18 = vmul.f32 %v25_v3, %v25_v3  ;;  %v50_v19 = vsel %vm40_vm1, %v28_v11, 0.0  ;;  %v85_v22 = vmul.f32 %v26_v4, %v26_v4  ;;  %v52_v23 = vsel %vm40_vm1, %v29_v14, 0.0  ;;  %v31_v25 = vld [vmem:[%s291_s0 + $0x40] sm:$0xff]  ;;  %v32_v32 = vld [vmem:[%s291_s0 + $0x48] sm:$0xff]  ;;  %v33_v38 = vld [vmem:[%s291_s0 + $0x50] sm:$0xff] }
   0x5   :  { %v45_v12 = vadd.f32 %v44_v7, %v43_v9  ;;  %v86_v24 = vmul.f32 %v27_v8, %v27_v8  ;;  %v98_v27 = vsel %vm40_vm1, %v82_v16, 0.0  ;;  %v99_v28 = vsel %vm40_vm1, %v83_v17, 0.0  ;;  %v34_v44 = vld [vmem:[%s291_s0 + $0x58] sm:$0xff]  ;;  %v35_v50 = vld [vmem:[%s291_s0 + $0x60] sm:$0xff]  ;;  %v36_v56 = vld [vmem:[%s291_s0 + $0x68] sm:$0xff] }
   0x6   :  { %v101_v29 = vsel %vm40_vm1, %v84_v18, 0.0  ;;  %v54_v30 = vsel %vm40_vm1, %v30_v20, 0.0  ;;  %v100_v31 = vadd.f32 %v99_v28, %v98_v27  ;;  %v87_v34 = vmul.f32 %v28_v11, %v28_v11  ;;  %v37_v62 = vld [vmem:[%s291_s0 + $0x70] sm:$0xff]  ;;  %v38_v4 = vld [vmem:[%s291_s0 + $0x78] sm:$0xff] }
   0x7   :  { %v47_v15 = vadd.f32 %v46_v10, %v45_v12  ;;  %v103_v35 = vsel %vm40_vm1, %v85_v22, 0.0  ;;  %v56_v36 = vsel %vm40_vm1, %v31_v25, 0.0  ;;  %v88_v40 = vmul.f32 %v29_v14, %v29_v14 }
   0x8   :  { %v102_v37 = vadd.f32 %v101_v29, %v100_v31  ;;  %v105_v41 = vsel %vm40_vm1, %v86_v24, 0.0  ;;  %v58_v42 = vsel %vm40_vm1, %v32_v32, 0.0  ;;  %v89_v46 = vmul.f32 %v30_v20, %v30_v20 }
   0x9   :  { %v49_v21 = vadd.f32 %v48_v13, %v47_v15  ;;  %v107_v47 = vsel %vm40_vm1, %v87_v34, 0.0  ;;  %v60_v48 = vsel %vm40_vm1, %v33_v38, 0.0  ;;  %v90_v52 = vmul.f32 %v31_v25, %v31_v25 }
   0xa   :  { %v104_v43 = vadd.f32 %v103_v35, %v102_v37  ;;  %v109_v53 = vsel %vm40_vm1, %v88_v40, 0.0  ;;  %v62_v54 = vsel %vm40_vm1, %v34_v44, 0.0  ;;  %v91_v58 = vmul.f32 %v32_v32, %v32_v32 }
   0xb   :  { %v51_v26 = vadd.f32 %v50_v19, %v49_v21  ;;  %v111_v59 = vsel %vm40_vm1, %v89_v46, 0.0  ;;  %v64_v60 = vsel %vm40_vm1, %v35_v50, 0.0  ;;  %v92_v0 = vmul.f32 %v33_v38, %v33_v38 }
   0xc   :  { %v106_v49 = vadd.f32 %v105_v41, %v104_v43  ;;  %v113_v1 = vsel %vm40_vm1, %v90_v52, 0.0  ;;  %v66_v2 = vsel %vm40_vm1, %v36_v56, 0.0  ;;  %v93_v6 = vmul.f32 %v34_v44, %v34_v44  ;;  %v81_v44 = vld [vmem:[#allocation3] sm:$0x1] }
   0xd   :  { %v53_v33 = vadd.f32 %v52_v23, %v51_v26  ;;  %v115_v7 = vsel %vm40_vm1, %v91_v58, 0.0  ;;  %v68_v8 = vsel %vm40_vm1, %v37_v62, 0.0  ;;  %v94_v11 = vmul.f32 %v35_v50, %v35_v50  ;;  %v152_v58 = vld [vmem:[%s293_s2] sm:$0x1] }
   0xe   :  { %v108_v55 = vadd.f32 %v107_v47, %v106_v49  ;;  %v117_v12 = vsel %vm40_vm1, %v92_v0, 0.0  ;;  %v70_v13 = vsel %vm40_vm1, %v38_v4, 0.0  ;;  %v95_v16 = vmul.f32 %v36_v56, %v36_v56 }
   0xf   :  { %v55_v39 = vadd.f32 %v54_v30, %v53_v33  ;;  %v119_v17 = vsel %vm40_vm1, %v93_v6, 0.0  ;;  %v96_v20 = vmul.f32 %v37_v62, %v37_v62  ;;  %v121_v21 = vsel %vm40_vm1, %v94_v11, 0.0 }
  0x10   :  { %v110_v61 = vadd.f32 %v109_v53, %v108_v55  ;;  %v97_v24 = vmul.f32 %v38_v4, %v38_v4  ;;  %v123_v25 = vsel %vm40_vm1, %v95_v16, 0.0  ;;  %v149_v55 = vld [vmem:[%s292_s1] sm:$0x1] }
  0x11   :  { %v57_v45 = vadd.f32 %v56_v36, %v55_v39  ;;  %v125_v28 = vsel %vm40_vm1, %v96_v20, 0.0  ;;  %v39_v36 = vld [vmem:[#allocation2] sm:$0x1] }
  0x12   :  { %v112_v3 = vadd.f32 %v111_v59, %v110_v61  ;;  %v127_v31 = vsel %vm40_vm1, %v97_v24, 0.0 }
  0x13   :  { %v59_v51 = vadd.f32 %v58_v42, %v57_v45 }
  0x14   :  { %v114_v9 = vadd.f32 %v113_v1, %v112_v3 }
  0x15   :  { %v61_v57 = vadd.f32 %v60_v48, %v59_v51 }
  0x16   :  { %v116_v14 = vadd.f32 %v115_v7, %v114_v9 }
  0x17   :  { %v63_v63 = vadd.f32 %v62_v54, %v61_v57 }
  0x18   :  { %v118_v18 = vadd.f32 %v117_v12, %v116_v14 }
  0x19   :  { %v65_v5 = vadd.f32 %v64_v60, %v63_v63 }
  0x1a   :  { %v120_v22 = vadd.f32 %v119_v17, %v118_v18 }
  0x1b   :  { %v67_v10 = vadd.f32 %v66_v2, %v65_v5 }
  0x1c   :  { %v122_v26 = vadd.f32 %v121_v21, %v120_v22 }
  0x1d   :  { %v69_v15 = vadd.f32 %v68_v8, %v67_v10 }
  0x1e   :  { %v124_v29 = vadd.f32 %v123_v25, %v122_v26 }
  0x1f   :  { %v71_v19 = vadd.f32 %v70_v13, %v69_v15 }
  0x20   :  { %v126_v32 = vadd.f32 %v125_v28, %v124_v29 }
  0x21   :  { %v72_v23 = vrot.slane %v71_v19, 4 }
  0x22   :  { %v128_v34 = vadd.f32 %v127_v31, %v126_v32 }
  0x23   :  { %v73_v27 = vadd.f32 %v72_v23, %v71_v19 }
  0x24   :  { %v129_v37 = vrot.slane %v128_v34, 4 }
  0x25   :  { %v74_v30 = vrot.slane %v73_v27, 2 }
  0x26   :  { %v130_v39 = vadd.f32 %v129_v37, %v128_v34 }
  0x27   :  { %v75_v33 = vadd.f32 %v74_v30, %v73_v27 }
  0x28   :  { %v131_v41 = vrot.slane %v130_v39, 2 }
  0x29   :  { %v76_v35 = vrot.slane %v75_v33, 1 }
  0x2a   :  { %v132_v42 = vadd.f32 %v131_v41, %v130_v39 }
  0x2b   :  { %v77_v38 = vadd.f32 %v76_v35, %v75_v33 }
  0x2c   :  { %v133_v43 = vrot.slane %v132_v42, 1 }
  0x2d   :  { %v78_v40 = vadd.f32 %v77_v38, %v39_v36 }
  0x2e   :  { %v134_v45 = vadd.f32 %v133_v43, %v132_v42 }
  0x2f   :  { %80 = vst.msk [vmem:[#allocation2] sm:$0x1] %vm20_vm0, %v78_v40 }
  0x30   :  { %v135_v46 = vadd.f32 %v134_v45, %v81_v44 }
  0x32   :  { %136 = vst.msk [vmem:[#allocation3] sm:$0x1] %vm20_vm0, %v135_v46 }
  0x36   :  { %v140_v47 = vld [vmem:[#allocation2] sm:$0x1] }
  0x37   :  { %v141_v48 = vmul.f32 0.0078125, %v140_v47 }
  0x39   :  { %v144_v49 = vmul.f32 %v141_v48, %v141_v48  ;;  %v142_v50 = vld [vmem:[#allocation3] sm:$0x1] }
  0x3a   :  { %v143_v51 = vmul.f32 0.0078125, %v142_v50 }
  0x3c   :  { %v145_v52 = vsub.f32 %v143_v51, %v144_v49 }
  0x3e   :  { %v146_v53 = vmax.f32 %v145_v52, 0.0 }
  0x40   :  { %v147_v54 = vadd.f32 1e-05, %v146_v53 }
  0x42   :  { %165 = vrsqrt.f32 %v147_v54 }
  0x4c   :  { %v166_v56 = vpop.eup %165 }
  0x4d   :  { %v150_v57 = vmul.f32 %v166_v56, %v149_v55 }
  0x4f   :  { %151 = vst.msk [vmem:[%s294_s3] sm:$0x1] %vm20_vm0, %v150_v57  ;;  %v153_v59 = vmul.f32 %v150_v57, %v141_v48 }
  0x51   :  { %v154_v60 = vsub.f32 %v152_v58, %v153_v59 }
  0x53   :  { %155 = vst.msk [vmem:[%s295_s4] sm:$0x1] %vm20_vm0, %v154_v60 }

// kernel: generator_forward.18
= control target key start
LH: loop header
LB: loop body
LE: loop exit
PB: predicated region body
PF: predicated region fallthrough
CT: control target
= control target key end

     0   :  { %s1057_s9 = smov 0   ;;  %s1059_s10 = smov 0   ;;  %s1265_s0 = inlined_call_operand.vmem [shape: bf16[128,64], index: 0, kind: input, shape index: {}]   ;;  %s1266_s1 = inlined_call_operand.vmem [shape: bf16[64,512], index: 1, kind: input, shape index: {}]   ;;  %s1267_s2 = inlined_call_operand.vmem [shape: f32[128,512], index: 2, kind: output, shape index: {}]  }
   0x1   :  { %s1061_s11 = smov 0   ;;  %s1063_s12 = smov 0  }
   0x2   :  { %s1065_s13 = smov 0  }
   0x3 LB: > { %s27_s14 = sadd.s32 1, %s1035_s12  ;;  %s890_s15 = sadd.s32 4294967295, %s1039_s13   ;;  %s1039_s13 = sphi %s1065_s13, %s12_s13   ;;  %s1035_s12 = sphi %s1063_s12, %s1272_s12   ;;  %s1031_s11 = sphi %s1061_s11, %s1271_s11   ;;  %s1027_s10 = sphi %s1059_s10, %s1270_s10   ;;  %s1023_s9 = sphi %s1057_s9, %s1269_s9  }
   0x4   : > { %p29_p0 = scmp.ge.s32.totalorder %s27_s14, 2  ;;  %p75_p1 = scmp.ne.s32.totalorder %s1027_s10, %s1023_s9 }
   0x5   : > { %p76_p2 = scmp.eq.s32.totalorder %s1039_s13, 0  ;;  %p107_p4 = scmp.eq.s32.totalorder %s890_s15, 1 }
   0x6   : > { %s1274_s14 = smov (%p29_p0, %s27_s14), 0  ;;  %s68_s17 = sadd.s32 1, %s1027_s10 }
   0x7   : > { %p77_p3 = por %p76_p2, %p75_p1  ;;  %s64_s16 = ssub.s32 %s1035_s12, %s1274_s14 }
   0x8   : > { %p66_p5 = scmp.eq.s32.totalorder %s64_s16, 0  ;;  %p1092_p6 = por %p107_p4, %p75_p1 }
   0x9   : > { %p894_p7 = scmp.ge.s32.totalorder %s1039_s13, 2 }
   0xa   : > { %s1097_s19 = scalar_select %p66_p5, %s1027_s10, %s68_s17  }
   0xb   : > { %141 = sbr.rel (%p894_p7) target bundleno = 26 (0x1a), region = 20 }
  0x12   : > { %144 = sbr.rel (!%p77_p3) target bundleno = 26 (0x1a), region = 24  ;;  %s146_s20 = sand.u32 (%p77_p3), 1, %s1027_s10  }
  0x13   : > { %s930_s21 = sshll.u32 (%p77_p3), %s1035_s12, 3  ;;  %s895_s22 = sshll.u32 (%p77_p3), %s146_s20, 6 }
  0x14   : > { %s154_s25 = scalar_lea.vmem (%p77_p3), %s1266_s1, %s930_s21  ;;  %s148_s26 = scalar_lea.vmem (%p77_p3), [#allocation3], %s895_s22 }
  0x15   : > { %v196_v0 = vld [vmem:[%s154_s25] sm:$0xff] (%p77_p3)  ;;  %v198_v1 = vld [vmem:[%s154_s25 + $0x10] sm:$0xff] (%p77_p3) }
  0x16   : > { %v200_v2 = vld [vmem:[%s154_s25 + $0x20] sm:$0xff] (%p77_p3)  ;;  %197 = vst [vmem:[%s148_s26] sm:$0xff] (%p77_p3), %v196_v0  ;;  %199 = vst [vmem:[%s148_s26 + $0x8] sm:$0xff] (%p77_p3), %v198_v1  ;;  %v202_v3 = vld [vmem:[%s154_s25 + $0x30] sm:$0xff] (%p77_p3) }
  0x17   : > { %201 = vst [vmem:[%s148_s26 + $0x10] sm:$0xff] (%p77_p3), %v200_v2  ;;  %v204_v4 = vld [vmem:[%s154_s25 + $0x40] sm:$0xff] (%p77_p3)  ;;  %v206_v5 = vld [vmem:[%s154_s25 + $0x50] sm:$0xff] (%p77_p3)  ;;  %203 = vst [vmem:[%s148_s26 + $0x18] sm:$0xff] (%p77_p3), %v202_v3 }
  0x18   : > { %205 = vst [vmem:[%s148_s26 + $0x20] sm:$0xff] (%p77_p3), %v204_v4  ;;  %207 = vst [vmem:[%s148_s26 + $0x28] sm:$0xff] (%p77_p3), %v206_v5  ;;  %v208_v6 = vld [vmem:[%s154_s25 + $0x60] sm:$0xff] (%p77_p3)  ;;  %v210_v7 = vld [vmem:[%s154_s25 + $0x70] sm:$0xff] (%p77_p3) }
  0x19   : > { %209 = vst [vmem:[%s148_s26 + $0x30] sm:$0xff] %v208_v6  ;;  %211 = vst [vmem:[%s148_s26 + $0x38] sm:$0xff] %v210_v7 }
  0x1a PF: > { %p898_p8 = scmp.ge.s32.totalorder %s1039_s13, 1  ;;  %p216_p9 = scmp.lt.s32.totalorder %s1039_s13, 3 }
  0x1c   : > { %p217_p10 = pnand %p898_p8, %p216_p9 }
  0x1d   : > { %s223_s27 = sand.u32 (!%p217_p10), 1, %s1023_s9   ;;  %v1041_v8 = vmov (!%p217_p10), 0   ;;  %v993_v17 = vld [vmem:[%s1265_s0] sm:$0xff] (!%p217_p10)   ;;  %vm437_vm0 = vcmask (!%p217_p10), 523264   ;;  %v995_v19 = vld [vmem:[%s1265_s0 + $0x8] sm:$0xff] (!%p217_p10)   ;;  %v997_v21 = vld [vmem:[%s1265_s0 + $0x10] sm:$0xff] (!%p217_p10)  }
  0x1e   : > { %220 = sbr.rel (%p217_p10) target bundleno = 298 (0x12a), region = 62  ;;  %s899_s28 = sshll.u32 (!%p217_p10), %s223_s27, 6  ;;  %494 = vmatprep.mubr.bf16.mxu0 (!%p217_p10), %v1041_v8  ;;  %534 = vmatprep.mubr.bf16.mxu1 (!%p217_p10), %v1041_v8  ;;  %v994_v18 = vld [vmem:[%s1265_s0 + $0x20] sm:$0xff] (!%p217_p10)   ;;  %v996_v20 = vld [vmem:[%s1265_s0 + $0x28] sm:$0xff] (!%p217_p10)   ;;  %v998_v22 = vld [vmem:[%s1265_s0 + $0x30] sm:$0xff] (!%p217_p10)  }
  0x1f   : > { %s225_s29 = scalar_lea.vmem (!%p217_p10), [#allocation3], %s899_s28  ;;  %v999_v23 = vld [vmem:[%s1265_s0 + $0x18] sm:$0xff] (!%p217_p10)   ;;  %s900_s26 = sshll.u32 (!%p217_p10), %s223_s27, 8 }
  0x20   : > { %v981_v9 = vld [vmem:[%s225_s29 + $0x4] ss:$8 sps:$4 sm:$0xff] (!%p217_p10)   ;;  %v983_v10 = vld [vmem:[%s225_s29] ss:$8 sps:$4 sm:$0xff] (!%p217_p10)   ;;  %v984_v11 = vld [vmem:[%s225_s29 + $0x14] ss:$8 sps:$4 sm:$0xff] (!%p217_p10)  }
  0x21   : > { %462 = vmatprep.subr.bf16.mxu0 (!%p217_p10), %v981_v9  ;;  %932 = vmatprep.subr.bf16.mxu1 (!%p217_p10), %v981_v9  ;;  %v986_v12 = vld [vmem:[%s225_s29 + $0x10] ss:$8 sps:$4 sm:$0xff] (!%p217_p10)   ;;  %v987_v13 = vld [vmem:[%s225_s29 + $0x24] ss:$8 sps:$4 sm:$0xff] (!%p217_p10)   ;;  %v989_v14 = vld [vmem:[%s225_s29 + $0x20] ss:$8 sps:$4 sm:$0xff] (!%p217_p10)  }
  0x22   : > { %463 = vmatpush1.bf16.msra.mxu0 (!%p217_p10), %v983_v10  ;;  %936 = vmatpush1.bf16.msra.mxu1 (!%p217_p10), %v983_v10  ;;  %v990_v15 = vld [vmem:[%s225_s29 + $0x34] ss:$8 sps:$4 sm:$0xff] (!%p217_p10)   ;;  %v992_v16 = vld [vmem:[%s225_s29 + $0x30] ss:$8 sps:$4 sm:$0xff] (!%p217_p10)   ;;  %s1144_s28 = scalar_lea.vmem (!%p217_p10), [#allocation4], %s900_s26 }
  0x23   : > { %464 = vmatprep.subr.bf16.mxu0 (!%p217_p10), %v984_v11  ;;  %933 = vmatprep.subr.bf16.mxu1 (!%p217_p10), %v984_v11  ;;  %v1000_v24 = vld [vmem:[%s1265_s0 + $0x38] sm:$0xff] (!%p217_p10)  }
  0x25   : > { %s931_s9 = sshll.u32 (%p1092_p6), %s1031_s11, 4 }
  0x26   : > { %465 = vmatpush1.bf16.msra.mxu0 %v986_v12  ;;  %937 = vmatpush1.bf16.msra.mxu1 %v986_v12  ;;  %s1187_s30 = scalar_lea.vmem (%p1092_p6), %s1267_s2, %s931_s9 }
  0x27   : > { %466 = vmatprep.subr.bf16.mxu0 %v987_v13  ;;  %934 = vmatprep.subr.bf16.mxu1 %v987_v13 }
  0x2a   : > { %467 = vmatpush1.bf16.msra.mxu0 %v989_v14  ;;  %938 = vmatpush1.bf16.msra.mxu1 %v989_v14 }
  0x2b   : > { %468 = vmatprep.subr.bf16.mxu0 %v990_v15  ;;  %935 = vmatprep.subr.bf16.mxu1 %v990_v15 }
  0x2e   : > { %469 = vmatpush1.bf16.msra.mxu0 %v992_v16  ;;  %939 = vmatpush1.bf16.msra.mxu1 %v992_v16 }
  0x31   : > { %917 = vmatmul.mubr.msk.bf16.vlgmr.msra.gmra.mrb[0].mxu0 %vm437_vm0, %v993_v17  ;;  %921 = vmatmul.mubr.msk.bf16.vlgmr.msra.gmra.mrb[0].mxu1 %vm437_vm0, %v994_v18 }
  0x32   : > { %504 = vmatprep.mubr.bf16.mxu0 %v1041_v8  ;;  %544 = vmatprep.mubr.bf16.mxu1 %v1041_v8 }
  0x39   : > { %918 = vmatmul.mubr.msk.bf16.gmra.mrb[4].mxu0 %vm437_vm0, %v995_v19  ;;  %922 = vmatmul.mubr.msk.bf16.gmra.mrb[4].mxu1 %vm437_vm0, %v996_v20 }
  0x3a   : > { %514 = vmatprep.mubr.bf16.mxu0 %v1041_v8  ;;  %554 = vmatprep.mubr.bf16.mxu1 %v1041_v8 }
  0x41   : > { %919 = vmatmul.mubr.msk.bf16.gmra.mrb[8].mxu0 %vm437_vm0, %v997_v21  ;;  %923 = vmatmul.mubr.msk.bf16.gmra.mrb[8].mxu1 %vm437_vm0, %v998_v22 }
  0x42   : > { %524 = vmatprep.mubr.bf16.mxu0 %v1041_v8  ;;  %564 = vmatprep.mubr.bf16.mxu1 %v1041_v8 }
  0x49   : > { %920 = vmatmul.mubr.msk.bf16.gmra.mrb[12].mxu0 %vm437_vm0, %v999_v23  ;;  %924 = vmatmul.mubr.msk.bf16.gmra.mrb[12].mxu1 %vm437_vm0, %v1000_v24 }
 0x104   : > { %v496_v25 = vpop.f32.mrb[0].mxu0  ;;  %v536_v26 = vpop.f32.mrb[0].mxu1 }
 0x105   : > { %674 = vst [vmem:[%s1144_s28] sm:$0xff] %v496_v25  ;;  %690 = vst [vmem:[%s1144_s28 + $0x80] sm:$0xff] %v536_v26  ;;  %v498_v27 = vpop.f32.mrb[1].mxu0  ;;  %v538_v28 = vpop.f32.mrb[1].mxu1 }
 0x106   : > { %675 = vst [vmem:[%s1144_s28 + $0x8] sm:$0xff] %v498_v27  ;;  %691 = vst [vmem:[%s1144_s28 + $0x88] sm:$0xff] %v538_v28  ;;  %v500_v29 = vpop.f32.mrb[2].mxu0  ;;  %v540_v30 = vpop.f32.mrb[2].mxu1 }
 0x107   : > { %676 = vst [vmem:[%s1144_s28 + $0x10] sm:$0xff] %v500_v29  ;;  %692 = vst [vmem:[%s1144_s28 + $0x90] sm:$0xff] %v540_v30  ;;  %v502_v31 = vpop.f32.mrb[3].mxu0  ;;  %v542_v32 = vpop.f32.mrb[3].mxu1 }
 0x108   : > { %677 = vst [vmem:[%s1144_s28 + $0x18] sm:$0xff] %v502_v31  ;;  %693 = vst [vmem:[%s1144_s28 + $0x98] sm:$0xff] %v542_v32 }
 0x10c   : > { %v506_v33 = vpop.f32.mrb[4].mxu0  ;;  %v546_v34 = vpop.f32.mrb[4].mxu1  ;;  %v731_v57 = vld [vmem:[%s1144_s28] sm:$0xff] (%p1092_p6) }
 0x10d   : > { %678 = vst [vmem:[%s1144_s28 + $0x20] sm:$0xff] %v506_v33  ;;  %694 = vst [vmem:[%s1144_s28 + $0xa0] sm:$0xff] %v546_v34  ;;  %v508_v35 = vpop.f32.mrb[5].mxu0  ;;  %v548_v36 = vpop.f32.mrb[5].mxu1  ;;  %v733_v58 = vld [vmem:[%s1144_s28 + $0x8] sm:$0xff] (%p1092_p6)  ;;  %v763_v9 = vld [vmem:[%s1144_s28 + $0x80] sm:$0xff] (%p1092_p6) }
 0x10e   : > { %679 = vst [vmem:[%s1144_s28 + $0x28] sm:$0xff] %v508_v35  ;;  %695 = vst [vmem:[%s1144_s28 + $0xa8] sm:$0xff] %v548_v36  ;;  %v510_v37 = vpop.f32.mrb[6].mxu0  ;;  %v550_v38 = vpop.f32.mrb[6].mxu1  ;;  %v735_v59 = vld [vmem:[%s1144_s28 + $0x10] sm:$0xff] (%p1092_p6)  ;;  %v765_v10 = vld [vmem:[%s1144_s28 + $0x88] sm:$0xff] (%p1092_p6) }
 0x10f   : > { %680 = vst [vmem:[%s1144_s28 + $0x30] sm:$0xff] %v510_v37  ;;  %696 = vst [vmem:[%s1144_s28 + $0xb0] sm:$0xff] %v550_v38  ;;  %v512_v39 = vpop.f32.mrb[7].mxu0  ;;  %v552_v40 = vpop.f32.mrb[7].mxu1  ;;  %v737_v60 = vld [vmem:[%s1144_s28 + $0x18] sm:$0xff] (%p1092_p6)  ;;  %v767_v11 = vld [vmem:[%s1144_s28 + $0x90] sm:$0xff] (%p1092_p6) }
 0x110   : > { %681 = vst [vmem:[%s1144_s28 + $0x38] sm:$0xff] %v512_v39  ;;  %697 = vst [vmem:[%s1144_s28 + $0xb8] sm:$0xff] %v552_v40  ;;  %v769_v12 = vld [vmem:[%s1144_s28 + $0x98] sm:$0xff] (%p1092_p6) }
 0x111   : > { %732 = vst [vmem:[%s1187_s30] sm:$0xff] (%p1092_p6), %v731_v57  ;;  %734 = vst [vmem:[%s1187_s30 + $0x8] sm:$0xff] (%p1092_p6), %v733_v58 }
 0x112   : > { %736 = vst [vmem:[%s1187_s30 + $0x20] sm:$0xff] (%p1092_p6), %v735_v59  ;;  %738 = vst [vmem:[%s1187_s30 + $0x28] sm:$0xff] (%p1092_p6), %v737_v60 }
 0x113   : > { %764 = vst [vmem:[%s1187_s30 + $0x100] sm:$0xff] (%p1092_p6), %v763_v9  ;;  %766 = vst [vmem:[%s1187_s30 + $0x108] sm:$0xff] (%p1092_p6), %v765_v10 }
 0x114   : > { %v516_v41 = vpop.f32.mrb[8].mxu0  ;;  %v556_v42 = vpop.f32.mrb[8].mxu1  ;;  %v739_v61 = vld [vmem:[%s1144_s28 + $0x20] sm:$0xff] (%p1092_p6)  ;;  %768 = vst [vmem:[%s1187_s30 + $0x120] sm:$0xff] (%p1092_p6), %v767_v11  ;;  %770 = vst [vmem:[%s1187_s30 + $0x128] sm:$0xff] (%p1092_p6), %v769_v12 }
 0x115   : > { %682 = vst [vmem:[%s1144_s28 + $0x40] sm:$0xff] %v516_v41  ;;  %698 = vst [vmem:[%s1144_s28 + $0xc0] sm:$0xff] %v556_v42  ;;  %v518_v43 = vpop.f32.mrb[9].mxu0  ;;  %v558_v44 = vpop.f32.mrb[9].mxu1  ;;  %v741_v62 = vld [vmem:[%s1144_s28 + $0x28] sm:$0xff] (%p1092_p6)  ;;  %v771_v13 = vld [vmem:[%s1144_s28 + $0xa0] sm:$0xff] (%p1092_p6) }
 0x116   : > { %683 = vst [vmem:[%s1144_s28 + $0x48] sm:$0xff] %v518_v43  ;;  %699 = vst [vmem:[%s1144_s28 + $0xc8] sm:$0xff] %v558_v44  ;;  %v520_v45 = vpop.f32.mrb[10].mxu0  ;;  %v560_v46 = vpop.f32.mrb[10].mxu1  ;;  %v743_v63 = vld [vmem:[%s1144_s28 + $0x30] sm:$0xff] (%p1092_p6)  ;;  %v773_v14 = vld [vmem:[%s1144_s28 + $0xa8] sm:$0xff] (%p1092_p6) }
 0x117   : > { %684 = vst [vmem:[%s1144_s28 + $0x50] sm:$0xff] %v520_v45  ;;  %700 = vst [vmem:[%s1144_s28 + $0xd0] sm:$0xff] %v560_v46  ;;  %v522_v47 = vpop.f32.mrb[11].mxu0  ;;  %v562_v48 = vpop.f32.mrb[11].mxu1  ;;  %v745_v0 = vld [vmem:[%s1144_s28 + $0x38] sm:$0xff] (%p1092_p6)  ;;  %v775_v15 = vld [vmem:[%s1144_s28 + $0xb0] sm:$0xff] (%p1092_p6) }
 0x118   : > { %685 = vst [vmem:[%s1144_s28 + $0x58] sm:$0xff] %v522_v47  ;;  %701 = vst [vmem:[%s1144_s28 + $0xd8] sm:$0xff] %v562_v48  ;;  %v777_v16 = vld [vmem:[%s1144_s28 + $0xb8] sm:$0xff] (%p1092_p6) }
 0x119   : > { %740 = vst [vmem:[%s1187_s30 + $0x40] sm:$0xff] (%p1092_p6), %v739_v61  ;;  %742 = vst [vmem:[%s1187_s30 + $0x48] sm:$0xff] (%p1092_p6), %v741_v62 }
 0x11a   : > { %712 = sbr.rel (!%p1092_p6) target bundleno = 298 (0x12a), region = 78  ;;  %744 = vst [vmem:[%s1187_s30 + $0x60] sm:$0xff] (%p1092_p6), %v743_v63  ;;  %746 = vst [vmem:[%s1187_s30 + $0x68] sm:$0xff] (%p1092_p6), %v745_v0 }
 0x11b   : > { %772 = vst [vmem:[%s1187_s30 + $0x140] sm:$0xff] (%p1092_p6), %v771_v13  ;;  %774 = vst [vmem:[%s1187_s30 + $0x148] sm:$0xff] (%p1092_p6), %v773_v14 }
 0x11c   : > { %v526_v49 = vpop.f32.mrb[12].mxu0  ;;  %v566_v50 = vpop.f32.mrb[12].mxu1  ;;  %v747_v1 = vld [vmem:[%s1144_s28 + $0x40] sm:$0xff] (%p1092_p6)  ;;  %776 = vst [vmem:[%s1187_s30 + $0x160] sm:$0xff] (%p1092_p6), %v775_v15  ;;  %778 = vst [vmem:[%s1187_s30 + $0x168] sm:$0xff] (%p1092_p6), %v777_v16 }
 0x11d   : > { %686 = vst [vmem:[%s1144_s28 + $0x60] sm:$0xff] %v526_v49  ;;  %702 = vst [vmem:[%s1144_s28 + $0xe0] sm:$0xff] %v566_v50  ;;  %v528_v51 = vpop.f32.mrb[13].mxu0  ;;  %v568_v52 = vpop.f32.mrb[13].mxu1  ;;  %v749_v2 = vld [vmem:[%s1144_s28 + $0x48] sm:$0xff] (%p1092_p6)  ;;  %v779_v17 = vld [vmem:[%s1144_s28 + $0xc0] sm:$0xff] (%p1092_p6) }
 0x11e   : > { %687 = vst [vmem:[%s1144_s28 + $0x68] sm:$0xff] %v528_v51  ;;  %703 = vst [vmem:[%s1144_s28 + $0xe8] sm:$0xff] %v568_v52  ;;  %v530_v53 = vpop.f32.mrb[14].mxu0  ;;  %v570_v54 = vpop.f32.mrb[14].mxu1  ;;  %v751_v3 = vld [vmem:[%s1144_s28 + $0x50] sm:$0xff] (%p1092_p6)  ;;  %v781_v18 = vld [vmem:[%s1144_s28 + $0xc8] sm:$0xff] (%p1092_p6) }
 0x11f   : > { %688 = vst [vmem:[%s1144_s28 + $0x70] sm:$0xff] %v530_v53  ;;  %704 = vst [vmem:[%s1144_s28 + $0xf0] sm:$0xff] %v570_v54  ;;  %v532_v55 = vpop.f32.mrb[15].mxu0  ;;  %v572_v56 = vpop.f32.mrb[15].mxu1  ;;  %v753_v4 = vld [vmem:[%s1144_s28 + $0x58] sm:$0xff] (%p1092_p6)  ;;  %v783_v19 = vld [vmem:[%s1144_s28 + $0xd0] sm:$0xff] (%p1092_p6) }
 0x120   : > { %689 = vst [vmem:[%s1144_s28 + $0x78] sm:$0xff] %v532_v55  ;;  %705 = vst [vmem:[%s1144_s28 + $0xf8] sm:$0xff] %v572_v56  ;;  %v785_v20 = vld [vmem:[%s1144_s28 + $0xd8] sm:$0xff] (%p1092_p6) }
 0x121   : > { %748 = vst [vmem:[%s1187_s30 + $0x80] sm:$0xff] %v747_v1  ;;  %750 = vst [vmem:[%s1187_s30 + $0x88] sm:$0xff] %v749_v2 }
 0x122   : > { %752 = vst [vmem:[%s1187_s30 + $0xa0] sm:$0xff] %v751_v3  ;;  %754 = vst [vmem:[%s1187_s30 + $0xa8] sm:$0xff] %v753_v4 }
 0x123   : > { %780 = vst [vmem:[%s1187_s30 + $0x180] sm:$0xff] %v779_v17  ;;  %782 = vst [vmem:[%s1187_s30 + $0x188] sm:$0xff] %v781_v18 }
 0x124   : > { %v755_v5 = vld [vmem:[%s1144_s28 + $0x60] sm:$0xff]  ;;  %784 = vst [vmem:[%s1187_s30 + $0x1a0] sm:$0xff] %v783_v19  ;;  %786 = vst [vmem:[%s1187_s30 + $0x1a8] sm:$0xff] %v785_v20 }
 0x125   : > { %v757_v6 = vld [vmem:[%s1144_s28 + $0x68] sm:$0xff]  ;;  %756 = vst [vmem:[%s1187_s30 + $0xc0] sm:$0xff] %v755_v5  ;;  %v787_v21 = vld [vmem:[%s1144_s28 + $0xe0] sm:$0xff] }
 0x126   : > { %v759_v7 = vld [vmem:[%s1144_s28 + $0x70] sm:$0xff]  ;;  %758 = vst [vmem:[%s1187_s30 + $0xc8] sm:$0xff] %v757_v6  ;;  %v789_v22 = vld [vmem:[%s1144_s28 + $0xe8] sm:$0xff]  ;;  %788 = vst [vmem:[%s1187_s30 + $0x1c0] sm:$0xff] %v787_v21 }
 0x127   : > { %760 = vst [vmem:[%s1187_s30 + $0xe0] sm:$0xff] %v759_v7  ;;  %v761_v8 = vld [vmem:[%s1144_s28 + $0x78] sm:$0xff]  ;;  %790 = vst [vmem:[%s1187_s30 + $0x1c8] sm:$0xff] %v789_v22  ;;  %v791_v23 = vld [vmem:[%s1144_s28 + $0xf0] sm:$0xff] }
 0x128   : > { %762 = vst [vmem:[%s1187_s30 + $0xe8] sm:$0xff] %v761_v8  ;;  %v793_v24 = vld [vmem:[%s1144_s28 + $0xf8] sm:$0xff]  ;;  %792 = vst [vmem:[%s1187_s30 + $0x1e0] sm:$0xff] %v791_v23 }
 0x129   : > { %794 = vst [vmem:[%s1187_s30 + $0x1e8] sm:$0xff] %v793_v24 }
 0x12a PF: > { %s12_s13 = sadd.s32 1, %s1039_s13   ;;  %s1269_s9 = smov %s1027_s10 }
 0x12b   : > { %p9_p11 = scmp.ge.s32.totalorder %s12_s13, 4   ;;  %s1270_s10 = smov %s1097_s19 }
 0x12c   : > { %s1271_s11 = smov %s1035_s12  ;;  %s1272_s12 = smov %s1274_s14 }
 0x12d   :  { %11 = sbr.rel (!%p9_p11) target bundleno = 3 (0x3), region = 135 }

// kernel: generator_forward.20
= control target key start
LH: loop header
LB: loop body
LE: loop exit
PB: predicated region body
PF: predicated region fallthrough
CT: control target
= control target key end

     0   :  { %vm284_vm0 = vcmask 261120   ;;  %s961_s0 = inlined_call_operand.vmem [shape: f32[512,32], index: 0, kind: input, shape index: {}]   ;;  %s962_s1 = inlined_call_operand.vmem [shape: f32[1,32], index: 1, kind: input, shape index: {}]   ;;  %s963_s2 = inlined_call_operand.vmem [shape: f32[1,32], index: 2, kind: input, shape index: {}]   ;;  %s964_s3 = inlined_call_operand.vmem [shape: f32[512,32], index: 3, kind: output, shape index: {}]  }
   0x1   :  { %v14_v0 = vld [vmem:[%s961_s0] sm:$0xff]  ;;  %v15_v4 = vld [vmem:[%s961_s0 + $0x8] sm:$0xff]  ;;  %v16_v5 = vld [vmem:[%s961_s0 + $0x10] sm:$0xff] }
   0x2   :  { %v381_v1 = vld [vmem:[%s962_s1] ss:$0 sm:$0xff]  ;;  %v17_v6 = vld [vmem:[%s961_s0 + $0x18] sm:$0xff]  ;;  %v19_v11 = vld [vmem:[%s961_s0 + $0x28] sm:$0xff] }
   0x3   :  { %v386_v2 = vld [vmem:[%s963_s2] ss:$0 sm:$0xff]  ;;  %v85_v3 = vmul.f32 %v381_v1, %v14_v0  ;;  %v86_v7 = vmul.f32 %v381_v1, %v15_v4  ;;  %v87_v8 = vmul.f32 %v381_v1, %v16_v5  ;;  %v88_v9 = vmul.f32 %v381_v1, %v17_v6  ;;  %v20_v12 = vld [vmem:[%s961_s0 + $0x30] sm:$0xff]  ;;  %v21_v17 = vld [vmem:[%s961_s0 + $0x38] sm:$0xff] }
   0x4   :  { %v18_v10 = vld [vmem:[%s961_s0 + $0x20] sm:$0xff]  ;;  %v90_v15 = vmul.f32 %v381_v1, %v19_v11  ;;  %v91_v16 = vmul.f32 %v381_v1, %v20_v12  ;;  %v92_v21 = vmul.f32 %v381_v1, %v21_v17  ;;  %v23_v27 = vld [vmem:[%s961_s0 + $0x48] sm:$0xff]  ;;  %v24_v28 = vld [vmem:[%s961_s0 + $0x50] sm:$0xff] }
   0x5   :  { %v156_v13 = vadd.f32 %v386_v2, %v85_v3  ;;  %v89_v14 = vmul.f32 %v381_v1, %v18_v10  ;;  %v157_v18 = vadd.f32 %v386_v2, %v86_v7  ;;  %v158_v19 = vadd.f32 %v386_v2, %v87_v8  ;;  %v22_v22 = vld [vmem:[%s961_s0 + $0x40] sm:$0xff]  ;;  %v25_v29 = vld [vmem:[%s961_s0 + $0x58] sm:$0xff]  ;;  %v27_v35 = vld [vmem:[%s961_s0 + $0x68] sm:$0xff] }
   0x6   :  { %v159_v20 = vadd.f32 %v386_v2, %v88_v9  ;;  %v161_v25 = vadd.f32 %v386_v2, %v90_v15  ;;  %v162_v26 = vadd.f32 %v386_v2, %v91_v16  ;;  %v163_v33 = vadd.f32 %v386_v2, %v92_v21  ;;  %v26_v34 = vld [vmem:[%s961_s0 + $0x60] sm:$0xff]  ;;  %v28_v36 = vld [vmem:[%s961_s0 + $0x70] sm:$0xff]  ;;  %v29_v41 = vld [vmem:[%s961_s0 + $0x78] sm:$0xff] }
   0x7   :  { %v220_v23 = vmax.f32 %v156_v13, 0.0  ;;  %v160_v24 = vadd.f32 %v386_v2, %v89_v14  ;;  %v221_v30 = vmax.f32 %v157_v18, 0.0  ;;  %v222_v31 = vmax.f32 %v158_v19, 0.0  ;;  %v30_v54 = vld [vmem:[%s961_s0 + $0x80] sm:$0xff]  ;;  %v31_v59 = vld [vmem:[%s961_s0 + $0x88] sm:$0xff]  ;;  %v32_v60 = vld [vmem:[%s961_s0 + $0x90] sm:$0xff] }
   0x8   :  { %v223_v32 = vmax.f32 %v159_v20, 0.0  ;;  %v225_v38 = vmax.f32 %v161_v25, 0.0  ;;  %v226_v39 = vmax.f32 %v162_v26, 0.0  ;;  %v93_v40 = vmul.f32 %v381_v1, %v22_v22  ;;  %v33_v61 = vld [vmem:[%s961_s0 + $0x98] sm:$0xff]  ;;  %v34_v4 = vld [vmem:[%s961_s0 + $0xa0] sm:$0xff]  ;;  %v35_v5 = vld [vmem:[%s961_s0 + $0xa8] sm:$0xff] }
   0x9   :  { %285 = vst.msk [vmem:[%s964_s3] sm:$0xff] %vm284_vm0, %v220_v23  ;;  %v224_v37 = vmax.f32 %v160_v24, 0.0  ;;  %286 = vst.msk [vmem:[%s964_s3 + $0x8] sm:$0xff] %vm284_vm0, %v221_v30  ;;  %v227_v42 = vmax.f32 %v163_v33, 0.0  ;;  %v94_v43 = vmul.f32 %v381_v1, %v23_v27  ;;  %v95_v44 = vmul.f32 %v381_v1, %v24_v28  ;;  %v36_v6 = vld [vmem:[%s961_s0 + $0xb0] sm:$0xff]  ;;  %v37_v11 = vld [vmem:[%s961_s0 + $0xb8] sm:$0xff] }
   0xa   :  { %287 = vst.msk [vmem:[%s964_s3 + $0x10] sm:$0xff] %vm284_vm0, %v222_v31  ;;  %288 = vst.msk [vmem:[%s964_s3 + $0x18] sm:$0xff] %vm284_vm0, %v223_v32  ;;  %v96_v45 = vmul.f32 %v381_v1, %v25_v29  ;;  %v164_v46 = vadd.f32 %v386_v2, %v93_v40  ;;  %v97_v47 = vmul.f32 %v381_v1, %v26_v34  ;;  %v38_v24 = vld [vmem:[%s961_s0 + $0xc0] sm:$0xff]  ;;  %v39_v29 = vld [vmem:[%s961_s0 + $0xc8] sm:$0xff] }
   0xb   :  { %289 = vst.msk [vmem:[%s964_s3 + $0x20] sm:$0xff] %vm284_vm0, %v224_v37  ;;  %290 = vst.msk [vmem:[%s964_s3 + $0x28] sm:$0xff] %vm284_vm0, %v225_v38  ;;  %v98_v48 = vmul.f32 %v381_v1, %v27_v35  ;;  %v99_v49 = vmul.f32 %v381_v1, %v28_v36  ;;  %v165_v50 = vadd.f32 %v386_v2, %v94_v43  ;;  %v40_v30 = vld [vmem:[%s961_s0 + $0xd0] sm:$0xff]  ;;  %v41_v31 = vld [vmem:[%s961_s0 + $0xd8] sm:$0xff] }
   0xc   :  { %291 = vst.msk [vmem:[%s964_s3 + $0x30] sm:$0xff] %vm284_vm0, %v226_v39  ;;  %292 = vst.msk [vmem:[%s964_s3 + $0x38] sm:$0xff] %vm284_vm0, %v227_v42  ;;  %v166_v51 = vadd.f32 %v386_v2, %v95_v44  ;;  %v167_v52 = vadd.f32 %v386_v2, %v96_v45  ;;  %v100_v53 = vmul.f32 %v381_v1, %v29_v41  ;;  %v228_v55 = vmax.f32 %v164_v46, 0.0  ;;  %v42_v36 = vld [vmem:[%s961_s0 + $0xe0] sm:$0xff]  ;;  %v43_v37 = vld [vmem:[%s961_s0 + $0xe8] sm:$0xff] }
   0xd   :  { %v168_v56 = vadd.f32 %v386_v2, %v97_v47  ;;  %v169_v57 = vadd.f32 %v386_v2, %v98_v48  ;;  %v170_v58 = vadd.f32 %v386_v2, %v99_v49  ;;  %v229_v62 = vmax.f32 %v165_v50, 0.0  ;;  %v44_v38 = vld [vmem:[%s961_s0 + $0xf0] sm:$0xff]  ;;  %v45_v43 = vld [vmem:[%s961_s0 + $0xf8] sm:$0xff] }
   0xe   :  { %v230_v63 = vmax.f32 %v166_v51, 0.0  ;;  %v231_v0 = vmax.f32 %v167_v52, 0.0  ;;  %v171_v3 = vadd.f32 %v386_v2, %v100_v53  ;;  %293 = vst.msk [vmem:[%s964_s3 + $0x40] sm:$0xff] %vm284_vm0, %v228_v55  ;;  %v101_v10 = vmul.f32 %v381_v1, %v30_v54 }
   0xf   :  { %v232_v7 = vmax.f32 %v168_v56, 0.0  ;;  %v233_v8 = vmax.f32 %v169_v57, 0.0  ;;  %v234_v9 = vmax.f32 %v170_v58, 0.0  ;;  %294 = vst.msk [vmem:[%s964_s3 + $0x48] sm:$0xff] %vm284_vm0, %v229_v62  ;;  %v102_v13 = vmul.f32 %v381_v1, %v31_v59  ;;  %v46_v56 = vld [vmem:[%s961_s0 + $0x100] sm:$0xff]  ;;  %v48_v62 = vld [vmem:[%s961_s0 + $0x110] sm:$0xff] }
  0x10   :  { %295 = vst.msk [vmem:[%s964_s3 + $0x50] sm:$0xff] %vm284_vm0, %v230_v63  ;;  %296 = vst.msk [vmem:[%s964_s3 + $0x58] sm:$0xff] %vm284_vm0, %v231_v0  ;;  %v235_v12 = vmax.f32 %v171_v3, 0.0  ;;  %v103_v14 = vmul.f32 %v381_v1, %v32_v60  ;;  %v104_v15 = vmul.f32 %v381_v1, %v33_v61  ;;  %v172_v16 = vadd.f32 %v386_v2, %v101_v10  ;;  %v47_v61 = vld [vmem:[%s961_s0 + $0x108] sm:$0xff]  ;;  %v49_v63 = vld [vmem:[%s961_s0 + $0x118] sm:$0xff] }
  0x11   :  { %297 = vst.msk [vmem:[%s964_s3 + $0x60] sm:$0xff] %vm284_vm0, %v232_v7  ;;  %298 = vst.msk [vmem:[%s964_s3 + $0x68] sm:$0xff] %vm284_vm0, %v233_v8  ;;  %v105_v17 = vmul.f32 %v381_v1, %v34_v4  ;;  %v106_v18 = vmul.f32 %v381_v1, %v35_v5  ;;  %v107_v19 = vmul.f32 %v381_v1, %v36_v6  ;;  %v50_v6 = vld [vmem:[%s961_s0 + $0x120] sm:$0xff]  ;;  %v51_v7 = vld [vmem:[%s961_s0 + $0x128] sm:$0xff] }
  0x12   :  { %299 = vst.msk [vmem:[%s964_s3 + $0x70] sm:$0xff] %vm284_vm0, %v234_v9  ;;  %300 = vst.msk [vmem:[%s964_s3 + $0x78] sm:$0xff] %vm284_vm0, %v235_v12  ;;  %v173_v20 = vadd.f32 %v386_v2, %v102_v13  ;;  %v174_v21 = vadd.f32 %v386_v2, %v103_v14  ;;  %v175_v22 = vadd.f32 %v386_v2, %v104_v15  ;;  %v236_v25 = vmax.f32 %v172_v16, 0.0  ;;  %v52_v8 = vld [vmem:[%s961_s0 + $0x130] sm:$0xff]  ;;  %v53_v13 = vld [vmem:[%s961_s0 + $0x138] sm:$0xff] }
  0x13   :  { %v108_v23 = vmul.f32 %v381_v1, %v37_v11  ;;  %v176_v26 = vadd.f32 %v386_v2, %v105_v17  ;;  %v177_v27 = vadd.f32 %v386_v2, %v106_v18  ;;  %v178_v28 = vadd.f32 %v386_v2, %v107_v19 }
  0x14   :  { %v237_v32 = vmax.f32 %v173_v20, 0.0  ;;  %v238_v33 = vmax.f32 %v174_v21, 0.0  ;;  %v239_v34 = vmax.f32 %v175_v22, 0.0  ;;  %301 = vst.msk [vmem:[%s964_s3 + $0x80] sm:$0xff] %vm284_vm0, %v236_v25  ;;  %v109_v42 = vmul.f32 %v381_v1, %v38_v24 }
  0x15   :  { %v179_v35 = vadd.f32 %v386_v2, %v108_v23  ;;  %v240_v39 = vmax.f32 %v176_v26, 0.0  ;;  %v241_v40 = vmax.f32 %v177_v27, 0.0  ;;  %v242_v41 = vmax.f32 %v178_v28, 0.0  ;;  %v54_v26 = vld [vmem:[%s961_s0 + $0x140] sm:$0xff] }
  0x16   :  { %302 = vst.msk [vmem:[%s964_s3 + $0x88] sm:$0xff] %vm284_vm0, %v237_v32  ;;  %303 = vst.msk [vmem:[%s964_s3 + $0x90] sm:$0xff] %vm284_vm0, %v238_v33  ;;  %v110_v45 = vmul.f32 %v381_v1, %v39_v29  ;;  %v111_v46 = vmul.f32 %v381_v1, %v40_v30  ;;  %v112_v47 = vmul.f32 %v381_v1, %v41_v31  ;;  %v55_v31 = vld [vmem:[%s961_s0 + $0x148] sm:$0xff]  ;;  %v56_v32 = vld [vmem:[%s961_s0 + $0x150] sm:$0xff] }
  0x17   :  { %304 = vst.msk [vmem:[%s964_s3 + $0x98] sm:$0xff] %vm284_vm0, %v239_v34  ;;  %v243_v44 = vmax.f32 %v179_v35, 0.0  ;;  %305 = vst.msk [vmem:[%s964_s3 + $0xa0] sm:$0xff] %vm284_vm0, %v240_v39  ;;  %v180_v48 = vadd.f32 %v386_v2, %v109_v42  ;;  %v113_v49 = vmul.f32 %v381_v1, %v42_v36  ;;  %v114_v50 = vmul.f32 %v381_v1, %v43_v37  ;;  %v57_v33 = vld [vmem:[%s961_s0 + $0x158] sm:$0xff]  ;;  %v59_v39 = vld [vmem:[%s961_s0 + $0x168] sm:$0xff] }
  0x18   :  { %306 = vst.msk [vmem:[%s964_s3 + $0xa8] sm:$0xff] %vm284_vm0, %v241_v40  ;;  %307 = vst.msk [vmem:[%s964_s3 + $0xb0] sm:$0xff] %vm284_vm0, %v242_v41  ;;  %v115_v51 = vmul.f32 %v381_v1, %v44_v38  ;;  %v181_v52 = vadd.f32 %v386_v2, %v110_v45  ;;  %v182_v53 = vadd.f32 %v386_v2, %v111_v46  ;;  %v58_v38 = vld [vmem:[%s961_s0 + $0x160] sm:$0xff]  ;;  %v60_v40 = vld [vmem:[%s961_s0 + $0x170] sm:$0xff] }
  0x19   :  { %308 = vst.msk [vmem:[%s964_s3 + $0xb8] sm:$0xff] %vm284_vm0, %v243_v44  ;;  %v183_v54 = vadd.f32 %v386_v2, %v112_v47  ;;  %v116_v55 = vmul.f32 %v381_v1, %v45_v43  ;;  %v244_v57 = vmax.f32 %v180_v48, 0.0  ;;  %v184_v58 = vadd.f32 %v386_v2, %v113_v49  ;;  %v61_v45 = vld [vmem:[%s961_s0 + $0x178] sm:$0xff] }
  0x1a   :  { %v185_v59 = vadd.f32 %v386_v2, %v114_v50  ;;  %v186_v60 = vadd.f32 %v386_v2, %v115_v51  ;;  %v245_v0 = vmax.f32 %v181_v52, 0.0  ;;  %v246_v3 = vmax.f32 %v182_v53, 0.0 }
  0x1b   :  { %v247_v4 = vmax.f32 %v183_v54, 0.0  ;;  %v187_v5 = vadd.f32 %v386_v2, %v116_v55  ;;  %309 = vst.msk [vmem:[%s964_s3 + $0xc0] sm:$0xff] %vm284_vm0, %v244_v57  ;;  %v248_v9 = vmax.f32 %v184_v58, 0.0  ;;  %v117_v12 = vmul.f32 %v381_v1, %v46_v56  ;;  %v62_v58 = vld [vmem:[%s961_s0 + $0x180] sm:$0xff] }
  0x1c   :  { %v249_v10 = vmax.f32 %v185_v59, 0.0  ;;  %v250_v11 = vmax.f32 %v186_v60, 0.0  ;;  %310 = vst.msk [vmem:[%s964_s3 + $0xc8] sm:$0xff] %vm284_vm0, %v245_v0  ;;  %311 = vst.msk [vmem:[%s964_s3 + $0xd0] sm:$0xff] %vm284_vm0, %v246_v3  ;;  %v118_v15 = vmul.f32 %v381_v1, %v47_v61  ;;  %v119_v16 = vmul.f32 %v381_v1, %v48_v62  ;;  %v64_v0 = vld [vmem:[%s961_s0 + $0x190] sm:$0xff]  ;;  %v65_v3 = vld [vmem:[%s961_s0 + $0x198] sm:$0xff] }
  0x1d   :  { %312 = vst.msk [vmem:[%s964_s3 + $0xd8] sm:$0xff] %vm284_vm0, %v247_v4  ;;  %v251_v14 = vmax.f32 %v187_v5, 0.0  ;;  %v120_v17 = vmul.f32 %v381_v1, %v49_v63  ;;  %313 = vst.msk [vmem:[%s964_s3 + $0xe0] sm:$0xff] %vm284_vm0, %v248_v9  ;;  %v188_v18 = vadd.f32 %v386_v2, %v117_v12  ;;  %v121_v19 = vmul.f32 %v381_v1, %v50_v6  ;;  %v63_v63 = vld [vmem:[%s961_s0 + $0x188] sm:$0xff] }
  0x1e   :  { %314 = vst.msk [vmem:[%s964_s3 + $0xe8] sm:$0xff] %vm284_vm0, %v249_v10  ;;  %315 = vst.msk [vmem:[%s964_s3 + $0xf0] sm:$0xff] %vm284_vm0, %v250_v11  ;;  %v122_v20 = vmul.f32 %v381_v1, %v51_v7  ;;  %v123_v21 = vmul.f32 %v381_v1, %v52_v8  ;;  %v189_v22 = vadd.f32 %v386_v2, %v118_v15  ;;  %v66_v8 = vld [vmem:[%s961_s0 + $0x1a0] sm:$0xff]  ;;  %v67_v9 = vld [vmem:[%s961_s0 + $0x1a8] sm:$0xff] }
  0x1f   :  { %316 = vst.msk [vmem:[%s964_s3 + $0xf8] sm:$0xff] %vm284_vm0, %v251_v14  ;;  %v190_v23 = vadd.f32 %v386_v2, %v119_v16  ;;  %v191_v24 = vadd.f32 %v386_v2, %v120_v17  ;;  %v124_v25 = vmul.f32 %v381_v1, %v53_v13  ;;  %v252_v27 = vmax.f32 %v188_v18, 0.0  ;;  %v68_v10 = vld [vmem:[%s961_s0 + $0x1b0] sm:$0xff]  ;;  %v69_v15 = vld [vmem:[%s961_s0 + $0x1b8] sm:$0xff] }
  0x20   :  { %v192_v28 = vadd.f32 %v386_v2, %v121_v19  ;;  %v193_v29 = vadd.f32 %v386_v2, %v122_v20  ;;  %v194_v30 = vadd.f32 %v386_v2, %v123_v21  ;;  %v253_v34 = vmax.f32 %v189_v22, 0.0 }
  0x21   :  { %v254_v35 = vmax.f32 %v190_v23, 0.0  ;;  %v255_v36 = vmax.f32 %v191_v24, 0.0  ;;  %v195_v37 = vadd.f32 %v386_v2, %v124_v25  ;;  %317 = vst.msk [vmem:[%s964_s3 + $0x100] sm:$0xff] %vm284_vm0, %v252_v27  ;;  %v125_v44 = vmul.f32 %v381_v1, %v54_v26 }
  0x22   :  { %v256_v41 = vmax.f32 %v192_v28, 0.0  ;;  %v257_v42 = vmax.f32 %v193_v29, 0.0  ;;  %v258_v43 = vmax.f32 %v194_v30, 0.0  ;;  %318 = vst.msk [vmem:[%s964_s3 + $0x108] sm:$0xff] %vm284_vm0, %v253_v34  ;;  %v126_v47 = vmul.f32 %v381_v1, %v55_v31  ;;  %v70_v28 = vld [vmem:[%s961_s0 + $0x1c0] sm:$0xff]  ;;  %v72_v34 = vld [vmem:[%s961_s0 + $0x1d0] sm:$0xff] }
  0x23   :  { %319 = vst.msk [vmem:[%s964_s3 + $0x110] sm:$0xff] %vm284_vm0, %v254_v35  ;;  %320 = vst.msk [vmem:[%s964_s3 + $0x118] sm:$0xff] %vm284_vm0, %v255_v36  ;;  %v259_v46 = vmax.f32 %v195_v37, 0.0  ;;  %v127_v48 = vmul.f32 %v381_v1, %v56_v32  ;;  %v128_v49 = vmul.f32 %v381_v1, %v57_v33  ;;  %v196_v50 = vadd.f32 %v386_v2, %v125_v44  ;;  %v71_v33 = vld [vmem:[%s961_s0 + $0x1c8] sm:$0xff]  ;;  %v73_v35 = vld [vmem:[%s961_s0 + $0x1d8] sm:$0xff] }
  0x24   :  { %321 = vst.msk [vmem:[%s964_s3 + $0x120] sm:$0xff] %vm284_vm0, %v256_v41  ;;  %322 = vst.msk [vmem:[%s964_s3 + $0x128] sm:$0xff] %vm284_vm0, %v257_v42  ;;  %v129_v51 = vmul.f32 %v381_v1, %v58_v38  ;;  %v130_v52 = vmul.f32 %v381_v1, %v59_v39  ;;  %v131_v53 = vmul.f32 %v381_v1, %v60_v40  ;;  %v74_v40 = vld [vmem:[%s961_s0 + $0x1e0] sm:$0xff]  ;;  %v75_v41 = vld [vmem:[%s961_s0 + $0x1e8] sm:$0xff] }
  0x25   :  { %323 = vst.msk [vmem:[%s964_s3 + $0x130] sm:$0xff] %vm284_vm0, %v258_v43  ;;  %324 = vst.msk [vmem:[%s964_s3 + $0x138] sm:$0xff] %vm284_vm0, %v259_v46  ;;  %v197_v54 = vadd.f32 %v386_v2, %v126_v47  ;;  %v198_v55 = vadd.f32 %v386_v2, %v127_v48  ;;  %v199_v56 = vadd.f32 %v386_v2, %v128_v49  ;;  %v260_v59 = vmax.f32 %v196_v50, 0.0  ;;  %v76_v42 = vld [vmem:[%s961_s0 + $0x1f0] sm:$0xff]  ;;  %v77_v47 = vld [vmem:[%s961_s0 + $0x1f8] sm:$0xff] }
  0x26   :  { %v132_v57 = vmul.f32 %v381_v1, %v61_v45  ;;  %v200_v60 = vadd.f32 %v386_v2, %v129_v51  ;;  %v201_v61 = vadd.f32 %v386_v2, %v130_v52  ;;  %v202_v62 = vadd.f32 %v386_v2, %v131_v53 }
  0x27   :  { %v261_v4 = vmax.f32 %v197_v54, 0.0  ;;  %v262_v5 = vmax.f32 %v198_v55, 0.0  ;;  %v263_v6 = vmax.f32 %v199_v56, 0.0  ;;  %325 = vst.msk [vmem:[%s964_s3 + $0x140] sm:$0xff] %vm284_vm0, %v260_v59  ;;  %v133_v14 = vmul.f32 %v381_v1, %v62_v58 }
  0x28   :  { %v203_v7 = vadd.f32 %v386_v2, %v132_v57  ;;  %v264_v11 = vmax.f32 %v200_v60, 0.0  ;;  %v265_v12 = vmax.f32 %v201_v61, 0.0  ;;  %v266_v13 = vmax.f32 %v202_v62, 0.0 }
  0x29   :  { %326 = vst.msk [vmem:[%s964_s3 + $0x148] sm:$0xff] %vm284_vm0, %v261_v4  ;;  %327 = vst.msk [vmem:[%s964_s3 + $0x150] sm:$0xff] %vm284_vm0, %v262_v5  ;;  %v134_v17 = vmul.f32 %v381_v1, %v63_v63  ;;  %v135_v18 = vmul.f32 %v381_v1, %v64_v0  ;;  %v136_v19 = vmul.f32 %v381_v1, %v65_v3 }
  0x2a   :  { %328 = vst.msk [vmem:[%s964_s3 + $0x158] sm:$0xff] %vm284_vm0, %v263_v6  ;;  %v267_v16 = vmax.f32 %v203_v7, 0.0  ;;  %329 = vst.msk [vmem:[%s964_s3 + $0x160] sm:$0xff] %vm284_vm0, %v264_v11  ;;  %v204_v20 = vadd.f32 %v386_v2, %v133_v14  ;;  %v137_v21 = vmul.f32 %v381_v1, %v66_v8  ;;  %v138_v22 = vmul.f32 %v381_v1, %v67_v9 }
  0x2b   :  { %330 = vst.msk [vmem:[%s964_s3 + $0x168] sm:$0xff] %vm284_vm0, %v265_v12  ;;  %331 = vst.msk [vmem:[%s964_s3 + $0x170] sm:$0xff] %vm284_vm0, %v266_v13  ;;  %v139_v23 = vmul.f32 %v381_v1, %v68_v10  ;;  %v205_v24 = vadd.f32 %v386_v2, %v134_v17  ;;  %v206_v25 = vadd.f32 %v386_v2, %v135_v18 }
  0x2c   :  { %332 = vst.msk [vmem:[%s964_s3 + $0x178] sm:$0xff] %vm284_vm0, %v267_v16  ;;  %v207_v26 = vadd.f32 %v386_v2, %v136_v19  ;;  %v140_v27 = vmul.f32 %v381_v1, %v69_v15  ;;  %v268_v29 = vmax.f32 %v204_v20, 0.0  ;;  %v208_v30 = vadd.f32 %v386_v2, %v137_v21 }
  0x2d   :  { %v209_v31 = vadd.f32 %v386_v2, %v138_v22  ;;  %v210_v32 = vadd.f32 %v386_v2, %v139_v23  ;;  %v269_v36 = vmax.f32 %v205_v24, 0.0  ;;  %v270_v37 = vmax.f32 %v206_v25, 0.0 }
  0x2e   :  { %v271_v38 = vmax.f32 %v207_v26, 0.0  ;;  %v211_v39 = vadd.f32 %v386_v2, %v140_v27  ;;  %333 = vst.msk [vmem:[%s964_s3 + $0x180] sm:$0xff] %vm284_vm0, %v268_v29  ;;  %v272_v43 = vmax.f32 %v208_v30, 0.0  ;;  %v141_v46 = vmul.f32 %v381_v1, %v70_v28 }
  0x2f   :  { %v273_v44 = vmax.f32 %v209_v31, 0.0  ;;  %v274_v45 = vmax.f32 %v210_v32, 0.0  ;;  %334 = vst.msk [vmem:[%s964_s3 + $0x188] sm:$0xff] %vm284_vm0, %v269_v36  ;;  %335 = vst.msk [vmem:[%s964_s3 + $0x190] sm:$0xff] %vm284_vm0, %v270_v37  ;;  %v142_v49 = vmul.f32 %v381_v1, %v71_v33  ;;  %v143_v50 = vmul.f32 %v381_v1, %v72_v34 }
  0x30   :  { %336 = vst.msk [vmem:[%s964_s3 + $0x198] sm:$0xff] %vm284_vm0, %v271_v38  ;;  %v275_v48 = vmax.f32 %v211_v39, 0.0  ;;  %v144_v51 = vmul.f32 %v381_v1, %v73_v35  ;;  %337 = vst.msk [vmem:[%s964_s3 + $0x1a0] sm:$0xff] %vm284_vm0, %v272_v43  ;;  %v212_v52 = vadd.f32 %v386_v2, %v141_v46  ;;  %v145_v53 = vmul.f32 %v381_v1, %v74_v40 }
  0x31   :  { %338 = vst.msk [vmem:[%s964_s3 + $0x1a8] sm:$0xff] %vm284_vm0, %v273_v44  ;;  %339 = vst.msk [vmem:[%s964_s3 + $0x1b0] sm:$0xff] %vm284_vm0, %v274_v45  ;;  %v146_v54 = vmul.f32 %v381_v1, %v75_v41  ;;  %v147_v55 = vmul.f32 %v381_v1, %v76_v42  ;;  %v213_v56 = vadd.f32 %v386_v2, %v142_v49 }
  0x32   :  { %340 = vst.msk [vmem:[%s964_s3 + $0x1b8] sm:$0xff] %vm284_vm0, %v275_v48  ;;  %v214_v57 = vadd.f32 %v386_v2, %v143_v50  ;;  %v215_v58 = vadd.f32 %v386_v2, %v144_v51  ;;  %v148_v59 = vmul.f32 %v381_v1, %v77_v47  ;;  %v276_v60 = vmax.f32 %v212_v52, 0.0 }
  0x33   :  { %v216_v61 = vadd.f32 %v386_v2, %v145_v53  ;;  %v217_v62 = vadd.f32 %v386_v2, %v146_v54  ;;  %v218_v63 = vadd.f32 %v386_v2, %v147_v55  ;;  %v277_v0 = vmax.f32 %v213_v56, 0.0 }
  0x34   :  { %v278_v3 = vmax.f32 %v214_v57, 0.0  ;;  %v279_v4 = vmax.f32 %v215_v58, 0.0  ;;  %v219_v5 = vadd.f32 %v386_v2, %v148_v59  ;;  %341 = vst.msk [vmem:[%s964_s3 + $0x1c0] sm:$0xff] %vm284_vm0, %v276_v60 }
  0x35   :  { %v280_v6 = vmax.f32 %v216_v61, 0.0  ;;  %v281_v7 = vmax.f32 %v217_v62, 0.0  ;;  %v282_v1 = vmax.f32 %v218_v63, 0.0  ;;  %342 = vst.msk [vmem:[%s964_s3 + $0x1c8] sm:$0xff] %vm284_vm0, %v277_v0 }
  0x36   :  { %343 = vst.msk [vmem:[%s964_s3 + $0x1d0] sm:$0xff] %vm284_vm0, %v278_v3  ;;  %344 = vst.msk [vmem:[%s964_s3 + $0x1d8] sm:$0xff] %vm284_vm0, %v279_v4  ;;  %v283_v2 = vmax.f32 %v219_v5, 0.0 }
  0x37   :  { %345 = vst.msk [vmem:[%s964_s3 + $0x1e0] sm:$0xff] %vm284_vm0, %v280_v6  ;;  %346 = vst.msk [vmem:[%s964_s3 + $0x1e8] sm:$0xff] %vm284_vm0, %v281_v7 }
  0x38   :  { %347 = vst.msk [vmem:[%s964_s3 + $0x1f0] sm:$0xff] %vm284_vm0, %v282_v1  ;;  %348 = vst.msk [vmem:[%s964_s3 + $0x1f8] sm:$0xff] %vm284_vm0, %v283_v2 }

// kernel: generator_forward.19
= control target key start
LH: loop header
LB: loop body
LE: loop exit
PB: predicated region body
PF: predicated region fallthrough
CT: control target
= control target key end

     0   :  { %vm20_vm0 = vcmask 253952   ;;  %vm88_vm1 = vcmask 261120   ;;  %v455_v0 = vmov 0.0   ;;  %s1353_s0 = inlined_call_operand.vmem [shape: f32[512,32], index: 0, kind: input, shape index: {}]   ;;  %s1354_s1 = inlined_call_operand.vmem [shape: f32[1,32], index: 1, kind: input, shape index: {}]   ;;  %s1355_s2 = inlined_call_operand.vmem [shape: f32[1,32], index: 2, kind: input, shape index: {}]   ;;  %s1356_s3 = inlined_call_operand.vmem [shape: f32[1,32], index: 3, kind: output, shape index: {0}]   ;;  %s1357_s4 = inlined_call_operand.vmem [shape: f32[1,32], index: 4, kind: output, shape index: {1}]  }
   0x1   :  { %21 = vst.msk [vmem:[#allocation2] sm:$0x1] %vm20_vm0, %v455_v0  ;;  %22 = vst.msk [vmem:[#allocation3] sm:$0x1] %vm20_vm0, %v455_v0  ;;  %v486_v1 = vld [vmem:[%s1353_s0] sm:$0xff]  ;;  %v491_v2 = vld [vmem:[%s1353_s0 + $0x8] sm:$0xff] }
   0x2   :  { %v496_v3 = vld [vmem:[%s1353_s0 + $0x10] sm:$0xff]  ;;  %v501_v4 = vld [vmem:[%s1353_s0 + $0x18] sm:$0xff]  ;;  %v89_v5 = vsel %vm88_vm1, %v486_v1, 0.0  ;;  %v90_v6 = vsel %vm88_vm1, %v491_v2, 0.0  ;;  %v512_v8 = vld [vmem:[%s1353_s0 + $0x20] sm:$0xff] }
   0x3   :  { %v92_v7 = vsel %vm88_vm1, %v496_v3, 0.0  ;;  %v91_v9 = vadd.f32 %v90_v6, %v89_v5  ;;  %v94_v10 = vsel %vm88_vm1, %v501_v4, 0.0  ;;  %v519_v11 = vld [vmem:[%s1353_s0 + $0x28] sm:$0xff]  ;;  %v96_v13 = vsel %vm88_vm1, %v512_v8, 0.0  ;;  %v526_v14 = vld [vmem:[%s1353_s0 + $0x30] sm:$0xff]  ;;  %v531_v16 = vld [vmem:[%s1353_s0 + $0x38] sm:$0xff] }
   0x4   :  { %v536_v17 = vld [vmem:[%s1353_s0 + $0x40] sm:$0xff]  ;;  %v98_v18 = vsel %vm88_vm1, %v519_v11, 0.0  ;;  %v543_v19 = vld [vmem:[%s1353_s0 + $0x48] sm:$0xff]  ;;  %v548_v20 = vld [vmem:[%s1353_s0 + $0x50] sm:$0xff]  ;;  %v100_v23 = vsel %vm88_vm1, %v526_v14, 0.0  ;;  %v102_v25 = vsel %vm88_vm1, %v531_v16, 0.0 }
   0x5   :  { %v93_v12 = vadd.f32 %v92_v7, %v91_v9  ;;  %v553_v21 = vld [vmem:[%s1353_s0 + $0x58] sm:$0xff]  ;;  %v104_v26 = vsel %vm88_vm1, %v536_v17, 0.0  ;;  %v564_v27 = vld [vmem:[%s1353_s0 + $0x108] sm:$0xff]  ;;  %v569_v28 = vld [vmem:[%s1353_s0 + $0x110] sm:$0xff]  ;;  %v106_v30 = vsel %vm88_vm1, %v543_v19, 0.0  ;;  %v108_v31 = vsel %vm88_vm1, %v548_v20, 0.0 }
   0x6   :  { %v574_v29 = vld [vmem:[%s1353_s0 + $0x118] sm:$0xff]  ;;  %v582_v32 = vsel %vm88_vm1, %v553_v21, 0.0  ;;  %v587_v33 = vld [vmem:[%s1353_s0 + $0x120] sm:$0xff]  ;;  %v592_v34 = vld [vmem:[%s1353_s0 + $0x128] sm:$0xff]  ;;  %v601_v37 = vsel %vm88_vm1, %v564_v27, 0.0  ;;  %v605_v38 = vsel %vm88_vm1, %v569_v28, 0.0 }
   0x7   :  { %v95_v15 = vadd.f32 %v94_v10, %v93_v12  ;;  %v597_v35 = vld [vmem:[%s1353_s0 + $0x130] sm:$0xff]  ;;  %1380 = vst [vmem:[#allocation4_spill] sm:$0xff] %v601_v37  ;;  %1381 = vst [vmem:[#allocation5_spill] sm:$0xff] %v605_v38  ;;  %v609_v39 = vsel %vm88_vm1, %v574_v29, 0.0  ;;  %v614_v40 = vld [vmem:[%s1353_s0 + $0x138] sm:$0xff]  ;;  %v628_v43 = vsel %vm88_vm1, %v587_v33, 0.0 }
   0x8   :  { %1382 = vst [vmem:[#allocation6_spill] sm:$0xff] %v609_v39  ;;  %v619_v41 = vld [vmem:[%s1353_s0 + $0x140] sm:$0xff]  ;;  %v624_v42 = vld [vmem:[%s1353_s0 + $0x148] sm:$0xff]  ;;  %1383 = vst [vmem:[#allocation7_spill] sm:$0xff] %v628_v43  ;;  %v632_v44 = vsel %vm88_vm1, %v592_v34, 0.0  ;;  %v636_v45 = vsel %vm88_vm1, %v597_v35, 0.0 }
   0x9   :  { %v97_v22 = vadd.f32 %v96_v13, %v95_v15  ;;  %1384 = vst [vmem:[#allocation8_spill] sm:$0xff] %v632_v44  ;;  %1385 = vst [vmem:[#allocation9_spill] sm:$0xff] %v636_v45  ;;  %v641_v46 = vld [vmem:[%s1353_s0 + $0x150] sm:$0xff]  ;;  %v646_v47 = vld [vmem:[%s1353_s0 + $0x158] sm:$0xff]  ;;  %v655_v50 = vsel %vm88_vm1, %v614_v40, 0.0  ;;  %v659_v51 = vsel %vm88_vm1, %v619_v41, 0.0 }
   0xa   :  { %v651_v48 = vld [vmem:[%s1353_s0 + $0x160] sm:$0xff]  ;;  %1386 = vst [vmem:[#allocation10_spill] sm:$0xff] %v655_v50  ;;  %1387 = vst [vmem:[#allocation11_spill] sm:$0xff] %v659_v51  ;;  %v663_v52 = vsel %vm88_vm1, %v624_v42, 0.0  ;;  %v668_v53 = vld [vmem:[%s1353_s0 + $0x168] sm:$0xff]  ;;  %v682_v56 = vsel %vm88_vm1, %v641_v46, 0.0 }
   0xb   :  { %v99_v24 = vadd.f32 %v98_v18, %v97_v22  ;;  %1388 = vst [vmem:[#allocation12_spill] sm:$0xff] %v663_v52  ;;  %v673_v54 = vld [vmem:[%s1353_s0 + $0x170] sm:$0xff]  ;;  %v678_v55 = vld [vmem:[%s1353_s0 + $0x178] sm:$0xff]  ;;  %1389 = vst [vmem:[#allocation13_spill] sm:$0xff] %v682_v56  ;;  %v686_v57 = vsel %vm88_vm1, %v646_v47, 0.0  ;;  %v690_v58 = vsel %vm88_vm1, %v651_v48, 0.0 }
   0xc   :  { %1390 = vst [vmem:[#allocation14_spill] sm:$0xff] %v686_v57  ;;  %1391 = vst [vmem:[#allocation15_spill] sm:$0xff] %v690_v58  ;;  %v695_v59 = vld [vmem:[%s1353_s0 + $0x60] sm:$0xff]  ;;  %v705_v61 = vld [vmem:[%s1353_s0 + $0x188] sm:$0xff]  ;;  %v714_v0 = vsel %vm88_vm1, %v668_v53, 0.0  ;;  %v718_v5 = vsel %vm88_vm1, %v673_v54, 0.0 }
   0xd   :  { %v101_v36 = vadd.f32 %v100_v23, %v99_v24  ;;  %v700_v60 = vld [vmem:[%s1353_s0 + $0x180] sm:$0xff]  ;;  %v710_v62 = vld [vmem:[%s1353_s0 + $0x190] sm:$0xff]  ;;  %1392 = vst [vmem:[#allocation16_spill] sm:$0xff] %v714_v0  ;;  %1393 = vst [vmem:[#allocation17_spill] sm:$0xff] %v718_v5  ;;  %v722_v6 = vsel %vm88_vm1, %v678_v55, 0.0  ;;  %v745_v13 = vsel %vm88_vm1, %v705_v61, 0.0 }
   0xe   :  { %1394 = vst [vmem:[#allocation18_spill] sm:$0xff] %v722_v6  ;;  %v727_v7 = vld [vmem:[%s1353_s0 + $0x198] sm:$0xff]  ;;  %v732_v9 = vld [vmem:[%s1353_s0 + $0x1a0] sm:$0xff]  ;;  %v737_v10 = vld [vmem:[%s1353_s0 + $0x1a8] sm:$0xff]  ;;  %v741_v12 = vsel %vm88_vm1, %v700_v60, 0.0  ;;  %v749_v15 = vsel %vm88_vm1, %v710_v62, 0.0 }
   0xf   :  { %v103_v49 = vadd.f32 %v102_v25, %v101_v36  ;;  %1395 = vst [vmem:[#allocation19_spill] sm:$0xff] %v741_v12  ;;  %1396 = vst [vmem:[#allocation20_spill] sm:$0xff] %v745_v13  ;;  %v754_v18 = vld [vmem:[%s1353_s0 + $0x68] sm:$0xff]  ;;  %v759_v22 = vld [vmem:[%s1353_s0 + $0x1b0] sm:$0xff]  ;;  %v777_v36 = vsel %vm88_vm1, %v732_v9, 0.0 }
  0x10   :  { %1397 = vst [vmem:[#allocation21_spill] sm:$0xff] %v749_v15  ;;  %v764_v23 = vld [vmem:[%s1353_s0 + $0x1b8] sm:$0xff]  ;;  %v769_v24 = vld [vmem:[%s1353_s0 + $0x1c0] sm:$0xff]  ;;  %1399 = vst [vmem:[#allocation23_spill] sm:$0xff] %v777_v36  ;;  %v800_v36 = vsel %vm88_vm1, %v759_v22, 0.0 }
  0x11   :  { %v105_v63 = vadd.f32 %v104_v26, %v103_v49  ;;  %v773_v26 = vsel %vm88_vm1, %v727_v7, 0.0  ;;  %v781_v49 = vsel %vm88_vm1, %v737_v10, 0.0  ;;  %v786_v15 = vld [vmem:[%s1353_s0 + $0x1c8] sm:$0xff]  ;;  %1403 = vst [vmem:[#allocation27_spill] sm:$0xff] %v800_v36  ;;  %v813_v13 = vld [vmem:[%s1353_s0 + $0x1e0] sm:$0xff]  ;;  %v823_v36 = vld [vmem:[%s1353_s0 + $0x1f0] sm:$0xff] }
  0x12   :  { %1398 = vst [vmem:[#allocation22_spill] sm:$0xff] %v773_v26  ;;  %1400 = vst [vmem:[#allocation24_spill] sm:$0xff] %v781_v49  ;;  %v804_v49 = vsel %vm88_vm1, %v764_v23, 0.0  ;;  %v808_v26 = vsel %vm88_vm1, %v769_v24, 0.0  ;;  %v818_v12 = vld [vmem:[%s1353_s0 + $0x1e8] sm:$0xff]  ;;  %v827_v6 = vsel %vm88_vm1, %v786_v15, 0.0 }
  0x13   :  { %v107_v25 = vadd.f32 %v106_v30, %v105_v63  ;;  %v791_v30 = vld [vmem:[%s1353_s0 + $0x1d0] sm:$0xff]  ;;  %v796_v63 = vld [vmem:[%s1353_s0 + $0x1d8] sm:$0xff]  ;;  %1404 = vst [vmem:[#allocation28_spill] sm:$0xff] %v804_v49  ;;  %1405 = vst [vmem:[#allocation29_spill] sm:$0xff] %v808_v26 }
  0x14   :  { %1401 = vst [vmem:[#allocation25_spill] sm:$0xff] %v791_v30  ;;  %1402 = vst [vmem:[#allocation26_spill] sm:$0xff] %v796_v63  ;;  %v831_v26 = vsel %vm88_vm1, %v791_v30, 0.0  ;;  %v835_v5 = vsel %vm88_vm1, %v796_v63, 0.0  ;;  %v840_v0 = vld [vmem:[%s1353_s0 + $0x1f8] sm:$0xff]  ;;  %v894_v56 = vld [vmem:[%s1353_s0 + $0xa0] sm:$0xff] }
  0x15   :  { %1406 = vst [vmem:[#allocation30_spill] sm:$0xff] %v813_v13  ;;  %1407 = vst [vmem:[#allocation31_spill] sm:$0xff] %v818_v12  ;;  %v109_v49 = vadd.f32 %v108_v31, %v107_v25  ;;  %v112_v31 = vsel %vm88_vm1, %v695_v59, 0.0  ;;  %v846_v25 = vsel %vm88_vm1, %v813_v13, 0.0  ;;  %v862_v57 = vsel %vm88_vm1, %v840_v0, 0.0  ;;  %v899_v51 = vld [vmem:[%s1353_s0 + $0xa8] sm:$0xff] }
  0x16   :  { %1408 = vst [vmem:[#allocation32_spill] sm:$0xff] %v823_v36  ;;  %1409 = vst [vmem:[#allocation33_spill] sm:$0xff] %v827_v6  ;;  %v850_v6 = vsel %vm88_vm1, %v818_v12, 0.0  ;;  %v904_v50 = vld [vmem:[%s1353_s0 + $0xb0] sm:$0xff]  ;;  %v909_v45 = vld [vmem:[%s1353_s0 + $0xb8] sm:$0xff] }
  0x17   :  { %1410 = vst [vmem:[#allocation34_spill] sm:$0xff] %v831_v26  ;;  %1411 = vst [vmem:[#allocation35_spill] sm:$0xff] %v835_v5  ;;  %v854_v26 = vsel %vm88_vm1, %v823_v36, 0.0  ;;  %v37_v5 = vld [vmem:[%s1353_s0 + $0x70] sm:$0xff]  ;;  %v111_v58 = vadd.f32 %v582_v32, %v109_v49  ;;  %v114_v32 = vsel %vm88_vm1, %v754_v18, 0.0  ;;  %v919_v43 = vld [vmem:[%s1353_s0 + $0xc0] sm:$0xff] }
  0x18   :  { %1412 = vst [vmem:[#allocation36_spill] sm:$0xff] %v840_v0  ;;  %1413 = vst [vmem:[#allocation37_spill] sm:$0xff] %v846_v25  ;;  %v867_v25 = vld [vmem:[%s1353_s0 + $0x78] sm:$0xff]  ;;  %v884_v49 = vld [vmem:[%s1353_s0 + $0x90] sm:$0xff]  ;;  %v116_v44 = vsel %vm88_vm1, %v37_v5, 0.0  ;;  %v228_v0 = vmul.f32 %v496_v3, %v496_v3  ;;  %v128_v3 = vsel %vm88_vm1, %v894_v56, 0.0 }
  0x19   :  { %1414 = vst [vmem:[#allocation38_spill] sm:$0xff] %v850_v6  ;;  %1415 = vst [vmem:[#allocation39_spill] sm:$0xff] %v854_v26  ;;  %v872_v6 = vld [vmem:[%s1353_s0 + $0x80] sm:$0xff]  ;;  %v877_v26 = vld [vmem:[%s1353_s0 + $0x88] sm:$0xff]  ;;  %v113_v52 = vadd.f32 %v112_v31, %v111_v58  ;;  %v226_v58 = vmul.f32 %v486_v1, %v486_v1  ;;  %v227_v31 = vmul.f32 %v491_v2, %v491_v2  ;;  %v118_v1 = vsel %vm88_vm1, %v867_v25, 0.0 }
  0x1a   :  { %1416 = vst [vmem:[#allocation40_spill] sm:$0xff] %v862_v57  ;;  %1417 = vst [vmem:[#allocation41_spill] sm:$0xff] %v867_v25  ;;  %v889_v57 = vld [vmem:[%s1353_s0 + $0x98] sm:$0xff]  ;;  %v924_v39 = vld [vmem:[%s1353_s0 + $0xc8] sm:$0xff]  ;;  %v120_v2 = vsel %vm88_vm1, %v872_v6, 0.0  ;;  %v973_v63 = vsel %vm88_vm1, %v909_v45, 0.0 }
  0x1b   :  { %1418 = vst [vmem:[#allocation42_spill] sm:$0xff] %v872_v6  ;;  %1419 = vst [vmem:[#allocation43_spill] sm:$0xff] %v877_v26  ;;  %v929_v38 = vld [vmem:[%s1353_s0 + $0xd0] sm:$0xff]  ;;  %v115_v37 = vadd.f32 %v114_v32, %v113_v52  ;;  %v940_v36 = vld [vmem:[%s1353_s0 + $0xd8] sm:$0xff]  ;;  %v122_v52 = vsel %vm88_vm1, %v877_v26, 0.0  ;;  %v124_v32 = vsel %vm88_vm1, %v884_v49, 0.0 }
  0x1c   :  { %1420 = vst [vmem:[#allocation44_spill] sm:$0xff] %v884_v49  ;;  %1421 = vst [vmem:[#allocation45_spill] sm:$0xff] %v889_v57  ;;  %v945_v12 = vld [vmem:[%s1353_s0 + $0xe0] sm:$0xff]  ;;  %v126_v6 = vsel %vm88_vm1, %v889_v57, 0.0  ;;  %v958_v25 = vld [vmem:[%s1353_s0 + $0xe8] sm:$0xff]  ;;  %v130_v49 = vsel %vm88_vm1, %v899_v51, 0.0 }
  0x1d   :  { %1422 = vst [vmem:[#allocation46_spill] sm:$0xff] %v894_v56  ;;  %1423 = vst [vmem:[#allocation47_spill] sm:$0xff] %v899_v51  ;;  %v963_v13 = vld [vmem:[%s1353_s0 + $0xf0] sm:$0xff]  ;;  %v117_v26 = vadd.f32 %v116_v44, %v115_v37  ;;  %v132_v57 = vsel %vm88_vm1, %v904_v50, 0.0  ;;  %v229_v56 = vmul.f32 %v501_v4, %v501_v4  ;;  %v977_v30 = vsel %vm88_vm1, %v919_v43, 0.0 }
  0x1e   :  { %1424 = vst [vmem:[#allocation48_spill] sm:$0xff] %v904_v50  ;;  %1425 = vst [vmem:[#allocation49_spill] sm:$0xff] %v909_v45  ;;  %v981_v37 = vsel %vm88_vm1, %v924_v39, 0.0  ;;  %v985_v44 = vsel %vm88_vm1, %v929_v38, 0.0  ;;  %v989_v4 = vsel %vm88_vm1, %v940_v36, 0.0  ;;  %v993_v45 = vsel %vm88_vm1, %v945_v12, 0.0 }
  0x1f   :  { %1426 = vst [vmem:[#allocation50_spill] sm:$0xff] %v919_v43  ;;  %1427 = vst [vmem:[#allocation51_spill] sm:$0xff] %v924_v39  ;;  %v119_v50 = vadd.f32 %v118_v1, %v117_v26  ;;  %v230_v43 = vmul.f32 %v512_v8, %v512_v8  ;;  %v999_v39 = vsel %vm88_vm1, %v958_v25, 0.0  ;;  %v231_v26 = vmul.f32 %v519_v11, %v519_v11 }
  0x20   :  { %1428 = vst [vmem:[#allocation52_spill] sm:$0xff] %v929_v38  ;;  %1429 = vst [vmem:[#allocation53_spill] sm:$0xff] %v940_v36  ;;  %v1003_v38 = vsel %vm88_vm1, %v963_v13, 0.0  ;;  %v232_v1 = vmul.f32 %v526_v14, %v526_v14  ;;  %v234_v8 = vmul.f32 %v536_v17, %v536_v17  ;;  %v237_v51 = vmul.f32 %v553_v21, %v553_v21 }
  0x21   :  { %1430 = vst [vmem:[#allocation54_spill] sm:$0xff] %v945_v12  ;;  %1431 = vst [vmem:[#allocation55_spill] sm:$0xff] %v958_v25  ;;  %v121_v36 = vadd.f32 %v120_v2, %v119_v50  ;;  %v233_v12 = vmul.f32 %v531_v16, %v531_v16  ;;  %v235_v25 = vmul.f32 %v543_v19, %v543_v19 }
  0x22   :  { %1432 = vst [vmem:[#allocation56_spill] sm:$0xff] %v963_v13  ;;  %v236_v13 = vmul.f32 %v548_v20, %v548_v20  ;;  %v238_v11 = vmul.f32 %v695_v59, %v695_v59  ;;  %v1023_v14 = vmul.f32 %v754_v18, %v754_v18  ;;  %v1025_v50 = vmul.f32 %v37_v5, %v37_v5 }
  0x23   :  { %v123_v16 = vadd.f32 %v122_v52, %v121_v36  ;;  %v259_v17 = vmul.f32 %v564_v27, %v564_v27  ;;  %v260_v19 = vmul.f32 %v569_v28, %v569_v28  ;;  %v261_v20 = vmul.f32 %v574_v29, %v574_v29 }
  0x24   :  { %v262_v21 = vmul.f32 %v587_v33, %v587_v33  ;;  %v263_v59 = vmul.f32 %v592_v34, %v592_v34  ;;  %v264_v18 = vmul.f32 %v597_v35, %v597_v35  ;;  %v265_v36 = vmul.f32 %v614_v40, %v614_v40 }
  0x25   :  { %v125_v5 = vadd.f32 %v124_v32, %v123_v16  ;;  %v266_v27 = vmul.f32 %v619_v41, %v619_v41  ;;  %v267_v28 = vmul.f32 %v624_v42, %v624_v42  ;;  %v268_v29 = vmul.f32 %v641_v46, %v641_v46 }
  0x26   :  { %v269_v33 = vmul.f32 %v646_v47, %v646_v47  ;;  %v290_v34 = vsel %vm88_vm1, %v226_v58, 0.0  ;;  %v291_v35 = vsel %vm88_vm1, %v227_v31, 0.0  ;;  %v270_v40 = vmul.f32 %v651_v48, %v651_v48 }
  0x27   :  { %v127_v2 = vadd.f32 %v126_v6, %v125_v5  ;;  %v292_v52 = vadd.f32 %v291_v35, %v290_v34  ;;  %v293_v41 = vsel %vm88_vm1, %v228_v0, 0.0  ;;  %v271_v42 = vmul.f32 %v668_v53, %v668_v53  ;;  %v1435_v35 = vld [vmem:[#allocation30_spill] sm:$0xff] }
  0x28   :  { %v272_v46 = vmul.f32 %v673_v54, %v673_v54  ;;  %v273_v47 = vmul.f32 %v678_v55, %v678_v55  ;;  %v295_v58 = vsel %vm88_vm1, %v229_v56, 0.0  ;;  %v274_v6 = vmul.f32 %v700_v60, %v700_v60 }
  0x29   :  { %v129_v32 = vadd.f32 %v128_v3, %v127_v2  ;;  %v275_v48 = vmul.f32 %v705_v61, %v705_v61  ;;  %v294_v31 = vadd.f32 %v293_v41, %v292_v52  ;;  %v276_v0 = vmul.f32 %v710_v62, %v710_v62 }
  0x2a   :  { %v277_v53 = vmul.f32 %v727_v7, %v727_v7  ;;  %v278_v54 = vmul.f32 %v732_v9, %v732_v9  ;;  %v297_v55 = vsel %vm88_vm1, %v230_v43, 0.0  ;;  %v279_v3 = vmul.f32 %v737_v10, %v737_v10  ;;  %v1434_v10 = vld [vmem:[#allocation26_spill] sm:$0xff] }
  0x2b   :  { %v131_v56 = vadd.f32 %v130_v49, %v129_v32  ;;  %v280_v60 = vmul.f32 %v759_v22, %v759_v22  ;;  %v296_v61 = vadd.f32 %v295_v58, %v294_v31  ;;  %v281_v16 = vmul.f32 %v764_v23, %v764_v23  ;;  %v1433_v49 = vld [vmem:[#allocation25_spill] sm:$0xff]  ;;  %v1436_v23 = vld [vmem:[#allocation31_spill] sm:$0xff] }
  0x2c   :  { %v282_v62 = vmul.f32 %v769_v24, %v769_v24  ;;  %v283_v7 = vmul.f32 %v786_v15, %v786_v15  ;;  %v299_v9 = vsel %vm88_vm1, %v231_v26, 0.0  ;;  %v284_v5 = vmul.f32 %v1433_v49, %v1433_v49  ;;  %v1437_v24 = vld [vmem:[#allocation32_spill] sm:$0xff] }
  0x2d   :  { %v133_v43 = vadd.f32 %v132_v57, %v131_v56  ;;  %v285_v34 = vmul.f32 %v1434_v10, %v1434_v10  ;;  %v298_v22 = vadd.f32 %v297_v55, %v296_v61  ;;  %v286_v2 = vmul.f32 %v1435_v35, %v1435_v35  ;;  %v1438_v26 = vld [vmem:[#allocation36_spill] sm:$0xff] }
  0x2e   :  { %v287_v52 = vmul.f32 %v1436_v23, %v1436_v23  ;;  %v288_v41 = vmul.f32 %v1437_v24, %v1437_v24  ;;  %v301_v15 = vsel %vm88_vm1, %v232_v1, 0.0  ;;  %v289_v58 = vmul.f32 %v1438_v26, %v1438_v26  ;;  %v1439_v24 = vld [vmem:[#allocation41_spill] sm:$0xff] }
  0x2f   :  { %v135_v57 = vadd.f32 %v973_v63, %v133_v43  ;;  %v300_v32 = vadd.f32 %v299_v9, %v298_v22  ;;  %v303_v31 = vsel %vm88_vm1, %v233_v12, 0.0  ;;  %v305_v55 = vsel %vm88_vm1, %v234_v8, 0.0 }
  0x30   :  { %v307_v56 = vsel %vm88_vm1, %v235_v25, 0.0  ;;  %v309_v61 = vsel %vm88_vm1, %v236_v13, 0.0  ;;  %v311_v49 = vsel %vm88_vm1, %v237_v51, 0.0  ;;  %v313_v1 = vsel %vm88_vm1, %v238_v11, 0.0 }
  0x31   :  { %v137_v10 = vadd.f32 %v977_v30, %v135_v57  ;;  %v302_v35 = vadd.f32 %v301_v15, %v300_v32  ;;  %v1105_v63 = vsel %vm88_vm1, %v259_v17, 0.0  ;;  %v1108_v9 = vsel %vm88_vm1, %v260_v19, 0.0 }
  0x32   :  { %v1111_v12 = vsel %vm88_vm1, %v261_v20, 0.0  ;;  %v1114_v25 = vsel %vm88_vm1, %v262_v21, 0.0  ;;  %v1117_v13 = vsel %vm88_vm1, %v263_v59, 0.0  ;;  %v1121_v8 = vsel %vm88_vm1, %v264_v18, 0.0 }
  0x33   :  { %v139_v51 = vadd.f32 %v981_v37, %v137_v10  ;;  %v304_v30 = vadd.f32 %v303_v31, %v302_v35  ;;  %v1124_v11 = vsel %vm88_vm1, %v265_v36, 0.0  ;;  %v1127_v17 = vsel %vm88_vm1, %v266_v27, 0.0 }
  0x34   :  { %v1130_v19 = vsel %vm88_vm1, %v267_v28, 0.0  ;;  %v1133_v20 = vsel %vm88_vm1, %v268_v29, 0.0  ;;  %v1136_v21 = vsel %vm88_vm1, %v269_v33, 0.0  ;;  %v1140_v18 = vsel %vm88_vm1, %v270_v40, 0.0 }
  0x35   :  { %v141_v37 = vadd.f32 %v985_v44, %v139_v51  ;;  %v306_v59 = vadd.f32 %v305_v55, %v304_v30  ;;  %v1143_v36 = vsel %vm88_vm1, %v271_v42, 0.0  ;;  %v1146_v27 = vsel %vm88_vm1, %v272_v46, 0.0  ;;  %v1443_v51 = vld [vmem:[#allocation4_spill] sm:$0xff] }
  0x36   :  { %v1149_v28 = vsel %vm88_vm1, %v273_v47, 0.0  ;;  %v1152_v29 = vsel %vm88_vm1, %v274_v6, 0.0  ;;  %v1155_v33 = vsel %vm88_vm1, %v275_v48, 0.0  ;;  %v1159_v40 = vsel %vm88_vm1, %v276_v0, 0.0 }
  0x37   :  { %v143_v44 = vadd.f32 %v989_v4, %v141_v37  ;;  %v308_v43 = vadd.f32 %v307_v56, %v306_v59  ;;  %v1162_v42 = vsel %vm88_vm1, %v277_v53, 0.0  ;;  %v1165_v46 = vsel %vm88_vm1, %v278_v54, 0.0  ;;  %v1179_v4 = vld [vmem:[%s1353_s0 + $0xf8] sm:$0xff]  ;;  %v1444_v59 = vld [vmem:[#allocation45_spill] sm:$0xff] }
  0x38   :  { %v1168_v47 = vsel %vm88_vm1, %v279_v3, 0.0  ;;  %v1171_v6 = vsel %vm88_vm1, %v280_v60, 0.0  ;;  %v1174_v48 = vsel %vm88_vm1, %v281_v16, 0.0  ;;  %v1183_v54 = vsel %vm88_vm1, %v282_v62, 0.0  ;;  %v1441_v56 = vld [vmem:[#allocation43_spill] sm:$0xff] }
  0x39   :  { %v145_v0 = vadd.f32 %v993_v45, %v143_v44  ;;  %v310_v53 = vadd.f32 %v309_v61, %v308_v43  ;;  %v1186_v3 = vsel %vm88_vm1, %v283_v7, 0.0  ;;  %v1189_v60 = vsel %vm88_vm1, %v284_v5, 0.0  ;;  %v1203_v45 = vld [vmem:[%s1353_s0 + $0x100] sm:$0xff]  ;;  %v1445_v43 = vld [vmem:[#allocation5_spill] sm:$0xff] }
  0x3a   :  { %v1192_v16 = vsel %vm88_vm1, %v285_v34, 0.0  ;;  %v1195_v22 = vsel %vm88_vm1, %v286_v2, 0.0  ;;  %v1198_v23 = vsel %vm88_vm1, %v287_v52, 0.0  ;;  %v1207_v5 = vsel %vm88_vm1, %v288_v41, 0.0  ;;  %v1440_v41 = vld [vmem:[#allocation42_spill] sm:$0xff] }
  0x3b   :  { %v147_v62 = vadd.f32 %v999_v39, %v145_v0  ;;  %v312_v7 = vadd.f32 %v311_v49, %v310_v53  ;;  %v1210_v34 = vsel %vm88_vm1, %v289_v58, 0.0  ;;  %v150_v2 = vsel %vm88_vm1, %v1179_v4, 0.0 }
  0x3c   :  { %v241_v52 = vmul.f32 %v1439_v24, %v1439_v24  ;;  %v315_v15 = vsel %vm88_vm1, %v1023_v14, 0.0  ;;  %v152_v39 = vsel %vm88_vm1, %v1203_v45, 0.0  ;;  %v242_v32 = vmul.f32 %v1440_v41, %v1440_v41  ;;  %v1447_v24 = vld [vmem:[#allocation6_spill] sm:$0xff]  ;;  %v1449_v41 = vld [vmem:[#allocation7_spill] sm:$0xff] }
  0x3d   :  { %v149_v57 = vadd.f32 %v1003_v38, %v147_v62  ;;  %v314_v26 = vadd.f32 %v313_v1, %v312_v7  ;;  %v317_v58 = vsel %vm88_vm1, %v1025_v50, 0.0  ;;  %v243_v61 = vmul.f32 %v1441_v56, %v1441_v56  ;;  %v1442_v38 = vld [vmem:[#allocation44_spill] sm:$0xff]  ;;  %v1446_v62 = vld [vmem:[#allocation46_spill] sm:$0xff] }
  0x3e   :  { %v319_v49 = vsel %vm88_vm1, %v241_v52, 0.0  ;;  %v244_v35 = vmul.f32 %v1442_v38, %v1442_v38  ;;  %v321_v1 = vsel %vm88_vm1, %v242_v32, 0.0  ;;  %v245_v50 = vmul.f32 %v1444_v59, %v1444_v59 }
  0x3f   :  { %v151_v31 = vadd.f32 %v150_v2, %v149_v57  ;;  %v316_v55 = vadd.f32 %v315_v15, %v314_v26  ;;  %v323_v44 = vsel %vm88_vm1, %v243_v61, 0.0  ;;  %v246_v7 = vmul.f32 %v1446_v62, %v1446_v62  ;;  %v1448_v57 = vld [vmem:[#allocation47_spill] sm:$0xff]  ;;  %v1451_v61 = vld [vmem:[#allocation8_spill] sm:$0xff] }
  0x40   :  { %v325_v2 = vsel %vm88_vm1, %v244_v35, 0.0  ;;  %v247_v26 = vmul.f32 %v1448_v57, %v1448_v57 }
  0x41   :  { %v153_v14 = vadd.f32 %v152_v39, %v151_v31  ;;  %v318_v10 = vadd.f32 %v317_v58, %v316_v55  ;;  %v327_v39 = vsel %vm88_vm1, %v245_v50, 0.0  ;;  %v1450_v31 = vld [vmem:[#allocation48_spill] sm:$0xff]  ;;  %v329_v56 = vsel %vm88_vm1, %v246_v7, 0.0 }
  0x42   :  { %v248_v55 = vmul.f32 %v1450_v31, %v1450_v31  ;;  %v331_v35 = vsel %vm88_vm1, %v247_v26, 0.0 }
  0x43   :  { %v155_v30 = vadd.f32 %v1443_v51, %v153_v14  ;;  %v320_v37 = vadd.f32 %v319_v49, %v318_v10  ;;  %v1452_v10 = vld [vmem:[#allocation49_spill] sm:$0xff] }
  0x44   :  { %v249_v38 = vmul.f32 %v1452_v10, %v1452_v10  ;;  %v333_v50 = vsel %vm88_vm1, %v248_v55, 0.0 }
  0x45   :  { %v157_v0 = vadd.f32 %v1445_v43, %v155_v30  ;;  %v322_v53 = vadd.f32 %v321_v1, %v320_v37  ;;  %v1453_v1 = vld [vmem:[#allocation9_spill] sm:$0xff]  ;;  %v1454_v37 = vld [vmem:[#allocation50_spill] sm:$0xff] }
  0x46   :  { %v250_v59 = vmul.f32 %v1454_v37, %v1454_v37  ;;  %v335_v7 = vsel %vm88_vm1, %v249_v38, 0.0 }
  0x47   :  { %v159_v52 = vadd.f32 %v1447_v24, %v157_v0  ;;  %v324_v15 = vadd.f32 %v323_v44, %v322_v53  ;;  %v1455_v44 = vld [vmem:[#allocation10_spill] sm:$0xff]  ;;  %v1456_v53 = vld [vmem:[#allocation51_spill] sm:$0xff] }
  0x48   :  { %v251_v62 = vmul.f32 %v1456_v53, %v1456_v53  ;;  %v337_v26 = vsel %vm88_vm1, %v250_v59, 0.0 }
  0x49   :  { %v161_v32 = vadd.f32 %v1449_v41, %v159_v52  ;;  %v326_v58 = vadd.f32 %v325_v2, %v324_v15  ;;  %v1457_v2 = vld [vmem:[#allocation11_spill] sm:$0xff]  ;;  %v1458_v15 = vld [vmem:[#allocation52_spill] sm:$0xff] }
  0x4a   :  { %v252_v57 = vmul.f32 %v1458_v15, %v1458_v15  ;;  %v339_v55 = vsel %vm88_vm1, %v251_v62, 0.0 }
  0x4b   :  { %v163_v49 = vadd.f32 %v1451_v61, %v161_v32  ;;  %v328_v14 = vadd.f32 %v327_v39, %v326_v58  ;;  %v1459_v39 = vld [vmem:[#allocation12_spill] sm:$0xff]  ;;  %v1460_v58 = vld [vmem:[#allocation53_spill] sm:$0xff] }
  0x4c   :  { %v253_v31 = vmul.f32 %v1460_v58, %v1460_v58  ;;  %v341_v38 = vsel %vm88_vm1, %v252_v57, 0.0  ;;  %v1468_v57 = vld [vmem:[#allocation17_spill] sm:$0xff]  ;;  %v1469_v58 = vld [vmem:[#allocation18_spill] sm:$0xff] }
  0x4d   :  { %v165_v51 = vadd.f32 %v1453_v1, %v163_v49  ;;  %v330_v30 = vadd.f32 %v329_v56, %v328_v14  ;;  %v1461_v56 = vld [vmem:[#allocation13_spill] sm:$0xff]  ;;  %v1462_v14 = vld [vmem:[#allocation54_spill] sm:$0xff] }
  0x4e   :  { %v254_v10 = vmul.f32 %v1462_v14, %v1462_v14  ;;  %v343_v59 = vsel %vm88_vm1, %v253_v31, 0.0 }
  0x4f   :  { %v167_v43 = vadd.f32 %v1455_v44, %v165_v51  ;;  %v332_v0 = vadd.f32 %v331_v35, %v330_v30  ;;  %v1463_v35 = vld [vmem:[#allocation14_spill] sm:$0xff]  ;;  %v1464_v30 = vld [vmem:[#allocation55_spill] sm:$0xff] }
  0x50   :  { %v255_v37 = vmul.f32 %v1464_v30, %v1464_v30  ;;  %v345_v62 = vsel %vm88_vm1, %v254_v10, 0.0  ;;  %v1471_v10 = vld [vmem:[#allocation20_spill] sm:$0xff] }
  0x51   :  { %v169_v24 = vadd.f32 %v1457_v2, %v167_v43  ;;  %v334_v52 = vadd.f32 %v333_v50, %v332_v0  ;;  %v1465_v50 = vld [vmem:[#allocation15_spill] sm:$0xff]  ;;  %v1466_v0 = vld [vmem:[#allocation56_spill] sm:$0xff] }
  0x52   :  { %v256_v53 = vmul.f32 %v1466_v0, %v1466_v0  ;;  %v347_v15 = vsel %vm88_vm1, %v255_v37, 0.0  ;;  %v1473_v37 = vld [vmem:[#allocation22_spill] sm:$0xff]  ;;  %v1475_v0 = vld [vmem:[#allocation24_spill] sm:$0xff] }
  0x53   :  { %v171_v41 = vadd.f32 %v1459_v39, %v169_v24  ;;  %v336_v32 = vadd.f32 %v335_v7, %v334_v52  ;;  %v1467_v7 = vld [vmem:[#allocation16_spill] sm:$0xff]  ;;  %v257_v52 = vmul.f32 %v1179_v4, %v1179_v4 }
  0x55   :  { %v173_v61 = vadd.f32 %v1461_v56, %v171_v41  ;;  %v338_v49 = vadd.f32 %v337_v26, %v336_v32  ;;  %v258_v41 = vmul.f32 %v1203_v45, %v1203_v45  ;;  %v349_v32 = vsel %vm88_vm1, %v256_v53, 0.0 }
  0x56   :  { %v351_v56 = vsel %vm88_vm1, %v257_v52, 0.0  ;;  %v1477_v52 = vld [vmem:[#allocation28_spill] sm:$0xff] }
  0x57   :  { %v175_v1 = vadd.f32 %v1463_v35, %v173_v61  ;;  %v340_v51 = vadd.f32 %v339_v55, %v338_v49  ;;  %v1470_v61 = vld [vmem:[#allocation19_spill] sm:$0xff]  ;;  %v353_v4 = vsel %vm88_vm1, %v258_v41, 0.0  ;;  %v1479_v41 = vld [vmem:[#allocation33_spill] sm:$0xff] }
  0x59   :  { %v177_v44 = vadd.f32 %v1465_v50, %v175_v1  ;;  %v342_v43 = vadd.f32 %v341_v38, %v340_v51  ;;  %v1472_v1 = vld [vmem:[#allocation21_spill] sm:$0xff]  ;;  %v1474_v50 = vld [vmem:[#allocation23_spill] sm:$0xff] }
  0x5b   :  { %v179_v2 = vadd.f32 %v1467_v7, %v177_v44  ;;  %v344_v24 = vadd.f32 %v343_v59, %v342_v43  ;;  %v1476_v7 = vld [vmem:[#allocation27_spill] sm:$0xff] }
  0x5d   :  { %v181_v26 = vadd.f32 %v1468_v57, %v179_v2  ;;  %v346_v39 = vadd.f32 %v345_v62, %v344_v24 }
  0x5f   :  { %v183_v31 = vadd.f32 %v1469_v58, %v181_v26  ;;  %v348_v55 = vadd.f32 %v347_v15, %v346_v39  ;;  %v1478_v26 = vld [vmem:[#allocation29_spill] sm:$0xff]  ;;  %v1480_v58 = vld [vmem:[#allocation34_spill] sm:$0xff] }
  0x61   :  { %v185_v49 = vadd.f32 %v1470_v61, %v183_v31  ;;  %v350_v14 = vadd.f32 %v349_v32, %v348_v55  ;;  %v1481_v55 = vld [vmem:[#allocation35_spill] sm:$0xff]  ;;  %v1482_v61 = vld [vmem:[#allocation37_spill] sm:$0xff] }
  0x63   :  { %v187_v38 = vadd.f32 %v1471_v10, %v185_v49  ;;  %v352_v35 = vadd.f32 %v351_v56, %v350_v14  ;;  %v1483_v14 = vld [vmem:[#allocation38_spill] sm:$0xff]  ;;  %v1484_v10 = vld [vmem:[#allocation39_spill] sm:$0xff] }
  0x65   :  { %v189_v51 = vadd.f32 %v1472_v1, %v187_v38  ;;  %v354_v30 = vadd.f32 %v353_v4, %v352_v35  ;;  %v1485_v35 = vld [vmem:[#allocation40_spill] sm:$0xff] }
  0x67   :  { %v191_v45 = vadd.f32 %v1473_v37, %v189_v51  ;;  %v356_v59 = vadd.f32 %v1105_v63, %v354_v30 }
  0x69   :  { %v193_v44 = vadd.f32 %v1474_v50, %v191_v45  ;;  %v358_v43 = vadd.f32 %v1108_v9, %v356_v59 }
  0x6b   :  { %v195_v53 = vadd.f32 %v1475_v0, %v193_v44  ;;  %v360_v62 = vadd.f32 %v1111_v12, %v358_v43 }
  0x6d   :  { %v197_v2 = vadd.f32 %v1476_v7, %v195_v53  ;;  %v362_v24 = vadd.f32 %v1114_v25, %v360_v62 }
  0x6f   :  { %v199_v15 = vadd.f32 %v1477_v52, %v197_v2  ;;  %v364_v57 = vadd.f32 %v1117_v13, %v362_v24 }
  0x71   :  { %v201_v39 = vadd.f32 %v1478_v26, %v199_v15  ;;  %v366_v63 = vadd.f32 %v1121_v8, %v364_v57 }
  0x73   :  { %v203_v32 = vadd.f32 %v1479_v41, %v201_v39  ;;  %v368_v9 = vadd.f32 %v1124_v11, %v366_v63 }
  0x75   :  { %v205_v31 = vadd.f32 %v1480_v58, %v203_v32  ;;  %v370_v12 = vadd.f32 %v1127_v17, %v368_v9  ;;  %v440_v9 = vld [vmem:[%s1355_s2] sm:$0x1] }
  0x77   :  { %v207_v56 = vadd.f32 %v1481_v55, %v205_v31  ;;  %v372_v25 = vadd.f32 %v1130_v19, %v370_v12 }
  0x79   :  { %v209_v49 = vadd.f32 %v1482_v61, %v207_v56  ;;  %v374_v13 = vadd.f32 %v1133_v20, %v372_v25 }
  0x7b   :  { %v211_v4 = vadd.f32 %v1483_v14, %v209_v49  ;;  %v376_v8 = vadd.f32 %v1136_v21, %v374_v13 }
  0x7d   :  { %v213_v38 = vadd.f32 %v1484_v10, %v211_v4  ;;  %v378_v11 = vadd.f32 %v1140_v18, %v376_v8  ;;  %v87_v18 = vld [vmem:[#allocation2] sm:$0x1] }
  0x7f   :  { %v215_v1 = vadd.f32 %v1485_v35, %v213_v38  ;;  %v380_v17 = vadd.f32 %v1143_v36, %v378_v11 }
  0x81   :  { %v216_v51 = vrot.slane %v215_v1, 4  ;;  %v382_v30 = vadd.f32 %v1146_v27, %v380_v17 }
  0x83   :  { %v217_v19 = vadd.f32 %v216_v51, %v215_v1  ;;  %v384_v37 = vadd.f32 %v1149_v28, %v382_v30 }
  0x85   :  { %v218_v45 = vrot.slane %v217_v19, 2  ;;  %v386_v20 = vadd.f32 %v1152_v29, %v384_v37 }
  0x87   :  { %v219_v59 = vadd.f32 %v218_v45, %v217_v19  ;;  %v388_v21 = vadd.f32 %v1155_v33, %v386_v20 }
  0x89   :  { %v220_v50 = vrot.slane %v219_v59, 1  ;;  %v390_v44 = vadd.f32 %v1159_v40, %v388_v21 }
  0x8b   :  { %v221_v43 = vadd.f32 %v220_v50, %v219_v59  ;;  %v392_v0 = vadd.f32 %v1162_v42, %v390_v44 }
  0x8d   :  { %v222_v36 = vadd.f32 %v221_v43, %v87_v18  ;;  %v394_v53 = vadd.f32 %v1165_v46, %v392_v0 }
  0x8f   :  { %224 = vst.msk [vmem:[#allocation2] sm:$0x1] %vm20_vm0, %v222_v36  ;;  %v396_v27 = vadd.f32 %v1168_v47, %v394_v53 }
  0x91   :  { %v398_v28 = vadd.f32 %v1171_v6, %v396_v27 }
  0x93   :  { %v400_v29 = vadd.f32 %v1174_v48, %v398_v28 }
  0x95   :  { %v402_v33 = vadd.f32 %v1183_v54, %v400_v29  ;;  %v225_v54 = vld [vmem:[#allocation3] sm:$0x1] }
  0x96   :  { %v428_v26 = vld [vmem:[#allocation2] sm:$0x1] }
  0x97   :  { %v404_v62 = vadd.f32 %v1186_v3, %v402_v33 }
  0x99   :  { %v406_v40 = vadd.f32 %v1189_v60, %v404_v62  ;;  %v429_v60 = vmul.f32 0.001953125, %v428_v26 }
  0x9b   :  { %v408_v7 = vadd.f32 %v1192_v16, %v406_v40  ;;  %v432_v16 = vmul.f32 %v429_v60, %v429_v60 }
  0x9d   :  { %v410_v42 = vadd.f32 %v1195_v22, %v408_v7 }
  0x9f   :  { %v412_v46 = vadd.f32 %v1198_v23, %v410_v42 }
  0xa1   :  { %v414_v2 = vadd.f32 %v1207_v5, %v412_v46 }
  0xa3   :  { %v416_v47 = vadd.f32 %v1210_v34, %v414_v2  ;;  %v437_v34 = vld [vmem:[%s1354_s1] sm:$0x1] }
  0xa5   :  { %v417_v24 = vrot.slane %v416_v47, 4 }
  0xa7   :  { %v418_v6 = vadd.f32 %v417_v24, %v416_v47 }
  0xa9   :  { %v419_v52 = vrot.slane %v418_v6, 2 }
  0xab   :  { %v420_v48 = vadd.f32 %v419_v52, %v418_v6 }
  0xad   :  { %v421_v15 = vrot.slane %v420_v48, 1 }
  0xaf   :  { %v422_v57 = vadd.f32 %v421_v15, %v420_v48 }
  0xb1   :  { %v423_v3 = vadd.f32 %v422_v57, %v225_v54 }
  0xb3   :  { %424 = vst.msk [vmem:[#allocation3] sm:$0x1] %vm20_vm0, %v423_v3 }
  0xba   :  { %v430_v22 = vld [vmem:[#allocation3] sm:$0x1] }
  0xbb   :  { %v431_v39 = vmul.f32 0.001953125, %v430_v22 }
  0xbd   :  { %v433_v23 = vsub.f32 %v431_v39, %v432_v16 }
  0xbf   :  { %v434_v63 = vmax.f32 %v433_v23, 0.0 }
  0xc1   :  { %v435_v5 = vadd.f32 1e-05, %v434_v63 }
  0xc3   :  { %453 = vrsqrt.f32 %v435_v5 }
  0xcd   :  { %v454_v41 = vpop.eup %453 }
  0xce   :  { %v438_v32 = vmul.f32 %v454_v41, %v437_v34 }
  0xd0   :  { %439 = vst.msk [vmem:[%s1356_s3] sm:$0x1] %vm20_vm0, %v438_v32  ;;  %v441_v58 = vmul.f32 %v438_v32, %v429_v60 }
  0xd2   :  { %v442_v31 = vsub.f32 %v440_v9, %v441_v58 }
  0xd4   :  { %443 = vst.msk [vmem:[%s1357_s4] sm:$0x1] %vm20_vm0, %v442_v31 }

// kernel: generator_forward.21
= control target key start
LH: loop header
LB: loop body
LE: loop exit
PB: predicated region body
PF: predicated region fallthrough
CT: control target
= control target key end

     0   :  { %v1600_v1 = vmov 0   ;;  %vm520_vm0 = vcmask 261120   ;;  %s2172_s1 = inlined_call_operand.vmem [shape: bf16[32,256], index: 1, kind: input, shape index: {}]   ;;  %s2173_s0 = inlined_call_operand.vmem [shape: bf16[512,32], index: 0, kind: input, shape index: {}]   ;;  %s2174_s2 = inlined_call_operand.vmem [shape: f32[512,256], index: 2, kind: output, shape index: {}]  }
   0x1   :  { %v1562_v0 = vld [vmem:[%s2172_s1 + $0x4] ss:$8 sps:$4 sm:$0xff]   ;;  %649 = vmatprep.mubr.bf16.mxu0 %v1600_v1  ;;  %809 = vmatprep.mubr.bf16.mxu1 %v1600_v1  ;;  %v1564_v2 = vld [vmem:[%s2172_s1] ss:$8 sps:$4 sm:$0xff]   ;;  %v1565_v3 = vld [vmem:[%s2172_s1 + $0x14] ss:$8 sps:$4 sm:$0xff]  }
   0x2   :  { %617 = vmatprep.subr.bf16.mxu0 %v1562_v0  ;;  %1557 = vmatprep.subr.bf16.mxu1 %v1562_v0  ;;  %v1567_v4 = vld [vmem:[%s2172_s1 + $0x10] ss:$8 sps:$4 sm:$0xff]   ;;  %v1568_v5 = vld [vmem:[%s2173_s0] sm:$0xff]   ;;  %v1570_v7 = vld [vmem:[%s2173_s0 + $0x8] sm:$0xff]  }
   0x3   :  { %618 = vmatpush1.bf16.msra.mxu0 %v1564_v2  ;;  %1559 = vmatpush1.bf16.msra.mxu1 %v1564_v2  ;;  %v1569_v6 = vld [vmem:[%s2173_s0 + $0x80] sm:$0xff]   ;;  %v1571_v8 = vld [vmem:[%s2173_s0 + $0x88] sm:$0xff]   ;;  %v1572_v9 = vld [vmem:[%s2173_s0 + $0x10] sm:$0xff]  }
   0x4   :  { %619 = vmatprep.subr.bf16.mxu0 %v1565_v3  ;;  %1558 = vmatprep.subr.bf16.mxu1 %v1565_v3  ;;  %v1573_v10 = vld [vmem:[%s2173_s0 + $0x90] sm:$0xff]   ;;  %v1574_v11 = vld [vmem:[%s2173_s0 + $0x18] sm:$0xff]   ;;  %v1576_v13 = vld [vmem:[%s2173_s0 + $0x20] sm:$0xff]  }
   0x5   :  { %v1575_v12 = vld [vmem:[%s2173_s0 + $0x98] sm:$0xff]   ;;  %v1577_v14 = vld [vmem:[%s2173_s0 + $0xa0] sm:$0xff]   ;;  %v1578_v15 = vld [vmem:[%s2173_s0 + $0x28] sm:$0xff]  }
   0x6   :  { %v1579_v16 = vld [vmem:[%s2173_s0 + $0xa8] sm:$0xff]   ;;  %v1580_v17 = vld [vmem:[%s2173_s0 + $0x30] sm:$0xff]   ;;  %v1582_v19 = vld [vmem:[%s2173_s0 + $0x38] sm:$0xff]  }
   0x7   :  { %620 = vmatpush1.bf16.msra.mxu0 %v1567_v4  ;;  %1560 = vmatpush1.bf16.msra.mxu1 %v1567_v4  ;;  %v1581_v18 = vld [vmem:[%s2173_s0 + $0xb0] sm:$0xff]   ;;  %v1583_v20 = vld [vmem:[%s2173_s0 + $0xb8] sm:$0xff]   ;;  %v1584_v21 = vld [vmem:[%s2173_s0 + $0x40] sm:$0xff]  }
   0x8   :  { %v1585_v22 = vld [vmem:[%s2173_s0 + $0xc0] sm:$0xff]   ;;  %v1586_v23 = vld [vmem:[%s2173_s0 + $0x48] sm:$0xff]   ;;  %v1588_v25 = vld [vmem:[%s2173_s0 + $0x50] sm:$0xff]  }
   0x9   :  { %v1587_v24 = vld [vmem:[%s2173_s0 + $0xc8] sm:$0xff]   ;;  %v1589_v26 = vld [vmem:[%s2173_s0 + $0xd0] sm:$0xff]   ;;  %v1590_v27 = vld [vmem:[%s2173_s0 + $0x58] sm:$0xff]  }
   0xa   :  { %1525 = vmatmul.mubr.msk.bf16.vlgmr.msra.gmra.mrb[0].mxu0 %vm520_vm0, %v1568_v5  ;;  %1541 = vmatmul.mubr.msk.bf16.vlgmr.msra.gmra.mrb[0].mxu1 %vm520_vm0, %v1569_v6  ;;  %v1591_v28 = vld [vmem:[%s2173_s0 + $0xd8] sm:$0xff]   ;;  %v1592_v29 = vld [vmem:[%s2173_s0 + $0x60] sm:$0xff]   ;;  %v1594_v31 = vld [vmem:[%s2173_s0 + $0x68] sm:$0xff]  }
   0xb   :  { %659 = vmatprep.mubr.bf16.mxu0 %v1600_v1  ;;  %819 = vmatprep.mubr.bf16.mxu1 %v1600_v1  ;;  %v1593_v30 = vld [vmem:[%s2173_s0 + $0xe0] sm:$0xff]   ;;  %v1595_v32 = vld [vmem:[%s2173_s0 + $0xe8] sm:$0xff]   ;;  %v1596_v33 = vld [vmem:[%s2173_s0 + $0x70] sm:$0xff]  }
   0xc   :  { %v1597_v34 = vld [vmem:[%s2173_s0 + $0xf0] sm:$0xff]   ;;  %v1598_v35 = vld [vmem:[%s2173_s0 + $0x78] sm:$0xff]  }
   0xd   :  { %v1599_v36 = vld [vmem:[%s2173_s0 + $0xf8] sm:$0xff]  }
  0x12   :  { %1526 = vmatmul.mubr.msk.bf16.gmra.mrb[4].mxu0 %vm520_vm0, %v1570_v7  ;;  %1542 = vmatmul.mubr.msk.bf16.gmra.mrb[4].mxu1 %vm520_vm0, %v1571_v8 }
  0x13   :  { %669 = vmatprep.mubr.bf16.mxu0 %v1600_v1  ;;  %829 = vmatprep.mubr.bf16.mxu1 %v1600_v1 }
  0x1a   :  { %1527 = vmatmul.mubr.msk.bf16.gmra.mrb[8].mxu0 %vm520_vm0, %v1572_v9  ;;  %1543 = vmatmul.mubr.msk.bf16.gmra.mrb[8].mxu1 %vm520_vm0, %v1573_v10 }
  0x1b   :  { %679 = vmatprep.mubr.bf16.mxu0 %v1600_v1  ;;  %839 = vmatprep.mubr.bf16.mxu1 %v1600_v1 }
  0x22   :  { %1528 = vmatmul.mubr.msk.bf16.gmra.mrb[12].mxu0 %vm520_vm0, %v1574_v11  ;;  %1544 = vmatmul.mubr.msk.bf16.gmra.mrb[12].mxu1 %vm520_vm0, %v1575_v12 }
  0x23   :  { %689 = vmatprep.mubr.bf16.mxu0 %v1600_v1  ;;  %849 = vmatprep.mubr.bf16.mxu1 %v1600_v1 }
  0x2a   :  { %1529 = vmatmul.mubr.msk.bf16.gmra.mrb[16].mxu0 %vm520_vm0, %v1576_v13  ;;  %1545 = vmatmul.mubr.msk.bf16.gmra.mrb[16].mxu1 %vm520_vm0, %v1577_v14 }
  0x2b   :  { %699 = vmatprep.mubr.bf16.mxu0 %v1600_v1  ;;  %859 = vmatprep.mubr.bf16.mxu1 %v1600_v1 }
  0x32   :  { %1530 = vmatmul.mubr.msk.bf16.gmra.mrb[20].mxu0 %vm520_vm0, %v1578_v15  ;;  %1546 = vmatmul.mubr.msk.bf16.gmra.mrb[20].mxu1 %vm520_vm0, %v1579_v16 }
  0x33   :  { %709 = vmatprep.mubr.bf16.mxu0 %v1600_v1  ;;  %869 = vmatprep.mubr.bf16.mxu1 %v1600_v1 }
  0x3a   :  { %1531 = vmatmul.mubr.msk.bf16.gmra.mrb[24].mxu0 %vm520_vm0, %v1580_v17  ;;  %1547 = vmatmul.mubr.msk.bf16.gmra.mrb[24].mxu1 %vm520_vm0, %v1581_v18 }
  0x3b   :  { %719 = vmatprep.mubr.bf16.mxu0 %v1600_v1  ;;  %879 = vmatprep.mubr.bf16.mxu1 %v1600_v1 }
  0x42   :  { %1532 = vmatmul.mubr.msk.bf16.gmra.mrb[28].mxu0 %vm520_vm0, %v1582_v19  ;;  %1548 = vmatmul.mubr.msk.bf16.gmra.mrb[28].mxu1 %vm520_vm0, %v1583_v20 }
  0x43   :  { %729 = vmatprep.mubr.bf16.mxu0 %v1600_v1  ;;  %889 = vmatprep.mubr.bf16.mxu1 %v1600_v1 }
  0x4a   :  { %1533 = vmatmul.mubr.msk.bf16.gmra.mrb[32].mxu0 %vm520_vm0, %v1584_v21  ;;  %1549 = vmatmul.mubr.msk.bf16.gmra.mrb[32].mxu1 %vm520_vm0, %v1585_v22 }
  0x4b   :  { %739 = vmatprep.mubr.bf16.mxu0 %v1600_v1  ;;  %899 = vmatprep.mubr.bf16.mxu1 %v1600_v1 }
  0x52   :  { %1534 = vmatmul.mubr.msk.bf16.gmra.mrb[36].mxu0 %vm520_vm0, %v1586_v23  ;;  %1550 = vmatmul.mubr.msk.bf16.gmra.mrb[36].mxu1 %vm520_vm0, %v1587_v24 }
  0x53   :  { %749 = vmatprep.mubr.bf16.mxu0 %v1600_v1  ;;  %909 = vmatprep.mubr.bf16.mxu1 %v1600_v1 }
  0x5a   :  { %1535 = vmatmul.mubr.msk.bf16.gmra.mrb[40].mxu0 %vm520_vm0, %v1588_v25  ;;  %1551 = vmatmul.mubr.msk.bf16.gmra.mrb[40].mxu1 %vm520_vm0, %v1589_v26 }
  0x5b   :  { %759 = vmatprep.mubr.bf16.mxu0 %v1600_v1  ;;  %919 = vmatprep.mubr.bf16.mxu1 %v1600_v1 }
  0x62   :  { %1536 = vmatmul.mubr.msk.bf16.gmra.mrb[44].mxu0 %vm520_vm0, %v1590_v27  ;;  %1552 = vmatmul.mubr.msk.bf16.gmra.mrb[44].mxu1 %vm520_vm0, %v1591_v28 }
  0x63   :  { %769 = vmatprep.mubr.bf16.mxu0 %v1600_v1  ;;  %929 = vmatprep.mubr.bf16.mxu1 %v1600_v1 }
  0x6a   :  { %1537 = vmatmul.mubr.msk.bf16.gmra.mrb[48].mxu0 %vm520_vm0, %v1592_v29  ;;  %1553 = vmatmul.mubr.msk.bf16.gmra.mrb[48].mxu1 %vm520_vm0, %v1593_v30 }
  0x6b   :  { %779 = vmatprep.mubr.bf16.mxu0 %v1600_v1  ;;  %939 = vmatprep.mubr.bf16.mxu1 %v1600_v1 }
  0x72   :  { %1538 = vmatmul.mubr.msk.bf16.gmra.mrb[52].mxu0 %vm520_vm0, %v1594_v31  ;;  %1554 = vmatmul.mubr.msk.bf16.gmra.mrb[52].mxu1 %vm520_vm0, %v1595_v32 }
  0x73   :  { %789 = vmatprep.mubr.bf16.mxu0 %v1600_v1  ;;  %949 = vmatprep.mubr.bf16.mxu1 %v1600_v1 }
  0x7a   :  { %1539 = vmatmul.mubr.msk.bf16.gmra.mrb[56].mxu0 %vm520_vm0, %v1596_v33  ;;  %1555 = vmatmul.mubr.msk.bf16.gmra.mrb[56].mxu1 %vm520_vm0, %v1597_v34 }
  0x7b   :  { %799 = vmatprep.mubr.bf16.mxu0 %v1600_v1  ;;  %959 = vmatprep.mubr.bf16.mxu1 %v1600_v1 }
  0x82   :  { %1540 = vmatmul.mubr.msk.bf16.gmra.mrb[60].mxu0 %vm520_vm0, %v1598_v35  ;;  %1556 = vmatmul.mubr.msk.bf16.gmra.mrb[60].mxu1 %vm520_vm0, %v1599_v36 }
  0xdd   :  { %v651_v37 = vpop.f32.mrb[0].mxu0  ;;  %v811_v38 = vpop.f32.mrb[0].mxu1 }
  0xde   :  { %1357 = vst [vmem:[%s2174_s2] sm:$0xff] %v651_v37  ;;  %1421 = vst [vmem:[%s2174_s2 + $0x200] sm:$0xff] %v811_v38  ;;  %v653_v39 = vpop.f32.mrb[1].mxu0  ;;  %v813_v40 = vpop.f32.mrb[1].mxu1 }
  0xdf   :  { %1358 = vst [vmem:[%s2174_s2 + $0x8] sm:$0xff] %v653_v39  ;;  %1422 = vst [vmem:[%s2174_s2 + $0x208] sm:$0xff] %v813_v40  ;;  %v655_v41 = vpop.f32.mrb[2].mxu0  ;;  %v815_v42 = vpop.f32.mrb[2].mxu1 }
  0xe0   :  { %1359 = vst [vmem:[%s2174_s2 + $0x10] sm:$0xff] %v655_v41  ;;  %1423 = vst [vmem:[%s2174_s2 + $0x210] sm:$0xff] %v815_v42  ;;  %v657_v43 = vpop.f32.mrb[3].mxu0  ;;  %v817_v44 = vpop.f32.mrb[3].mxu1 }
  0xe1   :  { %1360 = vst [vmem:[%s2174_s2 + $0x18] sm:$0xff] %v657_v43  ;;  %1424 = vst [vmem:[%s2174_s2 + $0x218] sm:$0xff] %v817_v44 }
  0xe5   :  { %v661_v45 = vpop.f32.mrb[4].mxu0  ;;  %v821_v46 = vpop.f32.mrb[4].mxu1 }
  0xe6   :  { %1361 = vst [vmem:[%s2174_s2 + $0x20] sm:$0xff] %v661_v45  ;;  %1425 = vst [vmem:[%s2174_s2 + $0x220] sm:$0xff] %v821_v46  ;;  %v663_v47 = vpop.f32.mrb[5].mxu0  ;;  %v823_v48 = vpop.f32.mrb[5].mxu1 }
  0xe7   :  { %1362 = vst [vmem:[%s2174_s2 + $0x28] sm:$0xff] %v663_v47  ;;  %1426 = vst [vmem:[%s2174_s2 + $0x228] sm:$0xff] %v823_v48  ;;  %v665_v49 = vpop.f32.mrb[6].mxu0  ;;  %v825_v50 = vpop.f32.mrb[6].mxu1 }
  0xe8   :  { %1363 = vst [vmem:[%s2174_s2 + $0x30] sm:$0xff] %v665_v49  ;;  %1427 = vst [vmem:[%s2174_s2 + $0x230] sm:$0xff] %v825_v50  ;;  %v667_v51 = vpop.f32.mrb[7].mxu0  ;;  %v827_v52 = vpop.f32.mrb[7].mxu1 }
  0xe9   :  { %1364 = vst [vmem:[%s2174_s2 + $0x38] sm:$0xff] %v667_v51  ;;  %1428 = vst [vmem:[%s2174_s2 + $0x238] sm:$0xff] %v827_v52 }
  0xed   :  { %v671_v53 = vpop.f32.mrb[8].mxu0  ;;  %v831_v54 = vpop.f32.mrb[8].mxu1 }
  0xee   :  { %1365 = vst [vmem:[%s2174_s2 + $0x40] sm:$0xff] %v671_v53  ;;  %1429 = vst [vmem:[%s2174_s2 + $0x240] sm:$0xff] %v831_v54  ;;  %v673_v55 = vpop.f32.mrb[9].mxu0  ;;  %v833_v56 = vpop.f32.mrb[9].mxu1 }
  0xef   :  { %1366 = vst [vmem:[%s2174_s2 + $0x48] sm:$0xff] %v673_v55  ;;  %1430 = vst [vmem:[%s2174_s2 + $0x248] sm:$0xff] %v833_v56  ;;  %v675_v57 = vpop.f32.mrb[10].mxu0  ;;  %v835_v58 = vpop.f32.mrb[10].mxu1 }
  0xf0   :  { %1367 = vst [vmem:[%s2174_s2 + $0x50] sm:$0xff] %v675_v57  ;;  %1431 = vst [vmem:[%s2174_s2 + $0x250] sm:$0xff] %v835_v58  ;;  %v677_v59 = vpop.f32.mrb[11].mxu0  ;;  %v837_v60 = vpop.f32.mrb[11].mxu1 }
  0xf1   :  { %1368 = vst [vmem:[%s2174_s2 + $0x58] sm:$0xff] %v677_v59  ;;  %1432 = vst [vmem:[%s2174_s2 + $0x258] sm:$0xff] %v837_v60 }
  0xf5   :  { %v681_v61 = vpop.f32.mrb[12].mxu0  ;;  %v841_v62 = vpop.f32.mrb[12].mxu1 }
  0xf6   :  { %1369 = vst [vmem:[%s2174_s2 + $0x60] sm:$0xff] %v681_v61  ;;  %1433 = vst [vmem:[%s2174_s2 + $0x260] sm:$0xff] %v841_v62  ;;  %v683_v63 = vpop.f32.mrb[13].mxu0  ;;  %v843_v0 = vpop.f32.mrb[13].mxu1 }
  0xf7   :  { %1370 = vst [vmem:[%s2174_s2 + $0x68] sm:$0xff] %v683_v63  ;;  %1434 = vst [vmem:[%s2174_s2 + $0x268] sm:$0xff] %v843_v0  ;;  %v685_v1 = vpop.f32.mrb[14].mxu0  ;;  %v845_v2 = vpop.f32.mrb[14].mxu1 }
  0xf8   :  { %1371 = vst [vmem:[%s2174_s2 + $0x70] sm:$0xff] %v685_v1  ;;  %1435 = vst [vmem:[%s2174_s2 + $0x270] sm:$0xff] %v845_v2  ;;  %v687_v3 = vpop.f32.mrb[15].mxu0  ;;  %v847_v4 = vpop.f32.mrb[15].mxu1 }
  0xf9   :  { %1372 = vst [vmem:[%s2174_s2 + $0x78] sm:$0xff] %v687_v3  ;;  %1436 = vst [vmem:[%s2174_s2 + $0x278] sm:$0xff] %v847_v4 }
  0xfd   :  { %v691_v5 = vpop.f32.mrb[16].mxu0  ;;  %v851_v6 = vpop.f32.mrb[16].mxu1 }
  0xfe   :  { %1373 = vst [vmem:[%s2174_s2 + $0x80] sm:$0xff] %v691_v5  ;;  %1437 = vst [vmem:[%s2174_s2 + $0x280] sm:$0xff] %v851_v6  ;;  %v693_v7 = vpop.f32.mrb[17].mxu0  ;;  %v853_v8 = vpop.f32.mrb[17].mxu1 }
  0xff   :  { %1374 = vst [vmem:[%s2174_s2 + $0x88] sm:$0xff] %v693_v7  ;;  %1438 = vst [vmem:[%s2174_s2 + $0x288] sm:$0xff] %v853_v8  ;;  %v695_v9 = vpop.f32.mrb[18].mxu0  ;;  %v855_v10 = vpop.f32.mrb[18].mxu1 }
 0x100   :  { %1375 = vst [vmem:[%s2174_s2 + $0x90] sm:$0xff] %v695_v9  ;;  %1439 = vst [vmem:[%s2174_s2 + $0x290] sm:$0xff] %v855_v10  ;;  %v697_v11 = vpop.f32.mrb[19].mxu0  ;;  %v857_v12 = vpop.f32.mrb[19].mxu1 }
 0x101   :  { %1376 = vst [vmem:[%s2174_s2 + $0x98] sm:$0xff] %v697_v11  ;;  %1440 = vst [vmem:[%s2174_s2 + $0x298] sm:$0xff] %v857_v12 }
 0x105   :  { %v701_v13 = vpop.f32.mrb[20].mxu0  ;;  %v861_v14 = vpop.f32.mrb[20].mxu1 }
 0x106   :  { %1377 = vst [vmem:[%s2174_s2 + $0xa0] sm:$0xff] %v701_v13  ;;  %1441 = vst [vmem:[%s2174_s2 + $0x2a0] sm:$0xff] %v861_v14  ;;  %v703_v15 = vpop.f32.mrb[21].mxu0  ;;  %v863_v16 = vpop.f32.mrb[21].mxu1 }
 0x107   :  { %1378 = vst [vmem:[%s2174_s2 + $0xa8] sm:$0xff] %v703_v15  ;;  %1442 = vst [vmem:[%s2174_s2 + $0x2a8] sm:$0xff] %v863_v16  ;;  %v705_v17 = vpop.f32.mrb[22].mxu0  ;;  %v865_v18 = vpop.f32.mrb[22].mxu1 }
 0x108   :  { %1379 = vst [vmem:[%s2174_s2 + $0xb0] sm:$0xff] %v705_v17  ;;  %1443 = vst [vmem:[%s2174_s2 + $0x2b0] sm:$0xff] %v865_v18  ;;  %v707_v19 = vpop.f32.mrb[23].mxu0  ;;  %v867_v20 = vpop.f32.mrb[23].mxu1 }
 0x109   :  { %1380 = vst [vmem:[%s2174_s2 + $0xb8] sm:$0xff] %v707_v19  ;;  %1444 = vst [vmem:[%s2174_s2 + $0x2b8] sm:$0xff] %v867_v20 }
 0x10d   :  { %v711_v21 = vpop.f32.mrb[24].mxu0  ;;  %v871_v22 = vpop.f32.mrb[24].mxu1 }
 0x10e   :  { %1381 = vst [vmem:[%s2174_s2 + $0xc0] sm:$0xff] %v711_v21  ;;  %1445 = vst [vmem:[%s2174_s2 + $0x2c0] sm:$0xff] %v871_v22  ;;  %v713_v23 = vpop.f32.mrb[25].mxu0  ;;  %v873_v24 = vpop.f32.mrb[25].mxu1 }
 0x10f   :  { %1382 = vst [vmem:[%s2174_s2 + $0xc8] sm:$0xff] %v713_v23  ;;  %1446 = vst [vmem:[%s2174_s2 + $0x2c8] sm:$0xff] %v873_v24  ;;  %v715_v25 = vpop.f32.mrb[26].mxu0  ;;  %v875_v26 = vpop.f32.mrb[26].mxu1 }
 0x110   :  { %1383 = vst [vmem:[%s2174_s2 + $0xd0] sm:$0xff] %v715_v25  ;;  %1447 = vst [vmem:[%s2174_s2 + $0x2d0] sm:$0xff] %v875_v26  ;;  %v717_v27 = vpop.f32.mrb[27].mxu0  ;;  %v877_v28 = vpop.f32.mrb[27].mxu1 }
 0x111   :  { %1384 = vst [vmem:[%s2174_s2 + $0xd8] sm:$0xff] %v717_v27  ;;  %1448 = vst [vmem:[%s2174_s2 + $0x2d8] sm:$0xff] %v877_v28 }
 0x115   :  { %v721_v29 = vpop.f32.mrb[28].mxu0  ;;  %v881_v30 = vpop.f32.mrb[28].mxu1 }
 0x116   :  { %1385 = vst [vmem:[%s2174_s2 + $0xe0] sm:$0xff] %v721_v29  ;;  %1449 = vst [vmem:[%s2174_s2 + $0x2e0] sm:$0xff] %v881_v30  ;;  %v723_v31 = vpop.f32.mrb[29].mxu0  ;;  %v883_v32 = vpop.f32.mrb[29].mxu1 }
 0x117   :  { %1386 = vst [vmem:[%s2174_s2 + $0xe8] sm:$0xff] %v723_v31  ;;  %1450 = vst [vmem:[%s2174_s2 + $0x2e8] sm:$0xff] %v883_v32  ;;  %v725_v33 = vpop.f32.mrb[30].mxu0  ;;  %v885_v34 = vpop.f32.mrb[30].mxu1 }
 0x118   :  { %1387 = vst [vmem:[%s2174_s2 + $0xf0] sm:$0xff] %v725_v33  ;;  %1451 = vst [vmem:[%s2174_s2 + $0x2f0] sm:$0xff] %v885_v34  ;;  %v727_v35 = vpop.f32.mrb[31].mxu0  ;;  %v887_v36 = vpop.f32.mrb[31].mxu1 }
 0x119   :  { %1388 = vst [vmem:[%s2174_s2 + $0xf8] sm:$0xff] %v727_v35  ;;  %1452 = vst [vmem:[%s2174_s2 + $0x2f8] sm:$0xff] %v887_v36 }
 0x11d   :  { %v731_v37 = vpop.f32.mrb[32].mxu0  ;;  %v891_v38 = vpop.f32.mrb[32].mxu1 }
 0x11e   :  { %1389 = vst [vmem:[%s2174_s2 + $0x100] sm:$0xff] %v731_v37  ;;  %1453 = vst [vmem:[%s2174_s2 + $0x300] sm:$0xff] %v891_v38  ;;  %v733_v39 = vpop.f32.mrb[33].mxu0  ;;  %v893_v40 = vpop.f32.mrb[33].mxu1 }
 0x11f   :  { %1390 = vst [vmem:[%s2174_s2 + $0x108] sm:$0xff] %v733_v39  ;;  %1454 = vst [vmem:[%s2174_s2 + $0x308] sm:$0xff] %v893_v40  ;;  %v735_v41 = vpop.f32.mrb[34].mxu0  ;;  %v895_v42 = vpop.f32.mrb[34].mxu1 }
 0x120   :  { %1391 = vst [vmem:[%s2174_s2 + $0x110] sm:$0xff] %v735_v41  ;;  %1455 = vst [vmem:[%s2174_s2 + $0x310] sm:$0xff] %v895_v42  ;;  %v737_v43 = vpop.f32.mrb[35].mxu0  ;;  %v897_v44 = vpop.f32.mrb[35].mxu1 }
 0x121   :  { %1392 = vst [vmem:[%s2174_s2 + $0x118] sm:$0xff] %v737_v43  ;;  %1456 = vst [vmem:[%s2174_s2 + $0x318] sm:$0xff] %v897_v44 }
 0x125   :  { %v741_v45 = vpop.f32.mrb[36].mxu0  ;;  %v901_v46 = vpop.f32.mrb[36].mxu1 }
 0x126   :  { %1393 = vst [vmem:[%s2174_s2 + $0x120] sm:$0xff] %v741_v45  ;;  %1457 = vst [vmem:[%s2174_s2 + $0x320] sm:$0xff] %v901_v46  ;;  %v743_v47 = vpop.f32.mrb[37].mxu0  ;;  %v903_v48 = vpop.f32.mrb[37].mxu1 }
 0x127   :  { %1394 = vst [vmem:[%s2174_s2 + $0x128] sm:$0xff] %v743_v47  ;;  %1458 = vst [vmem:[%s2174_s2 + $0x328] sm:$0xff] %v903_v48  ;;  %v745_v49 = vpop.f32.mrb[38].mxu0  ;;  %v905_v50 = vpop.f32.mrb[38].mxu1 }
 0x128   :  { %1395 = vst [vmem:[%s2174_s2 + $0x130] sm:$0xff] %v745_v49  ;;  %1459 = vst [vmem:[%s2174_s2 + $0x330] sm:$0xff] %v905_v50  ;;  %v747_v51 = vpop.f32.mrb[39].mxu0  ;;  %v907_v52 = vpop.f32.mrb[39].mxu1 }
 0x129   :  { %1396 = vst [vmem:[%s2174_s2 + $0x138] sm:$0xff] %v747_v51  ;;  %1460 = vst [vmem:[%s2174_s2 + $0x338] sm:$0xff] %v907_v52 }
 0x12d   :  { %v751_v53 = vpop.f32.mrb[40].mxu0  ;;  %v911_v54 = vpop.f32.mrb[40].mxu1 }
 0x12e   :  { %1397 = vst [vmem:[%s2174_s2 + $0x140] sm:$0xff] %v751_v53  ;;  %1461 = vst [vmem:[%s2174_s2 + $0x340] sm:$0xff] %v911_v54  ;;  %v753_v55 = vpop.f32.mrb[41].mxu0  ;;  %v913_v56 = vpop.f32.mrb[41].mxu1 }
 0x12f   :  { %1398 = vst [vmem:[%s2174_s2 + $0x148] sm:$0xff] %v753_v55  ;;  %1462 = vst [vmem:[%s2174_s2 + $0x348] sm:$0xff] %v913_v56  ;;  %v755_v57 = vpop.f32.mrb[42].mxu0  ;;  %v915_v58 = vpop.f32.mrb[42].mxu1 }
 0x130   :  { %1399 = vst [vmem:[%s2174_s2 + $0x150] sm:$0xff] %v755_v57  ;;  %1463 = vst [vmem:[%s2174_s2 + $0x350] sm:$0xff] %v915_v58  ;;  %v757_v59 = vpop.f32.mrb[43].mxu0  ;;  %v917_v60 = vpop.f32.mrb[43].mxu1 }
 0x131   :  { %1400 = vst [vmem:[%s2174_s2 + $0x158] sm:$0xff] %v757_v59  ;;  %1464 = vst [vmem:[%s2174_s2 + $0x358] sm:$0xff] %v917_v60 }
 0x135   :  { %v761_v61 = vpop.f32.mrb[44].mxu0  ;;  %v921_v62 = vpop.f32.mrb[44].mxu1 }
 0x136   :  { %1401 = vst [vmem:[%s2174_s2 + $0x160] sm:$0xff] %v761_v61  ;;  %1465 = vst [vmem:[%s2174_s2 + $0x360] sm:$0xff] %v921_v62  ;;  %v763_v63 = vpop.f32.mrb[45].mxu0  ;;  %v923_v0 = vpop.f32.mrb[45].mxu1 }
 0x137   :  { %1402 = vst [vmem:[%s2174_s2 + $0x168] sm:$0xff] %v763_v63  ;;  %1466 = vst [vmem:[%s2174_s2 + $0x368] sm:$0xff] %v923_v0  ;;  %v765_v1 = vpop.f32.mrb[46].mxu0  ;;  %v925_v2 = vpop.f32.mrb[46].mxu1 }
 0x138   :  { %1403 = vst [vmem:[%s2174_s2 + $0x170] sm:$0xff] %v765_v1  ;;  %1467 = vst [vmem:[%s2174_s2 + $0x370] sm:$0xff] %v925_v2  ;;  %v767_v3 = vpop.f32.mrb[47].mxu0  ;;  %v927_v4 = vpop.f32.mrb[47].mxu1 }
 0x139   :  { %1404 = vst [vmem:[%s2174_s2 + $0x178] sm:$0xff] %v767_v3  ;;  %1468 = vst [vmem:[%s2174_s2 + $0x378] sm:$0xff] %v927_v4 }
 0x13d   :  { %v771_v5 = vpop.f32.mrb[48].mxu0  ;;  %v931_v6 = vpop.f32.mrb[48].mxu1 }
 0x13e   :  { %1405 = vst [vmem:[%s2174_s2 + $0x180] sm:$0xff] %v771_v5  ;;  %1469 = vst [vmem:[%s2174_s2 + $0x380] sm:$0xff] %v931_v6  ;;  %v773_v7 = vpop.f32.mrb[49].mxu0  ;;  %v933_v8 = vpop.f32.mrb[49].mxu1 }
 0x13f   :  { %1406 = vst [vmem:[%s2174_s2 + $0x188] sm:$0xff] %v773_v7  ;;  %1470 = vst [vmem:[%s2174_s2 + $0x388] sm:$0xff] %v933_v8  ;;  %v775_v9 = vpop.f32.mrb[50].mxu0  ;;  %v935_v10 = vpop.f32.mrb[50].mxu1 }
 0x140   :  { %1407 = vst [vmem:[%s2174_s2 + $0x190] sm:$0xff] %v775_v9  ;;  %1471 = vst [vmem:[%s2174_s2 + $0x390] sm:$0xff] %v935_v10  ;;  %v777_v11 = vpop.f32.mrb[51].mxu0  ;;  %v937_v12 = vpop.f32.mrb[51].mxu1 }
 0x141   :  { %1408 = vst [vmem:[%s2174_s2 + $0x198] sm:$0xff] %v777_v11  ;;  %1472 = vst [vmem:[%s2174_s2 + $0x398] sm:$0xff] %v937_v12 }
 0x145   :  { %v781_v13 = vpop.f32.mrb[52].mxu0  ;;  %v941_v14 = vpop.f32.mrb[52].mxu1 }
 0x146   :  { %1409 = vst [vmem:[%s2174_s2 + $0x1a0] sm:$0xff] %v781_v13  ;;  %1473 = vst [vmem:[%s2174_s2 + $0x3a0] sm:$0xff] %v941_v14  ;;  %v783_v15 = vpop.f32.mrb[53].mxu0  ;;  %v943_v16 = vpop.f32.mrb[53].mxu1 }
 0x147   :  { %1410 = vst [vmem:[%s2174_s2 + $0x1a8] sm:$0xff] %v783_v15  ;;  %1474 = vst [vmem:[%s2174_s2 + $0x3a8] sm:$0xff] %v943_v16  ;;  %v785_v17 = vpop.f32.mrb[54].mxu0  ;;  %v945_v18 = vpop.f32.mrb[54].mxu1 }
 0x148   :  { %1411 = vst [vmem:[%s2174_s2 + $0x1b0] sm:$0xff] %v785_v17  ;;  %1475 = vst [vmem:[%s2174_s2 + $0x3b0] sm:$0xff] %v945_v18  ;;  %v787_v19 = vpop.f32.mrb[55].mxu0  ;;  %v947_v20 = vpop.f32.mrb[55].mxu1 }
 0x149   :  { %1412 = vst [vmem:[%s2174_s2 + $0x1b8] sm:$0xff] %v787_v19  ;;  %1476 = vst [vmem:[%s2174_s2 + $0x3b8] sm:$0xff] %v947_v20 }
 0x14d   :  { %v791_v21 = vpop.f32.mrb[56].mxu0  ;;  %v951_v22 = vpop.f32.mrb[56].mxu1 }
 0x14e   :  { %1413 = vst [vmem:[%s2174_s2 + $0x1c0] sm:$0xff] %v791_v21  ;;  %1477 = vst [vmem:[%s2174_s2 + $0x3c0] sm:$0xff] %v951_v22  ;;  %v793_v23 = vpop.f32.mrb[57].mxu0  ;;  %v953_v24 = vpop.f32.mrb[57].mxu1 }
 0x14f   :  { %1414 = vst [vmem:[%s2174_s2 + $0x1c8] sm:$0xff] %v793_v23  ;;  %1478 = vst [vmem:[%s2174_s2 + $0x3c8] sm:$0xff] %v953_v24  ;;  %v795_v25 = vpop.f32.mrb[58].mxu0  ;;  %v955_v26 = vpop.f32.mrb[58].mxu1 }
 0x150   :  { %1415 = vst [vmem:[%s2174_s2 + $0x1d0] sm:$0xff] %v795_v25  ;;  %1479 = vst [vmem:[%s2174_s2 + $0x3d0] sm:$0xff] %v955_v26  ;;  %v797_v27 = vpop.f32.mrb[59].mxu0  ;;  %v957_v28 = vpop.f32.mrb[59].mxu1 }
 0x151   :  { %1416 = vst [vmem:[%s2174_s2 + $0x1d8] sm:$0xff] %v797_v27  ;;  %1480 = vst [vmem:[%s2174_s2 + $0x3d8] sm:$0xff] %v957_v28 }
 0x155   :  { %v801_v29 = vpop.f32.mrb[60].mxu0  ;;  %v961_v30 = vpop.f32.mrb[60].mxu1 }
 0x156   :  { %1417 = vst [vmem:[%s2174_s2 + $0x1e0] sm:$0xff] %v801_v29  ;;  %1481 = vst [vmem:[%s2174_s2 + $0x3e0] sm:$0xff] %v961_v30  ;;  %v803_v31 = vpop.f32.mrb[61].mxu0  ;;  %v963_v32 = vpop.f32.mrb[61].mxu1 }
 0x157   :  { %1418 = vst [vmem:[%s2174_s2 + $0x1e8] sm:$0xff] %v803_v31  ;;  %1482 = vst [vmem:[%s2174_s2 + $0x3e8] sm:$0xff] %v963_v32  ;;  %v805_v33 = vpop.f32.mrb[62].mxu0  ;;  %v965_v34 = vpop.f32.mrb[62].mxu1 }
 0x158   :  { %1419 = vst [vmem:[%s2174_s2 + $0x1f0] sm:$0xff] %v805_v33  ;;  %1483 = vst [vmem:[%s2174_s2 + $0x3f0] sm:$0xff] %v965_v34  ;;  %v807_v35 = vpop.f32.mrb[63].mxu0  ;;  %v967_v36 = vpop.f32.mrb[63].mxu1 }
 0x159   :  { %1420 = vst [vmem:[%s2174_s2 + $0x1f8] sm:$0xff] %v807_v35  ;;  %1484 = vst [vmem:[%s2174_s2 + $0x3f8] sm:$0xff] %v967_v36 }

// kernel: generator_forward.22
= control target key start
LH: loop header
LB: loop body
LE: loop exit
PB: predicated region body
PF: predicated region fallthrough
CT: control target
= control target key end

     0   :  { %s701_s15 = smov 0   ;;  %s1220_s0 = inlined_call_operand.vmem [shape: f32[2048,16], index: 0, kind: input, shape index: {}]   ;;  %s1221_s1 = inlined_call_operand.vmem [shape: f32[1,16], index: 1, kind: input, shape index: {}]   ;;  %s1222_s2 = inlined_call_operand.vmem [shape: f32[1,16], index: 2, kind: input, shape index: {}]   ;;  %s1223_s3 = inlined_call_operand.vmem [shape: f32[1,16], index: 3, kind: output, shape index: {0}]   ;;  %s1224_s4 = inlined_call_operand.vmem [shape: f32[1,16], index: 4, kind: output, shape index: {1}]  }
   0x1 LB: > { %s707_s16 = sadd.s32 4294967295, %s673_s15   ;;  %p649_p0 = scmp.ge.s32.totalorder %s673_s15, 1  ;;  %s673_s15 = sphi %s701_s15, %s15_s15  }
   0x2   : > { %p156_p1 = scmp.lt.s32.totalorder %s673_s15, 5 }
   0x4   : > { %p157_p2 = pnand %p649_p0, %p156_p1 }
   0x5   : > { %s650_s17 = sshll.u32 (!%p157_p2), %s707_s16, 6  ;;  %p652_p4 = scmp.ne.s32.totalorder (!%p157_p2), %s707_s16, 0 }
   0x6   : > { %160 = sbr.rel (%p157_p2) target bundleno = 217 (0xd9), region = 32  ;;  %p178_p3 = scmp.lt.s32.totalorder (!%p157_p2), %s650_s17, 255 }
   0xd   : > { %s1226_s17 = smov (!%p178_p3, %s650_s17), 255  ;;  %186 = sbr.rel (%p652_p4) target bundleno = 20 (0x14), region = 36 }
   0xe   : > { %s651_s18 = sshll.u32 %s1226_s17, 3  ;;  %vm187_vm0 = vcmask (!%p652_p4), 122880   ;;  %v675_v0 = vmov (!%p652_p4), 0.0  }
   0xf   : > { %s715_s21 = scalar_lea.vmem %s1220_s0, %s651_s18  ;;  %188 = vst.msk [vmem:[#allocation2] sm:$0x1] (!%p652_p4), %vm187_vm0, %v675_v0  ;;  %189 = vst.msk [vmem:[#allocation3] sm:$0x1] (!%p652_p4), %vm187_vm0, %v675_v0 }
  0x14 PF: > { %v190_v1 = vld [vmem:[%s715_s21] sm:$0xff]  ;;  %v191_v2 = vld [vmem:[%s715_s21 + $0x8] sm:$0xff]  ;;  %v192_v3 = vld [vmem:[%s715_s21 + $0x10] sm:$0xff]  ;;  %vm255_vm1 = vcmask 130048   ;;  %vm390_vm2 = vcmask 122880   ;;  %p653_p5 = scmp.ne.s32.totalorder %s707_s16, 3 }
  0x15   : > { %v256_v4 = vsel %vm255_vm1, %v190_v1, 0.0  ;;  %v257_v5 = vsel %vm255_vm1, %v191_v2, 0.0  ;;  %v259_v6 = vsel %vm255_vm1, %v192_v3, 0.0  ;;  %v193_v7 = vld [vmem:[%s715_s21 + $0x18] sm:$0xff]  ;;  %v194_v10 = vld [vmem:[%s715_s21 + $0x20] sm:$0xff]  ;;  %v195_v13 = vld [vmem:[%s715_s21 + $0x28] sm:$0xff]  ;;  %v393_v55 = vmul.f32 %v190_v1, %v190_v1 }
  0x16   : > { %v258_v8 = vadd.f32 %v257_v5, %v256_v4  ;;  %v261_v9 = vsel %vm255_vm1, %v193_v7, 0.0  ;;  %v263_v12 = vsel %vm255_vm1, %v194_v10, 0.0  ;;  %v265_v15 = vsel %vm255_vm1, %v195_v13, 0.0  ;;  %v731_v16 = vld [vmem:[%s715_s21 + $0x30] sm:$0xff]  ;;  %v736_v19 = vld [vmem:[%s715_s21 + $0x38] sm:$0xff]  ;;  %v741_v22 = vld [vmem:[%s715_s21 + $0x40] sm:$0xff] }
  0x17   : > { %v267_v18 = vsel %vm255_vm1, %v731_v16, 0.0  ;;  %v269_v21 = vsel %vm255_vm1, %v736_v19, 0.0  ;;  %v271_v24 = vsel %vm255_vm1, %v741_v22, 0.0  ;;  %v746_v25 = vld [vmem:[%s715_s21 + $0x48] sm:$0xff]  ;;  %v751_v28 = vld [vmem:[%s715_s21 + $0x50] sm:$0xff]  ;;  %v756_v31 = vld [vmem:[%s715_s21 + $0x58] sm:$0xff]  ;;  %v394_v58 = vmul.f32 %v191_v2, %v191_v2 }
  0x18   : > { %v260_v11 = vadd.f32 %v259_v6, %v258_v8  ;;  %v273_v27 = vsel %vm255_vm1, %v746_v25, 0.0  ;;  %v275_v30 = vsel %vm255_vm1, %v751_v28, 0.0  ;;  %v277_v33 = vsel %vm255_vm1, %v756_v31, 0.0  ;;  %v761_v34 = vld [vmem:[%s715_s21 + $0x60] sm:$0xff]  ;;  %v766_v37 = vld [vmem:[%s715_s21 + $0x68] sm:$0xff]  ;;  %v771_v40 = vld [vmem:[%s715_s21 + $0x70] sm:$0xff] }
  0x19   : > { %v279_v36 = vsel %vm255_vm1, %v761_v34, 0.0  ;;  %v281_v39 = vsel %vm255_vm1, %v766_v37, 0.0  ;;  %v283_v42 = vsel %vm255_vm1, %v771_v40, 0.0  ;;  %v776_v43 = vld [vmem:[%s715_s21 + $0x78] sm:$0xff]  ;;  %v781_v46 = vld [vmem:[%s715_s21 + $0x80] sm:$0xff]  ;;  %v786_v49 = vld [vmem:[%s715_s21 + $0x88] sm:$0xff]  ;;  %v395_v59 = vmul.f32 %v192_v3, %v192_v3 }
  0x1a   : > { %v262_v14 = vadd.f32 %v261_v9, %v260_v11  ;;  %v285_v45 = vsel %vm255_vm1, %v776_v43, 0.0  ;;  %v287_v48 = vsel %vm255_vm1, %v781_v46, 0.0  ;;  %v289_v51 = vsel %vm255_vm1, %v786_v49, 0.0  ;;  %v791_v52 = vld [vmem:[%s715_s21 + $0x90] sm:$0xff]  ;;  %v796_v56 = vld [vmem:[%s715_s21 + $0x98] sm:$0xff]  ;;  %v801_v61 = vld [vmem:[%s715_s21 + $0xa0] sm:$0xff] }
  0x1b   : > { %v291_v54 = vsel %vm255_vm1, %v791_v52, 0.0  ;;  %v293_v60 = vsel %vm255_vm1, %v796_v56, 0.0  ;;  %v396_v63 = vmul.f32 %v193_v7, %v193_v7  ;;  %v295_v0 = vsel %vm255_vm1, %v801_v61, 0.0  ;;  %v807_v1 = vld [vmem:[%s715_s21 + $0xa8] sm:$0xff]  ;;  %v814_v7 = vld [vmem:[%s715_s21 + $0xb0] sm:$0xff] }
  0x1c   : > { %v264_v17 = vadd.f32 %v263_v12, %v262_v14  ;;  %v457_v4 = vsel %vm255_vm1, %v393_v55, 0.0  ;;  %v397_v6 = vmul.f32 %v194_v10, %v194_v10  ;;  %v458_v2 = vsel %vm255_vm1, %v394_v58, 0.0 }
  0x1d   : > { %v460_v3 = vsel %vm255_vm1, %v395_v59, 0.0  ;;  %v297_v8 = vsel %vm255_vm1, %v807_v1, 0.0  ;;  %v459_v9 = vadd.f32 %v458_v2, %v457_v4  ;;  %v398_v12 = vmul.f32 %v195_v13, %v195_v13 }
  0x1e   : > { %v266_v20 = vadd.f32 %v265_v15, %v264_v17  ;;  %v462_v14 = vsel %vm255_vm1, %v396_v63, 0.0  ;;  %v299_v15 = vsel %vm255_vm1, %v814_v7, 0.0  ;;  %v820_v17 = vld [vmem:[%s715_s21 + $0xb8] sm:$0xff]  ;;  %v405_v63 = vmul.f32 %v761_v34, %v761_v34 }
  0x1f   : > { %v461_v10 = vadd.f32 %v460_v3, %v459_v9  ;;  %v406_v2 = vmul.f32 %v766_v37, %v766_v37  ;;  %v884_v9 = vld [vmem:[%s715_s21 + $0xf8] sm:$0xff] }
  0x20   : > { %v268_v23 = vadd.f32 %v267_v18, %v266_v20  ;;  %v399_v20 = vmul.f32 %v731_v16, %v731_v16 }
  0x21   : > { %v463_v13 = vadd.f32 %v462_v14, %v461_v10  ;;  %v480_v14 = vsel %vm255_vm1, %v405_v63, 0.0  ;;  %v892_v10 = vld [vmem:[%s715_s21 + $0x100] sm:$0xff]  ;;  %v414_v63 = vmul.f32 %v807_v1, %v807_v1 }
  0x22   : > { %v270_v26 = vadd.f32 %v269_v21, %v268_v23  ;;  %v464_v21 = vsel %vm255_vm1, %v397_v6, 0.0  ;;  %v301_v23 = vsel %vm255_vm1, %v820_v17, 0.0 }
  0x23   : > { %v465_v16 = vadd.f32 %v464_v21, %v463_v13  ;;  %v482_v21 = vsel %vm255_vm1, %v406_v2, 0.0  ;;  %v900_v13 = vld [vmem:[%s715_s21 + $0x108] sm:$0xff]  ;;  %v415_v2 = vmul.f32 %v814_v7, %v814_v7 }
  0x24   : > { %v272_v29 = vadd.f32 %v271_v24, %v270_v26  ;;  %v828_v24 = vld [vmem:[%s715_s21 + $0xc0] sm:$0xff] }
  0x26   : > { %v274_v32 = vadd.f32 %v273_v27, %v272_v29  ;;  %v400_v27 = vmul.f32 %v736_v19, %v736_v19  ;;  %v466_v29 = vsel %vm255_vm1, %v398_v12, 0.0  ;;  %v407_v12 = vmul.f32 %v771_v40, %v771_v40 }
  0x27   : > { %v467_v19 = vadd.f32 %v466_v29, %v465_v16  ;;  %v908_v16 = vld [vmem:[%s715_s21 + $0x110] sm:$0xff] }
  0x28   : > { %v276_v35 = vadd.f32 %v275_v30, %v274_v32  ;;  %v303_v30 = vsel %vm255_vm1, %v828_v24, 0.0  ;;  %v836_v32 = vld [vmem:[%s715_s21 + $0xc8] sm:$0xff]  ;;  %v484_v29 = vsel %vm255_vm1, %v407_v12, 0.0  ;;  %v416_v12 = vmul.f32 %v820_v17, %v820_v17 }
  0x2a   : > { %v278_v38 = vadd.f32 %v277_v33, %v276_v35  ;;  %v401_v35 = vmul.f32 %v741_v22, %v741_v22 }
  0x2c   : > { %v280_v41 = vadd.f32 %v279_v36, %v278_v38  ;;  %v468_v36 = vsel %vm255_vm1, %v399_v20, 0.0  ;;  %v305_v38 = vsel %vm255_vm1, %v836_v32, 0.0  ;;  %v408_v20 = vmul.f32 %v776_v43, %v776_v43 }
  0x2d   : > { %v469_v22 = vadd.f32 %v468_v36, %v467_v19  ;;  %v916_v19 = vld [vmem:[%s715_s21 + $0x118] sm:$0xff] }
  0x2e   : > { %v282_v44 = vadd.f32 %v281_v39, %v280_v41  ;;  %v844_v39 = vld [vmem:[%s715_s21 + $0xd0] sm:$0xff]  ;;  %v486_v36 = vsel %vm255_vm1, %v408_v20, 0.0  ;;  %v417_v20 = vmul.f32 %v828_v24, %v828_v24 }
  0x30   : > { %v284_v47 = vadd.f32 %v283_v42, %v282_v44  ;;  %v402_v42 = vmul.f32 %v746_v25, %v746_v25  ;;  %v470_v44 = vsel %vm255_vm1, %v400_v27, 0.0  ;;  %v409_v27 = vmul.f32 %v781_v46, %v781_v46 }
  0x31   : > { %v471_v25 = vadd.f32 %v470_v44, %v469_v22  ;;  %v924_v22 = vld [vmem:[%s715_s21 + $0x120] sm:$0xff] }
  0x32   : > { %v286_v50 = vadd.f32 %v285_v45, %v284_v47  ;;  %v307_v45 = vsel %vm255_vm1, %v844_v39, 0.0  ;;  %v852_v47 = vld [vmem:[%s715_s21 + $0xd8] sm:$0xff]  ;;  %v474_v58 = vsel %vm255_vm1, %v402_v42, 0.0  ;;  %v411_v42 = vmul.f32 %v791_v52, %v791_v52 }
  0x33   : > { %v488_v44 = vsel %vm255_vm1, %v409_v27, 0.0  ;;  %v418_v27 = vmul.f32 %v836_v32, %v836_v32 }
  0x34   : > { %v288_v53 = vadd.f32 %v287_v48, %v286_v50  ;;  %v403_v50 = vmul.f32 %v751_v28, %v751_v28 }
  0x36   : > { %v290_v57 = vadd.f32 %v289_v51, %v288_v53  ;;  %v472_v51 = vsel %vm255_vm1, %v401_v35, 0.0  ;;  %v309_v53 = vsel %vm255_vm1, %v852_v47, 0.0  ;;  %v410_v35 = vmul.f32 %v786_v49, %v786_v49 }
  0x37   : > { %v473_v28 = vadd.f32 %v472_v51, %v471_v25  ;;  %v932_v25 = vld [vmem:[%s715_s21 + $0x128] sm:$0xff] }
  0x38   : > { %v292_v62 = vadd.f32 %v291_v54, %v290_v57  ;;  %v860_v54 = vld [vmem:[%s715_s21 + $0xe0] sm:$0xff]  ;;  %v404_v57 = vmul.f32 %v756_v31, %v756_v31  ;;  %v490_v51 = vsel %vm255_vm1, %v410_v35, 0.0  ;;  %v419_v35 = vmul.f32 %v844_v39, %v844_v39 }
  0x39   : > { %v311_v59 = vsel %vm255_vm1, %v860_v54, 0.0  ;;  %v475_v31 = vadd.f32 %v474_v58, %v473_v28  ;;  %v492_v58 = vsel %vm255_vm1, %v411_v42, 0.0  ;;  %v940_v28 = vld [vmem:[%s715_s21 + $0x130] sm:$0xff]  ;;  %v420_v42 = vmul.f32 %v852_v47, %v852_v47 }
  0x3a   : > { %v294_v5 = vadd.f32 %v293_v60, %v292_v62  ;;  %v868_v60 = vld [vmem:[%s715_s21 + $0xe8] sm:$0xff]  ;;  %v478_v3 = vsel %vm255_vm1, %v404_v57, 0.0  ;;  %v413_v57 = vmul.f32 %v801_v61, %v801_v61 }
  0x3b   : > { %v313_v4 = vsel %vm255_vm1, %v868_v60, 0.0 }
  0x3c   : > { %v296_v11 = vadd.f32 %v295_v0, %v294_v5  ;;  %v476_v0 = vsel %vm255_vm1, %v403_v50, 0.0  ;;  %v876_v5 = vld [vmem:[%s715_s21 + $0xf0] sm:$0xff]  ;;  %v412_v50 = vmul.f32 %v796_v56, %v796_v56 }
  0x3d   : > { %v477_v34 = vadd.f32 %v476_v0, %v475_v31  ;;  %v948_v31 = vld [vmem:[%s715_s21 + $0x138] sm:$0xff] }
  0x3e   : > { %v298_v18 = vadd.f32 %v297_v8, %v296_v11  ;;  %v315_v8 = vsel %vm255_vm1, %v876_v5, 0.0  ;;  %v494_v0 = vsel %vm255_vm1, %v412_v50, 0.0  ;;  %v421_v50 = vmul.f32 %v860_v54, %v860_v54 }
  0x3f   : > { %v479_v37 = vadd.f32 %v478_v3, %v477_v34  ;;  %v496_v3 = vsel %vm255_vm1, %v413_v57, 0.0  ;;  %v956_v34 = vld [vmem:[%s715_s21 + $0x140] sm:$0xff]  ;;  %v422_v57 = vmul.f32 %v868_v60, %v868_v60 }
  0x40   : > { %v300_v26 = vadd.f32 %v299_v15, %v298_v18  ;;  %v317_v15 = vsel %vm255_vm1, %v884_v9, 0.0 }
  0x41   : > { %v481_v40 = vadd.f32 %v480_v14, %v479_v37  ;;  %v498_v14 = vsel %vm255_vm1, %v414_v63, 0.0  ;;  %v964_v37 = vld [vmem:[%s715_s21 + $0x148] sm:$0xff]  ;;  %v423_v63 = vmul.f32 %v876_v5, %v876_v5 }
  0x42   : > { %v302_v33 = vadd.f32 %v301_v23, %v300_v26  ;;  %v319_v23 = vsel %vm255_vm1, %v892_v10, 0.0 }
  0x43   : > { %v483_v43 = vadd.f32 %v482_v21, %v481_v40  ;;  %v500_v21 = vsel %vm255_vm1, %v415_v2, 0.0  ;;  %v972_v40 = vld [vmem:[%s715_s21 + $0x150] sm:$0xff]  ;;  %v424_v2 = vmul.f32 %v884_v9, %v884_v9 }
  0x44   : > { %v304_v41 = vadd.f32 %v303_v30, %v302_v33  ;;  %v321_v30 = vsel %vm255_vm1, %v900_v13, 0.0 }
  0x45   : > { %v485_v46 = vadd.f32 %v484_v29, %v483_v43  ;;  %v502_v29 = vsel %vm255_vm1, %v416_v12, 0.0  ;;  %v980_v43 = vld [vmem:[%s715_s21 + $0x158] sm:$0xff]  ;;  %v425_v12 = vmul.f32 %v892_v10, %v892_v10 }
  0x46   : > { %v306_v48 = vadd.f32 %v305_v38, %v304_v41  ;;  %v323_v38 = vsel %vm255_vm1, %v908_v16, 0.0 }
  0x47   : > { %v487_v49 = vadd.f32 %v486_v36, %v485_v46  ;;  %v504_v36 = vsel %vm255_vm1, %v417_v20, 0.0  ;;  %v988_v46 = vld [vmem:[%s715_s21 + $0x160] sm:$0xff]  ;;  %v426_v20 = vmul.f32 %v900_v13, %v900_v13 }
  0x48   : > { %v308_v55 = vadd.f32 %v307_v45, %v306_v48  ;;  %v325_v45 = vsel %vm255_vm1, %v916_v19, 0.0 }
  0x49   : > { %v489_v52 = vadd.f32 %v488_v44, %v487_v49  ;;  %v506_v44 = vsel %vm255_vm1, %v418_v27, 0.0  ;;  %v996_v49 = vld [vmem:[%s715_s21 + $0x168] sm:$0xff]  ;;  %v427_v27 = vmul.f32 %v908_v16, %v908_v16 }
  0x4a   : > { %v310_v62 = vadd.f32 %v309_v53, %v308_v55  ;;  %v327_v53 = vsel %vm255_vm1, %v924_v22, 0.0 }
  0x4b   : > { %v491_v56 = vadd.f32 %v490_v51, %v489_v52  ;;  %v508_v51 = vsel %vm255_vm1, %v419_v35, 0.0  ;;  %v1004_v52 = vld [vmem:[%s715_s21 + $0x170] sm:$0xff]  ;;  %v428_v35 = vmul.f32 %v916_v19, %v916_v19 }
  0x4c   : > { %v312_v6 = vadd.f32 %v311_v59, %v310_v62  ;;  %v329_v59 = vsel %vm255_vm1, %v932_v25, 0.0 }
  0x4d   : > { %v493_v61 = vadd.f32 %v492_v58, %v491_v56  ;;  %v510_v58 = vsel %vm255_vm1, %v420_v42, 0.0  ;;  %v1012_v56 = vld [vmem:[%s715_s21 + $0x178] sm:$0xff]  ;;  %v429_v42 = vmul.f32 %v924_v22, %v924_v22 }
  0x4e   : > { %v314_v11 = vadd.f32 %v313_v4, %v312_v6  ;;  %v331_v4 = vsel %vm255_vm1, %v940_v28, 0.0 }
  0x4f   : > { %v495_v1 = vadd.f32 %v494_v0, %v493_v61  ;;  %v512_v0 = vsel %vm255_vm1, %v421_v50, 0.0  ;;  %v1020_v61 = vld [vmem:[%s715_s21 + $0x180] sm:$0xff]  ;;  %v430_v50 = vmul.f32 %v932_v25, %v932_v25 }
  0x50   : > { %v316_v18 = vadd.f32 %v315_v8, %v314_v11  ;;  %v333_v8 = vsel %vm255_vm1, %v948_v31, 0.0 }
  0x51   : > { %v497_v7 = vadd.f32 %v496_v3, %v495_v1  ;;  %v514_v3 = vsel %vm255_vm1, %v422_v57, 0.0  ;;  %v1028_v1 = vld [vmem:[%s715_s21 + $0x188] sm:$0xff]  ;;  %v431_v57 = vmul.f32 %v940_v28, %v940_v28 }
  0x52   : > { %v318_v26 = vadd.f32 %v317_v15, %v316_v18  ;;  %v335_v15 = vsel %vm255_vm1, %v956_v34, 0.0 }
  0x53   : > { %v499_v17 = vadd.f32 %v498_v14, %v497_v7  ;;  %v516_v14 = vsel %vm255_vm1, %v423_v63, 0.0  ;;  %v1036_v7 = vld [vmem:[%s715_s21 + $0x190] sm:$0xff]  ;;  %v432_v63 = vmul.f32 %v948_v31, %v948_v31 }
  0x54   : > { %v320_v33 = vadd.f32 %v319_v23, %v318_v26  ;;  %v337_v23 = vsel %vm255_vm1, %v964_v37, 0.0 }
  0x55   : > { %v501_v24 = vadd.f32 %v500_v21, %v499_v17  ;;  %v518_v21 = vsel %vm255_vm1, %v424_v2, 0.0  ;;  %v1044_v17 = vld [vmem:[%s715_s21 + $0x198] sm:$0xff]  ;;  %v433_v2 = vmul.f32 %v956_v34, %v956_v34 }
  0x56   : > { %v322_v41 = vadd.f32 %v321_v30, %v320_v33  ;;  %v339_v30 = vsel %vm255_vm1, %v972_v40, 0.0 }
  0x57   : > { %v503_v32 = vadd.f32 %v502_v29, %v501_v24  ;;  %v520_v29 = vsel %vm255_vm1, %v425_v12, 0.0  ;;  %v1052_v24 = vld [vmem:[%s715_s21 + $0x1a0] sm:$0xff]  ;;  %v434_v12 = vmul.f32 %v964_v37, %v964_v37 }
  0x58   : > { %v324_v48 = vadd.f32 %v323_v38, %v322_v41  ;;  %v341_v38 = vsel %vm255_vm1, %v980_v43, 0.0 }
  0x59   : > { %v505_v39 = vadd.f32 %v504_v36, %v503_v32  ;;  %v522_v36 = vsel %vm255_vm1, %v426_v20, 0.0  ;;  %v1060_v32 = vld [vmem:[%s715_s21 + $0x1a8] sm:$0xff]  ;;  %v435_v20 = vmul.f32 %v972_v40, %v972_v40 }
  0x5a   : > { %v326_v55 = vadd.f32 %v325_v45, %v324_v48  ;;  %v343_v45 = vsel %vm255_vm1, %v988_v46, 0.0 }
  0x5b   : > { %v507_v47 = vadd.f32 %v506_v44, %v505_v39  ;;  %v524_v44 = vsel %vm255_vm1, %v427_v27, 0.0  ;;  %v1068_v39 = vld [vmem:[%s715_s21 + $0x1b0] sm:$0xff]  ;;  %v436_v27 = vmul.f32 %v980_v43, %v980_v43 }
  0x5c   : > { %v328_v62 = vadd.f32 %v327_v53, %v326_v55  ;;  %v345_v53 = vsel %vm255_vm1, %v996_v49, 0.0  ;;  %v1132_v43 = vld [vmem:[%s715_s21 + $0x1f0] sm:$0xff] }
  0x5d   : > { %v509_v54 = vadd.f32 %v508_v51, %v507_v47  ;;  %v526_v51 = vsel %vm255_vm1, %v428_v35, 0.0  ;;  %v1076_v47 = vld [vmem:[%s715_s21 + $0x1b8] sm:$0xff]  ;;  %v437_v35 = vmul.f32 %v988_v46, %v988_v46 }
  0x5e   : > { %v330_v6 = vadd.f32 %v329_v59, %v328_v62  ;;  %v347_v59 = vsel %vm255_vm1, %v1004_v52, 0.0 }
  0x5f   : > { %v511_v60 = vadd.f32 %v510_v58, %v509_v54  ;;  %v528_v58 = vsel %vm255_vm1, %v429_v42, 0.0  ;;  %v1084_v54 = vld [vmem:[%s715_s21 + $0x1c0] sm:$0xff]  ;;  %v438_v42 = vmul.f32 %v996_v49, %v996_v49  ;;  %v440_v49 = vmul.f32 %v1012_v56, %v1012_v56 }
  0x60   : > { %v332_v11 = vadd.f32 %v331_v4, %v330_v6  ;;  %v349_v4 = vsel %vm255_vm1, %v1012_v56, 0.0  ;;  %v443_v56 = vmul.f32 %v1036_v7, %v1036_v7 }
  0x61   : > { %v513_v5 = vadd.f32 %v512_v0, %v511_v60  ;;  %v530_v0 = vsel %vm255_vm1, %v430_v50, 0.0  ;;  %v1092_v60 = vld [vmem:[%s715_s21 + $0x1c8] sm:$0xff]  ;;  %v439_v50 = vmul.f32 %v1004_v52, %v1004_v52 }
  0x62   : > { %v334_v18 = vadd.f32 %v333_v8, %v332_v11  ;;  %v351_v8 = vsel %vm255_vm1, %v1020_v61, 0.0 }
  0x63   : > { %v515_v9 = vadd.f32 %v514_v3, %v513_v5  ;;  %v532_v3 = vsel %vm255_vm1, %v431_v57, 0.0  ;;  %v1100_v5 = vld [vmem:[%s715_s21 + $0x1d0] sm:$0xff]  ;;  %v546_v57 = vsel %vm255_vm1, %v438_v42, 0.0 }
  0x64   : > { %v336_v26 = vadd.f32 %v335_v15, %v334_v18  ;;  %v353_v15 = vsel %vm255_vm1, %v1028_v1, 0.0 }
  0x65   : > { %v517_v10 = vadd.f32 %v516_v14, %v515_v9  ;;  %v534_v14 = vsel %vm255_vm1, %v432_v63, 0.0  ;;  %v1108_v9 = vld [vmem:[%s715_s21 + $0x1d8] sm:$0xff] }
  0x66   : > { %v338_v33 = vadd.f32 %v337_v23, %v336_v26  ;;  %v355_v23 = vsel %vm255_vm1, %v1036_v7, 0.0  ;;  %v446_v7 = vmul.f32 %v1060_v32, %v1060_v32 }
  0x67   : > { %v519_v13 = vadd.f32 %v518_v21, %v517_v10  ;;  %v536_v21 = vsel %vm255_vm1, %v433_v2, 0.0  ;;  %v1116_v10 = vld [vmem:[%s715_s21 + $0x1e0] sm:$0xff] }
  0x68   : > { %v340_v41 = vadd.f32 %v339_v30, %v338_v33  ;;  %v357_v30 = vsel %vm255_vm1, %v1044_v17, 0.0 }
  0x69   : > { %v521_v16 = vadd.f32 %v520_v29, %v519_v13  ;;  %v538_v29 = vsel %vm255_vm1, %v434_v12, 0.0  ;;  %v1124_v13 = vld [vmem:[%s715_s21 + $0x1e8] sm:$0xff] }
  0x6a   : > { %v342_v48 = vadd.f32 %v341_v38, %v340_v41  ;;  %v359_v38 = vsel %vm255_vm1, %v1052_v24, 0.0 }
  0x6b   : > { %v523_v19 = vadd.f32 %v522_v36, %v521_v16  ;;  %v540_v36 = vsel %vm255_vm1, %v435_v20, 0.0  ;;  %v254_v20 = vld [vmem:[#allocation2] sm:$0x1] }
  0x6c   : > { %v344_v55 = vadd.f32 %v343_v45, %v342_v48  ;;  %v361_v45 = vsel %vm255_vm1, %v1060_v32, 0.0  ;;  %v449_v32 = vmul.f32 %v1084_v54, %v1084_v54 }
  0x6d   : > { %v525_v22 = vadd.f32 %v524_v44, %v523_v19  ;;  %v542_v44 = vsel %vm255_vm1, %v436_v27, 0.0  ;;  %v448_v27 = vmul.f32 %v1076_v47, %v1076_v47 }
  0x6e   : > { %v346_v62 = vadd.f32 %v345_v53, %v344_v55  ;;  %v363_v53 = vsel %vm255_vm1, %v1068_v39, 0.0 }
  0x6f   : > { %v527_v25 = vadd.f32 %v526_v51, %v525_v22  ;;  %v544_v51 = vsel %vm255_vm1, %v437_v35, 0.0  ;;  %v566_v35 = vsel %vm255_vm1, %v448_v27, 0.0 }
  0x70   : > { %v348_v6 = vadd.f32 %v347_v59, %v346_v62  ;;  %v365_v59 = vsel %vm255_vm1, %v1076_v47, 0.0  ;;  %v451_v47 = vmul.f32 %v1100_v5, %v1100_v5 }
  0x71   : > { %v529_v28 = vadd.f32 %v528_v58, %v527_v25  ;;  %v441_v25 = vmul.f32 %v1020_v61, %v1020_v61  ;;  %v444_v61 = vmul.f32 %v1044_v17, %v1044_v17  ;;  %v447_v17 = vmul.f32 %v1068_v39, %v1068_v39 }
  0x72   : > { %v350_v11 = vadd.f32 %v349_v4, %v348_v6  ;;  %v367_v4 = vsel %vm255_vm1, %v1084_v54, 0.0  ;;  %v450_v39 = vmul.f32 %v1092_v60, %v1092_v60 }
  0x73   : > { %v531_v31 = vadd.f32 %v530_v0, %v529_v28  ;;  %v442_v0 = vmul.f32 %v1028_v1, %v1028_v1  ;;  %v552_v2 = vsel %vm255_vm1, %v441_v25, 0.0  ;;  %v445_v1 = vmul.f32 %v1052_v24, %v1052_v24 }
  0x74   : > { %v352_v18 = vadd.f32 %v351_v8, %v350_v11  ;;  %v369_v8 = vsel %vm255_vm1, %v1092_v60, 0.0  ;;  %v570_v54 = vsel %vm255_vm1, %v450_v39, 0.0  ;;  %v572_v60 = vsel %vm255_vm1, %v451_v47, 0.0 }
  0x75   : > { %v533_v34 = vadd.f32 %v532_v3, %v531_v31  ;;  %v554_v31 = vsel %vm255_vm1, %v442_v0, 0.0 }
  0x76   : > { %v354_v26 = vadd.f32 %v353_v15, %v352_v18  ;;  %v371_v15 = vsel %vm255_vm1, %v1100_v5, 0.0 }
  0x77   : > { %v535_v37 = vadd.f32 %v534_v14, %v533_v34  ;;  %v556_v14 = vsel %vm255_vm1, %v443_v56, 0.0 }
  0x78   : > { %v356_v33 = vadd.f32 %v355_v23, %v354_v26  ;;  %v373_v23 = vsel %vm255_vm1, %v1108_v9, 0.0 }
  0x79   : > { %v537_v40 = vadd.f32 %v536_v21, %v535_v37  ;;  %v560_v37 = vsel %vm255_vm1, %v445_v1, 0.0  ;;  %v608_v1 = vld [vmem:[%s1222_s2] sm:$0x1] (!%p653_p5) }
  0x7a   : > { %v358_v41 = vadd.f32 %v357_v30, %v356_v33  ;;  %v375_v30 = vsel %vm255_vm1, %v1116_v10, 0.0 }
  0x7b   : > { %v539_v16 = vadd.f32 %v538_v29, %v537_v40  ;;  %v562_v29 = vsel %vm255_vm1, %v446_v7, 0.0  ;;  %v564_v40 = vsel %vm255_vm1, %v447_v17, 0.0 }
  0x7c   : > { %v360_v48 = vadd.f32 %v359_v38, %v358_v41  ;;  %v377_v38 = vsel %vm255_vm1, %v1124_v13, 0.0 }
  0x7d   : > { %v541_v19 = vadd.f32 %v540_v36, %v539_v16 }
  0x7e   : > { %v362_v55 = vadd.f32 %v361_v45, %v360_v48  ;;  %v379_v45 = vsel %vm255_vm1, %v1132_v43, 0.0  ;;  %v1140_v48 = vld [vmem:[%s715_s21 + $0x1f8] sm:$0xff] }
  0x7f   : > { %v543_v22 = vadd.f32 %v542_v44, %v541_v19  ;;  %v453_v44 = vmul.f32 %v1116_v10, %v1116_v10  ;;  %v454_v19 = vmul.f32 %v1124_v13, %v1124_v13 }
  0x80   : > { %v364_v62 = vadd.f32 %v363_v53, %v362_v55  ;;  %v381_v53 = vsel %vm255_vm1, %v1140_v48, 0.0 }
  0x81   : > { %v545_v58 = vadd.f32 %v544_v51, %v543_v22  ;;  %v578_v10 = vsel %vm255_vm1, %v454_v19, 0.0 }
  0x82   : > { %v366_v6 = vadd.f32 %v365_v59, %v364_v62  ;;  %v548_v62 = vsel %vm255_vm1, %v439_v50, 0.0  ;;  %v455_v50 = vmul.f32 %v1132_v43, %v1132_v43 }
  0x83   : > { %v547_v52 = vadd.f32 %v546_v57, %v545_v58 }
  0x84   : > { %v368_v11 = vadd.f32 %v367_v4, %v366_v6  ;;  %v550_v4 = vsel %vm255_vm1, %v440_v49, 0.0 }
  0x85   : > { %v549_v28 = vadd.f32 %v548_v62, %v547_v52 }
  0x86   : > { %v370_v18 = vadd.f32 %v369_v8, %v368_v11 }
  0x87   : > { %v551_v3 = vadd.f32 %v550_v4, %v549_v28 }
  0x88   : > { %v372_v26 = vadd.f32 %v371_v15, %v370_v18  ;;  %v558_v18 = vsel %vm255_vm1, %v444_v61, 0.0 }
  0x89   : > { %v553_v11 = vadd.f32 %v552_v2, %v551_v3 }
  0x8a   : > { %v374_v33 = vadd.f32 %v373_v23, %v372_v26 }
  0x8b   : > { %v555_v15 = vadd.f32 %v554_v31, %v553_v11  ;;  %v605_v31 = vld [vmem:[%s1221_s1] sm:$0x1] (!%p653_p5) }
  0x8c   : > { %v376_v41 = vadd.f32 %v375_v30, %v374_v33 }
  0x8d   : > { %v557_v21 = vadd.f32 %v556_v14, %v555_v15 }
  0x8e   : > { %v378_v46 = vadd.f32 %v377_v38, %v376_v41  ;;  %v568_v38 = vsel %vm255_vm1, %v449_v32, 0.0  ;;  %v452_v41 = vmul.f32 %v1108_v9, %v1108_v9  ;;  %v576_v9 = vsel %vm255_vm1, %v453_v44, 0.0 }
  0x8f   : > { %v559_v26 = vadd.f32 %v558_v18, %v557_v21 }
  0x90   : > { %v380_v55 = vadd.f32 %v379_v45, %v378_v46  ;;  %v574_v5 = vsel %vm255_vm1, %v452_v41, 0.0 }
  0x91   : > { %v561_v30 = vadd.f32 %v560_v37, %v559_v26 }
  0x92   : > { %v382_v59 = vadd.f32 %v381_v53, %v380_v55  ;;  %v456_v53 = vmul.f32 %v1140_v48, %v1140_v48  ;;  %v580_v55 = vsel %vm255_vm1, %v455_v50, 0.0 }
  0x93   : > { %v563_v33 = vadd.f32 %v562_v29, %v561_v30 }
  0x94   : > { %v383_v63 = vrot.slane %v382_v59, 4  ;;  %v582_v13 = vsel %vm255_vm1, %v456_v53, 0.0 }
  0x95   : > { %v565_v36 = vadd.f32 %v564_v40, %v563_v33 }
  0x96   : > { %v384_v6 = vadd.f32 %v383_v63, %v382_v59  ;;  %v392_v63 = vld [vmem:[#allocation3] sm:$0x1] }
  0x97   : > { %v567_v16 = vadd.f32 %v566_v35, %v565_v36 }
  0x98   : > { %v385_v8 = vrot.slane %v384_v6, 2 }
  0x99   : > { %v569_v42 = vadd.f32 %v568_v38, %v567_v16 }
  0x9a   : > { %v386_v12 = vadd.f32 %v385_v8, %v384_v6 }
  0x9b   : > { %v571_v45 = vadd.f32 %v570_v54, %v569_v42 }
  0x9c   : > { %v387_v34 = vrot.slane %v386_v12, 1 }
  0x9d   : > { %v573_v46 = vadd.f32 %v572_v60, %v571_v45 }
  0x9e   : > { %v388_v23 = vadd.f32 %v387_v34, %v386_v12 }
  0x9f   : > { %v575_v51 = vadd.f32 %v574_v5, %v573_v46 }
  0xa0   : > { %v389_v24 = vadd.f32 %v388_v23, %v254_v20 }
  0xa1   : > { %v577_v22 = vadd.f32 %v576_v9, %v575_v51 }
  0xa2   : > { %391 = vst.msk [vmem:[#allocation2] sm:$0x1] %vm390_vm2, %v389_v24 }
  0xa3   : > { %v579_v49 = vadd.f32 %v578_v10, %v577_v22 }
  0xa5   : > { %v581_v57 = vadd.f32 %v580_v55, %v579_v49 }
  0xa7   : > { %v583_v58 = vadd.f32 %v582_v13, %v581_v57 }
  0xa9   : > { %v584_v59 = vrot.slane %v583_v58, 4  ;;  %v596_v48 = vld [vmem:[#allocation2] sm:$0x1] (!%p653_p5) }
  0xaa   : > { %v597_v6 = vmul.f32 (!%p653_p5), 0.00048828125, %v596_v48 }
  0xab   : > { %v585_v25 = vadd.f32 %v584_v59, %v583_v58 }
  0xac   : > { %v600_v2 = vmul.f32 (!%p653_p5), %v597_v6, %v597_v6 }
  0xad   : > { %v586_v62 = vrot.slane %v585_v25, 2 }
  0xaf   : > { %v587_v43 = vadd.f32 %v586_v62, %v585_v25 }
  0xb1   : > { %v588_v52 = vrot.slane %v587_v43, 1  ;;  %595 = sbr.rel (%p653_p5) target bundleno = 217 (0xd9), region = 40 }
  0xb3   : > { %v589_v0 = vadd.f32 %v588_v52, %v587_v43 }
  0xb5   : > { %v590_v4 = vadd.f32 %v589_v0, %v392_v63 }
  0xb7   : > { %591 = vst.msk [vmem:[#allocation3] sm:$0x1] %vm390_vm2, %v590_v4 }
  0xbe   : > { %v598_v28 = vld [vmem:[#allocation3] sm:$0x1] }
  0xbf   : > { %v599_v56 = vmul.f32 0.00048828125, %v598_v28 }
  0xc1   : > { %v601_v3 = vsub.f32 %v599_v56, %v600_v2 }
  0xc3   : > { %v602_v8 = vmax.f32 %v601_v3, 0.0 }
  0xc5   : > { %v603_v61 = vadd.f32 1e-05, %v602_v8 }
  0xc7   : > { %665 = vrsqrt.f32 %v603_v61 }
  0xd1   : > { %v666_v11 = vpop.eup %665 }
  0xd2   : > { %v606_v12 = vmul.f32 %v666_v11, %v605_v31 }
  0xd4   : > { %607 = vst.msk [vmem:[%s1223_s3] sm:$0x1] %vm390_vm2, %v606_v12  ;;  %v609_v14 = vmul.f32 %v606_v12, %v597_v6 }
  0xd6   : > { %v610_v15 = vsub.f32 %v608_v1, %v609_v14 }
  0xd8   : > { %611 = vst.msk [vmem:[%s1224_s4] sm:$0x1] %vm390_vm2, %v610_v15 }
  0xd9 PF: > { %s15_s15 = sadd.s32 1, %s673_s15  }
  0xda   : > { %p12_p6 = scmp.ge.s32.totalorder %s15_s15, 6  }
  0xdc   :  { %14 = sbr.rel (!%p12_p6) target bundleno = 1 (0x1), region = 74 }

// kernel: generator_forward.23
= control target key start
LH: loop header
LB: loop body
LE: loop exit
PB: predicated region body
PF: predicated region fallthrough
CT: control target
= control target key end

     0   :  { %s614_s12 = smov 0   ;;  %s965_s0 = inlined_call_operand.vmem [shape: f32[2048,16], index: 0, kind: input, shape index: {}]   ;;  %s966_s1 = inlined_call_operand.vmem [shape: f32[1,16], index: 1, kind: input, shape index: {}]   ;;  %s967_s2 = inlined_call_operand.vmem [shape: f32[1,16], index: 2, kind: input, shape index: {}]   ;;  %s968_s3 = inlined_call_operand.vmem [shape: f32[2048,16], index: 3, kind: output, shape index: {}]  }
   0x1 LB: > { %s565_s13 = sadd.s32 4294967295, %s592_s12   ;;  %p569_p0 = scmp.ge.s32.totalorder %s592_s12, 1  ;;  %s592_s12 = sphi %s614_s12, %s13_s12  }
   0x2   : > { %p138_p1 = scmp.lt.s32.totalorder %s592_s12, 5 }
   0x4   : > { %p139_p2 = pnand %p569_p0, %p138_p1 }
   0x5   : > { %s570_s14 = sshll.u32 (!%p139_p2), %s565_s13, 6  ;;  %v625_v0 = vld [vmem:[%s966_s1] ss:$0 sm:$0xff] (!%p139_p2)  ;;  %vm444_vm0 = vcmask (!%p139_p2), 130048  }
   0x6   : > { %142 = sbr.rel (%p139_p2) target bundleno = 70 (0x46), region = 32  ;;  %p163_p3 = scmp.lt.s32.totalorder (!%p139_p2), %s570_s14, 255  ;;  %v635_v1 = vld [vmem:[%s967_s2] ss:$0 sm:$0xff] (!%p139_p2) }
   0xd   : > { %s970_s14 = smov (!%p163_p3, %s570_s14), 255 }
   0xe   : > { %s571_s15 = sshll.u32 %s970_s14, 3 }
   0xf   : > { %s630_s20 = scalar_lea.vmem %s965_s0, %s571_s15  ;;  %s658_s25 = scalar_lea.vmem %s968_s3, %s571_s15 }
  0x10   : > { %v174_v2 = vld [vmem:[%s630_s20] sm:$0xff]  ;;  %v175_v3 = vld [vmem:[%s630_s20 + $0x8] sm:$0xff]  ;;  %v176_v4 = vld [vmem:[%s630_s20 + $0x10] sm:$0xff] }
  0x11   : > { %v245_v5 = vmul.f32 %v625_v0, %v174_v2  ;;  %v246_v6 = vmul.f32 %v625_v0, %v175_v3  ;;  %v247_v7 = vmul.f32 %v625_v0, %v176_v4  ;;  %v177_v8 = vld [vmem:[%s630_s20 + $0x18] sm:$0xff]  ;;  %v178_v9 = vld [vmem:[%s630_s20 + $0x20] sm:$0xff]  ;;  %v179_v10 = vld [vmem:[%s630_s20 + $0x28] sm:$0xff] }
  0x12   : > { %v248_v11 = vmul.f32 %v625_v0, %v177_v8  ;;  %v249_v12 = vmul.f32 %v625_v0, %v178_v9  ;;  %v250_v13 = vmul.f32 %v625_v0, %v179_v10  ;;  %v180_v14 = vld [vmem:[%s630_s20 + $0x30] sm:$0xff]  ;;  %v181_v15 = vld [vmem:[%s630_s20 + $0x38] sm:$0xff]  ;;  %v182_v24 = vld [vmem:[%s630_s20 + $0x40] sm:$0xff] }
  0x13   : > { %v316_v16 = vadd.f32 %v635_v1, %v245_v5  ;;  %v317_v17 = vadd.f32 %v635_v1, %v246_v6  ;;  %v318_v18 = vadd.f32 %v635_v1, %v247_v7  ;;  %v251_v19 = vmul.f32 %v625_v0, %v180_v14  ;;  %v183_v25 = vld [vmem:[%s630_s20 + $0x48] sm:$0xff]  ;;  %v184_v26 = vld [vmem:[%s630_s20 + $0x50] sm:$0xff]  ;;  %v185_v31 = vld [vmem:[%s630_s20 + $0x58] sm:$0xff] }
  0x14   : > { %v319_v20 = vadd.f32 %v635_v1, %v248_v11  ;;  %v320_v21 = vadd.f32 %v635_v1, %v249_v12  ;;  %v321_v22 = vadd.f32 %v635_v1, %v250_v13  ;;  %v252_v23 = vmul.f32 %v625_v0, %v181_v15  ;;  %v186_v32 = vld [vmem:[%s630_s20 + $0x60] sm:$0xff]  ;;  %v187_v33 = vld [vmem:[%s630_s20 + $0x68] sm:$0xff]  ;;  %v188_v38 = vld [vmem:[%s630_s20 + $0x70] sm:$0xff] }
  0x15   : > { %v380_v27 = vmax.f32 %v316_v16, 0.0  ;;  %v381_v28 = vmax.f32 %v317_v17, 0.0  ;;  %v382_v29 = vmax.f32 %v318_v18, 0.0  ;;  %v322_v30 = vadd.f32 %v635_v1, %v251_v19  ;;  %v189_v43 = vld [vmem:[%s630_s20 + $0x78] sm:$0xff]  ;;  %v190_v56 = vld [vmem:[%s630_s20 + $0x80] sm:$0xff]  ;;  %v191_v57 = vld [vmem:[%s630_s20 + $0x88] sm:$0xff] }
  0x16   : > { %v383_v34 = vmax.f32 %v319_v20, 0.0  ;;  %v384_v35 = vmax.f32 %v320_v21, 0.0  ;;  %v385_v36 = vmax.f32 %v321_v22, 0.0  ;;  %v323_v37 = vadd.f32 %v635_v1, %v252_v23  ;;  %v192_v58 = vld [vmem:[%s630_s20 + $0x90] sm:$0xff]  ;;  %v193_v63 = vld [vmem:[%s630_s20 + $0x98] sm:$0xff]  ;;  %v194_v2 = vld [vmem:[%s630_s20 + $0xa0] sm:$0xff] }
  0x17   : > { %445 = vst.msk [vmem:[%s658_s25] sm:$0xff] %vm444_vm0, %v380_v27  ;;  %446 = vst.msk [vmem:[%s658_s25 + $0x8] sm:$0xff] %vm444_vm0, %v381_v28  ;;  %v386_v39 = vmax.f32 %v322_v30, 0.0  ;;  %v253_v40 = vmul.f32 %v625_v0, %v182_v24  ;;  %v254_v41 = vmul.f32 %v625_v0, %v183_v25  ;;  %v255_v42 = vmul.f32 %v625_v0, %v184_v26  ;;  %v195_v3 = vld [vmem:[%s630_s20 + $0xa8] sm:$0xff]  ;;  %v196_v8 = vld [vmem:[%s630_s20 + $0xb0] sm:$0xff] }
  0x18   : > { %447 = vst.msk [vmem:[%s658_s25 + $0x10] sm:$0xff] %vm444_vm0, %v382_v29  ;;  %448 = vst.msk [vmem:[%s658_s25 + $0x18] sm:$0xff] %vm444_vm0, %v383_v34  ;;  %v387_v44 = vmax.f32 %v323_v37, 0.0  ;;  %v256_v45 = vmul.f32 %v625_v0, %v185_v31  ;;  %v257_v46 = vmul.f32 %v625_v0, %v186_v32  ;;  %v258_v47 = vmul.f32 %v625_v0, %v187_v33  ;;  %v197_v13 = vld [vmem:[%s630_s20 + $0xb8] sm:$0xff]  ;;  %v198_v26 = vld [vmem:[%s630_s20 + $0xc0] sm:$0xff] }
  0x19   : > { %449 = vst.msk [vmem:[%s658_s25 + $0x20] sm:$0xff] %vm444_vm0, %v384_v35  ;;  %450 = vst.msk [vmem:[%s658_s25 + $0x28] sm:$0xff] %vm444_vm0, %v385_v36  ;;  %v324_v48 = vadd.f32 %v635_v1, %v253_v40  ;;  %v325_v49 = vadd.f32 %v635_v1, %v254_v41  ;;  %v326_v50 = vadd.f32 %v635_v1, %v255_v42  ;;  %v199_v27 = vld [vmem:[%s630_s20 + $0xc8] sm:$0xff]  ;;  %v200_v28 = vld [vmem:[%s630_s20 + $0xd0] sm:$0xff] }
  0x1a   : > { %451 = vst.msk [vmem:[%s658_s25 + $0x30] sm:$0xff] %vm444_vm0, %v386_v39  ;;  %v259_v51 = vmul.f32 %v625_v0, %v188_v38  ;;  %452 = vst.msk [vmem:[%s658_s25 + $0x38] sm:$0xff] %vm444_vm0, %v387_v44  ;;  %v327_v52 = vadd.f32 %v635_v1, %v256_v45  ;;  %v328_v53 = vadd.f32 %v635_v1, %v257_v46  ;;  %v201_v33 = vld [vmem:[%s630_s20 + $0xd8] sm:$0xff]  ;;  %v202_v34 = vld [vmem:[%s630_s20 + $0xe0] sm:$0xff] }
  0x1b   : > { %v329_v54 = vadd.f32 %v635_v1, %v258_v47  ;;  %v260_v55 = vmul.f32 %v625_v0, %v189_v43  ;;  %v388_v59 = vmax.f32 %v324_v48, 0.0  ;;  %v389_v60 = vmax.f32 %v325_v49, 0.0  ;;  %v203_v35 = vld [vmem:[%s630_s20 + $0xe8] sm:$0xff]  ;;  %v204_v40 = vld [vmem:[%s630_s20 + $0xf0] sm:$0xff]  ;;  %v205_v45 = vld [vmem:[%s630_s20 + $0xf8] sm:$0xff] }
  0x1c   : > { %v390_v61 = vmax.f32 %v326_v50, 0.0  ;;  %v330_v62 = vadd.f32 %v635_v1, %v259_v51  ;;  %v391_v4 = vmax.f32 %v327_v52, 0.0  ;;  %v392_v5 = vmax.f32 %v328_v53, 0.0 }
  0x1d   : > { %v393_v6 = vmax.f32 %v329_v54, 0.0  ;;  %v331_v7 = vadd.f32 %v635_v1, %v260_v55  ;;  %453 = vst.msk [vmem:[%s658_s25 + $0x40] sm:$0xff] %vm444_vm0, %v388_v59  ;;  %454 = vst.msk [vmem:[%s658_s25 + $0x48] sm:$0xff] %vm444_vm0, %v389_v60  ;;  %v261_v10 = vmul.f32 %v625_v0, %v190_v56  ;;  %v262_v11 = vmul.f32 %v625_v0, %v191_v57  ;;  %v207_v59 = vld [vmem:[%s630_s20 + $0x108] sm:$0xff]  ;;  %v208_v60 = vld [vmem:[%s630_s20 + $0x110] sm:$0xff] }
  0x1e   : > { %455 = vst.msk [vmem:[%s658_s25 + $0x50] sm:$0xff] %vm444_vm0, %v390_v61  ;;  %v394_v9 = vmax.f32 %v330_v62, 0.0  ;;  %v263_v12 = vmul.f32 %v625_v0, %v192_v58  ;;  %456 = vst.msk [vmem:[%s658_s25 + $0x58] sm:$0xff] %vm444_vm0, %v391_v4  ;;  %v264_v15 = vmul.f32 %v625_v0, %v193_v63  ;;  %v265_v16 = vmul.f32 %v625_v0, %v194_v2  ;;  %v206_v58 = vld [vmem:[%s630_s20 + $0x100] sm:$0xff] }
  0x1f   : > { %457 = vst.msk [vmem:[%s658_s25 + $0x60] sm:$0xff] %vm444_vm0, %v392_v5  ;;  %458 = vst.msk [vmem:[%s658_s25 + $0x68] sm:$0xff] %vm444_vm0, %v393_v6  ;;  %v395_v14 = vmax.f32 %v331_v7, 0.0  ;;  %v266_v17 = vmul.f32 %v625_v0, %v195_v3  ;;  %v332_v18 = vadd.f32 %v635_v1, %v261_v10  ;;  %v333_v19 = vadd.f32 %v635_v1, %v262_v11  ;;  %v209_v3 = vld [vmem:[%s630_s20 + $0x118] sm:$0xff]  ;;  %v210_v4 = vld [vmem:[%s630_s20 + $0x120] sm:$0xff] }
  0x20   : > { %459 = vst.msk [vmem:[%s658_s25 + $0x70] sm:$0xff] %vm444_vm0, %v394_v9  ;;  %v334_v20 = vadd.f32 %v635_v1, %v263_v12  ;;  %v267_v21 = vmul.f32 %v625_v0, %v196_v8  ;;  %v335_v22 = vadd.f32 %v635_v1, %v264_v15  ;;  %v336_v23 = vadd.f32 %v635_v1, %v265_v16  ;;  %v211_v5 = vld [vmem:[%s630_s20 + $0x128] sm:$0xff]  ;;  %v212_v10 = vld [vmem:[%s630_s20 + $0x130] sm:$0xff]  ;;  %v213_v15 = vld [vmem:[%s630_s20 + $0x138] sm:$0xff] }
  0x21   : > { %460 = vst.msk [vmem:[%s658_s25 + $0x78] sm:$0xff] %vm444_vm0, %v395_v14  ;;  %v337_v24 = vadd.f32 %v635_v1, %v266_v17  ;;  %v268_v25 = vmul.f32 %v625_v0, %v197_v13  ;;  %v396_v29 = vmax.f32 %v332_v18, 0.0  ;;  %v397_v30 = vmax.f32 %v333_v19, 0.0 }
  0x22   : > { %v398_v31 = vmax.f32 %v334_v20, 0.0  ;;  %v338_v32 = vadd.f32 %v635_v1, %v267_v21  ;;  %v399_v36 = vmax.f32 %v335_v22, 0.0  ;;  %v400_v37 = vmax.f32 %v336_v23, 0.0 }
  0x23   : > { %v401_v38 = vmax.f32 %v337_v24, 0.0  ;;  %v339_v39 = vadd.f32 %v635_v1, %v268_v25  ;;  %461 = vst.msk [vmem:[%s658_s25 + $0x80] sm:$0xff] %vm444_vm0, %v396_v29  ;;  %462 = vst.msk [vmem:[%s658_s25 + $0x88] sm:$0xff] %vm444_vm0, %v397_v30  ;;  %v269_v42 = vmul.f32 %v625_v0, %v198_v26  ;;  %v270_v43 = vmul.f32 %v625_v0, %v199_v27  ;;  %v215_v29 = vld [vmem:[%s630_s20 + $0x148] sm:$0xff]  ;;  %v216_v30 = vld [vmem:[%s630_s20 + $0x150] sm:$0xff] }
  0x24   : > { %463 = vst.msk [vmem:[%s658_s25 + $0x90] sm:$0xff] %vm444_vm0, %v398_v31  ;;  %v402_v41 = vmax.f32 %v338_v32, 0.0  ;;  %v271_v44 = vmul.f32 %v625_v0, %v200_v28  ;;  %464 = vst.msk [vmem:[%s658_s25 + $0x98] sm:$0xff] %vm444_vm0, %v399_v36  ;;  %v272_v47 = vmul.f32 %v625_v0, %v201_v33  ;;  %v273_v48 = vmul.f32 %v625_v0, %v202_v34  ;;  %v214_v28 = vld [vmem:[%s630_s20 + $0x140] sm:$0xff] }
  0x25   : > { %465 = vst.msk [vmem:[%s658_s25 + $0xa0] sm:$0xff] %vm444_vm0, %v400_v37  ;;  %466 = vst.msk [vmem:[%s658_s25 + $0xa8] sm:$0xff] %vm444_vm0, %v401_v38  ;;  %v403_v46 = vmax.f32 %v339_v39, 0.0  ;;  %v274_v49 = vmul.f32 %v625_v0, %v203_v35  ;;  %v340_v50 = vadd.f32 %v635_v1, %v269_v42  ;;  %v341_v51 = vadd.f32 %v635_v1, %v270_v43  ;;  %v217_v35 = vld [vmem:[%s630_s20 + $0x158] sm:$0xff]  ;;  %v218_v36 = vld [vmem:[%s630_s20 + $0x160] sm:$0xff] }
  0x26   : > { %467 = vst.msk [vmem:[%s658_s25 + $0xb0] sm:$0xff] %vm444_vm0, %v402_v41  ;;  %v342_v52 = vadd.f32 %v635_v1, %v271_v44  ;;  %v275_v53 = vmul.f32 %v625_v0, %v204_v40  ;;  %v343_v54 = vadd.f32 %v635_v1, %v272_v47  ;;  %v344_v55 = vadd.f32 %v635_v1, %v273_v48  ;;  %v219_v37 = vld [vmem:[%s630_s20 + $0x168] sm:$0xff]  ;;  %v220_v42 = vld [vmem:[%s630_s20 + $0x170] sm:$0xff]  ;;  %v221_v47 = vld [vmem:[%s630_s20 + $0x178] sm:$0xff] }
  0x27   : > { %468 = vst.msk [vmem:[%s658_s25 + $0xb8] sm:$0xff] %vm444_vm0, %v403_v46  ;;  %v345_v56 = vadd.f32 %v635_v1, %v274_v49  ;;  %v276_v57 = vmul.f32 %v625_v0, %v205_v45  ;;  %v404_v61 = vmax.f32 %v340_v50, 0.0  ;;  %v405_v62 = vmax.f32 %v341_v51, 0.0 }
  0x28   : > { %v406_v63 = vmax.f32 %v342_v52, 0.0  ;;  %v346_v2 = vadd.f32 %v635_v1, %v275_v53  ;;  %v407_v6 = vmax.f32 %v343_v54, 0.0  ;;  %v408_v7 = vmax.f32 %v344_v55, 0.0 }
  0x29   : > { %v409_v8 = vmax.f32 %v345_v56, 0.0  ;;  %v347_v9 = vadd.f32 %v635_v1, %v276_v57  ;;  %469 = vst.msk [vmem:[%s658_s25 + $0xc0] sm:$0xff] %vm444_vm0, %v404_v61  ;;  %470 = vst.msk [vmem:[%s658_s25 + $0xc8] sm:$0xff] %vm444_vm0, %v405_v62  ;;  %v277_v12 = vmul.f32 %v625_v0, %v206_v58  ;;  %v278_v13 = vmul.f32 %v625_v0, %v207_v59  ;;  %v223_v61 = vld [vmem:[%s630_s20 + $0x188] sm:$0xff]  ;;  %v224_v62 = vld [vmem:[%s630_s20 + $0x190] sm:$0xff] }
  0x2a   : > { %471 = vst.msk [vmem:[%s658_s25 + $0xd0] sm:$0xff] %vm444_vm0, %v406_v63  ;;  %v410_v11 = vmax.f32 %v346_v2, 0.0  ;;  %v279_v14 = vmul.f32 %v625_v0, %v208_v60  ;;  %472 = vst.msk [vmem:[%s658_s25 + $0xd8] sm:$0xff] %vm444_vm0, %v407_v6  ;;  %v280_v17 = vmul.f32 %v625_v0, %v209_v3  ;;  %v281_v18 = vmul.f32 %v625_v0, %v210_v4  ;;  %v222_v60 = vld [vmem:[%s630_s20 + $0x180] sm:$0xff] }
  0x2b   : > { %473 = vst.msk [vmem:[%s658_s25 + $0xe0] sm:$0xff] %vm444_vm0, %v408_v7  ;;  %474 = vst.msk [vmem:[%s658_s25 + $0xe8] sm:$0xff] %vm444_vm0, %v409_v8  ;;  %v411_v16 = vmax.f32 %v347_v9, 0.0  ;;  %v282_v19 = vmul.f32 %v625_v0, %v211_v5  ;;  %v348_v20 = vadd.f32 %v635_v1, %v277_v12  ;;  %v349_v21 = vadd.f32 %v635_v1, %v278_v13  ;;  %v225_v5 = vld [vmem:[%s630_s20 + $0x198] sm:$0xff]  ;;  %v226_v6 = vld [vmem:[%s630_s20 + $0x1a0] sm:$0xff] }
  0x2c   : > { %475 = vst.msk [vmem:[%s658_s25 + $0xf0] sm:$0xff] %vm444_vm0, %v410_v11  ;;  %v350_v22 = vadd.f32 %v635_v1, %v279_v14  ;;  %v283_v23 = vmul.f32 %v625_v0, %v212_v10  ;;  %v351_v24 = vadd.f32 %v635_v1, %v280_v17  ;;  %v352_v25 = vadd.f32 %v635_v1, %v281_v18  ;;  %v227_v7 = vld [vmem:[%s630_s20 + $0x1a8] sm:$0xff]  ;;  %v228_v12 = vld [vmem:[%s630_s20 + $0x1b0] sm:$0xff]  ;;  %v229_v17 = vld [vmem:[%s630_s20 + $0x1b8] sm:$0xff] }
  0x2d   : > { %476 = vst.msk [vmem:[%s658_s25 + $0xf8] sm:$0xff] %vm444_vm0, %v411_v16  ;;  %v353_v26 = vadd.f32 %v635_v1, %v282_v19  ;;  %v284_v27 = vmul.f32 %v625_v0, %v213_v15  ;;  %v412_v31 = vmax.f32 %v348_v20, 0.0  ;;  %v413_v32 = vmax.f32 %v349_v21, 0.0 }
  0x2e   : > { %v414_v33 = vmax.f32 %v350_v22, 0.0  ;;  %v354_v34 = vadd.f32 %v635_v1, %v283_v23  ;;  %v415_v38 = vmax.f32 %v351_v24, 0.0  ;;  %v416_v39 = vmax.f32 %v352_v25, 0.0 }
  0x2f   : > { %v417_v40 = vmax.f32 %v353_v26, 0.0  ;;  %v355_v41 = vadd.f32 %v635_v1, %v284_v27  ;;  %477 = vst.msk [vmem:[%s658_s25 + $0x100] sm:$0xff] %vm444_vm0, %v412_v31  ;;  %478 = vst.msk [vmem:[%s658_s25 + $0x108] sm:$0xff] %vm444_vm0, %v413_v32  ;;  %v285_v44 = vmul.f32 %v625_v0, %v214_v28  ;;  %v286_v45 = vmul.f32 %v625_v0, %v215_v29  ;;  %v231_v31 = vld [vmem:[%s630_s20 + $0x1c8] sm:$0xff]  ;;  %v232_v32 = vld [vmem:[%s630_s20 + $0x1d0] sm:$0xff] }
  0x30   : > { %479 = vst.msk [vmem:[%s658_s25 + $0x110] sm:$0xff] %vm444_vm0, %v414_v33  ;;  %v418_v43 = vmax.f32 %v354_v34, 0.0  ;;  %v287_v46 = vmul.f32 %v625_v0, %v216_v30  ;;  %480 = vst.msk [vmem:[%s658_s25 + $0x118] sm:$0xff] %vm444_vm0, %v415_v38  ;;  %v288_v49 = vmul.f32 %v625_v0, %v217_v35  ;;  %v289_v50 = vmul.f32 %v625_v0, %v218_v36  ;;  %v230_v30 = vld [vmem:[%s630_s20 + $0x1c0] sm:$0xff] }
  0x31   : > { %481 = vst.msk [vmem:[%s658_s25 + $0x120] sm:$0xff] %vm444_vm0, %v416_v39  ;;  %482 = vst.msk [vmem:[%s658_s25 + $0x128] sm:$0xff] %vm444_vm0, %v417_v40  ;;  %v419_v48 = vmax.f32 %v355_v41, 0.0  ;;  %v290_v51 = vmul.f32 %v625_v0, %v219_v37  ;;  %v356_v52 = vadd.f32 %v635_v1, %v285_v44  ;;  %v357_v53 = vadd.f32 %v635_v1, %v286_v45  ;;  %v233_v37 = vld [vmem:[%s630_s20 + $0x1d8] sm:$0xff]  ;;  %v234_v38 = vld [vmem:[%s630_s20 + $0x1e0] sm:$0xff] }
  0x32   : > { %483 = vst.msk [vmem:[%s658_s25 + $0x130] sm:$0xff] %vm444_vm0, %v418_v43  ;;  %v358_v54 = vadd.f32 %v635_v1, %v287_v46  ;;  %v291_v55 = vmul.f32 %v625_v0, %v220_v42  ;;  %v359_v56 = vadd.f32 %v635_v1, %v288_v49  ;;  %v360_v57 = vadd.f32 %v635_v1, %v289_v50  ;;  %v235_v39 = vld [vmem:[%s630_s20 + $0x1e8] sm:$0xff]  ;;  %v236_v44 = vld [vmem:[%s630_s20 + $0x1f0] sm:$0xff]  ;;  %v237_v49 = vld [vmem:[%s630_s20 + $0x1f8] sm:$0xff] }
  0x33   : > { %484 = vst.msk [vmem:[%s658_s25 + $0x138] sm:$0xff] %vm444_vm0, %v419_v48  ;;  %v361_v58 = vadd.f32 %v635_v1, %v290_v51  ;;  %v292_v59 = vmul.f32 %v625_v0, %v221_v47  ;;  %v420_v63 = vmax.f32 %v356_v52, 0.0  ;;  %v421_v2 = vmax.f32 %v357_v53, 0.0 }
  0x34   : > { %v422_v3 = vmax.f32 %v358_v54, 0.0  ;;  %v362_v4 = vadd.f32 %v635_v1, %v291_v55  ;;  %v423_v8 = vmax.f32 %v359_v56, 0.0  ;;  %v424_v9 = vmax.f32 %v360_v57, 0.0 }
  0x35   : > { %v425_v10 = vmax.f32 %v361_v58, 0.0  ;;  %v363_v11 = vadd.f32 %v635_v1, %v292_v59  ;;  %485 = vst.msk [vmem:[%s658_s25 + $0x140] sm:$0xff] %vm444_vm0, %v420_v63  ;;  %486 = vst.msk [vmem:[%s658_s25 + $0x148] sm:$0xff] %vm444_vm0, %v421_v2  ;;  %v293_v14 = vmul.f32 %v625_v0, %v222_v60  ;;  %v294_v15 = vmul.f32 %v625_v0, %v223_v61 }
  0x36   : > { %487 = vst.msk [vmem:[%s658_s25 + $0x150] sm:$0xff] %vm444_vm0, %v422_v3  ;;  %v426_v13 = vmax.f32 %v362_v4, 0.0  ;;  %v295_v16 = vmul.f32 %v625_v0, %v224_v62  ;;  %488 = vst.msk [vmem:[%s658_s25 + $0x158] sm:$0xff] %vm444_vm0, %v423_v8  ;;  %v296_v19 = vmul.f32 %v625_v0, %v225_v5  ;;  %v297_v20 = vmul.f32 %v625_v0, %v226_v6 }
  0x37   : > { %489 = vst.msk [vmem:[%s658_s25 + $0x160] sm:$0xff] %vm444_vm0, %v424_v9  ;;  %490 = vst.msk [vmem:[%s658_s25 + $0x168] sm:$0xff] %vm444_vm0, %v425_v10  ;;  %v427_v18 = vmax.f32 %v363_v11, 0.0  ;;  %v298_v21 = vmul.f32 %v625_v0, %v227_v7  ;;  %v364_v22 = vadd.f32 %v635_v1, %v293_v14  ;;  %v365_v23 = vadd.f32 %v635_v1, %v294_v15 }
  0x38   : > { %491 = vst.msk [vmem:[%s658_s25 + $0x170] sm:$0xff] %vm444_vm0, %v426_v13  ;;  %v366_v24 = vadd.f32 %v635_v1, %v295_v16  ;;  %v299_v25 = vmul.f32 %v625_v0, %v228_v12  ;;  %v367_v26 = vadd.f32 %v635_v1, %v296_v19  ;;  %v368_v27 = vadd.f32 %v635_v1, %v297_v20 }
  0x39   : > { %492 = vst.msk [vmem:[%s658_s25 + $0x178] sm:$0xff] %vm444_vm0, %v427_v18  ;;  %v369_v28 = vadd.f32 %v635_v1, %v298_v21  ;;  %v300_v29 = vmul.f32 %v625_v0, %v229_v17  ;;  %v428_v33 = vmax.f32 %v364_v22, 0.0  ;;  %v429_v34 = vmax.f32 %v365_v23, 0.0 }
  0x3a   : > { %v430_v35 = vmax.f32 %v366_v24, 0.0  ;;  %v370_v36 = vadd.f32 %v635_v1, %v299_v25  ;;  %v431_v40 = vmax.f32 %v367_v26, 0.0  ;;  %v432_v41 = vmax.f32 %v368_v27, 0.0 }
  0x3b   : > { %v433_v42 = vmax.f32 %v369_v28, 0.0  ;;  %v371_v43 = vadd.f32 %v635_v1, %v300_v29  ;;  %493 = vst.msk [vmem:[%s658_s25 + $0x180] sm:$0xff] %vm444_vm0, %v428_v33  ;;  %494 = vst.msk [vmem:[%s658_s25 + $0x188] sm:$0xff] %vm444_vm0, %v429_v34  ;;  %v301_v46 = vmul.f32 %v625_v0, %v230_v30  ;;  %v302_v47 = vmul.f32 %v625_v0, %v231_v31 }
  0x3c   : > { %495 = vst.msk [vmem:[%s658_s25 + $0x190] sm:$0xff] %vm444_vm0, %v430_v35  ;;  %v434_v45 = vmax.f32 %v370_v36, 0.0  ;;  %v303_v48 = vmul.f32 %v625_v0, %v232_v32  ;;  %496 = vst.msk [vmem:[%s658_s25 + $0x198] sm:$0xff] %vm444_vm0, %v431_v40  ;;  %v304_v51 = vmul.f32 %v625_v0, %v233_v37  ;;  %v305_v52 = vmul.f32 %v625_v0, %v234_v38 }
  0x3d   : > { %497 = vst.msk [vmem:[%s658_s25 + $0x1a0] sm:$0xff] %vm444_vm0, %v432_v41  ;;  %498 = vst.msk [vmem:[%s658_s25 + $0x1a8] sm:$0xff] %vm444_vm0, %v433_v42  ;;  %v435_v50 = vmax.f32 %v371_v43, 0.0  ;;  %v306_v53 = vmul.f32 %v625_v0, %v235_v39  ;;  %v372_v54 = vadd.f32 %v635_v1, %v301_v46  ;;  %v373_v55 = vadd.f32 %v635_v1, %v302_v47 }
  0x3e   : > { %499 = vst.msk [vmem:[%s658_s25 + $0x1b0] sm:$0xff] %vm444_vm0, %v434_v45  ;;  %v374_v56 = vadd.f32 %v635_v1, %v303_v48  ;;  %v307_v57 = vmul.f32 %v625_v0, %v236_v44  ;;  %v375_v58 = vadd.f32 %v635_v1, %v304_v51  ;;  %v376_v59 = vadd.f32 %v635_v1, %v305_v52 }
  0x3f   : > { %500 = vst.msk [vmem:[%s658_s25 + $0x1b8] sm:$0xff] %vm444_vm0, %v435_v50  ;;  %v377_v60 = vadd.f32 %v635_v1, %v306_v53  ;;  %v308_v61 = vmul.f32 %v625_v0, %v237_v49  ;;  %v436_v62 = vmax.f32 %v372_v54, 0.0  ;;  %v437_v63 = vmax.f32 %v373_v55, 0.0 }
  0x40   : > { %v438_v2 = vmax.f32 %v374_v56, 0.0  ;;  %v378_v3 = vadd.f32 %v635_v1, %v307_v57  ;;  %v439_v4 = vmax.f32 %v375_v58, 0.0  ;;  %v440_v5 = vmax.f32 %v376_v59, 0.0 }
  0x41   : > { %v441_v6 = vmax.f32 %v377_v60, 0.0  ;;  %v379_v7 = vadd.f32 %v635_v1, %v308_v61  ;;  %501 = vst.msk [vmem:[%s658_s25 + $0x1c0] sm:$0xff] %vm444_vm0, %v436_v62  ;;  %502 = vst.msk [vmem:[%s658_s25 + $0x1c8] sm:$0xff] %vm444_vm0, %v437_v63 }
  0x42   : > { %503 = vst.msk [vmem:[%s658_s25 + $0x1d0] sm:$0xff] %vm444_vm0, %v438_v2  ;;  %v442_v8 = vmax.f32 %v378_v3, 0.0  ;;  %504 = vst.msk [vmem:[%s658_s25 + $0x1d8] sm:$0xff] %vm444_vm0, %v439_v4 }
  0x43   : > { %505 = vst.msk [vmem:[%s658_s25 + $0x1e0] sm:$0xff] %vm444_vm0, %v440_v5  ;;  %506 = vst.msk [vmem:[%s658_s25 + $0x1e8] sm:$0xff] %vm444_vm0, %v441_v6  ;;  %v443_v0 = vmax.f32 %v379_v7, 0.0 }
  0x44   : > { %507 = vst.msk [vmem:[%s658_s25 + $0x1f0] sm:$0xff] %vm444_vm0, %v442_v8 }
  0x45   : > { %508 = vst.msk [vmem:[%s658_s25 + $0x1f8] sm:$0xff] %vm444_vm0, %v443_v0 }
  0x46 PF: > { %s13_s12 = sadd.s32 1, %s592_s12  }
  0x47   : > { %p10_p4 = scmp.ge.s32.totalorder %s13_s12, 6  }
  0x49   :  { %12 = sbr.rel (!%p10_p4) target bundleno = 1 (0x1), region = 62 }

// kernel: generator_forward.24
= control target key start
LH: loop header
LB: loop body
LE: loop exit
PB: predicated region body
PF: predicated region fallthrough
CT: control target
= control target key end

     0   :  { %s1605_s9 = smov 0   ;;  %s1607_s10 = smov 0   ;;  %s2052_s0 = inlined_call_operand.vmem [shape: bf16[2048,16], index: 0, kind: input, shape index: {}]   ;;  %s2053_s1 = inlined_call_operand.vmem [shape: bf16[16,48], index: 1, kind: input, shape index: {}]   ;;  %s2054_s2 = inlined_call_operand.vmem [shape: f32[2048,48], index: 2, kind: output, shape index: {}]  }
   0x1   :  { %s1609_s11 = smov 0  }
   0x2 LB: > { %s31_s12 = sadd.s32 1, %s1583_s10  ;;  %p1334_p0 = scmp.ge.s32.totalorder %s1587_s11, 1  ;;  %s1587_s11 = sphi %s1609_s11, %s12_s11   ;;  %s1583_s10 = sphi %s1607_s10, %s2057_s10   ;;  %s1579_s9 = sphi %s1605_s9, %s2056_s9  }
   0x3   : > { %p33_p1 = scmp.ge.s32.totalorder %s31_s12, 4  ;;  %p155_p2 = scmp.lt.s32.totalorder %s1587_s11, 5 }
   0x5   : > { %s2059_s12 = smov (%p33_p1, %s31_s12), 0  ;;  %p156_p3 = pnand %p1334_p0, %p155_p2 }
   0x6   : > { %v1628_v0 = vld [vmem:[%s2053_s1] sm:$0xff] (!%p156_p3)   ;;  %s1335_s15 = sshll.u32 (!%p156_p3), %s1579_s9, 6  ;;  %vm223_vm0 = vcmask (!%p156_p3), 392192   ;;  %v1589_v1 = vmov (!%p156_p3), 0.0   ;;  %vm584_vm1 = vcmask (!%p156_p3), 130048  }
   0x7   : > { %159 = sbr.rel (%p156_p3) target bundleno = 305 (0x131), region = 28  ;;  %p1633_p4 = scmp.lt.s32.totalorder (!%p156_p3), %s1335_s15, 255  ;;  %1439 = vmatprep.subr.bf16.mxu0 (!%p156_p3), %v1628_v0  ;;  %1505 = vmatprep.subr.bf16.mxu1 (!%p156_p3), %v1628_v0  ;;  %226 = vst.msk [vmem:[#allocation2 + $0x10] sm:$0xff] (!%p156_p3), %vm223_vm0, %v1589_v1  ;;  %224 = vst.msk [vmem:[#allocation2] sm:$0xff] (!%p156_p3), %vm223_vm0, %v1589_v1 }
   0x8   : > { %225 = vst.msk [vmem:[#allocation2 + $0x8] sm:$0xff] (!%p156_p3), %vm223_vm0, %v1589_v1  ;;  %227 = vst.msk [vmem:[#allocation2 + $0x18] sm:$0xff] (!%p156_p3), %vm223_vm0, %v1589_v1  ;;  %1440 = vmatpush3.bf16.msra.mxu0 (!%p156_p3), %v1628_v0  ;;  %1506 = vmatpush3.bf16.msra.mxu1 (!%p156_p3), %v1628_v0 }
   0x9   : > { %228 = vst.msk [vmem:[#allocation2 + $0x20] sm:$0xff] (!%p156_p3), %vm223_vm0, %v1589_v1  ;;  %229 = vst.msk [vmem:[#allocation2 + $0x28] sm:$0xff] (!%p156_p3), %vm223_vm0, %v1589_v1 }
   0xa   : > { %230 = vst.msk [vmem:[#allocation2 + $0x30] sm:$0xff] (!%p156_p3), %vm223_vm0, %v1589_v1  ;;  %231 = vst.msk [vmem:[#allocation2 + $0x38] sm:$0xff] (!%p156_p3), %vm223_vm0, %v1589_v1 }
   0xb   : > { %232 = vst.msk [vmem:[#allocation2 + $0x40] sm:$0xff] (!%p156_p3), %vm223_vm0, %v1589_v1  ;;  %233 = vst.msk [vmem:[#allocation2 + $0x48] sm:$0xff] (!%p156_p3), %vm223_vm0, %v1589_v1 }
   0xc   : > { %234 = vst.msk [vmem:[#allocation2 + $0x50] sm:$0xff] (!%p156_p3), %vm223_vm0, %v1589_v1  ;;  %235 = vst.msk [vmem:[#allocation2 + $0x58] sm:$0xff] (!%p156_p3), %vm223_vm0, %v1589_v1 }
   0xd   : > { %236 = vst.msk [vmem:[#allocation2 + $0x60] sm:$0xff] (!%p156_p3), %vm223_vm0, %v1589_v1  ;;  %237 = vst.msk [vmem:[#allocation2 + $0x68] sm:$0xff] (!%p156_p3), %vm223_vm0, %v1589_v1 }
   0xe   : > { %238 = vst.msk [vmem:[#allocation2 + $0x70] sm:$0xff] %vm223_vm0, %v1589_v1  ;;  %239 = vst.msk [vmem:[#allocation2 + $0x78] sm:$0xff] %vm223_vm0, %v1589_v1  ;;  %s2061_s15 = smov (!%p1633_p4, %s1335_s15), 255  ;;  %v290_v34 = vld [vmem:[#allocation2 + $0x10] sm:$0xff]  ;;  %v288_v36 = vld [vmem:[#allocation2] sm:$0xff] }
   0xf   : > { %240 = vst.msk [vmem:[#allocation2 + $0x80] sm:$0xff] %vm223_vm0, %v1589_v1  ;;  %241 = vst.msk [vmem:[#allocation2 + $0x88] sm:$0xff] %vm223_vm0, %v1589_v1  ;;  %s1336_s17 = sshll.u32 %s2061_s15, 2  ;;  %v291_v39 = vld [vmem:[#allocation2 + $0x18] sm:$0xff]  ;;  %v289_v44 = vld [vmem:[#allocation2 + $0x8] sm:$0xff]  ;;  %s1338_s21 = sshll.u32 %s2061_s15, 3 }
  0x10   : > { %242 = vst.msk [vmem:[#allocation2 + $0x90] sm:$0xff] %vm223_vm0, %v1589_v1  ;;  %243 = vst.msk [vmem:[#allocation2 + $0x98] sm:$0xff] %vm223_vm0, %v1589_v1  ;;  %s1779_s20 = scalar_lea.vmem %s2052_s0, %s1336_s17  ;;  %v292_v60 = vld [vmem:[#allocation2 + $0x20] sm:$0xff]  ;;  %s1857_s24 = scalar_lea.vmem %s2054_s2, %s1338_s21 }
  0x11   : > { %244 = vst.msk [vmem:[#allocation2 + $0xa0] sm:$0xff] %vm223_vm0, %v1589_v1  ;;  %245 = vst.msk [vmem:[#allocation2 + $0xa8] sm:$0xff] %vm223_vm0, %v1589_v1  ;;  %v1533_v2 = vld [vmem:[%s1779_s20] sm:$0xff]   ;;  %v1535_v4 = vld [vmem:[%s1779_s20 + $0x8] sm:$0xff]  }
  0x12   : > { %246 = vst.msk [vmem:[#allocation2 + $0xb0] sm:$0xff] %vm223_vm0, %v1589_v1  ;;  %247 = vst.msk [vmem:[#allocation2 + $0xb8] sm:$0xff] %vm223_vm0, %v1589_v1  ;;  %v1534_v3 = vld [vmem:[%s1779_s20 + $0x80] sm:$0xff]   ;;  %1441 = vmatprep.mubr.msk.bf16.mxu0 %vm584_vm1, %v1533_v2  ;;  %v1536_v5 = vld [vmem:[%s1779_s20 + $0x88] sm:$0xff]  }
  0x13   : > { %248 = vst.msk [vmem:[#allocation2 + $0xc0] sm:$0xff] %vm223_vm0, %v1589_v1  ;;  %249 = vst.msk [vmem:[#allocation2 + $0xc8] sm:$0xff] %vm223_vm0, %v1589_v1  ;;  %1473 = vmatprep.mubr.msk.bf16.mxu1 %vm584_vm1, %v1534_v3  ;;  %1442 = vmatmul.mubr.msk.bf16.vlgmr.msra.gmra.mrb[0].mxu0 %vm584_vm1, %v1535_v4  ;;  %v1537_v6 = vld [vmem:[%s1779_s20 + $0x10] sm:$0xff]   ;;  %v1539_v8 = vld [vmem:[%s1779_s20 + $0x18] sm:$0xff]  }
  0x14   : > { %250 = vst.msk [vmem:[#allocation2 + $0xd0] sm:$0xff] %vm223_vm0, %v1589_v1  ;;  %251 = vst.msk [vmem:[#allocation2 + $0xd8] sm:$0xff] %vm223_vm0, %v1589_v1  ;;  %1474 = vmatmul.mubr.msk.bf16.vlgmr.msra.gmra.mrb[0].mxu1 %vm584_vm1, %v1536_v5  ;;  %v1538_v7 = vld [vmem:[%s1779_s20 + $0x90] sm:$0xff]   ;;  %1445 = vmatprep.mubr.msk.bf16.mxu0 %vm584_vm1, %v1537_v6  ;;  %v1540_v9 = vld [vmem:[%s1779_s20 + $0x98] sm:$0xff]  }
  0x15   : > { %252 = vst.msk [vmem:[#allocation2 + $0xe0] sm:$0xff] %vm223_vm0, %v1589_v1  ;;  %253 = vst.msk [vmem:[#allocation2 + $0xe8] sm:$0xff] %vm223_vm0, %v1589_v1  ;;  %1477 = vmatprep.mubr.msk.bf16.mxu1 %vm584_vm1, %v1538_v7  ;;  %v1541_v10 = vld [vmem:[%s1779_s20 + $0x20] sm:$0xff]   ;;  %v1543_v12 = vld [vmem:[%s1779_s20 + $0x28] sm:$0xff]  }
  0x16   : > { %254 = vst.msk [vmem:[#allocation2 + $0xf0] sm:$0xff] %vm223_vm0, %v1589_v1  ;;  %255 = vst.msk [vmem:[#allocation2 + $0xf8] sm:$0xff] %vm223_vm0, %v1589_v1  ;;  %v1542_v11 = vld [vmem:[%s1779_s20 + $0xa0] sm:$0xff]   ;;  %v1544_v13 = vld [vmem:[%s1779_s20 + $0xa8] sm:$0xff]  }
  0x17   : > { %256 = vst.msk [vmem:[#allocation2 + $0x100] sm:$0xff] %vm223_vm0, %v1589_v1  ;;  %257 = vst.msk [vmem:[#allocation2 + $0x108] sm:$0xff] %vm223_vm0, %v1589_v1  ;;  %v1545_v14 = vld [vmem:[%s1779_s20 + $0x30] sm:$0xff]   ;;  %v1547_v16 = vld [vmem:[%s1779_s20 + $0x38] sm:$0xff]  }
  0x18   : > { %258 = vst.msk [vmem:[#allocation2 + $0x110] sm:$0xff] %vm223_vm0, %v1589_v1  ;;  %259 = vst.msk [vmem:[#allocation2 + $0x118] sm:$0xff] %vm223_vm0, %v1589_v1  ;;  %v1546_v15 = vld [vmem:[%s1779_s20 + $0xb0] sm:$0xff]   ;;  %v1548_v17 = vld [vmem:[%s1779_s20 + $0xb8] sm:$0xff]  }
  0x19   : > { %260 = vst.msk [vmem:[#allocation2 + $0x120] sm:$0xff] %vm223_vm0, %v1589_v1  ;;  %261 = vst.msk [vmem:[#allocation2 + $0x128] sm:$0xff] %vm223_vm0, %v1589_v1  ;;  %v1549_v18 = vld [vmem:[%s1779_s20 + $0x40] sm:$0xff]   ;;  %v1551_v20 = vld [vmem:[%s1779_s20 + $0x48] sm:$0xff]  }
  0x1a   : > { %262 = vst.msk [vmem:[#allocation2 + $0x130] sm:$0xff] %vm223_vm0, %v1589_v1  ;;  %263 = vst.msk [vmem:[#allocation2 + $0x138] sm:$0xff] %vm223_vm0, %v1589_v1  ;;  %v1550_v19 = vld [vmem:[%s1779_s20 + $0xc0] sm:$0xff]   ;;  %v1552_v21 = vld [vmem:[%s1779_s20 + $0xc8] sm:$0xff]  }
  0x1b   : > { %264 = vst.msk [vmem:[#allocation2 + $0x140] sm:$0xff] %vm223_vm0, %v1589_v1  ;;  %265 = vst.msk [vmem:[#allocation2 + $0x148] sm:$0xff] %vm223_vm0, %v1589_v1  ;;  %1446 = vmatmul.mubr.msk.bf16.gmra.mrb[4].mxu0 %vm584_vm1, %v1539_v8  ;;  %v1553_v22 = vld [vmem:[%s1779_s20 + $0x50] sm:$0xff]   ;;  %v1555_v24 = vld [vmem:[%s1779_s20 + $0x58] sm:$0xff]  }
  0x1c   : > { %266 = vst.msk [vmem:[#allocation2 + $0x150] sm:$0xff] %vm223_vm0, %v1589_v1  ;;  %267 = vst.msk [vmem:[#allocation2 + $0x158] sm:$0xff] %vm223_vm0, %v1589_v1  ;;  %1478 = vmatmul.mubr.msk.bf16.gmra.mrb[4].mxu1 %vm584_vm1, %v1540_v9  ;;  %1449 = vmatprep.mubr.msk.bf16.mxu0 %vm584_vm1, %v1541_v10  ;;  %v1554_v23 = vld [vmem:[%s1779_s20 + $0xd0] sm:$0xff]   ;;  %v1556_v25 = vld [vmem:[%s1779_s20 + $0xd8] sm:$0xff]  }
  0x1d   : > { %268 = vst.msk [vmem:[#allocation2 + $0x160] sm:$0xff] %vm223_vm0, %v1589_v1  ;;  %269 = vst.msk [vmem:[#allocation2 + $0x168] sm:$0xff] %vm223_vm0, %v1589_v1  ;;  %1481 = vmatprep.mubr.msk.bf16.mxu1 %vm584_vm1, %v1542_v11  ;;  %v1557_v26 = vld [vmem:[%s1779_s20 + $0x60] sm:$0xff]   ;;  %v1559_v28 = vld [vmem:[%s1779_s20 + $0x68] sm:$0xff]  }
  0x1e   : > { %270 = vst.msk [vmem:[#allocation2 + $0x170] sm:$0xff] %vm223_vm0, %v1589_v1  ;;  %271 = vst.msk [vmem:[#allocation2 + $0x178] sm:$0xff] %vm223_vm0, %v1589_v1  ;;  %v1558_v27 = vld [vmem:[%s1779_s20 + $0xe0] sm:$0xff]   ;;  %v1560_v29 = vld [vmem:[%s1779_s20 + $0xe8] sm:$0xff]  }
  0x1f   : > { %272 = vst.msk [vmem:[#allocation2 + $0x180] sm:$0xff] %vm223_vm0, %v1589_v1  ;;  %273 = vst.msk [vmem:[#allocation2 + $0x188] sm:$0xff] %vm223_vm0, %v1589_v1  ;;  %v1561_v30 = vld [vmem:[%s1779_s20 + $0x70] sm:$0xff]   ;;  %v1563_v32 = vld [vmem:[%s1779_s20 + $0x78] sm:$0xff]  }
  0x20   : > { %274 = vst.msk [vmem:[#allocation2 + $0x190] sm:$0xff] %vm223_vm0, %v1589_v1  ;;  %275 = vst.msk [vmem:[#allocation2 + $0x198] sm:$0xff] %vm223_vm0, %v1589_v1  ;;  %v1562_v31 = vld [vmem:[%s1779_s20 + $0xf0] sm:$0xff]   ;;  %v1564_v33 = vld [vmem:[%s1779_s20 + $0xf8] sm:$0xff]  }
  0x21   : > { %276 = vst.msk [vmem:[#allocation2 + $0x1a0] sm:$0xff] %vm223_vm0, %v1589_v1  ;;  %277 = vst.msk [vmem:[#allocation2 + $0x1a8] sm:$0xff] %vm223_vm0, %v1589_v1  ;;  %v322_v35 = vld [vmem:[#allocation2 + $0x110] sm:$0xff]  ;;  %v320_v38 = vld [vmem:[#allocation2 + $0x100] sm:$0xff] }
  0x22   : > { %278 = vst.msk [vmem:[#allocation2 + $0x1b0] sm:$0xff] %vm223_vm0, %v1589_v1  ;;  %279 = vst.msk [vmem:[#allocation2 + $0x1b8] sm:$0xff] %vm223_vm0, %v1589_v1  ;;  %v323_v43 = vld [vmem:[#allocation2 + $0x118] sm:$0xff]  ;;  %v321_v49 = vld [vmem:[#allocation2 + $0x108] sm:$0xff] }
  0x23   : > { %280 = vst.msk [vmem:[#allocation2 + $0x1c0] sm:$0xff] %vm223_vm0, %v1589_v1  ;;  %281 = vst.msk [vmem:[#allocation2 + $0x1c8] sm:$0xff] %vm223_vm0, %v1589_v1  ;;  %1450 = vmatmul.mubr.msk.bf16.gmra.mrb[8].mxu0 %vm584_vm1, %v1543_v12  ;;  %v294_v58 = vld [vmem:[#allocation2 + $0x30] sm:$0xff]  ;;  %v324_v62 = vld [vmem:[#allocation2 + $0x120] sm:$0xff] }
  0x24   : > { %282 = vst.msk [vmem:[#allocation2 + $0x1d0] sm:$0xff] %vm223_vm0, %v1589_v1  ;;  %283 = vst.msk [vmem:[#allocation2 + $0x1d8] sm:$0xff] %vm223_vm0, %v1589_v1  ;;  %1482 = vmatmul.mubr.msk.bf16.gmra.mrb[8].mxu1 %vm584_vm1, %v1544_v13  ;;  %1453 = vmatprep.mubr.msk.bf16.mxu0 %vm584_vm1, %v1545_v14  ;;  %v326_v59 = vld [vmem:[#allocation2 + $0x130] sm:$0xff]  ;;  %v295_v63 = vld [vmem:[#allocation2 + $0x38] sm:$0xff] }
  0x25   : > { %284 = vst.msk [vmem:[#allocation2 + $0x1e0] sm:$0xff] %vm223_vm0, %v1589_v1  ;;  %285 = vst.msk [vmem:[#allocation2 + $0x1e8] sm:$0xff] %vm223_vm0, %v1589_v1  ;;  %1485 = vmatprep.mubr.msk.bf16.mxu1 %vm584_vm1, %v1546_v15  ;;  %v327_v3 = vld [vmem:[#allocation2 + $0x138] sm:$0xff]  ;;  %v293_v4 = vld [vmem:[#allocation2 + $0x28] sm:$0xff] }
  0x26   : > { %286 = vst.msk [vmem:[#allocation2 + $0x1f0] sm:$0xff] %vm223_vm0, %v1589_v1  ;;  %287 = vst.msk [vmem:[#allocation2 + $0x1f8] sm:$0xff] %vm223_vm0, %v1589_v1  ;;  %v325_v10 = vld [vmem:[#allocation2 + $0x128] sm:$0xff] }
  0x2b   : > { %1454 = vmatmul.mubr.msk.bf16.gmra.mrb[12].mxu0 %vm584_vm1, %v1547_v16 }
  0x2c   : > { %1486 = vmatmul.mubr.msk.bf16.gmra.mrb[12].mxu1 %vm584_vm1, %v1548_v17  ;;  %1457 = vmatprep.mubr.msk.bf16.mxu0 %vm584_vm1, %v1549_v18 }
  0x2d   : > { %1489 = vmatprep.mubr.msk.bf16.mxu1 %vm584_vm1, %v1550_v19 }
  0x33   : > { %1458 = vmatmul.mubr.msk.bf16.gmra.mrb[16].mxu0 %vm584_vm1, %v1551_v20 }
  0x34   : > { %1490 = vmatmul.mubr.msk.bf16.gmra.mrb[16].mxu1 %vm584_vm1, %v1552_v21  ;;  %1461 = vmatprep.mubr.msk.bf16.mxu0 %vm584_vm1, %v1553_v22 }
  0x35   : > { %1493 = vmatprep.mubr.msk.bf16.mxu1 %vm584_vm1, %v1554_v23 }
  0x3b   : > { %1462 = vmatmul.mubr.msk.bf16.gmra.mrb[20].mxu0 %vm584_vm1, %v1555_v24 }
  0x3c   : > { %1494 = vmatmul.mubr.msk.bf16.gmra.mrb[20].mxu1 %vm584_vm1, %v1556_v25  ;;  %1465 = vmatprep.mubr.msk.bf16.mxu0 %vm584_vm1, %v1557_v26  ;;  %v298_v26 = vld [vmem:[#allocation2 + $0x50] sm:$0xff] }
  0x3d   : > { %1497 = vmatprep.mubr.msk.bf16.mxu1 %vm584_vm1, %v1558_v27  ;;  %v330_v27 = vld [vmem:[#allocation2 + $0x150] sm:$0xff] }
  0x43   : > { %1466 = vmatmul.mubr.msk.bf16.gmra.mrb[24].mxu0 %vm584_vm1, %v1559_v28  ;;  %v296_v28 = vld [vmem:[#allocation2 + $0x40] sm:$0xff] }
  0x44   : > { %1498 = vmatmul.mubr.msk.bf16.gmra.mrb[24].mxu1 %vm584_vm1, %v1560_v29  ;;  %1469 = vmatprep.mubr.msk.bf16.mxu0 %vm584_vm1, %v1561_v30  ;;  %v328_v30 = vld [vmem:[#allocation2 + $0x140] sm:$0xff] }
  0x45   : > { %1501 = vmatprep.mubr.msk.bf16.mxu1 %vm584_vm1, %v1562_v31  ;;  %v299_v31 = vld [vmem:[#allocation2 + $0x58] sm:$0xff] }
  0x4b   : > { %1470 = vmatmul.mubr.msk.bf16.gmra.mrb[28].mxu0 %vm584_vm1, %v1563_v32 }
  0x4c   : > { %1502 = vmatmul.mubr.msk.bf16.gmra.mrb[28].mxu1 %vm584_vm1, %v1564_v33 }
  0xe6   : > { %v1443_v37 = vpop.f32.mrb[0].mxu0 }
  0xe7   : > { %v972_v40 = vadd.f32 %v1443_v37, %v290_v34  ;;  %v1475_v41 = vpop.f32.mrb[0].mxu1  ;;  %v715_v42 = vpop.f32.mrb[1].mxu0 }
  0xe8   : > { %v1004_v45 = vadd.f32 %v1475_v41, %v322_v35  ;;  %v970_v46 = vadd.f32 %v715_v42, %v288_v36  ;;  %v843_v47 = vpop.f32.mrb[1].mxu1  ;;  %v1444_v48 = vpop.f32.mrb[2].mxu0  ;;  %v331_v35 = vld [vmem:[#allocation2 + $0x158] sm:$0xff]  ;;  %v297_v36 = vld [vmem:[#allocation2 + $0x48] sm:$0xff] }
  0xe9   : > { %1037 = vst.msk [vmem:[#allocation2 + $0x10] sm:$0xff] %vm223_vm0, %v972_v40  ;;  %v1002_v50 = vadd.f32 %v843_v47, %v320_v38  ;;  %v973_v51 = vadd.f32 %v1444_v48, %v291_v39  ;;  %v1476_v52 = vpop.f32.mrb[2].mxu1  ;;  %v718_v53 = vpop.f32.mrb[3].mxu0  ;;  %v329_v42 = vld [vmem:[#allocation2 + $0x148] sm:$0xff] }
  0xea   : > { %1069 = vst.msk [vmem:[#allocation2 + $0x110] sm:$0xff] %vm223_vm0, %v1004_v45  ;;  %1035 = vst.msk [vmem:[#allocation2] sm:$0xff] %vm223_vm0, %v970_v46  ;;  %v1005_v54 = vadd.f32 %v1476_v52, %v323_v43  ;;  %v971_v55 = vadd.f32 %v718_v53, %v289_v44  ;;  %v846_v56 = vpop.f32.mrb[3].mxu1 }
  0xeb   : > { %1067 = vst.msk [vmem:[#allocation2 + $0x100] sm:$0xff] %vm223_vm0, %v1002_v50  ;;  %1038 = vst.msk [vmem:[#allocation2 + $0x18] sm:$0xff] %vm223_vm0, %v973_v51  ;;  %v1003_v57 = vadd.f32 %v846_v56, %v321_v49 }
  0xec   : > { %1070 = vst.msk [vmem:[#allocation2 + $0x118] sm:$0xff] %vm223_vm0, %v1005_v54  ;;  %1036 = vst.msk [vmem:[#allocation2 + $0x8] sm:$0xff] %vm223_vm0, %v971_v55 }
  0xed   : > { %1068 = vst.msk [vmem:[#allocation2 + $0x108] sm:$0xff] %vm223_vm0, %v1003_v57 }
  0xee   : > { %v1447_v61 = vpop.f32.mrb[4].mxu0 }
  0xef   : > { %v976_v0 = vadd.f32 %v1447_v61, %v294_v58  ;;  %v1479_v1 = vpop.f32.mrb[4].mxu1  ;;  %v731_v2 = vpop.f32.mrb[5].mxu0  ;;  %v302_v58 = vld [vmem:[#allocation2 + $0x70] sm:$0xff] }
  0xf0   : > { %v1104_v5 = vld [vmem:[#allocation2 + $0x10] sm:$0xff]  ;;  %v1008_v6 = vadd.f32 %v1479_v1, %v326_v59  ;;  %v974_v7 = vadd.f32 %v731_v2, %v292_v60  ;;  %v859_v8 = vpop.f32.mrb[5].mxu1  ;;  %v1448_v9 = vpop.f32.mrb[6].mxu0  ;;  %v300_v60 = vld [vmem:[#allocation2 + $0x60] sm:$0xff] }
  0xf1   : > { %1168 = vst.msk [vmem:[%s1857_s24 + $0x10] sm:$0xff] %vm223_vm0, %v1104_v5  ;;  %v1136_v11 = vld [vmem:[#allocation2 + $0x110] sm:$0xff]  ;;  %v1102_v12 = vld [vmem:[#allocation2] sm:$0xff]  ;;  %1041 = vst.msk [vmem:[#allocation2 + $0x30] sm:$0xff] %vm223_vm0, %v976_v0  ;;  %v1006_v13 = vadd.f32 %v859_v8, %v324_v62  ;;  %v977_v14 = vadd.f32 %v1448_v9, %v295_v63  ;;  %v1480_v15 = vpop.f32.mrb[6].mxu1  ;;  %v734_v16 = vpop.f32.mrb[7].mxu0 }
  0xf2   : > { %1200 = vst.msk [vmem:[%s1857_s24 + $0x110] sm:$0xff] %vm223_vm0, %v1136_v11  ;;  %1166 = vst.msk [vmem:[%s1857_s24] sm:$0xff] %vm223_vm0, %v1102_v12  ;;  %v1134_v17 = vld [vmem:[#allocation2 + $0x100] sm:$0xff]  ;;  %v1105_v18 = vld [vmem:[#allocation2 + $0x18] sm:$0xff]  ;;  %v1009_v19 = vadd.f32 %v1480_v15, %v327_v3  ;;  %v975_v20 = vadd.f32 %v734_v16, %v293_v4  ;;  %v862_v21 = vpop.f32.mrb[7].mxu1 }
  0xf3   : > { %1073 = vst.msk [vmem:[#allocation2 + $0x130] sm:$0xff] %vm223_vm0, %v1008_v6  ;;  %1039 = vst.msk [vmem:[#allocation2 + $0x20] sm:$0xff] %vm223_vm0, %v974_v7  ;;  %v1137_v22 = vld [vmem:[#allocation2 + $0x118] sm:$0xff]  ;;  %v1103_v23 = vld [vmem:[#allocation2 + $0x8] sm:$0xff]  ;;  %v1007_v24 = vadd.f32 %v862_v21, %v325_v10 }
  0xf4   : > { %1198 = vst.msk [vmem:[%s1857_s24 + $0x100] sm:$0xff] %vm223_vm0, %v1134_v17  ;;  %1169 = vst.msk [vmem:[%s1857_s24 + $0x18] sm:$0xff] %vm223_vm0, %v1105_v18  ;;  %v1135_v25 = vld [vmem:[#allocation2 + $0x108] sm:$0xff]  ;;  %v334_v59 = vld [vmem:[#allocation2 + $0x170] sm:$0xff] }
  0xf5   : > { %1071 = vst.msk [vmem:[#allocation2 + $0x120] sm:$0xff] %vm223_vm0, %v1006_v13  ;;  %1042 = vst.msk [vmem:[#allocation2 + $0x38] sm:$0xff] %vm223_vm0, %v977_v14  ;;  %v332_v62 = vld [vmem:[#allocation2 + $0x160] sm:$0xff]  ;;  %v303_v63 = vld [vmem:[#allocation2 + $0x78] sm:$0xff] }
  0xf6   : > { %1201 = vst.msk [vmem:[%s1857_s24 + $0x118] sm:$0xff] %vm223_vm0, %v1137_v22  ;;  %1167 = vst.msk [vmem:[%s1857_s24 + $0x8] sm:$0xff] %vm223_vm0, %v1103_v23  ;;  %v1451_v29 = vpop.f32.mrb[8].mxu0  ;;  %v335_v3 = vld [vmem:[#allocation2 + $0x178] sm:$0xff]  ;;  %v301_v4 = vld [vmem:[#allocation2 + $0x68] sm:$0xff] }
  0xf7   : > { %1074 = vst.msk [vmem:[#allocation2 + $0x138] sm:$0xff] %vm223_vm0, %v1009_v19  ;;  %1040 = vst.msk [vmem:[#allocation2 + $0x28] sm:$0xff] %vm223_vm0, %v975_v20  ;;  %v980_v32 = vadd.f32 %v1451_v29, %v298_v26  ;;  %v1483_v33 = vpop.f32.mrb[8].mxu1  ;;  %v747_v34 = vpop.f32.mrb[9].mxu0  ;;  %v333_v10 = vld [vmem:[#allocation2 + $0x168] sm:$0xff]  ;;  %v306_v26 = vld [vmem:[#allocation2 + $0x90] sm:$0xff] }
  0xf8   : > { %1199 = vst.msk [vmem:[%s1857_s24 + $0x108] sm:$0xff] %vm223_vm0, %v1135_v25  ;;  %1072 = vst.msk [vmem:[#allocation2 + $0x128] sm:$0xff] %vm223_vm0, %v1007_v24  ;;  %v1108_v37 = vld [vmem:[#allocation2 + $0x30] sm:$0xff]  ;;  %v1012_v38 = vadd.f32 %v1483_v33, %v330_v27  ;;  %v978_v39 = vadd.f32 %v747_v34, %v296_v28  ;;  %v875_v40 = vpop.f32.mrb[9].mxu1  ;;  %v1452_v41 = vpop.f32.mrb[10].mxu0  ;;  %v304_v28 = vld [vmem:[#allocation2 + $0x80] sm:$0xff] }
  0xf9   : > { %1172 = vst.msk [vmem:[%s1857_s24 + $0x30] sm:$0xff] %vm223_vm0, %v1108_v37  ;;  %1045 = vst.msk [vmem:[#allocation2 + $0x50] sm:$0xff] %vm223_vm0, %v980_v32  ;;  %v1010_v45 = vadd.f32 %v875_v40, %v328_v30  ;;  %v981_v46 = vadd.f32 %v1452_v41, %v299_v31  ;;  %v1484_v47 = vpop.f32.mrb[10].mxu1  ;;  %v750_v48 = vpop.f32.mrb[11].mxu0  ;;  %v338_v27 = vld [vmem:[#allocation2 + $0x190] sm:$0xff]  ;;  %v336_v30 = vld [vmem:[#allocation2 + $0x180] sm:$0xff] }
  0xfa   : > { %v1140_v43 = vld [vmem:[#allocation2 + $0x130] sm:$0xff]  ;;  %v1106_v44 = vld [vmem:[#allocation2 + $0x20] sm:$0xff]  ;;  %1077 = vst.msk [vmem:[#allocation2 + $0x150] sm:$0xff] %vm223_vm0, %v1012_v38  ;;  %1043 = vst.msk [vmem:[#allocation2 + $0x40] sm:$0xff] %vm223_vm0, %v978_v39  ;;  %v1013_v51 = vadd.f32 %v1484_v47, %v331_v35  ;;  %v979_v52 = vadd.f32 %v750_v48, %v297_v36  ;;  %v878_v53 = vpop.f32.mrb[11].mxu1 }
  0xfb   : > { %1204 = vst.msk [vmem:[%s1857_s24 + $0x130] sm:$0xff] %vm223_vm0, %v1140_v43  ;;  %1170 = vst.msk [vmem:[%s1857_s24 + $0x20] sm:$0xff] %vm223_vm0, %v1106_v44  ;;  %v1011_v56 = vadd.f32 %v878_v53, %v329_v42  ;;  %v307_v31 = vld [vmem:[#allocation2 + $0x98] sm:$0xff]  ;;  %v305_v36 = vld [vmem:[#allocation2 + $0x88] sm:$0xff] }
  0xfc   : > { %v1138_v49 = vld [vmem:[#allocation2 + $0x120] sm:$0xff]  ;;  %v1109_v50 = vld [vmem:[#allocation2 + $0x38] sm:$0xff]  ;;  %1075 = vst.msk [vmem:[#allocation2 + $0x140] sm:$0xff] %vm223_vm0, %v1010_v45  ;;  %1046 = vst.msk [vmem:[#allocation2 + $0x58] sm:$0xff] %vm223_vm0, %v981_v46 }
  0xfd   : > { %1202 = vst.msk [vmem:[%s1857_s24 + $0x120] sm:$0xff] %vm223_vm0, %v1138_v49  ;;  %1173 = vst.msk [vmem:[%s1857_s24 + $0x38] sm:$0xff] %vm223_vm0, %v1109_v50  ;;  %v339_v35 = vld [vmem:[#allocation2 + $0x198] sm:$0xff]  ;;  %v337_v42 = vld [vmem:[#allocation2 + $0x188] sm:$0xff] }
  0xfe   : > { %v1141_v54 = vld [vmem:[#allocation2 + $0x138] sm:$0xff]  ;;  %v1107_v55 = vld [vmem:[#allocation2 + $0x28] sm:$0xff]  ;;  %1078 = vst.msk [vmem:[#allocation2 + $0x158] sm:$0xff] %vm223_vm0, %v1013_v51  ;;  %1044 = vst.msk [vmem:[#allocation2 + $0x48] sm:$0xff] %vm223_vm0, %v979_v52  ;;  %v1455_v61 = vpop.f32.mrb[12].mxu0 }
  0xff   : > { %1205 = vst.msk [vmem:[%s1857_s24 + $0x138] sm:$0xff] %vm223_vm0, %v1141_v54  ;;  %1171 = vst.msk [vmem:[%s1857_s24 + $0x28] sm:$0xff] %vm223_vm0, %v1107_v55  ;;  %v1139_v57 = vld [vmem:[#allocation2 + $0x128] sm:$0xff]  ;;  %v984_v0 = vadd.f32 %v1455_v61, %v302_v58  ;;  %v1487_v1 = vpop.f32.mrb[12].mxu1  ;;  %v763_v2 = vpop.f32.mrb[13].mxu0  ;;  %v310_v58 = vld [vmem:[#allocation2 + $0xb0] sm:$0xff] }
 0x100   : > { %1203 = vst.msk [vmem:[%s1857_s24 + $0x128] sm:$0xff] %vm223_vm0, %v1139_v57  ;;  %1076 = vst.msk [vmem:[#allocation2 + $0x148] sm:$0xff] %vm223_vm0, %v1011_v56  ;;  %v1112_v5 = vld [vmem:[#allocation2 + $0x50] sm:$0xff]  ;;  %v1016_v6 = vadd.f32 %v1487_v1, %v334_v59  ;;  %v982_v7 = vadd.f32 %v763_v2, %v300_v60  ;;  %v891_v8 = vpop.f32.mrb[13].mxu1  ;;  %v1456_v9 = vpop.f32.mrb[14].mxu0  ;;  %v308_v60 = vld [vmem:[#allocation2 + $0xa0] sm:$0xff] }
 0x101   : > { %1176 = vst.msk [vmem:[%s1857_s24 + $0x50] sm:$0xff] %vm223_vm0, %v1112_v5  ;;  %v1144_v11 = vld [vmem:[#allocation2 + $0x150] sm:$0xff]  ;;  %v1110_v12 = vld [vmem:[#allocation2 + $0x40] sm:$0xff]  ;;  %1049 = vst.msk [vmem:[#allocation2 + $0x70] sm:$0xff] %vm223_vm0, %v984_v0  ;;  %v1014_v13 = vadd.f32 %v891_v8, %v332_v62  ;;  %v985_v14 = vadd.f32 %v1456_v9, %v303_v63  ;;  %v1488_v15 = vpop.f32.mrb[14].mxu1  ;;  %v766_v16 = vpop.f32.mrb[15].mxu0 }
 0x102   : > { %1208 = vst.msk [vmem:[%s1857_s24 + $0x150] sm:$0xff] %vm223_vm0, %v1144_v11  ;;  %1174 = vst.msk [vmem:[%s1857_s24 + $0x40] sm:$0xff] %vm223_vm0, %v1110_v12  ;;  %v1017_v19 = vadd.f32 %v1488_v15, %v335_v3  ;;  %v983_v20 = vadd.f32 %v766_v16, %v301_v4  ;;  %v894_v21 = vpop.f32.mrb[15].mxu1  ;;  %v342_v59 = vld [vmem:[#allocation2 + $0x1b0] sm:$0xff]  ;;  %v340_v62 = vld [vmem:[#allocation2 + $0x1a0] sm:$0xff] }
 0x103   : > { %v1142_v17 = vld [vmem:[#allocation2 + $0x140] sm:$0xff]  ;;  %v1113_v18 = vld [vmem:[#allocation2 + $0x58] sm:$0xff]  ;;  %1081 = vst.msk [vmem:[#allocation2 + $0x170] sm:$0xff] %vm223_vm0, %v1016_v6  ;;  %1047 = vst.msk [vmem:[#allocation2 + $0x60] sm:$0xff] %vm223_vm0, %v982_v7  ;;  %v1015_v24 = vadd.f32 %v894_v21, %v333_v10 }
 0x104   : > { %1206 = vst.msk [vmem:[%s1857_s24 + $0x140] sm:$0xff] %vm223_vm0, %v1142_v17  ;;  %1177 = vst.msk [vmem:[%s1857_s24 + $0x58] sm:$0xff] %vm223_vm0, %v1113_v18  ;;  %v311_v63 = vld [vmem:[#allocation2 + $0xb8] sm:$0xff]  ;;  %v309_v4 = vld [vmem:[#allocation2 + $0xa8] sm:$0xff] }
 0x105   : > { %v1145_v22 = vld [vmem:[#allocation2 + $0x158] sm:$0xff]  ;;  %v1111_v23 = vld [vmem:[#allocation2 + $0x48] sm:$0xff]  ;;  %1079 = vst.msk [vmem:[#allocation2 + $0x160] sm:$0xff] %vm223_vm0, %v1014_v13  ;;  %1050 = vst.msk [vmem:[#allocation2 + $0x78] sm:$0xff] %vm223_vm0, %v985_v14 }
 0x106   : > { %1209 = vst.msk [vmem:[%s1857_s24 + $0x158] sm:$0xff] %vm223_vm0, %v1145_v22  ;;  %1175 = vst.msk [vmem:[%s1857_s24 + $0x48] sm:$0xff] %vm223_vm0, %v1111_v23  ;;  %v1459_v29 = vpop.f32.mrb[16].mxu0  ;;  %v343_v3 = vld [vmem:[#allocation2 + $0x1b8] sm:$0xff]  ;;  %v341_v10 = vld [vmem:[#allocation2 + $0x1a8] sm:$0xff] }
 0x107   : > { %v1143_v25 = vld [vmem:[#allocation2 + $0x148] sm:$0xff]  ;;  %1082 = vst.msk [vmem:[#allocation2 + $0x178] sm:$0xff] %vm223_vm0, %v1017_v19  ;;  %1048 = vst.msk [vmem:[#allocation2 + $0x68] sm:$0xff] %vm223_vm0, %v983_v20  ;;  %v988_v32 = vadd.f32 %v1459_v29, %v306_v26  ;;  %v1491_v33 = vpop.f32.mrb[16].mxu1  ;;  %v779_v34 = vpop.f32.mrb[17].mxu0  ;;  %v314_v26 = vld [vmem:[#allocation2 + $0xd0] sm:$0xff] }
 0x108   : > { %1207 = vst.msk [vmem:[%s1857_s24 + $0x148] sm:$0xff] %vm223_vm0, %v1143_v25  ;;  %1080 = vst.msk [vmem:[#allocation2 + $0x168] sm:$0xff] %vm223_vm0, %v1015_v24  ;;  %v1116_v37 = vld [vmem:[#allocation2 + $0x70] sm:$0xff]  ;;  %v1020_v38 = vadd.f32 %v1491_v33, %v338_v27  ;;  %v986_v39 = vadd.f32 %v779_v34, %v304_v28  ;;  %v907_v40 = vpop.f32.mrb[17].mxu1  ;;  %v1460_v41 = vpop.f32.mrb[18].mxu0  ;;  %v312_v28 = vld [vmem:[#allocation2 + $0xc0] sm:$0xff] }
 0x109   : > { %1180 = vst.msk [vmem:[%s1857_s24 + $0x70] sm:$0xff] %vm223_vm0, %v1116_v37  ;;  %1053 = vst.msk [vmem:[#allocation2 + $0x90] sm:$0xff] %vm223_vm0, %v988_v32  ;;  %v1018_v45 = vadd.f32 %v907_v40, %v336_v30  ;;  %v989_v46 = vadd.f32 %v1460_v41, %v307_v31  ;;  %v1492_v47 = vpop.f32.mrb[18].mxu1  ;;  %v782_v48 = vpop.f32.mrb[19].mxu0  ;;  %v346_v27 = vld [vmem:[#allocation2 + $0x1d0] sm:$0xff]  ;;  %v344_v30 = vld [vmem:[#allocation2 + $0x1c0] sm:$0xff] }
 0x10a   : > { %v1148_v43 = vld [vmem:[#allocation2 + $0x170] sm:$0xff]  ;;  %v1114_v44 = vld [vmem:[#allocation2 + $0x60] sm:$0xff]  ;;  %1085 = vst.msk [vmem:[#allocation2 + $0x190] sm:$0xff] %vm223_vm0, %v1020_v38  ;;  %1051 = vst.msk [vmem:[#allocation2 + $0x80] sm:$0xff] %vm223_vm0, %v986_v39  ;;  %v1021_v51 = vadd.f32 %v1492_v47, %v339_v35  ;;  %v987_v52 = vadd.f32 %v782_v48, %v305_v36  ;;  %v910_v53 = vpop.f32.mrb[19].mxu1 }
 0x10b   : > { %1212 = vst.msk [vmem:[%s1857_s24 + $0x170] sm:$0xff] %vm223_vm0, %v1148_v43  ;;  %1178 = vst.msk [vmem:[%s1857_s24 + $0x60] sm:$0xff] %vm223_vm0, %v1114_v44  ;;  %v1019_v56 = vadd.f32 %v910_v53, %v337_v42  ;;  %v315_v31 = vld [vmem:[#allocation2 + $0xd8] sm:$0xff]  ;;  %v313_v36 = vld [vmem:[#allocation2 + $0xc8] sm:$0xff] }
 0x10c   : > { %v1146_v49 = vld [vmem:[#allocation2 + $0x160] sm:$0xff]  ;;  %v1117_v50 = vld [vmem:[#allocation2 + $0x78] sm:$0xff]  ;;  %1083 = vst.msk [vmem:[#allocation2 + $0x180] sm:$0xff] %vm223_vm0, %v1018_v45  ;;  %1054 = vst.msk [vmem:[#allocation2 + $0x98] sm:$0xff] %vm223_vm0, %v989_v46 }
 0x10d   : > { %1210 = vst.msk [vmem:[%s1857_s24 + $0x160] sm:$0xff] %vm223_vm0, %v1146_v49  ;;  %1181 = vst.msk [vmem:[%s1857_s24 + $0x78] sm:$0xff] %vm223_vm0, %v1117_v50  ;;  %v347_v35 = vld [vmem:[#allocation2 + $0x1d8] sm:$0xff]  ;;  %v345_v42 = vld [vmem:[#allocation2 + $0x1c8] sm:$0xff] }
 0x10e   : > { %v1149_v54 = vld [vmem:[#allocation2 + $0x178] sm:$0xff]  ;;  %v1115_v55 = vld [vmem:[#allocation2 + $0x68] sm:$0xff]  ;;  %1086 = vst.msk [vmem:[#allocation2 + $0x198] sm:$0xff] %vm223_vm0, %v1021_v51  ;;  %1052 = vst.msk [vmem:[#allocation2 + $0x88] sm:$0xff] %vm223_vm0, %v987_v52  ;;  %v1463_v61 = vpop.f32.mrb[20].mxu0 }
 0x10f   : > { %1213 = vst.msk [vmem:[%s1857_s24 + $0x178] sm:$0xff] %vm223_vm0, %v1149_v54  ;;  %1179 = vst.msk [vmem:[%s1857_s24 + $0x68] sm:$0xff] %vm223_vm0, %v1115_v55  ;;  %v1147_v57 = vld [vmem:[#allocation2 + $0x168] sm:$0xff]  ;;  %v992_v0 = vadd.f32 %v1463_v61, %v310_v58  ;;  %v1495_v1 = vpop.f32.mrb[20].mxu1  ;;  %v795_v2 = vpop.f32.mrb[21].mxu0  ;;  %v318_v58 = vld [vmem:[#allocation2 + $0xf0] sm:$0xff] }
 0x110   : > { %1211 = vst.msk [vmem:[%s1857_s24 + $0x168] sm:$0xff] %vm223_vm0, %v1147_v57  ;;  %1084 = vst.msk [vmem:[#allocation2 + $0x188] sm:$0xff] %vm223_vm0, %v1019_v56  ;;  %v1120_v5 = vld [vmem:[#allocation2 + $0x90] sm:$0xff]  ;;  %v1024_v6 = vadd.f32 %v1495_v1, %v342_v59  ;;  %v990_v7 = vadd.f32 %v795_v2, %v308_v60  ;;  %v923_v8 = vpop.f32.mrb[21].mxu1  ;;  %v1464_v9 = vpop.f32.mrb[22].mxu0  ;;  %v316_v60 = vld [vmem:[#allocation2 + $0xe0] sm:$0xff] }
 0x111   : > { %1184 = vst.msk [vmem:[%s1857_s24 + $0x90] sm:$0xff] %vm223_vm0, %v1120_v5  ;;  %v1152_v11 = vld [vmem:[#allocation2 + $0x190] sm:$0xff]  ;;  %v1118_v12 = vld [vmem:[#allocation2 + $0x80] sm:$0xff]  ;;  %1057 = vst.msk [vmem:[#allocation2 + $0xb0] sm:$0xff] %vm223_vm0, %v992_v0  ;;  %v1022_v13 = vadd.f32 %v923_v8, %v340_v62  ;;  %v993_v14 = vadd.f32 %v1464_v9, %v311_v63  ;;  %v1496_v15 = vpop.f32.mrb[22].mxu1  ;;  %v798_v16 = vpop.f32.mrb[23].mxu0 }
 0x112   : > { %1216 = vst.msk [vmem:[%s1857_s24 + $0x190] sm:$0xff] %vm223_vm0, %v1152_v11  ;;  %1182 = vst.msk [vmem:[%s1857_s24 + $0x80] sm:$0xff] %vm223_vm0, %v1118_v12  ;;  %v1025_v19 = vadd.f32 %v1496_v15, %v343_v3  ;;  %v991_v20 = vadd.f32 %v798_v16, %v309_v4  ;;  %v926_v21 = vpop.f32.mrb[23].mxu1  ;;  %v350_v59 = vld [vmem:[#allocation2 + $0x1f0] sm:$0xff]  ;;  %v348_v62 = vld [vmem:[#allocation2 + $0x1e0] sm:$0xff] }
 0x113   : > { %v1150_v17 = vld [vmem:[#allocation2 + $0x180] sm:$0xff]  ;;  %v1121_v18 = vld [vmem:[#allocation2 + $0x98] sm:$0xff]  ;;  %1089 = vst.msk [vmem:[#allocation2 + $0x1b0] sm:$0xff] %vm223_vm0, %v1024_v6  ;;  %1055 = vst.msk [vmem:[#allocation2 + $0xa0] sm:$0xff] %vm223_vm0, %v990_v7  ;;  %v1023_v24 = vadd.f32 %v926_v21, %v341_v10 }
 0x114   : > { %1214 = vst.msk [vmem:[%s1857_s24 + $0x180] sm:$0xff] %vm223_vm0, %v1150_v17  ;;  %1185 = vst.msk [vmem:[%s1857_s24 + $0x98] sm:$0xff] %vm223_vm0, %v1121_v18  ;;  %v319_v63 = vld [vmem:[#allocation2 + $0xf8] sm:$0xff]  ;;  %v317_v4 = vld [vmem:[#allocation2 + $0xe8] sm:$0xff] }
 0x115   : > { %v1153_v22 = vld [vmem:[#allocation2 + $0x198] sm:$0xff]  ;;  %v1119_v23 = vld [vmem:[#allocation2 + $0x88] sm:$0xff]  ;;  %1087 = vst.msk [vmem:[#allocation2 + $0x1a0] sm:$0xff] %vm223_vm0, %v1022_v13  ;;  %1058 = vst.msk [vmem:[#allocation2 + $0xb8] sm:$0xff] %vm223_vm0, %v993_v14 }
 0x116   : > { %1217 = vst.msk [vmem:[%s1857_s24 + $0x198] sm:$0xff] %vm223_vm0, %v1153_v22  ;;  %1183 = vst.msk [vmem:[%s1857_s24 + $0x88] sm:$0xff] %vm223_vm0, %v1119_v23  ;;  %v1467_v29 = vpop.f32.mrb[24].mxu0  ;;  %v351_v3 = vld [vmem:[#allocation2 + $0x1f8] sm:$0xff]  ;;  %v349_v10 = vld [vmem:[#allocation2 + $0x1e8] sm:$0xff] }
 0x117   : > { %v1151_v25 = vld [vmem:[#allocation2 + $0x188] sm:$0xff]  ;;  %1090 = vst.msk [vmem:[#allocation2 + $0x1b8] sm:$0xff] %vm223_vm0, %v1025_v19  ;;  %1056 = vst.msk [vmem:[#allocation2 + $0xa8] sm:$0xff] %vm223_vm0, %v991_v20  ;;  %v996_v32 = vadd.f32 %v1467_v29, %v314_v26  ;;  %v1499_v33 = vpop.f32.mrb[24].mxu1  ;;  %v811_v34 = vpop.f32.mrb[25].mxu0 }
 0x118   : > { %1215 = vst.msk [vmem:[%s1857_s24 + $0x188] sm:$0xff] %vm223_vm0, %v1151_v25  ;;  %1088 = vst.msk [vmem:[#allocation2 + $0x1a8] sm:$0xff] %vm223_vm0, %v1023_v24  ;;  %v1124_v37 = vld [vmem:[#allocation2 + $0xb0] sm:$0xff]  ;;  %v1028_v38 = vadd.f32 %v1499_v33, %v346_v27  ;;  %v994_v39 = vadd.f32 %v811_v34, %v312_v28  ;;  %v939_v40 = vpop.f32.mrb[25].mxu1  ;;  %v1468_v41 = vpop.f32.mrb[26].mxu0 }
 0x119   : > { %1188 = vst.msk [vmem:[%s1857_s24 + $0xb0] sm:$0xff] %vm223_vm0, %v1124_v37  ;;  %1061 = vst.msk [vmem:[#allocation2 + $0xd0] sm:$0xff] %vm223_vm0, %v996_v32  ;;  %v1026_v45 = vadd.f32 %v939_v40, %v344_v30  ;;  %v997_v46 = vadd.f32 %v1468_v41, %v315_v31  ;;  %v1500_v47 = vpop.f32.mrb[26].mxu1  ;;  %v814_v48 = vpop.f32.mrb[27].mxu0 }
 0x11a   : > { %v1156_v43 = vld [vmem:[#allocation2 + $0x1b0] sm:$0xff]  ;;  %v1122_v44 = vld [vmem:[#allocation2 + $0xa0] sm:$0xff]  ;;  %1093 = vst.msk [vmem:[#allocation2 + $0x1d0] sm:$0xff] %vm223_vm0, %v1028_v38  ;;  %1059 = vst.msk [vmem:[#allocation2 + $0xc0] sm:$0xff] %vm223_vm0, %v994_v39  ;;  %v1029_v51 = vadd.f32 %v1500_v47, %v347_v35  ;;  %v995_v52 = vadd.f32 %v814_v48, %v313_v36  ;;  %v942_v53 = vpop.f32.mrb[27].mxu1 }
 0x11b   : > { %1220 = vst.msk [vmem:[%s1857_s24 + $0x1b0] sm:$0xff] %vm223_vm0, %v1156_v43  ;;  %1186 = vst.msk [vmem:[%s1857_s24 + $0xa0] sm:$0xff] %vm223_vm0, %v1122_v44  ;;  %v1027_v56 = vadd.f32 %v942_v53, %v345_v42 }
 0x11c   : > { %v1154_v49 = vld [vmem:[#allocation2 + $0x1a0] sm:$0xff]  ;;  %v1125_v50 = vld [vmem:[#allocation2 + $0xb8] sm:$0xff]  ;;  %1091 = vst.msk [vmem:[#allocation2 + $0x1c0] sm:$0xff] %vm223_vm0, %v1026_v45  ;;  %1062 = vst.msk [vmem:[#allocation2 + $0xd8] sm:$0xff] %vm223_vm0, %v997_v46 }
 0x11d   : > { %1218 = vst.msk [vmem:[%s1857_s24 + $0x1a0] sm:$0xff] %vm223_vm0, %v1154_v49  ;;  %1189 = vst.msk [vmem:[%s1857_s24 + $0xb8] sm:$0xff] %vm223_vm0, %v1125_v50 }
 0x11e   : > { %v1157_v54 = vld [vmem:[#allocation2 + $0x1b8] sm:$0xff]  ;;  %v1123_v55 = vld [vmem:[#allocation2 + $0xa8] sm:$0xff]  ;;  %1094 = vst.msk [vmem:[#allocation2 + $0x1d8] sm:$0xff] %vm223_vm0, %v1029_v51  ;;  %1060 = vst.msk [vmem:[#allocation2 + $0xc8] sm:$0xff] %vm223_vm0, %v995_v52  ;;  %v1471_v61 = vpop.f32.mrb[28].mxu0 }
 0x11f   : > { %1221 = vst.msk [vmem:[%s1857_s24 + $0x1b8] sm:$0xff] %vm223_vm0, %v1157_v54  ;;  %1187 = vst.msk [vmem:[%s1857_s24 + $0xa8] sm:$0xff] %vm223_vm0, %v1123_v55  ;;  %v1155_v57 = vld [vmem:[#allocation2 + $0x1a8] sm:$0xff]  ;;  %v1000_v0 = vadd.f32 %v1471_v61, %v318_v58  ;;  %v1503_v1 = vpop.f32.mrb[28].mxu1  ;;  %v827_v2 = vpop.f32.mrb[29].mxu0 }
 0x120   : > { %1219 = vst.msk [vmem:[%s1857_s24 + $0x1a8] sm:$0xff] %vm223_vm0, %v1155_v57  ;;  %1092 = vst.msk [vmem:[#allocation2 + $0x1c8] sm:$0xff] %vm223_vm0, %v1027_v56  ;;  %v1128_v5 = vld [vmem:[#allocation2 + $0xd0] sm:$0xff]  ;;  %v1032_v6 = vadd.f32 %v1503_v1, %v350_v59  ;;  %v998_v7 = vadd.f32 %v827_v2, %v316_v60  ;;  %v955_v8 = vpop.f32.mrb[29].mxu1  ;;  %v1472_v9 = vpop.f32.mrb[30].mxu0 }
 0x121   : > { %1192 = vst.msk [vmem:[%s1857_s24 + $0xd0] sm:$0xff] %vm223_vm0, %v1128_v5  ;;  %v1160_v11 = vld [vmem:[#allocation2 + $0x1d0] sm:$0xff]  ;;  %v1126_v12 = vld [vmem:[#allocation2 + $0xc0] sm:$0xff]  ;;  %1065 = vst.msk [vmem:[#allocation2 + $0xf0] sm:$0xff] %vm223_vm0, %v1000_v0  ;;  %v1030_v13 = vadd.f32 %v955_v8, %v348_v62  ;;  %v1001_v14 = vadd.f32 %v1472_v9, %v319_v63  ;;  %v1504_v15 = vpop.f32.mrb[30].mxu1  ;;  %v830_v16 = vpop.f32.mrb[31].mxu0 }
 0x122   : > { %1224 = vst.msk [vmem:[%s1857_s24 + $0x1d0] sm:$0xff] %vm223_vm0, %v1160_v11  ;;  %1190 = vst.msk [vmem:[%s1857_s24 + $0xc0] sm:$0xff] %vm223_vm0, %v1126_v12  ;;  %v1033_v19 = vadd.f32 %v1504_v15, %v351_v3  ;;  %v999_v20 = vadd.f32 %v830_v16, %v317_v4  ;;  %v958_v21 = vpop.f32.mrb[31].mxu1 }
 0x123   : > { %v1158_v17 = vld [vmem:[#allocation2 + $0x1c0] sm:$0xff]  ;;  %v1129_v18 = vld [vmem:[#allocation2 + $0xd8] sm:$0xff]  ;;  %1097 = vst.msk [vmem:[#allocation2 + $0x1f0] sm:$0xff] %vm223_vm0, %v1032_v6  ;;  %1063 = vst.msk [vmem:[#allocation2 + $0xe0] sm:$0xff] %vm223_vm0, %v998_v7  ;;  %v1031_v24 = vadd.f32 %v958_v21, %v349_v10 }
 0x124   : > { %1222 = vst.msk [vmem:[%s1857_s24 + $0x1c0] sm:$0xff] %vm223_vm0, %v1158_v17  ;;  %1193 = vst.msk [vmem:[%s1857_s24 + $0xd8] sm:$0xff] %vm223_vm0, %v1129_v18 }
 0x125   : > { %v1161_v22 = vld [vmem:[#allocation2 + $0x1d8] sm:$0xff]  ;;  %v1127_v23 = vld [vmem:[#allocation2 + $0xc8] sm:$0xff]  ;;  %1095 = vst.msk [vmem:[#allocation2 + $0x1e0] sm:$0xff] %vm223_vm0, %v1030_v13  ;;  %1066 = vst.msk [vmem:[#allocation2 + $0xf8] sm:$0xff] %vm223_vm0, %v1001_v14 }
 0x126   : > { %1225 = vst.msk [vmem:[%s1857_s24 + $0x1d8] sm:$0xff] %vm223_vm0, %v1161_v22  ;;  %1191 = vst.msk [vmem:[%s1857_s24 + $0xc8] sm:$0xff] %vm223_vm0, %v1127_v23 }
 0x127   : > { %v1159_v25 = vld [vmem:[#allocation2 + $0x1c8] sm:$0xff]  ;;  %1098 = vst.msk [vmem:[#allocation2 + $0x1f8] sm:$0xff] %vm223_vm0, %v1033_v19  ;;  %1064 = vst.msk [vmem:[#allocation2 + $0xe8] sm:$0xff] %vm223_vm0, %v999_v20 }
 0x128   : > { %1223 = vst.msk [vmem:[%s1857_s24 + $0x1c8] sm:$0xff] %vm223_vm0, %v1159_v25  ;;  %1096 = vst.msk [vmem:[#allocation2 + $0x1e8] sm:$0xff] %vm223_vm0, %v1031_v24  ;;  %v1132_v26 = vld [vmem:[#allocation2 + $0xf0] sm:$0xff] }
 0x129   : > { %1196 = vst.msk [vmem:[%s1857_s24 + $0xf0] sm:$0xff] %vm223_vm0, %v1132_v26 }
 0x12a   : > { %v1164_v27 = vld [vmem:[#allocation2 + $0x1f0] sm:$0xff]  ;;  %v1130_v28 = vld [vmem:[#allocation2 + $0xe0] sm:$0xff] }
 0x12b   : > { %1228 = vst.msk [vmem:[%s1857_s24 + $0x1f0] sm:$0xff] %vm223_vm0, %v1164_v27  ;;  %1194 = vst.msk [vmem:[%s1857_s24 + $0xe0] sm:$0xff] %vm223_vm0, %v1130_v28 }
 0x12c   : > { %v1162_v29 = vld [vmem:[#allocation2 + $0x1e0] sm:$0xff]  ;;  %v1133_v30 = vld [vmem:[#allocation2 + $0xf8] sm:$0xff] }
 0x12d   : > { %1226 = vst.msk [vmem:[%s1857_s24 + $0x1e0] sm:$0xff] %vm223_vm0, %v1162_v29  ;;  %1197 = vst.msk [vmem:[%s1857_s24 + $0xf8] sm:$0xff] %vm223_vm0, %v1133_v30 }
 0x12e   : > { %v1165_v31 = vld [vmem:[#allocation2 + $0x1f8] sm:$0xff]  ;;  %v1131_v32 = vld [vmem:[#allocation2 + $0xe8] sm:$0xff] }
 0x12f   : > { %1229 = vst.msk [vmem:[%s1857_s24 + $0x1f8] sm:$0xff] %vm223_vm0, %v1165_v31  ;;  %1195 = vst.msk [vmem:[%s1857_s24 + $0xe8] sm:$0xff] %vm223_vm0, %v1131_v32  ;;  %v1163_v33 = vld [vmem:[#allocation2 + $0x1e8] sm:$0xff] }
 0x130   : > { %1227 = vst.msk [vmem:[%s1857_s24 + $0x1e8] sm:$0xff] %vm223_vm0, %v1163_v33 }
 0x131 PF: > { %s12_s11 = sadd.s32 1, %s1587_s11   ;;  %s2056_s9 = smov %s1583_s10 }
 0x132   : > { %p9_p5 = scmp.ge.s32.totalorder %s12_s11, 6   ;;  %s2057_s10 = smov %s2059_s12 }
 0x134   :  { %11 = sbr.rel (!%p9_p5) target bundleno = 2 (0x2), region = 69 }

// kernel: tile.8
= control target key start
LH: loop header
LB: loop body
LE: loop exit
PB: predicated region body
PF: predicated region fallthrough
CT: control target
= control target key end

     0   :  { %s22_s0 = inlined_call_operand.vmem [shape: f32[3], index: 0, kind: input, shape index: {}]   ;;  %s23_s1 = inlined_call_operand.vmem [shape: f32[2,3], index: 1, kind: output, shape index: {}]  }
   0x1   :  { %v4_v0 = vld [vmem:[%s22_s0] ss:$0 sm:$0xff] }
   0x2   :  { %5 = vst [vmem:[%s23_s1] sm:$0x3] %v4_v0 }

// kernel: tile.0
= control target key start
LH: loop header
LB: loop body
LE: loop exit
PB: predicated region body
PF: predicated region fallthrough
CT: control target
= control target key end

     0   :  { %vm7_vm0 = vcmask 7168   ;;  %s26_s10 = smov 126   ;;  %s49_s0 = inlined_call_operand.vmem [shape: f32[2,3], index: 0, kind: input, shape index: {}]   ;;  %s50_s1 = inlined_call_operand.vmem [shape: f32[6,1], index: 1, kind: output, shape index: {}]  }
   0x1   :  { %v4_v0 = vld [vmem:[%s49_s0] sm:$0x3]  ;;  %s25_s0 = smov 127  }
   0x2   :  { %5 = vst [vmem:[#allocation0] sm:$0x3] %v4_v0 }
   0x9   :  { %v9_v1 = vld [vmem:[#allocation0] sm:$0x3]  }
   0xa   :  { %v6_v2 = vld [vmem:[#allocation0] sm:$0x3]   ;;  %10 = vrot.lane.b32.xlu0 %v9_v1, %s25_s0 }
   0xb   :  { %8 = vst.msk [vmem:[%s50_s1] ss:$3 sm:$0x3] %vm7_vm0, %v6_v2   ;;  %v15_v3 = vld [vmem:[#allocation0] sm:$0x3]  }
   0xe   :  { %16 = vrot.lane.b32.xlu0 %v15_v3, %s26_s10 }
  0x7c   :  { %v11_v4 = vpop.permute.xlu0 %10  }
  0x7d   :  { %21 = vst.msk [vmem:[%s50_s1 + $0x1] ss:$3 sm:$0x3] %vm7_vm0, %v11_v4  }
  0x80   :  { %v17_v5 = vpop.permute.xlu0 %16  }
  0x81   :  { %22 = vst.msk [vmem:[%s50_s1 + $0x2] ss:$3 sm:$0x3] %vm7_vm0, %v17_v5  }

// kernel: generator_forward.25
= control target key start
LH: loop header
LB: loop body
LE: loop exit
PB: predicated region body
PF: predicated region fallthrough
CT: control target
= control target key end

     0   :  { %s350_s9 = smov 0   ;;  %s413_s0 = inlined_call_operand.vmem [shape: f32[6,4096], index: 0, kind: input, shape index: {}]   ;;  %s414_s1 = inlined_call_operand.vmem [shape: f32[6,1], index: 1, kind: input, shape index: {}]   ;;  %s415_s2 = inlined_call_operand.vmem [shape: f32[6,4096], index: 2, kind: output, shape index: {}]  }
   0x1 LB: > { %s273_s10 = sadd.s32 4294967295, %s332_s9   ;;  %p277_p0 = scmp.ge.s32.totalorder %s332_s9, 1  ;;  %s332_s9 = sphi %s350_s9, %s12_s9  }
   0x2   : > { %p113_p1 = scmp.lt.s32.totalorder %s332_s9, 3 }
   0x4   : > { %p114_p2 = pnand %p277_p0, %p113_p1 }
   0x5   : > { %v163_v0 = vld [vmem:[%s414_s1] sm:$0x3f] (!%p114_p2)  ;;  %v334_v1 = vmov (!%p114_p2), 0   ;;  %s278_s13 = sshll.u32 (!%p114_p2), %s273_s10, 4 }
   0x6   : > { %117 = sbr.rel (%p114_p2) target bundleno = 164 (0xa4), region = 28  ;;  %293 = vset.pattern.permute.xlu0 (!%p114_p2), %v334_v1  ;;  %p136_p3 = scmp.lt.s32.totalorder (!%p114_p2), %s278_s13, 31 }
   0x7   : > { %166 = vperm.xlu0 (!%p114_p2), %293, %v163_v0  }
   0xd   : > { %s417_s13 = smov (!%p136_p3, %s278_s13), 31 }
   0xe   : > { %s279_s14 = sshll.u32 %s417_s13, 3 }
   0xf   : > { %s369_s17 = scalar_lea.vmem %s413_s0, %s279_s14  ;;  %s391_s20 = scalar_lea.vmem %s415_s2, %s279_s14 }
  0x10   : > { %v147_v2 = vld [vmem:[%s369_s17] sm:$0x3f]  ;;  %v148_v3 = vld [vmem:[%s369_s17 + $0x8] sm:$0x3f]  ;;  %v149_v5 = vld [vmem:[%s369_s17 + $0x10] sm:$0x3f] }
  0x11   : > { %v150_v6 = vld [vmem:[%s369_s17 + $0x18] sm:$0x3f]  ;;  %v151_v8 = vld [vmem:[%s369_s17 + $0x20] sm:$0x3f]  ;;  %v152_v10 = vld [vmem:[%s369_s17 + $0x28] sm:$0x3f] }
  0x12   : > { %v153_v12 = vld [vmem:[%s369_s17 + $0x30] sm:$0x3f]  ;;  %v154_v14 = vld [vmem:[%s369_s17 + $0x38] sm:$0x3f]  ;;  %v155_v16 = vld [vmem:[%s369_s17 + $0x40] sm:$0x3f] }
  0x13   : > { %v156_v18 = vld [vmem:[%s369_s17 + $0x48] sm:$0x3f]  ;;  %v157_v20 = vld [vmem:[%s369_s17 + $0x50] sm:$0x3f]  ;;  %v158_v22 = vld [vmem:[%s369_s17 + $0x58] sm:$0x3f] }
  0x14   : > { %v159_v24 = vld [vmem:[%s369_s17 + $0x60] sm:$0x3f]  ;;  %v160_v26 = vld [vmem:[%s369_s17 + $0x68] sm:$0x3f]  ;;  %v161_v28 = vld [vmem:[%s369_s17 + $0x70] sm:$0x3f] }
  0x15   : > { %v162_v30 = vld [vmem:[%s369_s17 + $0x78] sm:$0x3f] }
  0x86   : > { %v167_v4 = vpop.permute.xlu0 %166 }
  0x87   : > { %v169_v7 = vadd.f32 %v167_v4, %v147_v2  ;;  %v170_v9 = vadd.f32 %v167_v4, %v148_v3  ;;  %v171_v11 = vadd.f32 %v167_v4, %v149_v5  ;;  %v172_v13 = vadd.f32 %v167_v4, %v150_v6 }
  0x88   : > { %v173_v15 = vadd.f32 %v167_v4, %v151_v8  ;;  %v174_v17 = vadd.f32 %v167_v4, %v152_v10  ;;  %v175_v19 = vadd.f32 %v167_v4, %v153_v12  ;;  %v176_v21 = vadd.f32 %v167_v4, %v154_v14 }
  0x89   : > { %294 = vtanh.f32 %v169_v7  ;;  %v177_v23 = vadd.f32 %v167_v4, %v155_v16  ;;  %v178_v25 = vadd.f32 %v167_v4, %v156_v18  ;;  %v179_v27 = vadd.f32 %v167_v4, %v157_v20 }
  0x8a   : > { %296 = vtanh.f32 %v170_v9  ;;  %v180_v29 = vadd.f32 %v167_v4, %v158_v22  ;;  %v181_v31 = vadd.f32 %v167_v4, %v159_v24  ;;  %v182_v32 = vadd.f32 %v167_v4, %v160_v26 }
  0x8b   : > { %298 = vtanh.f32 %v171_v11  ;;  %v183_v34 = vadd.f32 %v167_v4, %v161_v28  ;;  %v184_v36 = vadd.f32 %v167_v4, %v162_v30 }
  0x8c   : > { %300 = vtanh.f32 %v172_v13 }
  0x8d   : > { %302 = vtanh.f32 %v173_v15 }
  0x8e   : > { %304 = vtanh.f32 %v174_v17 }
  0x8f   : > { %306 = vtanh.f32 %v175_v19 }
  0x90   : > { %308 = vtanh.f32 %v176_v21 }
  0x91   : > { %310 = vtanh.f32 %v177_v23 }
  0x92   : > { %312 = vtanh.f32 %v178_v25 }
  0x93   : > { %v295_v33 = vpop.eup %294  ;;  %314 = vtanh.f32 %v179_v27 }
  0x94   : > { %v297_v35 = vpop.eup %296  ;;  %316 = vtanh.f32 %v180_v29  ;;  %201 = vst [vmem:[%s391_s20] sm:$0x3f] %v295_v33 }
  0x95   : > { %v299_v37 = vpop.eup %298  ;;  %318 = vtanh.f32 %v181_v31  ;;  %202 = vst [vmem:[%s391_s20 + $0x8] sm:$0x3f] %v297_v35 }
  0x96   : > { %v301_v38 = vpop.eup %300  ;;  %320 = vtanh.f32 %v182_v32  ;;  %203 = vst [vmem:[%s391_s20 + $0x10] sm:$0x3f] %v299_v37 }
  0x97   : > { %v303_v39 = vpop.eup %302  ;;  %322 = vtanh.f32 %v183_v34  ;;  %204 = vst [vmem:[%s391_s20 + $0x18] sm:$0x3f] %v301_v38 }
  0x98   : > { %v305_v40 = vpop.eup %304  ;;  %324 = vtanh.f32 %v184_v36  ;;  %205 = vst [vmem:[%s391_s20 + $0x20] sm:$0x3f] %v303_v39 }
  0x99   : > { %v307_v41 = vpop.eup %306  ;;  %206 = vst [vmem:[%s391_s20 + $0x28] sm:$0x3f] %v305_v40 }
  0x9a   : > { %v309_v42 = vpop.eup %308  ;;  %207 = vst [vmem:[%s391_s20 + $0x30] sm:$0x3f] %v307_v41 }
  0x9b   : > { %v311_v43 = vpop.eup %310  ;;  %208 = vst [vmem:[%s391_s20 + $0x38] sm:$0x3f] %v309_v42 }
  0x9c   : > { %v313_v44 = vpop.eup %312  ;;  %209 = vst [vmem:[%s391_s20 + $0x40] sm:$0x3f] %v311_v43 }
  0x9d   : > { %v315_v45 = vpop.eup %314  ;;  %210 = vst [vmem:[%s391_s20 + $0x48] sm:$0x3f] %v313_v44 }
  0x9e   : > { %v317_v46 = vpop.eup %316  ;;  %211 = vst [vmem:[%s391_s20 + $0x50] sm:$0x3f] %v315_v45 }
  0x9f   : > { %v319_v47 = vpop.eup %318  ;;  %212 = vst [vmem:[%s391_s20 + $0x58] sm:$0x3f] %v317_v46 }
  0xa0   : > { %v321_v48 = vpop.eup %320  ;;  %213 = vst [vmem:[%s391_s20 + $0x60] sm:$0x3f] %v319_v47 }
  0xa1   : > { %v323_v49 = vpop.eup %322  ;;  %214 = vst [vmem:[%s391_s20 + $0x68] sm:$0x3f] %v321_v48 }
  0xa2   : > { %v325_v50 = vpop.eup %324  ;;  %215 = vst [vmem:[%s391_s20 + $0x70] sm:$0x3f] %v323_v49 }
  0xa3   : > { %216 = vst [vmem:[%s391_s20 + $0x78] sm:$0x3f] %v325_v50 }
  0xa4 PF: > { %s12_s9 = sadd.s32 1, %s332_s9  }
  0xa5   : > { %p9_p4 = scmp.ge.s32.totalorder %s12_s9, 4  }
  0xa7   :  { %11 = sbr.rel (!%p9_p4) target bundleno = 1 (0x1), region = 58 }

</bundles_post_ra>
